<compile_context>
chip_gen: v5e
topology: v5e:2x2
jax: 0.10.0
libtpu: 0.0.40
codegen_flags: <defaults>
</compile_context>

<pallas_src>
import functools

import jax
import jax.numpy as jnp
from jax.experimental import pallas as pl
from jax.experimental.pallas import tpu as pltpu

VMEM_SPEC = pl.BlockSpec(memory_space=pltpu.MemorySpace.VMEM)


# ----------------------------- fused kernel ----------------------------------

def mpnn_fused_kernel(
    x_ref, eattr_ref, src_oh_ref, dst_oh_ref, invc_ref, batch_oh_ref,
    proj_w_ref, proj_b_ref,
    en1_w_ref, en1_b_ref, en2_w_ref, en2_b_ref,
    root_ref, conv_b_ref,
    gru_wih_ref, gru_whh_ref, gru_bih_ref, gru_bhh_ref,
    lstm_wih_ref, lstm_whh_ref, lstm_bih_ref, lstm_bhh_ref,
    emb_w_ref, emb_b_ref,
    o_ref,
    *, hidden, msg_steps, s2s_steps):
    H = hidden
    f32 = jnp.float32

    x = x_ref[...]                        # (N, F_in)
    src_oh = src_oh_ref[...]              # (E, N) one-hot gather
    dst_oh = dst_oh_ref[...]              # (N, E) one-hot scatter
    inv_cnt = invc_ref[...]               # (N, 1) 1/in-degree (0 for isolated)
    batch_oh = batch_oh_ref[...]          # (B, N) graph assignment

    # ---- project + relu -------------------------------------------------
    out = jnp.maximum(
        jnp.dot(x, proj_w_ref[...], preferred_element_type=f32) + proj_b_ref[...],
        0.0)                                                          # (N, H)
    h = out                                                           # GRU hidden init

    # ---- edge network, hoisted out of the message-passing loop ----------
    h1 = jnp.maximum(
        jnp.dot(eattr_ref[...], en1_w_ref[...], preferred_element_type=f32)
        + en1_b_ref[...], 0.0)                                        # (E, 2H)
    we = (jnp.dot(h1, en2_w_ref[...], preferred_element_type=f32)
          + en2_b_ref[...])                                           # (E, H*H), h-major

    root = root_ref[...]
    conv_b = conv_b_ref[...]
    gru_wih = gru_wih_ref[...]
    gru_whh = gru_whh_ref[...]
    gru_bih = gru_bih_ref[...]
    gru_bhh = gru_bhh_ref[...]

    # ---- message passing: relu(NNConv(mean)) + GRU cell, msg_steps times -
    for _ in range(msg_steps):
        # gather source-node features (E, H)
        x_src = jnp.dot(src_oh, out, preferred_element_type=f32)
        # per-edge matvec: msgs[e,k] = sum_h x_src[e,h] * we[e, h*H + k]
        # statically unrolled lane-broadcast MAC (no rep/fold matmuls).
        msgs = jnp.zeros_like(x_src)
        for hh in range(H):
            msgs = msgs + x_src[:, hh:hh + 1] * we[:, hh * H:(hh + 1) * H]
        # mean aggregation at destination nodes + root weight + bias, relu
        aggr = jnp.dot(dst_oh, msgs, preferred_element_type=f32) * inv_cnt
        m = jnp.maximum(
            aggr + jnp.dot(out, root, preferred_element_type=f32) + conv_b, 0.0)
        # GRU cell (PyTorch gate order r, z, n); seq_len==1 so out == new h
        gi = jnp.dot(m, gru_wih, preferred_element_type=f32) + gru_bih
        gh = jnp.dot(h, gru_whh, preferred_element_type=f32) + gru_bhh
        r = jax.nn.sigmoid(gi[:, 0:H] + gh[:, 0:H])
        z = jax.nn.sigmoid(gi[:, H:2 * H] + gh[:, H:2 * H])
        n = jnp.tanh(gi[:, 2 * H:3 * H] + r * gh[:, 2 * H:3 * H])
        h = (1.0 - z) * n + z * h
        out = h

    # ---- Set2Set pooling (LSTM gate order i, f, g, o) --------------------
    B = batch_oh.shape[0]
    q_star = jnp.zeros((B, 2 * H), f32)
    hl = jnp.zeros((B, H), f32)
    cl = jnp.zeros((B, H), f32)
    for _ in range(s2s_steps):
        g = (jnp.dot(q_star, lstm_wih_ref[...], preferred_element_type=f32)
             + lstm_bih_ref[...]
             + jnp.dot(hl, lstm_whh_ref[...], preferred_element_type=f32)
             + lstm_bhh_ref[...])
        i_g = jax.nn.sigmoid(g[:, 0:H])
        f_g = jax.nn.sigmoid(g[:, H:2 * H])
        g_g = jnp.tanh(g[:, 2 * H:3 * H])
        o_g = jax.nn.sigmoid(g[:, 3 * H:4 * H])
        cl = f_g * cl + i_g * g_g
        hl = o_g * jnp.tanh(cl)
        q = hl                                                       # (B, H)
        # e[n] = <x[n], q[batch[n]]>, batched as (B, N) scores
        scores = jnp.einsum('bh,nh->bn', q, out, preferred_element_type=f32)
        masked = jnp.where(batch_oh > 0, scores, jnp.float32(-1e30))
        emax = jnp.max(masked, axis=1, keepdims=True)                # (B, 1)
        # exp on masked scores: out-of-graph entries never overflow
        expv = jnp.where(batch_oh > 0, jnp.exp(masked - emax), 0.0)  # (B, N)
        denom = jnp.sum(expv, axis=1, keepdims=True)
        a = expv / denom
        r_read = jnp.dot(a, out, preferred_element_type=f32)         # (B, H)
        q_star = jnp.concatenate([q, r_read], axis=-1)               # (B, 2H)

    # ---- embed + relu (only HBM write of the whole forward) --------------
    o_ref[...] = jnp.maximum(
        jnp.dot(q_star, emb_w_ref[...], preferred_element_type=f32) + emb_b_ref[...],
        0.0)


# ------------------------------ glue ------------------------------------------

@functools.partial(jax.jit, static_argnames=('msg_steps', 's2s_steps'))
def mpnn_forward(params, x, edge_attr, src_oh, dst_oh, inv_cnt, batch_oh,
                 *, msg_steps=3, s2s_steps=3):
    hidden = params['proj_w'].shape[1]
    embed = params['emb_w'].shape[1]
    num_graphs = batch_oh.shape[0]

    kernel = functools.partial(mpnn_fused_kernel, hidden=hidden,
                               msg_steps=msg_steps, s2s_steps=s2s_steps)
    ins = (x, edge_attr, src_oh, dst_oh, inv_cnt, batch_oh,
           params['proj_w'], params['proj_b'],
           params['en1_w'], params['en1_b'], params['en2_w'], params['en2_b'],
           params['root'], params['conv_b'],
           params['gru_wih'], params['gru_whh'], params['gru_bih'], params['gru_bhh'],
           params['lstm_wih'], params['lstm_whh'], params['lstm_bih'], params['lstm_bhh'],
           params['emb_w'], params['emb_b'])
    # TODO(synk): for large graphs (E,N in the thousands) grid the edge axis
    # ('arbitrary', VMEM accumulator) and replace the dense one-hot gather with
    # scalar-prefetched indices; at these sizes the whole problem fits VMEM.
    return pl.pallas_call(
        kernel,
        out_shape=jax.ShapeDtypeStruct((num_graphs, embed), jnp.float32),
        in_specs=[VMEM_SPEC] * len(ins),
        out_specs=VMEM_SPEC,
    )(*ins)


def build_structure(edge_index, batch, num_nodes, num_graphs):
    """One-hot gather/scatter matrices; built once per (fixed) graph."""
    src = edge_index[0]
    dst = edge_index[1]
    nid = jnp.arange(num_nodes)
    src_oh = (src[:, None] == nid[None, :]).astype(jnp.float32)      # (E, N)
    dst_oh = (nid[:, None] == dst[None, :]).astype(jnp.float32)      # (N, E)
    cnt = dst_oh.sum(axis=1, keepdims=True)
    inv_cnt = jnp.where(cnt > 0, 1.0 / jnp.maximum(cnt, 1.0), 0.0)   # (N, 1)
    batch_oh = (jnp.arange(num_graphs)[:, None] == batch[None, :]).astype(jnp.float32)  # (B, N)
    return src_oh, dst_oh, inv_cnt, batch_oh


def init_params(key, in_nodes, in_edges, hidden, embed):
    # deterministic synthetic init; linear weights stored as (in, out)
    keys = jax.random.split(key, 18)

    def u(k, shape):
        return jax.random.uniform(k, shape, jnp.float32, -0.1, 0.1)

    H = hidden
    return {
        'proj_w': u(keys[0], (in_nodes, H)),     'proj_b': u(keys[1], (1, H)),
        'en1_w': u(keys[2], (in_edges, 2 * H)),  'en1_b': u(keys[3], (1, 2 * H)),
        'en2_w': u(keys[4], (2 * H, H * H)),     'en2_b': u(keys[5], (1, H * H)),
        'root': u(keys[6], (H, H)),              'conv_b': u(keys[7], (1, H)),
        'gru_wih': u(keys[8], (H, 3 * H)),       'gru_whh': u(keys[9], (H, 3 * H)),
        'gru_bih': u(keys[10], (1, 3 * H)),      'gru_bhh': u(keys[11], (1, 3 * H)),
        'lstm_wih': u(keys[12], (2 * H, 4 * H)), 'lstm_whh': u(keys[13], (H, 4 * H)),
        'lstm_bih': u(keys[14], (1, 4 * H)),     'lstm_bhh': u(keys[15], (1, 4 * H)),
        'emb_w': u(keys[16], (2 * H, embed)),    'emb_b': u(keys[17], (1, embed)),
    }


# ------------------------------ main ------------------------------------------

if __name__ == "__main__":
    N, E, B = 12, 24, 2
    IN_NODES, IN_EDGES, HIDDEN, EMBED = 8, 6, 32, 16

    key = jax.random.PRNGKey(0)
    k_x, k_e, k_s, k_d, k_p = jax.random.split(key, 5)

    x = jax.random.normal(k_x, (N, IN_NODES), jnp.float32)
    edge_attr = jax.random.normal(k_e, (E, IN_EDGES), jnp.float32)
    src = jax.random.randint(k_s, (E,), 0, N, dtype=jnp.int32)
    dst = jax.random.randint(k_d, (E,), 0, N, dtype=jnp.int32)
    edge_index = jnp.stack([src, dst])                               # (2, E)
    batch = jnp.concatenate([jnp.zeros(N // 2, jnp.int32),
                             jnp.ones(N - N // 2, jnp.int32)])       # (N,)

    params = init_params(k_p, IN_NODES, IN_EDGES, HIDDEN, EMBED)

    # graph structure hoisted out of the per-forward path (fixed graph)
    src_oh, dst_oh, inv_cnt, batch_oh = build_structure(edge_index, batch, N, B)
    src_oh, dst_oh, inv_cnt, batch_oh = jax.block_until_ready(
        (src_oh, dst_oh, inv_cnt, batch_oh))

    out = mpnn_forward(params, x, edge_attr, src_oh, dst_oh, inv_cnt, batch_oh,
                       msg_steps=3, s2s_steps=3)
    out = jax.block_until_ready(out)
    assert out.shape == (B, EMBED) and out.dtype == jnp.float32
    print("KERNEL_OK")
</pallas_src>

<mosaic_0001>
module attributes {stable_mosaic.version = 11 : i64} {
  func.func @mpnn_fused_kernel(%arg0: memref<12x8xf32, #tpu.memory_space<vmem>>, %arg1: memref<24x6xf32, #tpu.memory_space<vmem>>, %arg2: memref<24x12xf32, #tpu.memory_space<vmem>>, %arg3: memref<12x24xf32, #tpu.memory_space<vmem>>, %arg4: memref<12x1xf32, #tpu.memory_space<vmem>>, %arg5: memref<2x12xf32, #tpu.memory_space<vmem>>, %arg6: memref<8x32xf32, #tpu.memory_space<vmem>>, %arg7: memref<1x32xf32, #tpu.memory_space<vmem>>, %arg8: memref<6x64xf32, #tpu.memory_space<vmem>>, %arg9: memref<1x64xf32, #tpu.memory_space<vmem>>, %arg10: memref<64x1024xf32, #tpu.memory_space<vmem>>, %arg11: memref<1x1024xf32, #tpu.memory_space<vmem>>, %arg12: memref<32x32xf32, #tpu.memory_space<vmem>>, %arg13: memref<1x32xf32, #tpu.memory_space<vmem>>, %arg14: memref<32x96xf32, #tpu.memory_space<vmem>>, %arg15: memref<32x96xf32, #tpu.memory_space<vmem>>, %arg16: memref<1x96xf32, #tpu.memory_space<vmem>>, %arg17: memref<1x96xf32, #tpu.memory_space<vmem>>, %arg18: memref<64x128xf32, #tpu.memory_space<vmem>>, %arg19: memref<32x128xf32, #tpu.memory_space<vmem>>, %arg20: memref<1x128xf32, #tpu.memory_space<vmem>>, %arg21: memref<1x128xf32, #tpu.memory_space<vmem>>, %arg22: memref<64x16xf32, #tpu.memory_space<vmem>>, %arg23: memref<1x16xf32, #tpu.memory_space<vmem>>, %arg24: memref<2x16xf32, #tpu.memory_space<vmem>>) attributes {dimension_semantics = [], scalar_prefetch = 0 : i64, scratch_operands = 0 : i64, tpu.core_type = #tpu.core_type<tc>} {
    %c0 = arith.constant 0 : index
    %c0_0 = arith.constant 0 : index
    %0 = vector.load %arg0[%c0, %c0_0] : memref<12x8xf32, #tpu.memory_space<vmem>>, vector<12x8xf32>
    %c0_1 = arith.constant 0 : index
    %c0_2 = arith.constant 0 : index
    %1 = vector.load %arg2[%c0_1, %c0_2] : memref<24x12xf32, #tpu.memory_space<vmem>>, vector<24x12xf32>
    %c0_3 = arith.constant 0 : index
    %c0_4 = arith.constant 0 : index
    %2 = vector.load %arg3[%c0_3, %c0_4] : memref<12x24xf32, #tpu.memory_space<vmem>>, vector<12x24xf32>
    %c0_5 = arith.constant 0 : index
    %c0_6 = arith.constant 0 : index
    %3 = vector.load %arg4[%c0_5, %c0_6] : memref<12x1xf32, #tpu.memory_space<vmem>>, vector<12x1xf32>
    %c0_7 = arith.constant 0 : index
    %c0_8 = arith.constant 0 : index
    %4 = vector.load %arg5[%c0_7, %c0_8] : memref<2x12xf32, #tpu.memory_space<vmem>>, vector<2x12xf32>
    %c0_9 = arith.constant 0 : index
    %c0_10 = arith.constant 0 : index
    %5 = vector.load %arg6[%c0_9, %c0_10] : memref<8x32xf32, #tpu.memory_space<vmem>>, vector<8x32xf32>
    %cst = arith.constant dense<0.000000e+00> : vector<12x32xf32>
    %6 = tpu.matmul %0, %5, %cst {dimension_numbers = #tpu.dot_dimension_numbers<[1], [0], [0], [1], [0, 0, 1, 1], [], []>} : vector<12x8xf32>, vector<8x32xf32>, vector<12x32xf32> -> vector<12x32xf32>
    %c0_11 = arith.constant 0 : index
    %c0_12 = arith.constant 0 : index
    %7 = vector.load %arg7[%c0_11, %c0_12] : memref<1x32xf32, #tpu.memory_space<vmem>>, vector<1x32xf32>
    %8 = vector.broadcast %7 : vector<1x32xf32> to vector<12x32xf32>
    %9 = arith.addf %6, %8 : vector<12x32xf32>
    %cst_13 = arith.constant 0.000000e+00 : f32
    %10 = vector.broadcast %cst_13 : f32 to vector<12x32xf32>
    %11 = arith.maximumf %9, %10 : vector<12x32xf32>
    %c0_14 = arith.constant 0 : index
    %c0_15 = arith.constant 0 : index
    %12 = vector.load %arg1[%c0_14, %c0_15] : memref<24x6xf32, #tpu.memory_space<vmem>>, vector<24x6xf32>
    %c0_16 = arith.constant 0 : index
    %c0_17 = arith.constant 0 : index
    %13 = vector.load %arg8[%c0_16, %c0_17] : memref<6x64xf32, #tpu.memory_space<vmem>>, vector<6x64xf32>
    %cst_18 = arith.constant dense<0.000000e+00> : vector<24x64xf32>
    %14 = tpu.matmul %12, %13, %cst_18 {dimension_numbers = #tpu.dot_dimension_numbers<[1], [0], [0], [1], [0, 0, 1, 1], [], []>} : vector<24x6xf32>, vector<6x64xf32>, vector<24x64xf32> -> vector<24x64xf32>
    %c0_19 = arith.constant 0 : index
    %c0_20 = arith.constant 0 : index
    %15 = vector.load %arg9[%c0_19, %c0_20] : memref<1x64xf32, #tpu.memory_space<vmem>>, vector<1x64xf32>
    %16 = vector.broadcast %15 : vector<1x64xf32> to vector<24x64xf32>
    %17 = arith.addf %14, %16 : vector<24x64xf32>
    %cst_21 = arith.constant 0.000000e+00 : f32
    %18 = vector.broadcast %cst_21 : f32 to vector<24x64xf32>
    %19 = arith.maximumf %17, %18 : vector<24x64xf32>
    %c0_22 = arith.constant 0 : index
    %c0_23 = arith.constant 0 : index
    %20 = vector.load %arg10[%c0_22, %c0_23] : memref<64x1024xf32, #tpu.memory_space<vmem>>, vector<64x1024xf32>
    %cst_24 = arith.constant dense<0.000000e+00> : vector<24x1024xf32>
    %21 = tpu.matmul %19, %20, %cst_24 {dimension_numbers = #tpu.dot_dimension_numbers<[1], [0], [0], [1], [0, 0, 1, 1], [], []>} : vector<24x64xf32>, vector<64x1024xf32>, vector<24x1024xf32> -> vector<24x1024xf32>
    %c0_25 = arith.constant 0 : index
    %c0_26 = arith.constant 0 : index
    %22 = vector.load %arg11[%c0_25, %c0_26] : memref<1x1024xf32, #tpu.memory_space<vmem>>, vector<1x1024xf32>
    %23 = vector.broadcast %22 : vector<1x1024xf32> to vector<24x1024xf32>
    %24 = arith.addf %21, %23 : vector<24x1024xf32>
    %c0_27 = arith.constant 0 : index
    %c0_28 = arith.constant 0 : index
    %25 = vector.load %arg12[%c0_27, %c0_28] : memref<32x32xf32, #tpu.memory_space<vmem>>, vector<32x32xf32>
    %c0_29 = arith.constant 0 : index
    %c0_30 = arith.constant 0 : index
    %26 = vector.load %arg13[%c0_29, %c0_30] : memref<1x32xf32, #tpu.memory_space<vmem>>, vector<1x32xf32>
    %c0_31 = arith.constant 0 : index
    %c0_32 = arith.constant 0 : index
    %27 = vector.load %arg14[%c0_31, %c0_32] : memref<32x96xf32, #tpu.memory_space<vmem>>, vector<32x96xf32>
    %c0_33 = arith.constant 0 : index
    %c0_34 = arith.constant 0 : index
    %28 = vector.load %arg15[%c0_33, %c0_34] : memref<32x96xf32, #tpu.memory_space<vmem>>, vector<32x96xf32>
    %c0_35 = arith.constant 0 : index
    %c0_36 = arith.constant 0 : index
    %29 = vector.load %arg16[%c0_35, %c0_36] : memref<1x96xf32, #tpu.memory_space<vmem>>, vector<1x96xf32>
    %c0_37 = arith.constant 0 : index
    %c0_38 = arith.constant 0 : index
    %30 = vector.load %arg17[%c0_37, %c0_38] : memref<1x96xf32, #tpu.memory_space<vmem>>, vector<1x96xf32>
    %cst_39 = arith.constant dense<0.000000e+00> : vector<24x32xf32>
    %31 = tpu.matmul %1, %11, %cst_39 {dimension_numbers = #tpu.dot_dimension_numbers<[1], [0], [0], [1], [0, 0, 1, 1], [], []>} : vector<24x12xf32>, vector<12x32xf32>, vector<24x32xf32> -> vector<24x32xf32>
    %cst_40 = arith.constant 0.000000e+00 : f32
    %32 = vector.broadcast %cst_40 : f32 to vector<24x32xf32>
    %33 = vector.extract_strided_slice %31 {offsets = [0, 0], sizes = [24, 1], strides = [1, 1]} : vector<24x32xf32> to vector<24x1xf32>
    %34 = vector.extract_strided_slice %24 {offsets = [0, 0], sizes = [24, 32], strides = [1, 1]} : vector<24x1024xf32> to vector<24x32xf32>
    %35 = vector.broadcast %33 : vector<24x1xf32> to vector<24x32xf32>
    %36 = arith.mulf %35, %34 : vector<24x32xf32>
    %37 = arith.addf %32, %36 : vector<24x32xf32>
    %38 = vector.extract_strided_slice %31 {offsets = [0, 1], sizes = [24, 1], strides = [1, 1]} : vector<24x32xf32> to vector<24x1xf32>
    %39 = vector.extract_strided_slice %24 {offsets = [0, 32], sizes = [24, 32], strides = [1, 1]} : vector<24x1024xf32> to vector<24x32xf32>
    %40 = vector.broadcast %38 : vector<24x1xf32> to vector<24x32xf32>
    %41 = arith.mulf %40, %39 : vector<24x32xf32>
    %42 = arith.addf %37, %41 : vector<24x32xf32>
    %43 = vector.extract_strided_slice %31 {offsets = [0, 2], sizes = [24, 1], strides = [1, 1]} : vector<24x32xf32> to vector<24x1xf32>
    %44 = vector.extract_strided_slice %24 {offsets = [0, 64], sizes = [24, 32], strides = [1, 1]} : vector<24x1024xf32> to vector<24x32xf32>
    %45 = vector.broadcast %43 : vector<24x1xf32> to vector<24x32xf32>
    %46 = arith.mulf %45, %44 : vector<24x32xf32>
    %47 = arith.addf %42, %46 : vector<24x32xf32>
    %48 = vector.extract_strided_slice %31 {offsets = [0, 3], sizes = [24, 1], strides = [1, 1]} : vector<24x32xf32> to vector<24x1xf32>
    %49 = vector.extract_strided_slice %24 {offsets = [0, 96], sizes = [24, 32], strides = [1, 1]} : vector<24x1024xf32> to vector<24x32xf32>
    %50 = vector.broadcast %48 : vector<24x1xf32> to vector<24x32xf32>
    %51 = arith.mulf %50, %49 : vector<24x32xf32>
    %52 = arith.addf %47, %51 : vector<24x32xf32>
    %53 = vector.extract_strided_slice %31 {offsets = [0, 4], sizes = [24, 1], strides = [1, 1]} : vector<24x32xf32> to vector<24x1xf32>
    %54 = vector.extract_strided_slice %24 {offsets = [0, 128], sizes = [24, 32], strides = [1, 1]} : vector<24x1024xf32> to vector<24x32xf32>
    %55 = vector.broadcast %53 : vector<24x1xf32> to vector<24x32xf32>
    %56 = arith.mulf %55, %54 : vector<24x32xf32>
    %57 = arith.addf %52, %56 : vector<24x32xf32>
    %58 = vector.extract_strided_slice %31 {offsets = [0, 5], sizes = [24, 1], strides = [1, 1]} : vector<24x32xf32> to vector<24x1xf32>
    %59 = vector.extract_strided_slice %24 {offsets = [0, 160], sizes = [24, 32], strides = [1, 1]} : vector<24x1024xf32> to vector<24x32xf32>
    %60 = vector.broadcast %58 : vector<24x1xf32> to vector<24x32xf32>
    %61 = arith.mulf %60, %59 : vector<24x32xf32>
    %62 = arith.addf %57, %61 : vector<24x32xf32>
    %63 = vector.extract_strided_slice %31 {offsets = [0, 6], sizes = [24, 1], strides = [1, 1]} : vector<24x32xf32> to vector<24x1xf32>
    %64 = vector.extract_strided_slice %24 {offsets = [0, 192], sizes = [24, 32], strides = [1, 1]} : vector<24x1024xf32> to vector<24x32xf32>
    %65 = vector.broadcast %63 : vector<24x1xf32> to vector<24x32xf32>
    %66 = arith.mulf %65, %64 : vector<24x32xf32>
    %67 = arith.addf %62, %66 : vector<24x32xf32>
    %68 = vector.extract_strided_slice %31 {offsets = [0, 7], sizes = [24, 1], strides = [1, 1]} : vector<24x32xf32> to vector<24x1xf32>
    %69 = vector.extract_strided_slice %24 {offsets = [0, 224], sizes = [24, 32], strides = [1, 1]} : vector<24x1024xf32> to vector<24x32xf32>
    %70 = vector.broadcast %68 : vector<24x1xf32> to vector<24x32xf32>
    %71 = arith.mulf %70, %69 : vector<24x32xf32>
    %72 = arith.addf %67, %71 : vector<24x32xf32>
    %73 = vector.extract_strided_slice %31 {offsets = [0, 8], sizes = [24, 1], strides = [1, 1]} : vector<24x32xf32> to vector<24x1xf32>
    %74 = vector.extract_strided_slice %24 {offsets = [0, 256], sizes = [24, 32], strides = [1, 1]} : vector<24x1024xf32> to vector<24x32xf32>
    %75 = vector.broadcast %73 : vector<24x1xf32> to vector<24x32xf32>
    %76 = arith.mulf %75, %74 : vector<24x32xf32>
    %77 = arith.addf %72, %76 : vector<24x32xf32>
    %78 = vector.extract_strided_slice %31 {offsets = [0, 9], sizes = [24, 1], strides = [1, 1]} : vector<24x32xf32> to vector<24x1xf32>
    %79 = vector.extract_strided_slice %24 {offsets = [0, 288], sizes = [24, 32], strides = [1, 1]} : vector<24x1024xf32> to vector<24x32xf32>
    %80 = vector.broadcast %78 : vector<24x1xf32> to vector<24x32xf32>
    %81 = arith.mulf %80, %79 : vector<24x32xf32>
    %82 = arith.addf %77, %81 : vector<24x32xf32>
    %83 = vector.extract_strided_slice %31 {offsets = [0, 10], sizes = [24, 1], strides = [1, 1]} : vector<24x32xf32> to vector<24x1xf32>
    %84 = vector.extract_strided_slice %24 {offsets = [0, 320], sizes = [24, 32], strides = [1, 1]} : vector<24x1024xf32> to vector<24x32xf32>
    %85 = vector.broadcast %83 : vector<24x1xf32> to vector<24x32xf32>
    %86 = arith.mulf %85, %84 : vector<24x32xf32>
    %87 = arith.addf %82, %86 : vector<24x32xf32>
    %88 = vector.extract_strided_slice %31 {offsets = [0, 11], sizes = [24, 1], strides = [1, 1]} : vector<24x32xf32> to vector<24x1xf32>
    %89 = vector.extract_strided_slice %24 {offsets = [0, 352], sizes = [24, 32], strides = [1, 1]} : vector<24x1024xf32> to vector<24x32xf32>
    %90 = vector.broadcast %88 : vector<24x1xf32> to vector<24x32xf32>
    %91 = arith.mulf %90, %89 : vector<24x32xf32>
    %92 = arith.addf %87, %91 : vector<24x32xf32>
    %93 = vector.extract_strided_slice %31 {offsets = [0, 12], sizes = [24, 1], strides = [1, 1]} : vector<24x32xf32> to vector<24x1xf32>
    %94 = vector.extract_strided_slice %24 {offsets = [0, 384], sizes = [24, 32], strides = [1, 1]} : vector<24x1024xf32> to vector<24x32xf32>
    %95 = vector.broadcast %93 : vector<24x1xf32> to vector<24x32xf32>
    %96 = arith.mulf %95, %94 : vector<24x32xf32>
    %97 = arith.addf %92, %96 : vector<24x32xf32>
    %98 = vector.extract_strided_slice %31 {offsets = [0, 13], sizes = [24, 1], strides = [1, 1]} : vector<24x32xf32> to vector<24x1xf32>
    %99 = vector.extract_strided_slice %24 {offsets = [0, 416], sizes = [24, 32], strides = [1, 1]} : vector<24x1024xf32> to vector<24x32xf32>
    %100 = vector.broadcast %98 : vector<24x1xf32> to vector<24x32xf32>
    %101 = arith.mulf %100, %99 : vector<24x32xf32>
    %102 = arith.addf %97, %101 : vector<24x32xf32>
    %103 = vector.extract_strided_slice %31 {offsets = [0, 14], sizes = [24, 1], strides = [1, 1]} : vector<24x32xf32> to vector<24x1xf32>
    %104 = vector.extract_strided_slice %24 {offsets = [0, 448], sizes = [24, 32], strides = [1, 1]} : vector<24x1024xf32> to vector<24x32xf32>
    %105 = vector.broadcast %103 : vector<24x1xf32> to vector<24x32xf32>
    %106 = arith.mulf %105, %104 : vector<24x32xf32>
    %107 = arith.addf %102, %106 : vector<24x32xf32>
    %108 = vector.extract_strided_slice %31 {offsets = [0, 15], sizes = [24, 1], strides = [1, 1]} : vector<24x32xf32> to vector<24x1xf32>
    %109 = vector.extract_strided_slice %24 {offsets = [0, 480], sizes = [24, 32], strides = [1, 1]} : vector<24x1024xf32> to vector<24x32xf32>
    %110 = vector.broadcast %108 : vector<24x1xf32> to vector<24x32xf32>
    %111 = arith.mulf %110, %109 : vector<24x32xf32>
    %112 = arith.addf %107, %111 : vector<24x32xf32>
    %113 = vector.extract_strided_slice %31 {offsets = [0, 16], sizes = [24, 1], strides = [1, 1]} : vector<24x32xf32> to vector<24x1xf32>
    %114 = vector.extract_strided_slice %24 {offsets = [0, 512], sizes = [24, 32], strides = [1, 1]} : vector<24x1024xf32> to vector<24x32xf32>
    %115 = vector.broadcast %113 : vector<24x1xf32> to vector<24x32xf32>
    %116 = arith.mulf %115, %114 : vector<24x32xf32>
    %117 = arith.addf %112, %116 : vector<24x32xf32>
    %118 = vector.extract_strided_slice %31 {offsets = [0, 17], sizes = [24, 1], strides = [1, 1]} : vector<24x32xf32> to vector<24x1xf32>
    %119 = vector.extract_strided_slice %24 {offsets = [0, 544], sizes = [24, 32], strides = [1, 1]} : vector<24x1024xf32> to vector<24x32xf32>
    %120 = vector.broadcast %118 : vector<24x1xf32> to vector<24x32xf32>
    %121 = arith.mulf %120, %119 : vector<24x32xf32>
    %122 = arith.addf %117, %121 : vector<24x32xf32>
    %123 = vector.extract_strided_slice %31 {offsets = [0, 18], sizes = [24, 1], strides = [1, 1]} : vector<24x32xf32> to vector<24x1xf32>
    %124 = vector.extract_strided_slice %24 {offsets = [0, 576], sizes = [24, 32], strides = [1, 1]} : vector<24x1024xf32> to vector<24x32xf32>
    %125 = vector.broadcast %123 : vector<24x1xf32> to vector<24x32xf32>
    %126 = arith.mulf %125, %124 : vector<24x32xf32>
    %127 = arith.addf %122, %126 : vector<24x32xf32>
    %128 = vector.extract_strided_slice %31 {offsets = [0, 19], sizes = [24, 1], strides = [1, 1]} : vector<24x32xf32> to vector<24x1xf32>
    %129 = vector.extract_strided_slice %24 {offsets = [0, 608], sizes = [24, 32], strides = [1, 1]} : vector<24x1024xf32> to vector<24x32xf32>
    %130 = vector.broadcast %128 : vector<24x1xf32> to vector<24x32xf32>
    %131 = arith.mulf %130, %129 : vector<24x32xf32>
    %132 = arith.addf %127, %131 : vector<24x32xf32>
    %133 = vector.extract_strided_slice %31 {offsets = [0, 20], sizes = [24, 1], strides = [1, 1]} : vector<24x32xf32> to vector<24x1xf32>
    %134 = vector.extract_strided_slice %24 {offsets = [0, 640], sizes = [24, 32], strides = [1, 1]} : vector<24x1024xf32> to vector<24x32xf32>
    %135 = vector.broadcast %133 : vector<24x1xf32> to vector<24x32xf32>
    %136 = arith.mulf %135, %134 : vector<24x32xf32>
    %137 = arith.addf %132, %136 : vector<24x32xf32>
    %138 = vector.extract_strided_slice %31 {offsets = [0, 21], sizes = [24, 1], strides = [1, 1]} : vector<24x32xf32> to vector<24x1xf32>
    %139 = vector.extract_strided_slice %24 {offsets = [0, 672], sizes = [24, 32], strides = [1, 1]} : vector<24x1024xf32> to vector<24x32xf32>
    %140 = vector.broadcast %138 : vector<24x1xf32> to vector<24x32xf32>
    %141 = arith.mulf %140, %139 : vector<24x32xf32>
    %142 = arith.addf %137, %141 : vector<24x32xf32>
    %143 = vector.extract_strided_slice %31 {offsets = [0, 22], sizes = [24, 1], strides = [1, 1]} : vector<24x32xf32> to vector<24x1xf32>
    %144 = vector.extract_strided_slice %24 {offsets = [0, 704], sizes = [24, 32], strides = [1, 1]} : vector<24x1024xf32> to vector<24x32xf32>
    %145 = vector.broadcast %143 : vector<24x1xf32> to vector<24x32xf32>
    %146 = arith.mulf %145, %144 : vector<24x32xf32>
    %147 = arith.addf %142, %146 : vector<24x32xf32>
    %148 = vector.extract_strided_slice %31 {offsets = [0, 23], sizes = [24, 1], strides = [1, 1]} : vector<24x32xf32> to vector<24x1xf32>
    %149 = vector.extract_strided_slice %24 {offsets = [0, 736], sizes = [24, 32], strides = [1, 1]} : vector<24x1024xf32> to vector<24x32xf32>
    %150 = vector.broadcast %148 : vector<24x1xf32> to vector<24x32xf32>
    %151 = arith.mulf %150, %149 : vector<24x32xf32>
    %152 = arith.addf %147, %151 : vector<24x32xf32>
    %153 = vector.extract_strided_slice %31 {offsets = [0, 24], sizes = [24, 1], strides = [1, 1]} : vector<24x32xf32> to vector<24x1xf32>
    %154 = vector.extract_strided_slice %24 {offsets = [0, 768], sizes = [24, 32], strides = [1, 1]} : vector<24x1024xf32> to vector<24x32xf32>
    %155 = vector.broadcast %153 : vector<24x1xf32> to vector<24x32xf32>
    %156 = arith.mulf %155, %154 : vector<24x32xf32>
    %157 = arith.addf %152, %156 : vector<24x32xf32>
    %158 = vector.extract_strided_slice %31 {offsets = [0, 25], sizes = [24, 1], strides = [1, 1]} : vector<24x32xf32> to vector<24x1xf32>
    %159 = vector.extract_strided_slice %24 {offsets = [0, 800], sizes = [24, 32], strides = [1, 1]} : vector<24x1024xf32> to vector<24x32xf32>
    %160 = vector.broadcast %158 : vector<24x1xf32> to vector<24x32xf32>
    %161 = arith.mulf %160, %159 : vector<24x32xf32>
    %162 = arith.addf %157, %161 : vector<24x32xf32>
    %163 = vector.extract_strided_slice %31 {offsets = [0, 26], sizes = [24, 1], strides = [1, 1]} : vector<24x32xf32> to vector<24x1xf32>
    %164 = vector.extract_strided_slice %24 {offsets = [0, 832], sizes = [24, 32], strides = [1, 1]} : vector<24x1024xf32> to vector<24x32xf32>
    %165 = vector.broadcast %163 : vector<24x1xf32> to vector<24x32xf32>
    %166 = arith.mulf %165, %164 : vector<24x32xf32>
    %167 = arith.addf %162, %166 : vector<24x32xf32>
    %168 = vector.extract_strided_slice %31 {offsets = [0, 27], sizes = [24, 1], strides = [1, 1]} : vector<24x32xf32> to vector<24x1xf32>
    %169 = vector.extract_strided_slice %24 {offsets = [0, 864], sizes = [24, 32], strides = [1, 1]} : vector<24x1024xf32> to vector<24x32xf32>
    %170 = vector.broadcast %168 : vector<24x1xf32> to vector<24x32xf32>
    %171 = arith.mulf %170, %169 : vector<24x32xf32>
    %172 = arith.addf %167, %171 : vector<24x32xf32>
    %173 = vector.extract_strided_slice %31 {offsets = [0, 28], sizes = [24, 1], strides = [1, 1]} : vector<24x32xf32> to vector<24x1xf32>
    %174 = vector.extract_strided_slice %24 {offsets = [0, 896], sizes = [24, 32], strides = [1, 1]} : vector<24x1024xf32> to vector<24x32xf32>
    %175 = vector.broadcast %173 : vector<24x1xf32> to vector<24x32xf32>
    %176 = arith.mulf %175, %174 : vector<24x32xf32>
    %177 = arith.addf %172, %176 : vector<24x32xf32>
    %178 = vector.extract_strided_slice %31 {offsets = [0, 29], sizes = [24, 1], strides = [1, 1]} : vector<24x32xf32> to vector<24x1xf32>
    %179 = vector.extract_strided_slice %24 {offsets = [0, 928], sizes = [24, 32], strides = [1, 1]} : vector<24x1024xf32> to vector<24x32xf32>
    %180 = vector.broadcast %178 : vector<24x1xf32> to vector<24x32xf32>
    %181 = arith.mulf %180, %179 : vector<24x32xf32>
    %182 = arith.addf %177, %181 : vector<24x32xf32>
    %183 = vector.extract_strided_slice %31 {offsets = [0, 30], sizes = [24, 1], strides = [1, 1]} : vector<24x32xf32> to vector<24x1xf32>
    %184 = vector.extract_strided_slice %24 {offsets = [0, 960], sizes = [24, 32], strides = [1, 1]} : vector<24x1024xf32> to vector<24x32xf32>
    %185 = vector.broadcast %183 : vector<24x1xf32> to vector<24x32xf32>
    %186 = arith.mulf %185, %184 : vector<24x32xf32>
    %187 = arith.addf %182, %186 : vector<24x32xf32>
    %188 = vector.extract_strided_slice %31 {offsets = [0, 31], sizes = [24, 1], strides = [1, 1]} : vector<24x32xf32> to vector<24x1xf32>
    %189 = vector.extract_strided_slice %24 {offsets = [0, 992], sizes = [24, 32], strides = [1, 1]} : vector<24x1024xf32> to vector<24x32xf32>
    %190 = vector.broadcast %188 : vector<24x1xf32> to vector<24x32xf32>
    %191 = arith.mulf %190, %189 : vector<24x32xf32>
    %192 = arith.addf %187, %191 : vector<24x32xf32>
    %cst_41 = arith.constant dense<0.000000e+00> : vector<12x32xf32>
    %193 = tpu.matmul %2, %192, %cst_41 {dimension_numbers = #tpu.dot_dimension_numbers<[1], [0], [0], [1], [0, 0, 1, 1], [], []>} : vector<12x24xf32>, vector<24x32xf32>, vector<12x32xf32> -> vector<12x32xf32>
    %194 = vector.broadcast %3 : vector<12x1xf32> to vector<12x32xf32>
    %195 = arith.mulf %193, %194 : vector<12x32xf32>
    %cst_42 = arith.constant dense<0.000000e+00> : vector<12x32xf32>
    %196 = tpu.matmul %11, %25, %cst_42 {dimension_numbers = #tpu.dot_dimension_numbers<[1], [0], [0], [1], [0, 0, 1, 1], [], []>} : vector<12x32xf32>, vector<32x32xf32>, vector<12x32xf32> -> vector<12x32xf32>
    %197 = arith.addf %195, %196 : vector<12x32xf32>
    %198 = vector.broadcast %26 : vector<1x32xf32> to vector<12x32xf32>
    %199 = arith.addf %197, %198 : vector<12x32xf32>
    %cst_43 = arith.constant 0.000000e+00 : f32
    %200 = vector.broadcast %cst_43 : f32 to vector<12x32xf32>
    %201 = arith.maximumf %199, %200 : vector<12x32xf32>
    %cst_44 = arith.constant dense<0.000000e+00> : vector<12x96xf32>
    %202 = tpu.matmul %201, %27, %cst_44 {dimension_numbers = #tpu.dot_dimension_numbers<[1], [0], [0], [1], [0, 0, 1, 1], [], []>} : vector<12x32xf32>, vector<32x96xf32>, vector<12x96xf32> -> vector<12x96xf32>
    %203 = vector.broadcast %29 : vector<1x96xf32> to vector<12x96xf32>
    %204 = arith.addf %202, %203 : vector<12x96xf32>
    %cst_45 = arith.constant dense<0.000000e+00> : vector<12x96xf32>
    %205 = tpu.matmul %11, %28, %cst_45 {dimension_numbers = #tpu.dot_dimension_numbers<[1], [0], [0], [1], [0, 0, 1, 1], [], []>} : vector<12x32xf32>, vector<32x96xf32>, vector<12x96xf32> -> vector<12x96xf32>
    %206 = vector.broadcast %30 : vector<1x96xf32> to vector<12x96xf32>
    %207 = arith.addf %205, %206 : vector<12x96xf32>
    %208 = vector.extract_strided_slice %204 {offsets = [0, 0], sizes = [12, 32], strides = [1, 1]} : vector<12x96xf32> to vector<12x32xf32>
    %209 = vector.extract_strided_slice %207 {offsets = [0, 0], sizes = [12, 32], strides = [1, 1]} : vector<12x96xf32> to vector<12x32xf32>
    %210 = arith.addf %208, %209 : vector<12x32xf32>
    %211 = arith.negf %210 : vector<12x32xf32>
    %212 = math.exp %211 : vector<12x32xf32>
    %cst_46 = arith.constant 1.000000e+00 : f32
    %213 = vector.broadcast %cst_46 : f32 to vector<12x32xf32>
    %214 = arith.addf %213, %212 : vector<12x32xf32>
    %215 = arith.divf %213, %214 : vector<12x32xf32>
    %216 = vector.extract_strided_slice %204 {offsets = [0, 32], sizes = [12, 32], strides = [1, 1]} : vector<12x96xf32> to vector<12x32xf32>
    %217 = vector.extract_strided_slice %207 {offsets = [0, 32], sizes = [12, 32], strides = [1, 1]} : vector<12x96xf32> to vector<12x32xf32>
    %218 = arith.addf %216, %217 : vector<12x32xf32>
    %219 = arith.negf %218 : vector<12x32xf32>
    %220 = math.exp %219 : vector<12x32xf32>
    %cst_47 = arith.constant 1.000000e+00 : f32
    %221 = vector.broadcast %cst_47 : f32 to vector<12x32xf32>
    %222 = arith.addf %221, %220 : vector<12x32xf32>
    %223 = arith.divf %221, %222 : vector<12x32xf32>
    %224 = vector.extract_strided_slice %204 {offsets = [0, 64], sizes = [12, 32], strides = [1, 1]} : vector<12x96xf32> to vector<12x32xf32>
    %225 = vector.extract_strided_slice %207 {offsets = [0, 64], sizes = [12, 32], strides = [1, 1]} : vector<12x96xf32> to vector<12x32xf32>
    %226 = arith.mulf %215, %225 : vector<12x32xf32>
    %227 = arith.addf %224, %226 : vector<12x32xf32>
    %228 = math.tanh %227 : vector<12x32xf32>
    %cst_48 = arith.constant 1.000000e+00 : f32
    %229 = vector.broadcast %cst_48 : f32 to vector<12x32xf32>
    %230 = arith.subf %229, %223 : vector<12x32xf32>
    %231 = arith.mulf %230, %228 : vector<12x32xf32>
    %232 = arith.mulf %223, %11 : vector<12x32xf32>
    %233 = arith.addf %231, %232 : vector<12x32xf32>
    %cst_49 = arith.constant dense<0.000000e+00> : vector<24x32xf32>
    %234 = tpu.matmul %1, %233, %cst_49 {dimension_numbers = #tpu.dot_dimension_numbers<[1], [0], [0], [1], [0, 0, 1, 1], [], []>} : vector<24x12xf32>, vector<12x32xf32>, vector<24x32xf32> -> vector<24x32xf32>
    %cst_50 = arith.constant 0.000000e+00 : f32
    %235 = vector.broadcast %cst_50 : f32 to vector<24x32xf32>
    %236 = vector.extract_strided_slice %234 {offsets = [0, 0], sizes = [24, 1], strides = [1, 1]} : vector<24x32xf32> to vector<24x1xf32>
    %237 = vector.extract_strided_slice %24 {offsets = [0, 0], sizes = [24, 32], strides = [1, 1]} : vector<24x1024xf32> to vector<24x32xf32>
    %238 = vector.broadcast %236 : vector<24x1xf32> to vector<24x32xf32>
    %239 = arith.mulf %238, %237 : vector<24x32xf32>
    %240 = arith.addf %235, %239 : vector<24x32xf32>
    %241 = vector.extract_strided_slice %234 {offsets = [0, 1], sizes = [24, 1], strides = [1, 1]} : vector<24x32xf32> to vector<24x1xf32>
    %242 = vector.extract_strided_slice %24 {offsets = [0, 32], sizes = [24, 32], strides = [1, 1]} : vector<24x1024xf32> to vector<24x32xf32>
    %243 = vector.broadcast %241 : vector<24x1xf32> to vector<24x32xf32>
    %244 = arith.mulf %243, %242 : vector<24x32xf32>
    %245 = arith.addf %240, %244 : vector<24x32xf32>
    %246 = vector.extract_strided_slice %234 {offsets = [0, 2], sizes = [24, 1], strides = [1, 1]} : vector<24x32xf32> to vector<24x1xf32>
    %247 = vector.extract_strided_slice %24 {offsets = [0, 64], sizes = [24, 32], strides = [1, 1]} : vector<24x1024xf32> to vector<24x32xf32>
    %248 = vector.broadcast %246 : vector<24x1xf32> to vector<24x32xf32>
    %249 = arith.mulf %248, %247 : vector<24x32xf32>
    %250 = arith.addf %245, %249 : vector<24x32xf32>
    %251 = vector.extract_strided_slice %234 {offsets = [0, 3], sizes = [24, 1], strides = [1, 1]} : vector<24x32xf32> to vector<24x1xf32>
    %252 = vector.extract_strided_slice %24 {offsets = [0, 96], sizes = [24, 32], strides = [1, 1]} : vector<24x1024xf32> to vector<24x32xf32>
    %253 = vector.broadcast %251 : vector<24x1xf32> to vector<24x32xf32>
    %254 = arith.mulf %253, %252 : vector<24x32xf32>
    %255 = arith.addf %250, %254 : vector<24x32xf32>
    %256 = vector.extract_strided_slice %234 {offsets = [0, 4], sizes = [24, 1], strides = [1, 1]} : vector<24x32xf32> to vector<24x1xf32>
    %257 = vector.extract_strided_slice %24 {offsets = [0, 128], sizes = [24, 32], strides = [1, 1]} : vector<24x1024xf32> to vector<24x32xf32>
    %258 = vector.broadcast %256 : vector<24x1xf32> to vector<24x32xf32>
    %259 = arith.mulf %258, %257 : vector<24x32xf32>
    %260 = arith.addf %255, %259 : vector<24x32xf32>
    %261 = vector.extract_strided_slice %234 {offsets = [0, 5], sizes = [24, 1], strides = [1, 1]} : vector<24x32xf32> to vector<24x1xf32>
    %262 = vector.extract_strided_slice %24 {offsets = [0, 160], sizes = [24, 32], strides = [1, 1]} : vector<24x1024xf32> to vector<24x32xf32>
    %263 = vector.broadcast %261 : vector<24x1xf32> to vector<24x32xf32>
    %264 = arith.mulf %263, %262 : vector<24x32xf32>
    %265 = arith.addf %260, %264 : vector<24x32xf32>
    %266 = vector.extract_strided_slice %234 {offsets = [0, 6], sizes = [24, 1], strides = [1, 1]} : vector<24x32xf32> to vector<24x1xf32>
    %267 = vector.extract_strided_slice %24 {offsets = [0, 192], sizes = [24, 32], strides = [1, 1]} : vector<24x1024xf32> to vector<24x32xf32>
    %268 = vector.broadcast %266 : vector<24x1xf32> to vector<24x32xf32>
    %269 = arith.mulf %268, %267 : vector<24x32xf32>
    %270 = arith.addf %265, %269 : vector<24x32xf32>
    %271 = vector.extract_strided_slice %234 {offsets = [0, 7], sizes = [24, 1], strides = [1, 1]} : vector<24x32xf32> to vector<24x1xf32>
    %272 = vector.extract_strided_slice %24 {offsets = [0, 224], sizes = [24, 32], strides = [1, 1]} : vector<24x1024xf32> to vector<24x32xf32>
    %273 = vector.broadcast %271 : vector<24x1xf32> to vector<24x32xf32>
    %274 = arith.mulf %273, %272 : vector<24x32xf32>
    %275 = arith.addf %270, %274 : vector<24x32xf32>
    %276 = vector.extract_strided_slice %234 {offsets = [0, 8], sizes = [24, 1], strides = [1, 1]} : vector<24x32xf32> to vector<24x1xf32>
    %277 = vector.extract_strided_slice %24 {offsets = [0, 256], sizes = [24, 32], strides = [1, 1]} : vector<24x1024xf32> to vector<24x32xf32>
    %278 = vector.broadcast %276 : vector<24x1xf32> to vector<24x32xf32>
    %279 = arith.mulf %278, %277 : vector<24x32xf32>
    %280 = arith.addf %275, %279 : vector<24x32xf32>
    %281 = vector.extract_strided_slice %234 {offsets = [0, 9], sizes = [24, 1], strides = [1, 1]} : vector<24x32xf32> to vector<24x1xf32>
    %282 = vector.extract_strided_slice %24 {offsets = [0, 288], sizes = [24, 32], strides = [1, 1]} : vector<24x1024xf32> to vector<24x32xf32>
    %283 = vector.broadcast %281 : vector<24x1xf32> to vector<24x32xf32>
    %284 = arith.mulf %283, %282 : vector<24x32xf32>
    %285 = arith.addf %280, %284 : vector<24x32xf32>
    %286 = vector.extract_strided_slice %234 {offsets = [0, 10], sizes = [24, 1], strides = [1, 1]} : vector<24x32xf32> to vector<24x1xf32>
    %287 = vector.extract_strided_slice %24 {offsets = [0, 320], sizes = [24, 32], strides = [1, 1]} : vector<24x1024xf32> to vector<24x32xf32>
    %288 = vector.broadcast %286 : vector<24x1xf32> to vector<24x32xf32>
    %289 = arith.mulf %288, %287 : vector<24x32xf32>
    %290 = arith.addf %285, %289 : vector<24x32xf32>
    %291 = vector.extract_strided_slice %234 {offsets = [0, 11], sizes = [24, 1], strides = [1, 1]} : vector<24x32xf32> to vector<24x1xf32>
    %292 = vector.extract_strided_slice %24 {offsets = [0, 352], sizes = [24, 32], strides = [1, 1]} : vector<24x1024xf32> to vector<24x32xf32>
    %293 = vector.broadcast %291 : vector<24x1xf32> to vector<24x32xf32>
    %294 = arith.mulf %293, %292 : vector<24x32xf32>
    %295 = arith.addf %290, %294 : vector<24x32xf32>
    %296 = vector.extract_strided_slice %234 {offsets = [0, 12], sizes = [24, 1], strides = [1, 1]} : vector<24x32xf32> to vector<24x1xf32>
    %297 = vector.extract_strided_slice %24 {offsets = [0, 384], sizes = [24, 32], strides = [1, 1]} : vector<24x1024xf32> to vector<24x32xf32>
    %298 = vector.broadcast %296 : vector<24x1xf32> to vector<24x32xf32>
    %299 = arith.mulf %298, %297 : vector<24x32xf32>
    %300 = arith.addf %295, %299 : vector<24x32xf32>
    %301 = vector.extract_strided_slice %234 {offsets = [0, 13], sizes = [24, 1], strides = [1, 1]} : vector<24x32xf32> to vector<24x1xf32>
    %302 = vector.extract_strided_slice %24 {offsets = [0, 416], sizes = [24, 32], strides = [1, 1]} : vector<24x1024xf32> to vector<24x32xf32>
    %303 = vector.broadcast %301 : vector<24x1xf32> to vector<24x32xf32>
    %304 = arith.mulf %303, %302 : vector<24x32xf32>
    %305 = arith.addf %300, %304 : vector<24x32xf32>
    %306 = vector.extract_strided_slice %234 {offsets = [0, 14], sizes = [24, 1], strides = [1, 1]} : vector<24x32xf32> to vector<24x1xf32>
    %307 = vector.extract_strided_slice %24 {offsets = [0, 448], sizes = [24, 32], strides = [1, 1]} : vector<24x1024xf32> to vector<24x32xf32>
    %308 = vector.broadcast %306 : vector<24x1xf32> to vector<24x32xf32>
    %309 = arith.mulf %308, %307 : vector<24x32xf32>
    %310 = arith.addf %305, %309 : vector<24x32xf32>
    %311 = vector.extract_strided_slice %234 {offsets = [0, 15], sizes = [24, 1], strides = [1, 1]} : vector<24x32xf32> to vector<24x1xf32>
    %312 = vector.extract_strided_slice %24 {offsets = [0, 480], sizes = [24, 32], strides = [1, 1]} : vector<24x1024xf32> to vector<24x32xf32>
    %313 = vector.broadcast %311 : vector<24x1xf32> to vector<24x32xf32>
    %314 = arith.mulf %313, %312 : vector<24x32xf32>
    %315 = arith.addf %310, %314 : vector<24x32xf32>
    %316 = vector.extract_strided_slice %234 {offsets = [0, 16], sizes = [24, 1], strides = [1, 1]} : vector<24x32xf32> to vector<24x1xf32>
    %317 = vector.extract_strided_slice %24 {offsets = [0, 512], sizes = [24, 32], strides = [1, 1]} : vector<24x1024xf32> to vector<24x32xf32>
    %318 = vector.broadcast %316 : vector<24x1xf32> to vector<24x32xf32>
    %319 = arith.mulf %318, %317 : vector<24x32xf32>
    %320 = arith.addf %315, %319 : vector<24x32xf32>
    %321 = vector.extract_strided_slice %234 {offsets = [0, 17], sizes = [24, 1], strides = [1, 1]} : vector<24x32xf32> to vector<24x1xf32>
    %322 = vector.extract_strided_slice %24 {offsets = [0, 544], sizes = [24, 32], strides = [1, 1]} : vector<24x1024xf32> to vector<24x32xf32>
    %323 = vector.broadcast %321 : vector<24x1xf32> to vector<24x32xf32>
    %324 = arith.mulf %323, %322 : vector<24x32xf32>
    %325 = arith.addf %320, %324 : vector<24x32xf32>
    %326 = vector.extract_strided_slice %234 {offsets = [0, 18], sizes = [24, 1], strides = [1, 1]} : vector<24x32xf32> to vector<24x1xf32>
    %327 = vector.extract_strided_slice %24 {offsets = [0, 576], sizes = [24, 32], strides = [1, 1]} : vector<24x1024xf32> to vector<24x32xf32>
    %328 = vector.broadcast %326 : vector<24x1xf32> to vector<24x32xf32>
    %329 = arith.mulf %328, %327 : vector<24x32xf32>
    %330 = arith.addf %325, %329 : vector<24x32xf32>
    %331 = vector.extract_strided_slice %234 {offsets = [0, 19], sizes = [24, 1], strides = [1, 1]} : vector<24x32xf32> to vector<24x1xf32>
    %332 = vector.extract_strided_slice %24 {offsets = [0, 608], sizes = [24, 32], strides = [1, 1]} : vector<24x1024xf32> to vector<24x32xf32>
    %333 = vector.broadcast %331 : vector<24x1xf32> to vector<24x32xf32>
    %334 = arith.mulf %333, %332 : vector<24x32xf32>
    %335 = arith.addf %330, %334 : vector<24x32xf32>
    %336 = vector.extract_strided_slice %234 {offsets = [0, 20], sizes = [24, 1], strides = [1, 1]} : vector<24x32xf32> to vector<24x1xf32>
    %337 = vector.extract_strided_slice %24 {offsets = [0, 640], sizes = [24, 32], strides = [1, 1]} : vector<24x1024xf32> to vector<24x32xf32>
    %338 = vector.broadcast %336 : vector<24x1xf32> to vector<24x32xf32>
    %339 = arith.mulf %338, %337 : vector<24x32xf32>
    %340 = arith.addf %335, %339 : vector<24x32xf32>
    %341 = vector.extract_strided_slice %234 {offsets = [0, 21], sizes = [24, 1], strides = [1, 1]} : vector<24x32xf32> to vector<24x1xf32>
    %342 = vector.extract_strided_slice %24 {offsets = [0, 672], sizes = [24, 32], strides = [1, 1]} : vector<24x1024xf32> to vector<24x32xf32>
    %343 = vector.broadcast %341 : vector<24x1xf32> to vector<24x32xf32>
    %344 = arith.mulf %343, %342 : vector<24x32xf32>
    %345 = arith.addf %340, %344 : vector<24x32xf32>
    %346 = vector.extract_strided_slice %234 {offsets = [0, 22], sizes = [24, 1], strides = [1, 1]} : vector<24x32xf32> to vector<24x1xf32>
    %347 = vector.extract_strided_slice %24 {offsets = [0, 704], sizes = [24, 32], strides = [1, 1]} : vector<24x1024xf32> to vector<24x32xf32>
    %348 = vector.broadcast %346 : vector<24x1xf32> to vector<24x32xf32>
    %349 = arith.mulf %348, %347 : vector<24x32xf32>
    %350 = arith.addf %345, %349 : vector<24x32xf32>
    %351 = vector.extract_strided_slice %234 {offsets = [0, 23], sizes = [24, 1], strides = [1, 1]} : vector<24x32xf32> to vector<24x1xf32>
    %352 = vector.extract_strided_slice %24 {offsets = [0, 736], sizes = [24, 32], strides = [1, 1]} : vector<24x1024xf32> to vector<24x32xf32>
    %353 = vector.broadcast %351 : vector<24x1xf32> to vector<24x32xf32>
    %354 = arith.mulf %353, %352 : vector<24x32xf32>
    %355 = arith.addf %350, %354 : vector<24x32xf32>
    %356 = vector.extract_strided_slice %234 {offsets = [0, 24], sizes = [24, 1], strides = [1, 1]} : vector<24x32xf32> to vector<24x1xf32>
    %357 = vector.extract_strided_slice %24 {offsets = [0, 768], sizes = [24, 32], strides = [1, 1]} : vector<24x1024xf32> to vector<24x32xf32>
    %358 = vector.broadcast %356 : vector<24x1xf32> to vector<24x32xf32>
    %359 = arith.mulf %358, %357 : vector<24x32xf32>
    %360 = arith.addf %355, %359 : vector<24x32xf32>
    %361 = vector.extract_strided_slice %234 {offsets = [0, 25], sizes = [24, 1], strides = [1, 1]} : vector<24x32xf32> to vector<24x1xf32>
    %362 = vector.extract_strided_slice %24 {offsets = [0, 800], sizes = [24, 32], strides = [1, 1]} : vector<24x1024xf32> to vector<24x32xf32>
    %363 = vector.broadcast %361 : vector<24x1xf32> to vector<24x32xf32>
    %364 = arith.mulf %363, %362 : vector<24x32xf32>
    %365 = arith.addf %360, %364 : vector<24x32xf32>
    %366 = vector.extract_strided_slice %234 {offsets = [0, 26], sizes = [24, 1], strides = [1, 1]} : vector<24x32xf32> to vector<24x1xf32>
    %367 = vector.extract_strided_slice %24 {offsets = [0, 832], sizes = [24, 32], strides = [1, 1]} : vector<24x1024xf32> to vector<24x32xf32>
    %368 = vector.broadcast %366 : vector<24x1xf32> to vector<24x32xf32>
    %369 = arith.mulf %368, %367 : vector<24x32xf32>
    %370 = arith.addf %365, %369 : vector<24x32xf32>
    %371 = vector.extract_strided_slice %234 {offsets = [0, 27], sizes = [24, 1], strides = [1, 1]} : vector<24x32xf32> to vector<24x1xf32>
    %372 = vector.extract_strided_slice %24 {offsets = [0, 864], sizes = [24, 32], strides = [1, 1]} : vector<24x1024xf32> to vector<24x32xf32>
    %373 = vector.broadcast %371 : vector<24x1xf32> to vector<24x32xf32>
    %374 = arith.mulf %373, %372 : vector<24x32xf32>
    %375 = arith.addf %370, %374 : vector<24x32xf32>
    %376 = vector.extract_strided_slice %234 {offsets = [0, 28], sizes = [24, 1], strides = [1, 1]} : vector<24x32xf32> to vector<24x1xf32>
    %377 = vector.extract_strided_slice %24 {offsets = [0, 896], sizes = [24, 32], strides = [1, 1]} : vector<24x1024xf32> to vector<24x32xf32>
    %378 = vector.broadcast %376 : vector<24x1xf32> to vector<24x32xf32>
    %379 = arith.mulf %378, %377 : vector<24x32xf32>
    %380 = arith.addf %375, %379 : vector<24x32xf32>
    %381 = vector.extract_strided_slice %234 {offsets = [0, 29], sizes = [24, 1], strides = [1, 1]} : vector<24x32xf32> to vector<24x1xf32>
    %382 = vector.extract_strided_slice %24 {offsets = [0, 928], sizes = [24, 32], strides = [1, 1]} : vector<24x1024xf32> to vector<24x32xf32>
    %383 = vector.broadcast %381 : vector<24x1xf32> to vector<24x32xf32>
    %384 = arith.mulf %383, %382 : vector<24x32xf32>
    %385 = arith.addf %380, %384 : vector<24x32xf32>
    %386 = vector.extract_strided_slice %234 {offsets = [0, 30], sizes = [24, 1], strides = [1, 1]} : vector<24x32xf32> to vector<24x1xf32>
    %387 = vector.extract_strided_slice %24 {offsets = [0, 960], sizes = [24, 32], strides = [1, 1]} : vector<24x1024xf32> to vector<24x32xf32>
    %388 = vector.broadcast %386 : vector<24x1xf32> to vector<24x32xf32>
    %389 = arith.mulf %388, %387 : vector<24x32xf32>
    %390 = arith.addf %385, %389 : vector<24x32xf32>
    %391 = vector.extract_strided_slice %234 {offsets = [0, 31], sizes = [24, 1], strides = [1, 1]} : vector<24x32xf32> to vector<24x1xf32>
    %392 = vector.extract_strided_slice %24 {offsets = [0, 992], sizes = [24, 32], strides = [1, 1]} : vector<24x1024xf32> to vector<24x32xf32>
    %393 = vector.broadcast %391 : vector<24x1xf32> to vector<24x32xf32>
    %394 = arith.mulf %393, %392 : vector<24x32xf32>
    %395 = arith.addf %390, %394 : vector<24x32xf32>
    %cst_51 = arith.constant dense<0.000000e+00> : vector<12x32xf32>
    %396 = tpu.matmul %2, %395, %cst_51 {dimension_numbers = #tpu.dot_dimension_numbers<[1], [0], [0], [1], [0, 0, 1, 1], [], []>} : vector<12x24xf32>, vector<24x32xf32>, vector<12x32xf32> -> vector<12x32xf32>
    %397 = vector.broadcast %3 : vector<12x1xf32> to vector<12x32xf32>
    %398 = arith.mulf %396, %397 : vector<12x32xf32>
    %cst_52 = arith.constant dense<0.000000e+00> : vector<12x32xf32>
    %399 = tpu.matmul %233, %25, %cst_52 {dimension_numbers = #tpu.dot_dimension_numbers<[1], [0], [0], [1], [0, 0, 1, 1], [], []>} : vector<12x32xf32>, vector<32x32xf32>, vector<12x32xf32> -> vector<12x32xf32>
    %400 = arith.addf %398, %399 : vector<12x32xf32>
    %401 = vector.broadcast %26 : vector<1x32xf32> to vector<12x32xf32>
    %402 = arith.addf %400, %401 : vector<12x32xf32>
    %cst_53 = arith.constant 0.000000e+00 : f32
    %403 = vector.broadcast %cst_53 : f32 to vector<12x32xf32>
    %404 = arith.maximumf %402, %403 : vector<12x32xf32>
    %cst_54 = arith.constant dense<0.000000e+00> : vector<12x96xf32>
    %405 = tpu.matmul %404, %27, %cst_54 {dimension_numbers = #tpu.dot_dimension_numbers<[1], [0], [0], [1], [0, 0, 1, 1], [], []>} : vector<12x32xf32>, vector<32x96xf32>, vector<12x96xf32> -> vector<12x96xf32>
    %406 = vector.broadcast %29 : vector<1x96xf32> to vector<12x96xf32>
    %407 = arith.addf %405, %406 : vector<12x96xf32>
    %cst_55 = arith.constant dense<0.000000e+00> : vector<12x96xf32>
    %408 = tpu.matmul %233, %28, %cst_55 {dimension_numbers = #tpu.dot_dimension_numbers<[1], [0], [0], [1], [0, 0, 1, 1], [], []>} : vector<12x32xf32>, vector<32x96xf32>, vector<12x96xf32> -> vector<12x96xf32>
    %409 = vector.broadcast %30 : vector<1x96xf32> to vector<12x96xf32>
    %410 = arith.addf %408, %409 : vector<12x96xf32>
    %411 = vector.extract_strided_slice %407 {offsets = [0, 0], sizes = [12, 32], strides = [1, 1]} : vector<12x96xf32> to vector<12x32xf32>
    %412 = vector.extract_strided_slice %410 {offsets = [0, 0], sizes = [12, 32], strides = [1, 1]} : vector<12x96xf32> to vector<12x32xf32>
    %413 = arith.addf %411, %412 : vector<12x32xf32>
    %414 = arith.negf %413 : vector<12x32xf32>
    %415 = math.exp %414 : vector<12x32xf32>
    %cst_56 = arith.constant 1.000000e+00 : f32
    %416 = vector.broadcast %cst_56 : f32 to vector<12x32xf32>
    %417 = arith.addf %416, %415 : vector<12x32xf32>
    %418 = arith.divf %416, %417 : vector<12x32xf32>
    %419 = vector.extract_strided_slice %407 {offsets = [0, 32], sizes = [12, 32], strides = [1, 1]} : vector<12x96xf32> to vector<12x32xf32>
    %420 = vector.extract_strided_slice %410 {offsets = [0, 32], sizes = [12, 32], strides = [1, 1]} : vector<12x96xf32> to vector<12x32xf32>
    %421 = arith.addf %419, %420 : vector<12x32xf32>
    %422 = arith.negf %421 : vector<12x32xf32>
    %423 = math.exp %422 : vector<12x32xf32>
    %cst_57 = arith.constant 1.000000e+00 : f32
    %424 = vector.broadcast %cst_57 : f32 to vector<12x32xf32>
    %425 = arith.addf %424, %423 : vector<12x32xf32>
    %426 = arith.divf %424, %425 : vector<12x32xf32>
    %427 = vector.extract_strided_slice %407 {offsets = [0, 64], sizes = [12, 32], strides = [1, 1]} : vector<12x96xf32> to vector<12x32xf32>
    %428 = vector.extract_strided_slice %410 {offsets = [0, 64], sizes = [12, 32], strides = [1, 1]} : vector<12x96xf32> to vector<12x32xf32>
    %429 = arith.mulf %418, %428 : vector<12x32xf32>
    %430 = arith.addf %427, %429 : vector<12x32xf32>
    %431 = math.tanh %430 : vector<12x32xf32>
    %cst_58 = arith.constant 1.000000e+00 : f32
    %432 = vector.broadcast %cst_58 : f32 to vector<12x32xf32>
    %433 = arith.subf %432, %426 : vector<12x32xf32>
    %434 = arith.mulf %433, %431 : vector<12x32xf32>
    %435 = arith.mulf %426, %233 : vector<12x32xf32>
    %436 = arith.addf %434, %435 : vector<12x32xf32>
    %cst_59 = arith.constant dense<0.000000e+00> : vector<24x32xf32>
    %437 = tpu.matmul %1, %436, %cst_59 {dimension_numbers = #tpu.dot_dimension_numbers<[1], [0], [0], [1], [0, 0, 1, 1], [], []>} : vector<24x12xf32>, vector<12x32xf32>, vector<24x32xf32> -> vector<24x32xf32>
    %cst_60 = arith.constant 0.000000e+00 : f32
    %438 = vector.broadcast %cst_60 : f32 to vector<24x32xf32>
    %439 = vector.extract_strided_slice %437 {offsets = [0, 0], sizes = [24, 1], strides = [1, 1]} : vector<24x32xf32> to vector<24x1xf32>
    %440 = vector.extract_strided_slice %24 {offsets = [0, 0], sizes = [24, 32], strides = [1, 1]} : vector<24x1024xf32> to vector<24x32xf32>
    %441 = vector.broadcast %439 : vector<24x1xf32> to vector<24x32xf32>
    %442 = arith.mulf %441, %440 : vector<24x32xf32>
    %443 = arith.addf %438, %442 : vector<24x32xf32>
    %444 = vector.extract_strided_slice %437 {offsets = [0, 1], sizes = [24, 1], strides = [1, 1]} : vector<24x32xf32> to vector<24x1xf32>
    %445 = vector.extract_strided_slice %24 {offsets = [0, 32], sizes = [24, 32], strides = [1, 1]} : vector<24x1024xf32> to vector<24x32xf32>
    %446 = vector.broadcast %444 : vector<24x1xf32> to vector<24x32xf32>
    %447 = arith.mulf %446, %445 : vector<24x32xf32>
    %448 = arith.addf %443, %447 : vector<24x32xf32>
    %449 = vector.extract_strided_slice %437 {offsets = [0, 2], sizes = [24, 1], strides = [1, 1]} : vector<24x32xf32> to vector<24x1xf32>
    %450 = vector.extract_strided_slice %24 {offsets = [0, 64], sizes = [24, 32], strides = [1, 1]} : vector<24x1024xf32> to vector<24x32xf32>
    %451 = vector.broadcast %449 : vector<24x1xf32> to vector<24x32xf32>
    %452 = arith.mulf %451, %450 : vector<24x32xf32>
    %453 = arith.addf %448, %452 : vector<24x32xf32>
    %454 = vector.extract_strided_slice %437 {offsets = [0, 3], sizes = [24, 1], strides = [1, 1]} : vector<24x32xf32> to vector<24x1xf32>
    %455 = vector.extract_strided_slice %24 {offsets = [0, 96], sizes = [24, 32], strides = [1, 1]} : vector<24x1024xf32> to vector<24x32xf32>
    %456 = vector.broadcast %454 : vector<24x1xf32> to vector<24x32xf32>
    %457 = arith.mulf %456, %455 : vector<24x32xf32>
    %458 = arith.addf %453, %457 : vector<24x32xf32>
    %459 = vector.extract_strided_slice %437 {offsets = [0, 4], sizes = [24, 1], strides = [1, 1]} : vector<24x32xf32> to vector<24x1xf32>
    %460 = vector.extract_strided_slice %24 {offsets = [0, 128], sizes = [24, 32], strides = [1, 1]} : vector<24x1024xf32> to vector<24x32xf32>
    %461 = vector.broadcast %459 : vector<24x1xf32> to vector<24x32xf32>
    %462 = arith.mulf %461, %460 : vector<24x32xf32>
    %463 = arith.addf %458, %462 : vector<24x32xf32>
    %464 = vector.extract_strided_slice %437 {offsets = [0, 5], sizes = [24, 1], strides = [1, 1]} : vector<24x32xf32> to vector<24x1xf32>
    %465 = vector.extract_strided_slice %24 {offsets = [0, 160], sizes = [24, 32], strides = [1, 1]} : vector<24x1024xf32> to vector<24x32xf32>
    %466 = vector.broadcast %464 : vector<24x1xf32> to vector<24x32xf32>
    %467 = arith.mulf %466, %465 : vector<24x32xf32>
    %468 = arith.addf %463, %467 : vector<24x32xf32>
    %469 = vector.extract_strided_slice %437 {offsets = [0, 6], sizes = [24, 1], strides = [1, 1]} : vector<24x32xf32> to vector<24x1xf32>
    %470 = vector.extract_strided_slice %24 {offsets = [0, 192], sizes = [24, 32], strides = [1, 1]} : vector<24x1024xf32> to vector<24x32xf32>
    %471 = vector.broadcast %469 : vector<24x1xf32> to vector<24x32xf32>
    %472 = arith.mulf %471, %470 : vector<24x32xf32>
    %473 = arith.addf %468, %472 : vector<24x32xf32>
    %474 = vector.extract_strided_slice %437 {offsets = [0, 7], sizes = [24, 1], strides = [1, 1]} : vector<24x32xf32> to vector<24x1xf32>
    %475 = vector.extract_strided_slice %24 {offsets = [0, 224], sizes = [24, 32], strides = [1, 1]} : vector<24x1024xf32> to vector<24x32xf32>
    %476 = vector.broadcast %474 : vector<24x1xf32> to vector<24x32xf32>
    %477 = arith.mulf %476, %475 : vector<24x32xf32>
    %478 = arith.addf %473, %477 : vector<24x32xf32>
    %479 = vector.extract_strided_slice %437 {offsets = [0, 8], sizes = [24, 1], strides = [1, 1]} : vector<24x32xf32> to vector<24x1xf32>
    %480 = vector.extract_strided_slice %24 {offsets = [0, 256], sizes = [24, 32], strides = [1, 1]} : vector<24x1024xf32> to vector<24x32xf32>
    %481 = vector.broadcast %479 : vector<24x1xf32> to vector<24x32xf32>
    %482 = arith.mulf %481, %480 : vector<24x32xf32>
    %483 = arith.addf %478, %482 : vector<24x32xf32>
    %484 = vector.extract_strided_slice %437 {offsets = [0, 9], sizes = [24, 1], strides = [1, 1]} : vector<24x32xf32> to vector<24x1xf32>
    %485 = vector.extract_strided_slice %24 {offsets = [0, 288], sizes = [24, 32], strides = [1, 1]} : vector<24x1024xf32> to vector<24x32xf32>
    %486 = vector.broadcast %484 : vector<24x1xf32> to vector<24x32xf32>
    %487 = arith.mulf %486, %485 : vector<24x32xf32>
    %488 = arith.addf %483, %487 : vector<24x32xf32>
    %489 = vector.extract_strided_slice %437 {offsets = [0, 10], sizes = [24, 1], strides = [1, 1]} : vector<24x32xf32> to vector<24x1xf32>
    %490 = vector.extract_strided_slice %24 {offsets = [0, 320], sizes = [24, 32], strides = [1, 1]} : vector<24x1024xf32> to vector<24x32xf32>
    %491 = vector.broadcast %489 : vector<24x1xf32> to vector<24x32xf32>
    %492 = arith.mulf %491, %490 : vector<24x32xf32>
    %493 = arith.addf %488, %492 : vector<24x32xf32>
    %494 = vector.extract_strided_slice %437 {offsets = [0, 11], sizes = [24, 1], strides = [1, 1]} : vector<24x32xf32> to vector<24x1xf32>
    %495 = vector.extract_strided_slice %24 {offsets = [0, 352], sizes = [24, 32], strides = [1, 1]} : vector<24x1024xf32> to vector<24x32xf32>
    %496 = vector.broadcast %494 : vector<24x1xf32> to vector<24x32xf32>
    %497 = arith.mulf %496, %495 : vector<24x32xf32>
    %498 = arith.addf %493, %497 : vector<24x32xf32>
    %499 = vector.extract_strided_slice %437 {offsets = [0, 12], sizes = [24, 1], strides = [1, 1]} : vector<24x32xf32> to vector<24x1xf32>
    %500 = vector.extract_strided_slice %24 {offsets = [0, 384], sizes = [24, 32], strides = [1, 1]} : vector<24x1024xf32> to vector<24x32xf32>
    %501 = vector.broadcast %499 : vector<24x1xf32> to vector<24x32xf32>
    %502 = arith.mulf %501, %500 : vector<24x32xf32>
    %503 = arith.addf %498, %502 : vector<24x32xf32>
    %504 = vector.extract_strided_slice %437 {offsets = [0, 13], sizes = [24, 1], strides = [1, 1]} : vector<24x32xf32> to vector<24x1xf32>
    %505 = vector.extract_strided_slice %24 {offsets = [0, 416], sizes = [24, 32], strides = [1, 1]} : vector<24x1024xf32> to vector<24x32xf32>
    %506 = vector.broadcast %504 : vector<24x1xf32> to vector<24x32xf32>
    %507 = arith.mulf %506, %505 : vector<24x32xf32>
    %508 = arith.addf %503, %507 : vector<24x32xf32>
    %509 = vector.extract_strided_slice %437 {offsets = [0, 14], sizes = [24, 1], strides = [1, 1]} : vector<24x32xf32> to vector<24x1xf32>
    %510 = vector.extract_strided_slice %24 {offsets = [0, 448], sizes = [24, 32], strides = [1, 1]} : vector<24x1024xf32> to vector<24x32xf32>
    %511 = vector.broadcast %509 : vector<24x1xf32> to vector<24x32xf32>
    %512 = arith.mulf %511, %510 : vector<24x32xf32>
    %513 = arith.addf %508, %512 : vector<24x32xf32>
    %514 = vector.extract_strided_slice %437 {offsets = [0, 15], sizes = [24, 1], strides = [1, 1]} : vector<24x32xf32> to vector<24x1xf32>
    %515 = vector.extract_strided_slice %24 {offsets = [0, 480], sizes = [24, 32], strides = [1, 1]} : vector<24x1024xf32> to vector<24x32xf32>
    %516 = vector.broadcast %514 : vector<24x1xf32> to vector<24x32xf32>
    %517 = arith.mulf %516, %515 : vector<24x32xf32>
    %518 = arith.addf %513, %517 : vector<24x32xf32>
    %519 = vector.extract_strided_slice %437 {offsets = [0, 16], sizes = [24, 1], strides = [1, 1]} : vector<24x32xf32> to vector<24x1xf32>
    %520 = vector.extract_strided_slice %24 {offsets = [0, 512], sizes = [24, 32], strides = [1, 1]} : vector<24x1024xf32> to vector<24x32xf32>
    %521 = vector.broadcast %519 : vector<24x1xf32> to vector<24x32xf32>
    %522 = arith.mulf %521, %520 : vector<24x32xf32>
    %523 = arith.addf %518, %522 : vector<24x32xf32>
    %524 = vector.extract_strided_slice %437 {offsets = [0, 17], sizes = [24, 1], strides = [1, 1]} : vector<24x32xf32> to vector<24x1xf32>
    %525 = vector.extract_strided_slice %24 {offsets = [0, 544], sizes = [24, 32], strides = [1, 1]} : vector<24x1024xf32> to vector<24x32xf32>
    %526 = vector.broadcast %524 : vector<24x1xf32> to vector<24x32xf32>
    %527 = arith.mulf %526, %525 : vector<24x32xf32>
    %528 = arith.addf %523, %527 : vector<24x32xf32>
    %529 = vector.extract_strided_slice %437 {offsets = [0, 18], sizes = [24, 1], strides = [1, 1]} : vector<24x32xf32> to vector<24x1xf32>
    %530 = vector.extract_strided_slice %24 {offsets = [0, 576], sizes = [24, 32], strides = [1, 1]} : vector<24x1024xf32> to vector<24x32xf32>
    %531 = vector.broadcast %529 : vector<24x1xf32> to vector<24x32xf32>
    %532 = arith.mulf %531, %530 : vector<24x32xf32>
    %533 = arith.addf %528, %532 : vector<24x32xf32>
    %534 = vector.extract_strided_slice %437 {offsets = [0, 19], sizes = [24, 1], strides = [1, 1]} : vector<24x32xf32> to vector<24x1xf32>
    %535 = vector.extract_strided_slice %24 {offsets = [0, 608], sizes = [24, 32], strides = [1, 1]} : vector<24x1024xf32> to vector<24x32xf32>
    %536 = vector.broadcast %534 : vector<24x1xf32> to vector<24x32xf32>
    %537 = arith.mulf %536, %535 : vector<24x32xf32>
    %538 = arith.addf %533, %537 : vector<24x32xf32>
    %539 = vector.extract_strided_slice %437 {offsets = [0, 20], sizes = [24, 1], strides = [1, 1]} : vector<24x32xf32> to vector<24x1xf32>
    %540 = vector.extract_strided_slice %24 {offsets = [0, 640], sizes = [24, 32], strides = [1, 1]} : vector<24x1024xf32> to vector<24x32xf32>
    %541 = vector.broadcast %539 : vector<24x1xf32> to vector<24x32xf32>
    %542 = arith.mulf %541, %540 : vector<24x32xf32>
    %543 = arith.addf %538, %542 : vector<24x32xf32>
    %544 = vector.extract_strided_slice %437 {offsets = [0, 21], sizes = [24, 1], strides = [1, 1]} : vector<24x32xf32> to vector<24x1xf32>
    %545 = vector.extract_strided_slice %24 {offsets = [0, 672], sizes = [24, 32], strides = [1, 1]} : vector<24x1024xf32> to vector<24x32xf32>
    %546 = vector.broadcast %544 : vector<24x1xf32> to vector<24x32xf32>
    %547 = arith.mulf %546, %545 : vector<24x32xf32>
    %548 = arith.addf %543, %547 : vector<24x32xf32>
    %549 = vector.extract_strided_slice %437 {offsets = [0, 22], sizes = [24, 1], strides = [1, 1]} : vector<24x32xf32> to vector<24x1xf32>
    %550 = vector.extract_strided_slice %24 {offsets = [0, 704], sizes = [24, 32], strides = [1, 1]} : vector<24x1024xf32> to vector<24x32xf32>
    %551 = vector.broadcast %549 : vector<24x1xf32> to vector<24x32xf32>
    %552 = arith.mulf %551, %550 : vector<24x32xf32>
    %553 = arith.addf %548, %552 : vector<24x32xf32>
    %554 = vector.extract_strided_slice %437 {offsets = [0, 23], sizes = [24, 1], strides = [1, 1]} : vector<24x32xf32> to vector<24x1xf32>
    %555 = vector.extract_strided_slice %24 {offsets = [0, 736], sizes = [24, 32], strides = [1, 1]} : vector<24x1024xf32> to vector<24x32xf32>
    %556 = vector.broadcast %554 : vector<24x1xf32> to vector<24x32xf32>
    %557 = arith.mulf %556, %555 : vector<24x32xf32>
    %558 = arith.addf %553, %557 : vector<24x32xf32>
    %559 = vector.extract_strided_slice %437 {offsets = [0, 24], sizes = [24, 1], strides = [1, 1]} : vector<24x32xf32> to vector<24x1xf32>
    %560 = vector.extract_strided_slice %24 {offsets = [0, 768], sizes = [24, 32], strides = [1, 1]} : vector<24x1024xf32> to vector<24x32xf32>
    %561 = vector.broadcast %559 : vector<24x1xf32> to vector<24x32xf32>
    %562 = arith.mulf %561, %560 : vector<24x32xf32>
    %563 = arith.addf %558, %562 : vector<24x32xf32>
    %564 = vector.extract_strided_slice %437 {offsets = [0, 25], sizes = [24, 1], strides = [1, 1]} : vector<24x32xf32> to vector<24x1xf32>
    %565 = vector.extract_strided_slice %24 {offsets = [0, 800], sizes = [24, 32], strides = [1, 1]} : vector<24x1024xf32> to vector<24x32xf32>
    %566 = vector.broadcast %564 : vector<24x1xf32> to vector<24x32xf32>
    %567 = arith.mulf %566, %565 : vector<24x32xf32>
    %568 = arith.addf %563, %567 : vector<24x32xf32>
    %569 = vector.extract_strided_slice %437 {offsets = [0, 26], sizes = [24, 1], strides = [1, 1]} : vector<24x32xf32> to vector<24x1xf32>
    %570 = vector.extract_strided_slice %24 {offsets = [0, 832], sizes = [24, 32], strides = [1, 1]} : vector<24x1024xf32> to vector<24x32xf32>
    %571 = vector.broadcast %569 : vector<24x1xf32> to vector<24x32xf32>
    %572 = arith.mulf %571, %570 : vector<24x32xf32>
    %573 = arith.addf %568, %572 : vector<24x32xf32>
    %574 = vector.extract_strided_slice %437 {offsets = [0, 27], sizes = [24, 1], strides = [1, 1]} : vector<24x32xf32> to vector<24x1xf32>
    %575 = vector.extract_strided_slice %24 {offsets = [0, 864], sizes = [24, 32], strides = [1, 1]} : vector<24x1024xf32> to vector<24x32xf32>
    %576 = vector.broadcast %574 : vector<24x1xf32> to vector<24x32xf32>
    %577 = arith.mulf %576, %575 : vector<24x32xf32>
    %578 = arith.addf %573, %577 : vector<24x32xf32>
    %579 = vector.extract_strided_slice %437 {offsets = [0, 28], sizes = [24, 1], strides = [1, 1]} : vector<24x32xf32> to vector<24x1xf32>
    %580 = vector.extract_strided_slice %24 {offsets = [0, 896], sizes = [24, 32], strides = [1, 1]} : vector<24x1024xf32> to vector<24x32xf32>
    %581 = vector.broadcast %579 : vector<24x1xf32> to vector<24x32xf32>
    %582 = arith.mulf %581, %580 : vector<24x32xf32>
    %583 = arith.addf %578, %582 : vector<24x32xf32>
    %584 = vector.extract_strided_slice %437 {offsets = [0, 29], sizes = [24, 1], strides = [1, 1]} : vector<24x32xf32> to vector<24x1xf32>
    %585 = vector.extract_strided_slice %24 {offsets = [0, 928], sizes = [24, 32], strides = [1, 1]} : vector<24x1024xf32> to vector<24x32xf32>
    %586 = vector.broadcast %584 : vector<24x1xf32> to vector<24x32xf32>
    %587 = arith.mulf %586, %585 : vector<24x32xf32>
    %588 = arith.addf %583, %587 : vector<24x32xf32>
    %589 = vector.extract_strided_slice %437 {offsets = [0, 30], sizes = [24, 1], strides = [1, 1]} : vector<24x32xf32> to vector<24x1xf32>
    %590 = vector.extract_strided_slice %24 {offsets = [0, 960], sizes = [24, 32], strides = [1, 1]} : vector<24x1024xf32> to vector<24x32xf32>
    %591 = vector.broadcast %589 : vector<24x1xf32> to vector<24x32xf32>
    %592 = arith.mulf %591, %590 : vector<24x32xf32>
    %593 = arith.addf %588, %592 : vector<24x32xf32>
    %594 = vector.extract_strided_slice %437 {offsets = [0, 31], sizes = [24, 1], strides = [1, 1]} : vector<24x32xf32> to vector<24x1xf32>
    %595 = vector.extract_strided_slice %24 {offsets = [0, 992], sizes = [24, 32], strides = [1, 1]} : vector<24x1024xf32> to vector<24x32xf32>
    %596 = vector.broadcast %594 : vector<24x1xf32> to vector<24x32xf32>
    %597 = arith.mulf %596, %595 : vector<24x32xf32>
    %598 = arith.addf %593, %597 : vector<24x32xf32>
    %cst_61 = arith.constant dense<0.000000e+00> : vector<12x32xf32>
    %599 = tpu.matmul %2, %598, %cst_61 {dimension_numbers = #tpu.dot_dimension_numbers<[1], [0], [0], [1], [0, 0, 1, 1], [], []>} : vector<12x24xf32>, vector<24x32xf32>, vector<12x32xf32> -> vector<12x32xf32>
    %600 = vector.broadcast %3 : vector<12x1xf32> to vector<12x32xf32>
    %601 = arith.mulf %599, %600 : vector<12x32xf32>
    %cst_62 = arith.constant dense<0.000000e+00> : vector<12x32xf32>
    %602 = tpu.matmul %436, %25, %cst_62 {dimension_numbers = #tpu.dot_dimension_numbers<[1], [0], [0], [1], [0, 0, 1, 1], [], []>} : vector<12x32xf32>, vector<32x32xf32>, vector<12x32xf32> -> vector<12x32xf32>
    %603 = arith.addf %601, %602 : vector<12x32xf32>
    %604 = vector.broadcast %26 : vector<1x32xf32> to vector<12x32xf32>
    %605 = arith.addf %603, %604 : vector<12x32xf32>
    %cst_63 = arith.constant 0.000000e+00 : f32
    %606 = vector.broadcast %cst_63 : f32 to vector<12x32xf32>
    %607 = arith.maximumf %605, %606 : vector<12x32xf32>
    %cst_64 = arith.constant dense<0.000000e+00> : vector<12x96xf32>
    %608 = tpu.matmul %607, %27, %cst_64 {dimension_numbers = #tpu.dot_dimension_numbers<[1], [0], [0], [1], [0, 0, 1, 1], [], []>} : vector<12x32xf32>, vector<32x96xf32>, vector<12x96xf32> -> vector<12x96xf32>
    %609 = vector.broadcast %29 : vector<1x96xf32> to vector<12x96xf32>
    %610 = arith.addf %608, %609 : vector<12x96xf32>
    %cst_65 = arith.constant dense<0.000000e+00> : vector<12x96xf32>
    %611 = tpu.matmul %436, %28, %cst_65 {dimension_numbers = #tpu.dot_dimension_numbers<[1], [0], [0], [1], [0, 0, 1, 1], [], []>} : vector<12x32xf32>, vector<32x96xf32>, vector<12x96xf32> -> vector<12x96xf32>
    %612 = vector.broadcast %30 : vector<1x96xf32> to vector<12x96xf32>
    %613 = arith.addf %611, %612 : vector<12x96xf32>
    %614 = vector.extract_strided_slice %610 {offsets = [0, 0], sizes = [12, 32], strides = [1, 1]} : vector<12x96xf32> to vector<12x32xf32>
    %615 = vector.extract_strided_slice %613 {offsets = [0, 0], sizes = [12, 32], strides = [1, 1]} : vector<12x96xf32> to vector<12x32xf32>
    %616 = arith.addf %614, %615 : vector<12x32xf32>
    %617 = arith.negf %616 : vector<12x32xf32>
    %618 = math.exp %617 : vector<12x32xf32>
    %cst_66 = arith.constant 1.000000e+00 : f32
    %619 = vector.broadcast %cst_66 : f32 to vector<12x32xf32>
    %620 = arith.addf %619, %618 : vector<12x32xf32>
    %621 = arith.divf %619, %620 : vector<12x32xf32>
    %622 = vector.extract_strided_slice %610 {offsets = [0, 32], sizes = [12, 32], strides = [1, 1]} : vector<12x96xf32> to vector<12x32xf32>
    %623 = vector.extract_strided_slice %613 {offsets = [0, 32], sizes = [12, 32], strides = [1, 1]} : vector<12x96xf32> to vector<12x32xf32>
    %624 = arith.addf %622, %623 : vector<12x32xf32>
    %625 = arith.negf %624 : vector<12x32xf32>
    %626 = math.exp %625 : vector<12x32xf32>
    %cst_67 = arith.constant 1.000000e+00 : f32
    %627 = vector.broadcast %cst_67 : f32 to vector<12x32xf32>
    %628 = arith.addf %627, %626 : vector<12x32xf32>
    %629 = arith.divf %627, %628 : vector<12x32xf32>
    %630 = vector.extract_strided_slice %610 {offsets = [0, 64], sizes = [12, 32], strides = [1, 1]} : vector<12x96xf32> to vector<12x32xf32>
    %631 = vector.extract_strided_slice %613 {offsets = [0, 64], sizes = [12, 32], strides = [1, 1]} : vector<12x96xf32> to vector<12x32xf32>
    %632 = arith.mulf %621, %631 : vector<12x32xf32>
    %633 = arith.addf %630, %632 : vector<12x32xf32>
    %634 = math.tanh %633 : vector<12x32xf32>
    %cst_68 = arith.constant 1.000000e+00 : f32
    %635 = vector.broadcast %cst_68 : f32 to vector<12x32xf32>
    %636 = arith.subf %635, %629 : vector<12x32xf32>
    %637 = arith.mulf %636, %634 : vector<12x32xf32>
    %638 = arith.mulf %629, %436 : vector<12x32xf32>
    %639 = arith.addf %637, %638 : vector<12x32xf32>
    %cst_69 = arith.constant 0.000000e+00 : f32
    %640 = vector.broadcast %cst_69 : f32 to vector<2x64xf32>
    %cst_70 = arith.constant 0.000000e+00 : f32
    %641 = vector.broadcast %cst_70 : f32 to vector<2x32xf32>
    %cst_71 = arith.constant 0.000000e+00 : f32
    %642 = vector.broadcast %cst_71 : f32 to vector<2x32xf32>
    %c0_72 = arith.constant 0 : index
    %c0_73 = arith.constant 0 : index
    %643 = vector.load %arg18[%c0_72, %c0_73] : memref<64x128xf32, #tpu.memory_space<vmem>>, vector<64x128xf32>
    %cst_74 = arith.constant dense<0.000000e+00> : vector<2x128xf32>
    %644 = tpu.matmul %640, %643, %cst_74 {dimension_numbers = #tpu.dot_dimension_numbers<[1], [0], [0], [1], [0, 0, 1, 1], [], []>} : vector<2x64xf32>, vector<64x128xf32>, vector<2x128xf32> -> vector<2x128xf32>
    %c0_75 = arith.constant 0 : index
    %c0_76 = arith.constant 0 : index
    %645 = vector.load %arg20[%c0_75, %c0_76] : memref<1x128xf32, #tpu.memory_space<vmem>>, vector<1x128xf32>
    %646 = vector.broadcast %645 : vector<1x128xf32> to vector<2x128xf32>
    %647 = arith.addf %644, %646 : vector<2x128xf32>
    %c0_77 = arith.constant 0 : index
    %c0_78 = arith.constant 0 : index
    %648 = vector.load %arg19[%c0_77, %c0_78] : memref<32x128xf32, #tpu.memory_space<vmem>>, vector<32x128xf32>
    %cst_79 = arith.constant dense<0.000000e+00> : vector<2x128xf32>
    %649 = tpu.matmul %641, %648, %cst_79 {dimension_numbers = #tpu.dot_dimension_numbers<[1], [0], [0], [1], [0, 0, 1, 1], [], []>} : vector<2x32xf32>, vector<32x128xf32>, vector<2x128xf32> -> vector<2x128xf32>
    %650 = arith.addf %647, %649 : vector<2x128xf32>
    %c0_80 = arith.constant 0 : index
    %c0_81 = arith.constant 0 : index
    %651 = vector.load %arg21[%c0_80, %c0_81] : memref<1x128xf32, #tpu.memory_space<vmem>>, vector<1x128xf32>
    %652 = vector.broadcast %651 : vector<1x128xf32> to vector<2x128xf32>
    %653 = arith.addf %650, %652 : vector<2x128xf32>
    %654 = vector.extract_strided_slice %653 {offsets = [0, 0], sizes = [2, 32], strides = [1, 1]} : vector<2x128xf32> to vector<2x32xf32>
    %655 = arith.negf %654 : vector<2x32xf32>
    %656 = math.exp %655 : vector<2x32xf32>
    %cst_82 = arith.constant 1.000000e+00 : f32
    %657 = vector.broadcast %cst_82 : f32 to vector<2x32xf32>
    %658 = arith.addf %657, %656 : vector<2x32xf32>
    %659 = arith.divf %657, %658 : vector<2x32xf32>
    %660 = vector.extract_strided_slice %653 {offsets = [0, 32], sizes = [2, 32], strides = [1, 1]} : vector<2x128xf32> to vector<2x32xf32>
    %661 = arith.negf %660 : vector<2x32xf32>
    %662 = math.exp %661 : vector<2x32xf32>
    %cst_83 = arith.constant 1.000000e+00 : f32
    %663 = vector.broadcast %cst_83 : f32 to vector<2x32xf32>
    %664 = arith.addf %663, %662 : vector<2x32xf32>
    %665 = arith.divf %663, %664 : vector<2x32xf32>
    %666 = vector.extract_strided_slice %653 {offsets = [0, 64], sizes = [2, 32], strides = [1, 1]} : vector<2x128xf32> to vector<2x32xf32>
    %667 = math.tanh %666 : vector<2x32xf32>
    %668 = vector.extract_strided_slice %653 {offsets = [0, 96], sizes = [2, 32], strides = [1, 1]} : vector<2x128xf32> to vector<2x32xf32>
    %669 = arith.negf %668 : vector<2x32xf32>
    %670 = math.exp %669 : vector<2x32xf32>
    %cst_84 = arith.constant 1.000000e+00 : f32
    %671 = vector.broadcast %cst_84 : f32 to vector<2x32xf32>
    %672 = arith.addf %671, %670 : vector<2x32xf32>
    %673 = arith.divf %671, %672 : vector<2x32xf32>
    %674 = arith.mulf %665, %642 : vector<2x32xf32>
    %675 = arith.mulf %659, %667 : vector<2x32xf32>
    %676 = arith.addf %674, %675 : vector<2x32xf32>
    %677 = math.tanh %676 : vector<2x32xf32>
    %678 = arith.mulf %673, %677 : vector<2x32xf32>
    "tpu.trace_start"() <{level = 10 : i32, message = "bh,nh->bn"}> : () -> ()
    %cst_85 = arith.constant dense<0.000000e+00> : vector<2x12xf32>
    %679 = tpu.matmul %678, %639, %cst_85 {dimension_numbers = #tpu.dot_dimension_numbers<[1], [1], [0], [0], [0, 0, 1, 0], [], []>} : vector<2x32xf32>, vector<12x32xf32>, vector<2x12xf32> -> vector<2x12xf32>
    %cst_86 = arith.constant 0.000000e+00 : f32
    "tpu.trace_stop"() : () -> ()
    %680 = vector.broadcast %cst_86 : f32 to vector<2x12xf32>
    %681 = arith.cmpf ogt, %4, %680 : vector<2x12xf32>
    %cst_87 = arith.constant -1.000000e+30 : f32
    %682 = vector.broadcast %cst_87 : f32 to vector<2x12xf32>
    %683 = arith.select %681, %679, %682 : vector<2x12xi1>, vector<2x12xf32>
    %cst_88 = arith.constant dense<0xFF800000> : vector<2xf32>
    %684 = vector.multi_reduction <maximumf>, %683, %cst_88 [1] : vector<2x12xf32> to vector<2xf32>
    %685 = vector.shape_cast %684 : vector<2xf32> to vector<2x1xf32>
    %cst_89 = arith.constant 0.000000e+00 : f32
    %686 = vector.broadcast %cst_89 : f32 to vector<2x12xf32>
    %687 = arith.cmpf ogt, %4, %686 : vector<2x12xf32>
    %688 = vector.broadcast %685 : vector<2x1xf32> to vector<2x12xf32>
    %689 = arith.subf %683, %688 : vector<2x12xf32>
    %690 = math.exp %689 : vector<2x12xf32>
    %cst_90 = arith.constant 0.000000e+00 : f32
    %691 = vector.broadcast %cst_90 : f32 to vector<2x12xf32>
    %692 = arith.select %687, %690, %691 : vector<2x12xi1>, vector<2x12xf32>
    %cst_91 = arith.constant dense<0.000000e+00> : vector<2xf32>
    %693 = vector.multi_reduction <add>, %692, %cst_91 [1] : vector<2x12xf32> to vector<2xf32>
    %694 = vector.shape_cast %693 : vector<2xf32> to vector<2x1xf32>
    %695 = vector.broadcast %694 : vector<2x1xf32> to vector<2x12xf32>
    %696 = arith.divf %692, %695 : vector<2x12xf32>
    %cst_92 = arith.constant dense<0.000000e+00> : vector<2x32xf32>
    %697 = tpu.matmul %696, %639, %cst_92 {dimension_numbers = #tpu.dot_dimension_numbers<[1], [0], [0], [1], [0, 0, 1, 1], [], []>} : vector<2x12xf32>, vector<12x32xf32>, vector<2x32xf32> -> vector<2x32xf32>
    %698 = tpu.concatenate %678, %697 in 1 : vector<2x32xf32>, vector<2x32xf32> -> vector<2x64xf32>
    %c0_93 = arith.constant 0 : index
    %c0_94 = arith.constant 0 : index
    %699 = vector.load %arg18[%c0_93, %c0_94] : memref<64x128xf32, #tpu.memory_space<vmem>>, vector<64x128xf32>
    %cst_95 = arith.constant dense<0.000000e+00> : vector<2x128xf32>
    %700 = tpu.matmul %698, %699, %cst_95 {dimension_numbers = #tpu.dot_dimension_numbers<[1], [0], [0], [1], [0, 0, 1, 1], [], []>} : vector<2x64xf32>, vector<64x128xf32>, vector<2x128xf32> -> vector<2x128xf32>
    %c0_96 = arith.constant 0 : index
    %c0_97 = arith.constant 0 : index
    %701 = vector.load %arg20[%c0_96, %c0_97] : memref<1x128xf32, #tpu.memory_space<vmem>>, vector<1x128xf32>
    %702 = vector.broadcast %701 : vector<1x128xf32> to vector<2x128xf32>
    %703 = arith.addf %700, %702 : vector<2x128xf32>
    %c0_98 = arith.constant 0 : index
    %c0_99 = arith.constant 0 : index
    %704 = vector.load %arg19[%c0_98, %c0_99] : memref<32x128xf32, #tpu.memory_space<vmem>>, vector<32x128xf32>
    %cst_100 = arith.constant dense<0.000000e+00> : vector<2x128xf32>
    %705 = tpu.matmul %678, %704, %cst_100 {dimension_numbers = #tpu.dot_dimension_numbers<[1], [0], [0], [1], [0, 0, 1, 1], [], []>} : vector<2x32xf32>, vector<32x128xf32>, vector<2x128xf32> -> vector<2x128xf32>
    %706 = arith.addf %703, %705 : vector<2x128xf32>
    %c0_101 = arith.constant 0 : index
    %c0_102 = arith.constant 0 : index
    %707 = vector.load %arg21[%c0_101, %c0_102] : memref<1x128xf32, #tpu.memory_space<vmem>>, vector<1x128xf32>
    %708 = vector.broadcast %707 : vector<1x128xf32> to vector<2x128xf32>
    %709 = arith.addf %706, %708 : vector<2x128xf32>
    %710 = vector.extract_strided_slice %709 {offsets = [0, 0], sizes = [2, 32], strides = [1, 1]} : vector<2x128xf32> to vector<2x32xf32>
    %711 = arith.negf %710 : vector<2x32xf32>
    %712 = math.exp %711 : vector<2x32xf32>
    %cst_103 = arith.constant 1.000000e+00 : f32
    %713 = vector.broadcast %cst_103 : f32 to vector<2x32xf32>
    %714 = arith.addf %713, %712 : vector<2x32xf32>
    %715 = arith.divf %713, %714 : vector<2x32xf32>
    %716 = vector.extract_strided_slice %709 {offsets = [0, 32], sizes = [2, 32], strides = [1, 1]} : vector<2x128xf32> to vector<2x32xf32>
    %717 = arith.negf %716 : vector<2x32xf32>
    %718 = math.exp %717 : vector<2x32xf32>
    %cst_104 = arith.constant 1.000000e+00 : f32
    %719 = vector.broadcast %cst_104 : f32 to vector<2x32xf32>
    %720 = arith.addf %719, %718 : vector<2x32xf32>
    %721 = arith.divf %719, %720 : vector<2x32xf32>
    %722 = vector.extract_strided_slice %709 {offsets = [0, 64], sizes = [2, 32], strides = [1, 1]} : vector<2x128xf32> to vector<2x32xf32>
    %723 = math.tanh %722 : vector<2x32xf32>
    %724 = vector.extract_strided_slice %709 {offsets = [0, 96], sizes = [2, 32], strides = [1, 1]} : vector<2x128xf32> to vector<2x32xf32>
    %725 = arith.negf %724 : vector<2x32xf32>
    %726 = math.exp %725 : vector<2x32xf32>
    %cst_105 = arith.constant 1.000000e+00 : f32
    %727 = vector.broadcast %cst_105 : f32 to vector<2x32xf32>
    %728 = arith.addf %727, %726 : vector<2x32xf32>
    %729 = arith.divf %727, %728 : vector<2x32xf32>
    %730 = arith.mulf %721, %676 : vector<2x32xf32>
    %731 = arith.mulf %715, %723 : vector<2x32xf32>
    %732 = arith.addf %730, %731 : vector<2x32xf32>
    %733 = math.tanh %732 : vector<2x32xf32>
    %734 = arith.mulf %729, %733 : vector<2x32xf32>
    "tpu.trace_start"() <{level = 10 : i32, message = "bh,nh->bn"}> : () -> ()
    %cst_106 = arith.constant dense<0.000000e+00> : vector<2x12xf32>
    %735 = tpu.matmul %734, %639, %cst_106 {dimension_numbers = #tpu.dot_dimension_numbers<[1], [1], [0], [0], [0, 0, 1, 0], [], []>} : vector<2x32xf32>, vector<12x32xf32>, vector<2x12xf32> -> vector<2x12xf32>
    %cst_107 = arith.constant 0.000000e+00 : f32
    "tpu.trace_stop"() : () -> ()
    %736 = vector.broadcast %cst_107 : f32 to vector<2x12xf32>
    %737 = arith.cmpf ogt, %4, %736 : vector<2x12xf32>
    %cst_108 = arith.constant -1.000000e+30 : f32
    %738 = vector.broadcast %cst_108 : f32 to vector<2x12xf32>
    %739 = arith.select %737, %735, %738 : vector<2x12xi1>, vector<2x12xf32>
    %cst_109 = arith.constant dense<0xFF800000> : vector<2xf32>
    %740 = vector.multi_reduction <maximumf>, %739, %cst_109 [1] : vector<2x12xf32> to vector<2xf32>
    %741 = vector.shape_cast %740 : vector<2xf32> to vector<2x1xf32>
    %cst_110 = arith.constant 0.000000e+00 : f32
    %742 = vector.broadcast %cst_110 : f32 to vector<2x12xf32>
    %743 = arith.cmpf ogt, %4, %742 : vector<2x12xf32>
    %744 = vector.broadcast %741 : vector<2x1xf32> to vector<2x12xf32>
    %745 = arith.subf %739, %744 : vector<2x12xf32>
    %746 = math.exp %745 : vector<2x12xf32>
    %cst_111 = arith.constant 0.000000e+00 : f32
    %747 = vector.broadcast %cst_111 : f32 to vector<2x12xf32>
    %748 = arith.select %743, %746, %747 : vector<2x12xi1>, vector<2x12xf32>
    %cst_112 = arith.constant dense<0.000000e+00> : vector<2xf32>
    %749 = vector.multi_reduction <add>, %748, %cst_112 [1] : vector<2x12xf32> to vector<2xf32>
    %750 = vector.shape_cast %749 : vector<2xf32> to vector<2x1xf32>
    %751 = vector.broadcast %750 : vector<2x1xf32> to vector<2x12xf32>
    %752 = arith.divf %748, %751 : vector<2x12xf32>
    %cst_113 = arith.constant dense<0.000000e+00> : vector<2x32xf32>
    %753 = tpu.matmul %752, %639, %cst_113 {dimension_numbers = #tpu.dot_dimension_numbers<[1], [0], [0], [1], [0, 0, 1, 1], [], []>} : vector<2x12xf32>, vector<12x32xf32>, vector<2x32xf32> -> vector<2x32xf32>
    %754 = tpu.concatenate %734, %753 in 1 : vector<2x32xf32>, vector<2x32xf32> -> vector<2x64xf32>
    %c0_114 = arith.constant 0 : index
    %c0_115 = arith.constant 0 : index
    %755 = vector.load %arg18[%c0_114, %c0_115] : memref<64x128xf32, #tpu.memory_space<vmem>>, vector<64x128xf32>
    %cst_116 = arith.constant dense<0.000000e+00> : vector<2x128xf32>
    %756 = tpu.matmul %754, %755, %cst_116 {dimension_numbers = #tpu.dot_dimension_numbers<[1], [0], [0], [1], [0, 0, 1, 1], [], []>} : vector<2x64xf32>, vector<64x128xf32>, vector<2x128xf32> -> vector<2x128xf32>
    %c0_117 = arith.constant 0 : index
    %c0_118 = arith.constant 0 : index
    %757 = vector.load %arg20[%c0_117, %c0_118] : memref<1x128xf32, #tpu.memory_space<vmem>>, vector<1x128xf32>
    %758 = vector.broadcast %757 : vector<1x128xf32> to vector<2x128xf32>
    %759 = arith.addf %756, %758 : vector<2x128xf32>
    %c0_119 = arith.constant 0 : index
    %c0_120 = arith.constant 0 : index
    %760 = vector.load %arg19[%c0_119, %c0_120] : memref<32x128xf32, #tpu.memory_space<vmem>>, vector<32x128xf32>
    %cst_121 = arith.constant dense<0.000000e+00> : vector<2x128xf32>
    %761 = tpu.matmul %734, %760, %cst_121 {dimension_numbers = #tpu.dot_dimension_numbers<[1], [0], [0], [1], [0, 0, 1, 1], [], []>} : vector<2x32xf32>, vector<32x128xf32>, vector<2x128xf32> -> vector<2x128xf32>
    %762 = arith.addf %759, %761 : vector<2x128xf32>
    %c0_122 = arith.constant 0 : index
    %c0_123 = arith.constant 0 : index
    %763 = vector.load %arg21[%c0_122, %c0_123] : memref<1x128xf32, #tpu.memory_space<vmem>>, vector<1x128xf32>
    %764 = vector.broadcast %763 : vector<1x128xf32> to vector<2x128xf32>
    %765 = arith.addf %762, %764 : vector<2x128xf32>
    %766 = vector.extract_strided_slice %765 {offsets = [0, 0], sizes = [2, 32], strides = [1, 1]} : vector<2x128xf32> to vector<2x32xf32>
    %767 = arith.negf %766 : vector<2x32xf32>
    %768 = math.exp %767 : vector<2x32xf32>
    %cst_124 = arith.constant 1.000000e+00 : f32
    %769 = vector.broadcast %cst_124 : f32 to vector<2x32xf32>
    %770 = arith.addf %769, %768 : vector<2x32xf32>
    %771 = arith.divf %769, %770 : vector<2x32xf32>
    %772 = vector.extract_strided_slice %765 {offsets = [0, 32], sizes = [2, 32], strides = [1, 1]} : vector<2x128xf32> to vector<2x32xf32>
    %773 = arith.negf %772 : vector<2x32xf32>
    %774 = math.exp %773 : vector<2x32xf32>
    %cst_125 = arith.constant 1.000000e+00 : f32
    %775 = vector.broadcast %cst_125 : f32 to vector<2x32xf32>
    %776 = arith.addf %775, %774 : vector<2x32xf32>
    %777 = arith.divf %775, %776 : vector<2x32xf32>
    %778 = vector.extract_strided_slice %765 {offsets = [0, 64], sizes = [2, 32], strides = [1, 1]} : vector<2x128xf32> to vector<2x32xf32>
    %779 = math.tanh %778 : vector<2x32xf32>
    %780 = vector.extract_strided_slice %765 {offsets = [0, 96], sizes = [2, 32], strides = [1, 1]} : vector<2x128xf32> to vector<2x32xf32>
    %781 = arith.negf %780 : vector<2x32xf32>
    %782 = math.exp %781 : vector<2x32xf32>
    %cst_126 = arith.constant 1.000000e+00 : f32
    %783 = vector.broadcast %cst_126 : f32 to vector<2x32xf32>
    %784 = arith.addf %783, %782 : vector<2x32xf32>
    %785 = arith.divf %783, %784 : vector<2x32xf32>
    %786 = arith.mulf %777, %732 : vector<2x32xf32>
    %787 = arith.mulf %771, %779 : vector<2x32xf32>
    %788 = arith.addf %786, %787 : vector<2x32xf32>
    %789 = math.tanh %788 : vector<2x32xf32>
    %790 = arith.mulf %785, %789 : vector<2x32xf32>
    "tpu.trace_start"() <{level = 10 : i32, message = "bh,nh->bn"}> : () -> ()
    %cst_127 = arith.constant dense<0.000000e+00> : vector<2x12xf32>
    %791 = tpu.matmul %790, %639, %cst_127 {dimension_numbers = #tpu.dot_dimension_numbers<[1], [1], [0], [0], [0, 0, 1, 0], [], []>} : vector<2x32xf32>, vector<12x32xf32>, vector<2x12xf32> -> vector<2x12xf32>
    %cst_128 = arith.constant 0.000000e+00 : f32
    "tpu.trace_stop"() : () -> ()
    %792 = vector.broadcast %cst_128 : f32 to vector<2x12xf32>
    %793 = arith.cmpf ogt, %4, %792 : vector<2x12xf32>
    %cst_129 = arith.constant -1.000000e+30 : f32
    %794 = vector.broadcast %cst_129 : f32 to vector<2x12xf32>
    %795 = arith.select %793, %791, %794 : vector<2x12xi1>, vector<2x12xf32>
    %cst_130 = arith.constant dense<0xFF800000> : vector<2xf32>
    %796 = vector.multi_reduction <maximumf>, %795, %cst_130 [1] : vector<2x12xf32> to vector<2xf32>
    %797 = vector.shape_cast %796 : vector<2xf32> to vector<2x1xf32>
    %cst_131 = arith.constant 0.000000e+00 : f32
    %798 = vector.broadcast %cst_131 : f32 to vector<2x12xf32>
    %799 = arith.cmpf ogt, %4, %798 : vector<2x12xf32>
    %800 = vector.broadcast %797 : vector<2x1xf32> to vector<2x12xf32>
    %801 = arith.subf %795, %800 : vector<2x12xf32>
    %802 = math.exp %801 : vector<2x12xf32>
    %cst_132 = arith.constant 0.000000e+00 : f32
    %803 = vector.broadcast %cst_132 : f32 to vector<2x12xf32>
    %804 = arith.select %799, %802, %803 : vector<2x12xi1>, vector<2x12xf32>
    %cst_133 = arith.constant dense<0.000000e+00> : vector<2xf32>
    %805 = vector.multi_reduction <add>, %804, %cst_133 [1] : vector<2x12xf32> to vector<2xf32>
    %806 = vector.shape_cast %805 : vector<2xf32> to vector<2x1xf32>
    %807 = vector.broadcast %806 : vector<2x1xf32> to vector<2x12xf32>
    %808 = arith.divf %804, %807 : vector<2x12xf32>
    %cst_134 = arith.constant dense<0.000000e+00> : vector<2x32xf32>
    %809 = tpu.matmul %808, %639, %cst_134 {dimension_numbers = #tpu.dot_dimension_numbers<[1], [0], [0], [1], [0, 0, 1, 1], [], []>} : vector<2x12xf32>, vector<12x32xf32>, vector<2x32xf32> -> vector<2x32xf32>
    %810 = tpu.concatenate %790, %809 in 1 : vector<2x32xf32>, vector<2x32xf32> -> vector<2x64xf32>
    %c0_135 = arith.constant 0 : index
    %c0_136 = arith.constant 0 : index
    %811 = vector.load %arg22[%c0_135, %c0_136] : memref<64x16xf32, #tpu.memory_space<vmem>>, vector<64x16xf32>
    %cst_137 = arith.constant dense<0.000000e+00> : vector<2x16xf32>
    %812 = tpu.matmul %810, %811, %cst_137 {dimension_numbers = #tpu.dot_dimension_numbers<[1], [0], [0], [1], [0, 0, 1, 1], [], []>} : vector<2x64xf32>, vector<64x16xf32>, vector<2x16xf32> -> vector<2x16xf32>
    %c0_138 = arith.constant 0 : index
    %c0_139 = arith.constant 0 : index
    %813 = vector.load %arg23[%c0_138, %c0_139] : memref<1x16xf32, #tpu.memory_space<vmem>>, vector<1x16xf32>
    %814 = vector.broadcast %813 : vector<1x16xf32> to vector<2x16xf32>
    %815 = arith.addf %812, %814 : vector<2x16xf32>
    %cst_140 = arith.constant 0.000000e+00 : f32
    %816 = vector.broadcast %cst_140 : f32 to vector<2x16xf32>
    %817 = arith.maximumf %815, %816 : vector<2x16xf32>
    %c0_141 = arith.constant 0 : index
    %c0_142 = arith.constant 0 : index
    %818 = vector.load %arg24[%c0_141, %c0_142] : memref<2x16xf32, #tpu.memory_space<vmem>>, vector<2x16xf32>
    tpu.vector_store %arg24[%c0_141, %c0_142], %817 {strides = array<i32>} : memref<2x16xf32, #tpu.memory_space<vmem>>, vector<2x16xf32>,
    return
  }
}

</mosaic_0001>

<bundles_post_ra>
// kernel: mpnn_forward.1
= control target key start
LH: loop header
LB: loop body
LE: loop exit
PB: predicated region body
PF: predicated region fallthrough
CT: control target
= control target key end

     0   :  { %s8185_s0 = inlined_call_operand.vmem [shape: f32[12,8], index: 0, kind: input, shape index: {}]   ;;  %s8186_s1 = inlined_call_operand.vmem [shape: f32[24,6], index: 1, kind: input, shape index: {}]   ;;  %s8187_s2 = inlined_call_operand.vmem [shape: f32[24,12], index: 2, kind: input, shape index: {}]   ;;  %s8188_s3 = inlined_call_operand.vmem [shape: f32[12,24], index: 3, kind: input, shape index: {}]   ;;  %s8189_s4 = inlined_call_operand.vmem [shape: f32[12,1], index: 4, kind: input, shape index: {}]   ;;  %s8190_s5 = inlined_call_operand.vmem [shape: f32[2,12], index: 5, kind: input, shape index: {}]   ;;  %s8191_s6 = inlined_call_operand.vmem [shape: f32[8,32], index: 6, kind: input, shape index: {}]   ;;  %s8192_s7 = inlined_call_operand.vmem [shape: f32[1,32], index: 7, kind: input, shape index: {}]   ;;  %s8193_s8 = inlined_call_operand.hbm [shape: f32[6,64], index: 8, kind: input, shape index: {}]   ;;  %s8194_s9 = inlined_call_operand.hbm [shape: f32[1,64], index: 9, kind: input, shape index: {}]   ;;  %s8195_s10 = inlined_call_operand.hbm [shape: f32[64,1024], index: 10, kind: input, shape index: {}]   ;;  %s8196_s11 = inlined_call_operand.hbm [shape: f32[1,1024], index: 11, kind: input, shape index: {}]   ;;  %s8197_s12 = inlined_call_operand.vmem [shape: f32[32,32], index: 12, kind: input, shape index: {}]   ;;  %s8198_s13 = inlined_call_operand.hbm [shape: f32[1,32], index: 13, kind: input, shape index: {}]   ;;  %s8199_s14 = inlined_call_operand.vmem [shape: f32[32,96], index: 14, kind: input, shape index: {}]   ;;  %s8200_s15 = inlined_call_operand.hbm [shape: f32[32,96], index: 15, kind: input, shape index: {}]   ;;  %s8201_s16 = inlined_call_operand.vmem [shape: f32[1,96], index: 16, kind: input, shape index: {}]   ;;  %s8202_s17 = inlined_call_operand.vmem [shape: f32[1,96], index: 17, kind: input, shape index: {}]   ;;  %s8203_s18 = inlined_call_operand.vmem [shape: f32[64,128], index: 18, kind: input, shape index: {}]   ;;  %s8204_s19 = inlined_call_operand.hbm [shape: f32[32,128], index: 19, kind: input, shape index: {}]   ;;  %s8205_s20 = inlined_call_operand.vmem [shape: f32[1,128], index: 20, kind: input, shape index: {}]   ;;  %s8206_s21 = inlined_call_operand.vmem [shape: f32[1,128], index: 21, kind: input, shape index: {}]   ;;  %s8207_s22 = inlined_call_operand.vmem [shape: f32[64,16], index: 22, kind: input, shape index: {}]   ;;  %s8208_s23 = inlined_call_operand.hbm [shape: f32[1,16], index: 23, kind: input, shape index: {}]   ;;  %s8209_s24 = inlined_call_operand.hbm [shape: f32[2,16], index: 24, kind: output, shape index: {}]  }
   0x1   :  { %8401 = sst [smem:[#allocation73_spill]] %s8185_s0 }
   0x2   :  { %8402 = sst [smem:[#allocation74_spill]] %s8186_s1 }
   0x3   :  { %8403 = sst [smem:[#allocation75_spill]] %s8187_s2 }
   0x4   :  { %8404 = sst [smem:[#allocation76_spill]] %s8188_s3 }
   0x5   :  { %8405 = sst [smem:[#allocation77_spill]] %s8189_s4 }
   0x6   :  { %8406 = sst [smem:[#allocation78_spill]] %s8190_s5 }
   0x7   :  { %8407 = sst [smem:[#allocation79_spill]] %s8191_s6 }
   0x8   :  { %8408 = sst [smem:[#allocation80_spill]] %s8192_s7 }
   0x9   :  { %8409 = sst [smem:[#allocation81_spill]] %s8193_s8 }
   0xa   :  { %29 = vsyncpa [#allocation3], 0 }
   0xb   :  { %30 = vsyncpa [#allocation6], 0 }
   0xc   :  { %31 = vsyncpa [#allocation9], 0 }
   0xd   :  { %32 = vsyncpa [#allocation12], 0 }
   0xe   :  { %33 = vsyncpa [#allocation15], 0  ;;  %s67_s27 = sshll.u32 %s8194_s9, 4  ;;  %s68_s27 = int_to_ptr.hbm [resolvable:$true] %s67_s27 }
   0xf   :  { %34 = vsyncpa [#allocation4], 0  ;;  %s5312_s28 = smov [#allocation5]   ;;  %s91_s0 = sshll.u32 %s8196_s11, 4  ;;  %s92_s0 = int_to_ptr.hbm [resolvable:$true] %s91_s0 }
  0x10   :  { %s69_s6 = sshll.u32 %s5312_s28, 4  ;;  %s5313_s7 = smov [#allocation8]   ;;  %s70_s6 = int_to_ptr.vmem [resolvable:$true] %s69_s6 }
  0x11   :  { %72 = dma.hbm_to_vmem [thread:$0]  %s68_s27, 16, %s70_s6, [#allocation6]  }
  0x12   :  { %s93_s30 = sshll.u32 %s5313_s7, 4  ;;  %s116_s8 = sshll.u32 %s8200_s15, 4  ;;  %s94_s30 = int_to_ptr.vmem [resolvable:$true] %s93_s30  ;;  %s117_s8 = int_to_ptr.hbm [resolvable:$true] %s116_s8 }
  0x13   :  { %96 = dma.hbm_to_vmem [thread:$0]  %s92_s0, 128, %s94_s30, [#allocation9]  }
  0x14   :  { %s5314_s9 = smov [#allocation11]   ;;  %s8410_s26 = sld [smem:[#allocation81_spill]] }
  0x15   :  { %s118_s4 = sshll.u32 %s5314_s9, 4  ;;  %s5315_s2 = smov 128   ;;  %s119_s4 = int_to_ptr.vmem [resolvable:$true] %s118_s4 }
  0x16   :  { %s5316_s11 = smov 8   ;;  %s5317_s27 = smov [#allocation2]  }
  0x17   :  { %124 = dma.hbm_to_vmem [thread:$0]  %s117_s8, 512, %s119_s4, [#allocation12], %s5315_s2, %s5315_s2, %s5316_s11  }
  0x18   :  { %s58_s6 = sshll.u32 %s5317_s27, 4  ;;  %s77_s0 = sshll.u32 %s8195_s10, 4  ;;  %s59_s6 = int_to_ptr.vmem [resolvable:$true] %s58_s6  ;;  %s78_s0 = int_to_ptr.hbm [resolvable:$true] %s77_s0 }
  0x19   :  { %s5318_s7 = smov [#allocation7]   ;;  %s104_s9 = sshll.u32 %s8198_s13, 4  ;;  %s105_s9 = int_to_ptr.hbm [resolvable:$true] %s104_s9 }
  0x1a   :  { %s56_s28 = sshll.u32 %s8410_s26, 4  ;;  %s79_s30 = sshll.u32 %s5318_s7, 4  ;;  %s57_s28 = int_to_ptr.hbm [resolvable:$true] %s56_s28  ;;  %s80_s30 = int_to_ptr.vmem [resolvable:$true] %s79_s30 }
  0x1b   :  { %61 = dma.hbm_to_vmem [thread:$0]  %s57_s28, 128, %s59_s6, [#allocation3]  }
  0x1c   :  { %s5319_s1 = smov 1024   ;;  %s5320_s5 = smov 64  }
  0x1d   :  { %85 = dma.hbm_to_vmem [thread:$0]  %s78_s0, 8192, %s80_s30, [#allocation6], %s5319_s1, %s5319_s1, %s5320_s5  }
  0x1e   :  { %s5321_s8 = smov [#allocation10]   ;;  %s135_s10 = sshll.u32 %s8204_s19, 4  ;;  %s136_s10 = int_to_ptr.hbm [resolvable:$true] %s135_s10 }
  0x1f   :  { %s106_s4 = sshll.u32 %s5321_s8, 4  ;;  %s155_s15 = sshll.u32 %s8208_s23, 4  ;;  %s107_s4 = int_to_ptr.vmem [resolvable:$true] %s106_s4  ;;  %s156_s15 = int_to_ptr.hbm [resolvable:$true] %s155_s15 }
  0x20   :  { %109 = dma.hbm_to_vmem [thread:$0]  %s105_s9, 16, %s107_s4, [#allocation9]  }
  0x21   :  { %s5322_s29 = smov [#allocation13]   ;;  %s5323_s0 = smov [#allocation14]  }
  0x22   :  { %s137_s13 = sshll.u32 %s5322_s29, 4  ;;  %s157_s7 = sshll.u32 %s5323_s0, 4  ;;  %s138_s13 = int_to_ptr.vmem [resolvable:$true] %s137_s13  ;;  %s158_s7 = int_to_ptr.vmem [resolvable:$true] %s157_s7 }
  0x23   :  { %143 = dma.hbm_to_vmem [thread:$0]  %s136_s10, 512, %s138_s13, [#allocation12], %s5315_s2, %s5315_s2, %s5316_s11  }
  0x24   :  { %160 = dma.hbm_to_vmem [thread:$0]  %s156_s15, 16, %s158_s7, [#allocation15]  }
  0x25   :  { %5300 = dma.done.wait [#allocation3], 128  }
  0x26   :  { %5301 = vsyncadd [#allocation3], 4294967168 }
  0x27   :  { %5302 = dma.done.wait [#allocation6], 8208  }
  0x28   :  { %5303 = vsyncadd [#allocation6], 4294959088 }
  0x29   :  { %5304 = dma.done.wait [#allocation9], 144  }
  0x2a   :  { %5305 = vsyncadd [#allocation9], 4294967152 }
  0x2b   :  { %5306 = dma.done.wait [#allocation12], 1024  }
  0x2c   :  { %5307 = vsyncadd [#allocation12], 4294966272 }
  0x2d   :  { %5308 = dma.done.wait [#allocation15], 16  }
  0x2e   :  { %5309 = vsyncadd [#allocation15], 4294967280  ;;  %vm258_vm0 = vcmask 1045504   ;;  %vm248_vm1 = vcmask 48128   ;;  %v243_v0 = vld [vmem:[#allocation2] sm:$0x3f] }
  0x2f   :  { %s8411_s2 = sld [smem:[#allocation74_spill]]  ;;  %4539 = vmatpush.msk.msra.mxu1 %vm258_vm0, %v243_v0  ;;  %4632 = vmatpush.msk.msra.mxu2 %vm258_vm0, %v243_v0  ;;  %vm208_vm2 = vcmask 64512   ;;  %v347_v5 = vld [vmem:[#allocation7 + $0x1c0] sm:$0xff]  ;;  %v348_v6 = vld [vmem:[#allocation7 + $0x1c8] sm:$0xff]  ;;  %v349_v7 = vld [vmem:[#allocation7 + $0x1d0] sm:$0xff]  ;;  %vm373_vm3 = vcmask 523264  }
  0x30   :  { %s8412_s9 = sld [smem:[#allocation79_spill]]  ;;  %v350_v8 = vld [vmem:[#allocation7 + $0x1d8] sm:$0xff]  ;;  %v339_v9 = vld [vmem:[#allocation7 + $0x180] sm:$0xff]  ;;  %417 = vmatpush.msra.mxu3 %v348_v6  ;;  %v340_v10 = vld [vmem:[#allocation7 + $0x188] sm:$0xff]  ;;  %vm616_vm4 = vcmask 1043456   ;;  %vm606_vm5 = vcmask 97280  }
  0x31   :  { %s8413_s4 = sld [smem:[#allocation73_spill]]  ;;  %391 = vmatpush.msrb.mxu2 %v347_v5  ;;  %v341_v11 = vld [vmem:[#allocation7 + $0x190] sm:$0xff]  ;;  %v342_v12 = vld [vmem:[#allocation7 + $0x198] sm:$0xff]  ;;  %469 = vmatpush.msrb.mxu1 %v350_v8  ;;  %v331_v13 = vld [vmem:[#allocation7 + $0x140] sm:$0xff]  ;;  %vm1555_vm6 = vcmask 261120   ;;  %s5353_s27 = smov 32  }
  0x32   :  { %v332_v14 = vld [vmem:[#allocation7 + $0x148] sm:$0xff]  ;;  %418 = vmatpush.msra.mxu3 %v340_v10  ;;  %v333_v16 = vld [vmem:[#allocation7 + $0x150] sm:$0xff]  ;;  %v334_v17 = vld [vmem:[#allocation7 + $0x158] sm:$0xff]  ;;  %s8414_s29 = sld [smem:[#allocation80_spill]]  ;;  %s5356_s10 = smov 96   ;;  %vm1513_vm7 = vcmask 195584  }
  0x33   :  { %392 = vmatpush.msrb.mxu2 %v339_v9  ;;  %470 = vmatpush.msrb.mxu1 %v342_v12  ;;  %v323_v19 = vld [vmem:[#allocation7 + $0x100] sm:$0xff]  ;;  %v324_v20 = vld [vmem:[#allocation7 + $0x108] sm:$0xff]  ;;  %v325_v21 = vld [vmem:[#allocation7 + $0x110] sm:$0xff]  ;;  %s8464_s15 = sld [smem:[#allocation77_spill]]  ;;  %s4523_s0 = sshll.u32 %s8209_s24, 4  ;;  %s4524_s0 = int_to_ptr.hbm [resolvable:$true] %s4523_s0 }
  0x34   :  { %419 = vmatpush.msra.mxu3 %v332_v14  ;;  %v326_v22 = vld [vmem:[#allocation7 + $0x118] sm:$0xff]  ;;  %v315_v23 = vld [vmem:[#allocation7 + $0xc0] sm:$0xff]  ;;  %v316_v24 = vld [vmem:[#allocation7 + $0xc8] sm:$0xff]  ;;  %s8523_s19 = sld [smem:[#allocation76_spill]] }
  0x35   :  { %v240_v1 = vld [vmem:[%s8411_s2] sm:$0xff]  ;;  %v242_v2 = vld [vmem:[%s8411_s2 + $0x10] sm:$0xff]  ;;  %v241_v15 = vld [vmem:[%s8411_s2 + $0x8] sm:$0xff]  ;;  %393 = vmatpush.msrb.mxu2 %v331_v13  ;;  %471 = vmatpush.msrb.mxu1 %v334_v17 }
  0x36   :  { %v203_v3 = vld [vmem:[%s8412_s9] sm:$0xff]  ;;  %4540 = vmatmul.msk.f32.vlgmr.msra.gmra.mxu1 %vm248_vm1, %v240_v1  ;;  %4542 = vmatmul.msk.f32.vlgmr.msra.gmra.mxu2 %vm248_vm1, %v242_v2  ;;  %v307_v27 = vld [vmem:[#allocation7 + $0x80] sm:$0xff]  ;;  %v308_v28 = vld [vmem:[#allocation7 + $0x88] sm:$0xff]  ;;  %s8417_s9 = sld [smem:[#allocation75_spill]] }
  0x37   :  { %v193_v4 = vld [vmem:[%s8413_s4] sm:$0xff]  ;;  %230 = vmatpush.msra.mxu0 %v203_v3  ;;  %v194_v18 = vld [vmem:[%s8413_s4 + $0x8] sm:$0xf]  ;;  %394 = vmatpush.msrb.mxu2 %v323_v19  ;;  %v300_v32 = vld [vmem:[#allocation7 + $0x48] sm:$0xff] }
  0x38   :  { %4537 = vmatmul.msk.f32.vlgmr.msra.gmra.mxu0 %vm208_vm2, %v193_v4  ;;  %v317_v25 = vld [vmem:[#allocation7 + $0xd0] sm:$0xff]  ;;  %v318_v26 = vld [vmem:[#allocation7 + $0xd8] sm:$0xff]  ;;  %420 = vmatpush.msra.mxu3 %v324_v20  ;;  %v299_v31 = vld [vmem:[#allocation7 + $0x40] sm:$0xff] }
  0x39   :  { %443 = vmatpush.msrb.mxu0 %v349_v7  ;;  %472 = vmatpush.msrb.mxu1 %v326_v22  ;;  %v309_v29 = vld [vmem:[#allocation7 + $0x90] sm:$0xff]  ;;  %v310_v30 = vld [vmem:[#allocation7 + $0x98] sm:$0xff]  ;;  %v291_v35 = vld [vmem:[#allocation7] sm:$0xff] }
  0x3a   :  { %395 = vmatpush.msrb.mxu2 %v315_v23  ;;  %421 = vmatpush.msra.mxu3 %v316_v24  ;;  %v301_v33 = vld [vmem:[#allocation7 + $0x50] sm:$0xff]  ;;  %v302_v34 = vld [vmem:[#allocation7 + $0x58] sm:$0xff]  ;;  %v292_v36 = vld [vmem:[#allocation7 + $0x8] sm:$0xff] }
  0x3b   :  { %444 = vmatpush.msrb.mxu0 %v341_v11  ;;  %473 = vmatpush.msrb.mxu1 %v318_v26  ;;  %v293_v37 = vld [vmem:[#allocation7 + $0x10] sm:$0xff]  ;;  %v294_v38 = vld [vmem:[#allocation7 + $0x18] sm:$0xff]  ;;  %v351_v39 = vld [vmem:[#allocation7 + $0x1e0] sm:$0xff] }
  0x3c   :  { %396 = vmatpush.msrb.mxu2 %v307_v27  ;;  %422 = vmatpush.msra.mxu3 %v308_v28  ;;  %v352_v40 = vld [vmem:[#allocation7 + $0x1e8] sm:$0xff]  ;;  %v353_v41 = vld [vmem:[#allocation7 + $0x1f0] sm:$0xff]  ;;  %v354_v42 = vld [vmem:[#allocation7 + $0x1f8] sm:$0xff] }
  0x3d   :  { %445 = vmatpush.msrb.mxu0 %v333_v16  ;;  %474 = vmatpush.msrb.mxu1 %v310_v30  ;;  %v343_v43 = vld [vmem:[#allocation7 + $0x1a0] sm:$0xff]  ;;  %v344_v44 = vld [vmem:[#allocation7 + $0x1a8] sm:$0xff]  ;;  %v345_v45 = vld [vmem:[#allocation7 + $0x1b0] sm:$0xff] }
  0x3e   :  { %4541 = vmatmul.msk.f32.gmra.mxu1 %vm248_vm1, %v241_v15  ;;  %397 = vmatpush.msrb.mxu2 %v299_v31  ;;  %v346_v46 = vld [vmem:[#allocation7 + $0x1b8] sm:$0xff]  ;;  %v335_v47 = vld [vmem:[#allocation7 + $0x160] sm:$0xff]  ;;  %v336_v48 = vld [vmem:[#allocation7 + $0x168] sm:$0xff] }
  0x3f   :  { %446 = vmatpush.msrb.mxu0 %v325_v21  ;;  %423 = vmatpush.msra.mxu3 %v300_v32  ;;  %v337_v49 = vld [vmem:[#allocation7 + $0x170] sm:$0xff]  ;;  %v338_v50 = vld [vmem:[#allocation7 + $0x178] sm:$0xff]  ;;  %v327_v51 = vld [vmem:[#allocation7 + $0x120] sm:$0xff] }
  0x40   :  { %4538 = vmatmul.msk.f32.gmra.mxu0 %vm208_vm2, %v194_v18  ;;  %475 = vmatpush.msrb.mxu1 %v302_v34  ;;  %v328_v52 = vld [vmem:[#allocation7 + $0x128] sm:$0xff]  ;;  %v329_v53 = vld [vmem:[#allocation7 + $0x130] sm:$0xff]  ;;  %v330_v54 = vld [vmem:[#allocation7 + $0x138] sm:$0xff] }
  0x41   :  { %447 = vmatpush.msrb.mxu0 %v317_v25  ;;  %398 = vmatpush.msrb.mxu2 %v291_v35  ;;  %v319_v55 = vld [vmem:[#allocation7 + $0xe0] sm:$0xff]  ;;  %v320_v56 = vld [vmem:[#allocation7 + $0xe8] sm:$0xff]  ;;  %v321_v57 = vld [vmem:[#allocation7 + $0xf0] sm:$0xff] }
  0x42   :  { %424 = vmatpush.msra.mxu3 %v292_v36  ;;  %476 = vmatpush.msrb.mxu1 %v294_v38  ;;  %v322_v58 = vld [vmem:[#allocation7 + $0xf8] sm:$0xff]  ;;  %v311_v59 = vld [vmem:[#allocation7 + $0xa0] sm:$0xff]  ;;  %v312_v60 = vld [vmem:[#allocation7 + $0xa8] sm:$0xff] }
  0x43   :  { %448 = vmatpush.msrb.mxu0 %v309_v29  ;;  %495 = vmatpush.msra.mxu2 %v351_v39  ;;  %v313_v61 = vld [vmem:[#allocation7 + $0xb0] sm:$0xff]  ;;  %v314_v62 = vld [vmem:[#allocation7 + $0xb8] sm:$0xff]  ;;  %v303_v63 = vld [vmem:[#allocation7 + $0x60] sm:$0xff] }
  0x44   :  { %521 = vmatpush.msrb.mxu3 %v352_v40  ;;  %573 = vmatpush.msra.mxu1 %v354_v42  ;;  %v304_v0 = vld [vmem:[#allocation7 + $0x68] sm:$0xff]  ;;  %v305_v1 = vld [vmem:[#allocation7 + $0x70] sm:$0xff]  ;;  %v306_v2 = vld [vmem:[#allocation7 + $0x78] sm:$0xff] }
  0x45   :  { %449 = vmatpush.msrb.mxu0 %v301_v33  ;;  %496 = vmatpush.msra.mxu2 %v343_v43  ;;  %v295_v3 = vld [vmem:[#allocation7 + $0x20] sm:$0xff]  ;;  %v296_v4 = vld [vmem:[#allocation7 + $0x28] sm:$0xff]  ;;  %v297_v5 = vld [vmem:[#allocation7 + $0x30] sm:$0xff] }
  0x46   :  { %522 = vmatpush.msrb.mxu3 %v344_v44  ;;  %574 = vmatpush.msra.mxu1 %v346_v46  ;;  %v298_v6 = vld [vmem:[#allocation7 + $0x38] sm:$0xff]  ;;  %v4969_v12 = vld [vmem:[%s8414_s29] ss:$0 sm:$0xff]  ;;  %v594_v23 = vld [vmem:[%s8197_s12 + $0x18] sm:$0xff] }
  0x47   :  { %450 = vmatpush.msrb.mxu0 %v293_v37  ;;  %497 = vmatpush.msra.mxu2 %v335_v47  ;;  %v4968_v7 = vld [vmem:[#allocation5] ss:$0 sm:$0xff]  ;;  %v593_v24 = vld [vmem:[%s8197_s12 + $0x10] sm:$0xff]  ;;  %v591_v27 = vld [vmem:[%s8197_s12] sm:$0xff] }
  0x48   :  { %523 = vmatpush.msrb.mxu3 %v336_v48  ;;  %575 = vmatpush.msra.mxu1 %v338_v50  ;;  %v592_v25 = vld [vmem:[%s8197_s12 + $0x8] sm:$0xff]  ;;  %v195_v28 = vld [vmem:[%s8417_s9] sm:$0xff]  ;;  %v8237_v48 = vmov 3   ;;  %v8217_v50 = vmov 1  }
  0x49   :  { %547 = vmatpush.msra.mxu0 %v353_v41  ;;  %498 = vmatpush.msra.mxu2 %v327_v51  ;;  %v196_v29 = vld [vmem:[%s8417_s9 + $0x8] sm:$0xff] }
  0x4a   :  { %524 = vmatpush.msrb.mxu3 %v328_v52  ;;  %576 = vmatpush.msra.mxu1 %v330_v54  ;;  %v5601_v32 = vld [vmem:[#allocation8] sm:$0xff] }
  0x4b   :  { %548 = vmatpush.msra.mxu0 %v345_v45  ;;  %499 = vmatpush.msra.mxu2 %v319_v55  ;;  %v5608_v35 = vperm.slane %v5601_v32, 2  ;;  %v5616_v39 = vperm.slane %v5601_v32, 0  ;;  %v5619_v40 = vperm.slane %v5601_v32, 1 }
  0x4c   :  { %525 = vmatpush.msrb.mxu3 %v320_v56  ;;  %577 = vmatpush.msra.mxu1 %v322_v58 }
  0x4d   :  { %549 = vmatpush.msra.mxu0 %v337_v49  ;;  %500 = vmatpush.msra.mxu2 %v311_v59  ;;  %v8257_v49 = vmov 2  }
  0x4e   :  { %526 = vmatpush.msrb.mxu3 %v312_v60  ;;  %578 = vmatpush.msra.mxu1 %v314_v62 }
  0x4f   :  { %550 = vmatpush.msra.mxu0 %v329_v53  ;;  %501 = vmatpush.msra.mxu2 %v303_v63  ;;  %v5636_v53 = vperm.slane %v5601_v32, 7 }
  0x50   :  { %527 = vmatpush.msrb.mxu3 %v304_v0  ;;  %579 = vmatpush.msra.mxu1 %v306_v2  ;;  %v8243_v2 = vmov 9  }
  0x51   :  { %551 = vmatpush.msra.mxu0 %v321_v57  ;;  %502 = vmatpush.msra.mxu2 %v295_v3  ;;  %v197_v57 = vld [vmem:[%s8417_s9 + $0x10] sm:$0xff]  ;;  %v8259_v3 = vmov 5  }
  0x52   :  { %528 = vmatpush.msrb.mxu3 %v296_v4  ;;  %580 = vmatpush.msra.mxu1 %v298_v6  ;;  %v8271_v4 = vmov 13   ;;  %v8265_v6 = vmov 7  }
  0x53   :  { %552 = vmatpush.msra.mxu0 %v313_v61  ;;  %4683 = vset.pattern.permute.xlu2 %v8237_v48  ;;  %v5656_v61 = vperm.slane %v5601_v32, 4 }
  0x54   :  { %4682 = vset.pattern.permute.xlu0 %v8257_v49  ;;  %4681 = vset.pattern.permute.xlu1 %v8217_v50 }
  0x55   :  { %553 = vmatpush.msra.mxu0 %v305_v1  ;;  %v8221_v1 = vmov 6  }
  0x57   :  { %554 = vmatpush.msra.mxu0 %v297_v5  ;;  %v8253_v5 = vmov 11  }
  0xb3   :  { %v279_v8 = vpop.f32.mrf.mxu1 }
  0xb4   :  { %v280_v9 = vadd.f32 %v4968_v7, %v279_v8  ;;  %v8263_v8 = vmov 22  }
  0xb5   :  { %v232_v10 = vpop.f32.mrf.mxu0 }
  0xb6   :  { %v288_v11 = vmax.f32 %v280_v9, 0.0  ;;  %v233_v15 = vadd.f32 %v4969_v12, %v232_v10  ;;  %v8247_v9 = vmov 10   ;;  %v8225_v10 = vmov 15  }
  0xb8   :  { %4543 = vmatmul.msk.f32.vlgmr.msrb.gmra.mxu2 %vm373_vm3, %v288_v11  ;;  %4546 = vmatmul.msk.f32.vlgmr.msra.gmra.mxu3 %vm373_vm3, %v288_v11  ;;  %v5548_v21 = vmax.f32 %v233_v15, 0.0  ;;  %v8255_v15 = vmov 18  }
  0xb9   :  { %4549 = vmatmul.msk.f32.vlgmr.msrb.gmra.mxu0 %vm373_vm3, %v288_v11  ;;  %4552 = vmatmul.msk.f32.vlgmr.msrb.gmra.mxu1 %vm373_vm3, %v288_v11  ;;  %v285_v16 = vpop.f32.mrf.mxu2 }
  0xba   :  { %v286_v20 = vadd.f32 %v4968_v7, %v285_v16  ;;  %8415 = vst [vmem:[#allocation23_spill] sm:$0xff] %v5548_v21  ;;  %1573 = vmatpush.msrb.mxu0 %v594_v23  ;;  %v8223_v16 = vmov 25   ;;  %v8219_v23 = vmov 26  }
  0xbb   :  { %v282_v13 = vpop.f32.mrf.mxu1 }
  0xbc   :  { %v283_v14 = vadd.f32 %v4968_v7, %v282_v13  ;;  %v290_v26 = vmax.f32 %v286_v20, 0.0  ;;  %1574 = vmatpush.msrb.mxu0 %v593_v24  ;;  %v8239_v7 = vmov 14   ;;  %v8231_v13 = vmov 19  }
  0xbd   :  { %v235_v17 = vpop.f32.mrf.mxu0  ;;  %v8269_v20 = vmov 4   ;;  %v8229_v24 = vmov 27  }
  0xbe   :  { %v289_v18 = vmax.f32 %v283_v14, 0.0  ;;  %v236_v19 = vadd.f32 %v4969_v12, %v235_v17  ;;  %1575 = vmatpush.msrb.mxu0 %v592_v25  ;;  %v8227_v12 = vmov 17   ;;  %v8251_v14 = vmov 12  }
  0xc0   :  { %4544 = vmatmul.msk.f32.gmra.mxu2 %vm373_vm3, %v289_v18  ;;  %4547 = vmatmul.msk.f32.gmra.mxu3 %vm373_vm3, %v289_v18  ;;  %v5550_v22 = vmax.f32 %v236_v19, 0.0  ;;  %v8249_v19 = vmov 29  }
  0xc1   :  { %4550 = vmatmul.msk.f32.gmra.mxu0 %vm373_vm3, %v289_v18  ;;  %4553 = vmatmul.msk.f32.gmra.mxu1 %vm373_vm3, %v289_v18 }
  0xc2   :  { %8416 = vst [vmem:[#allocation24_spill] sm:$0xff] %v5550_v22  ;;  %4567 = vmatpush.msk.msrb.mxu2 %vm616_vm4, %v5550_v22  ;;  %1576 = vmatpush.msrb.mxu0 %v591_v27 }
  0xc4   :  { %635 = vmatpush.msrb.mxu2 %v5548_v21 }
  0xc8   :  { %4545 = vmatmul.msk.f32.gmra.mxu2 %vm373_vm3, %v290_v26  ;;  %4548 = vmatmul.msk.f32.gmra.mxu3 %vm373_vm3, %v290_v26 }
  0xc9   :  { %4551 = vmatmul.msk.f32.gmra.mxu0 %vm373_vm3, %v290_v26  ;;  %4554 = vmatmul.msk.f32.gmra.mxu1 %vm373_vm3, %v290_v26 }
  0xd0   :  { %4555 = vmatmul.msk.f32.vlgmr.msra.gmra.mxu2 %vm373_vm3, %v288_v11  ;;  %4558 = vmatmul.msk.f32.vlgmr.msrb.gmra.mxu3 %vm373_vm3, %v288_v11 }
  0xd1   :  { %4561 = vmatmul.msk.f32.vlgmr.msra.gmra.mxu0 %vm373_vm3, %v288_v11  ;;  %4564 = vmatmul.msk.f32.vlgmr.msra.gmra.mxu1 %vm373_vm3, %v288_v11  ;;  %v8241_v11 = vmov 23  }
  0xd8   :  { %4556 = vmatmul.msk.f32.gmra.mxu2 %vm373_vm3, %v289_v18  ;;  %4559 = vmatmul.msk.f32.gmra.mxu3 %vm373_vm3, %v289_v18 }
  0xd9   :  { %4562 = vmatmul.msk.f32.gmra.mxu0 %vm373_vm3, %v289_v18  ;;  %4565 = vmatmul.msk.f32.gmra.mxu1 %vm373_vm3, %v289_v18  ;;  %v8235_v18 = vmov 21  }
  0xe0   :  { %4557 = vmatmul.msk.f32.gmra.mxu2 %vm373_vm3, %v290_v26  ;;  %4560 = vmatmul.msk.f32.gmra.mxu3 %vm373_vm3, %v290_v26 }
  0xe1   :  { %4563 = vmatmul.msk.f32.gmra.mxu0 %vm373_vm3, %v290_v26  ;;  %4566 = vmatmul.msk.f32.gmra.mxu1 %vm373_vm3, %v290_v26  ;;  %v8245_v26 = vmov 8  }
  0xe8   :  { %4568 = vmatmul.msk.f32.vlgmr.msrb.gmra.mxu2 %vm606_vm5, %v195_v28  ;;  %v8215_v28 = vmov 30  }
  0xe9   :  { %4573 = vmatmul.msk.f32.vlgmr.msrb.gmra.mxu0 %vm1555_vm6, %v5548_v21 }
  0xf0   :  { %4569 = vmatmul.msk.f32.gmra.mxu2 %vm606_vm5, %v196_v29 }
  0xf1   :  { %4574 = vmatmul.msk.f32.gmra.mxu0 %vm1555_vm6, %v5550_v22 }
  0xf8   :  { %4570 = vmatmul.msk.f32.gmra.mxu2 %vm606_vm5, %v197_v57 }
 0x136   :  { %v5597_v30 = vpop.f32.mrf.mxu0  ;;  %v5599_v31 = vpop.f32.mrf.mxu1 }
 0x13b   :  { %v5603_v33 = vpop.f32.mrf.mxu2  ;;  %v5605_v34 = vpop.f32.mrf.mxu3 }
 0x13e   :  { %v455_v36 = vpop.f32.mrf.mxu0  ;;  %v5610_v37 = vpop.f32.mrf.mxu1 }
 0x13f   :  { %v5613_v38 = vadd.f32 %v455_v36, %v5608_v35  ;;  %v8233_v36 = vmov 31  }
 0x141   :  { %8418 = vst [vmem:[#allocation25_spill] sm:$0xff] %v5613_v38 }
 0x143   :  { %v403_v41 = vpop.f32.mrf.mxu2  ;;  %v429_v42 = vpop.f32.mrf.mxu3 }
 0x144   :  { %v5622_v43 = vadd.f32 %v403_v41, %v5616_v39  ;;  %v5625_v44 = vadd.f32 %v429_v42, %v5619_v40 }
 0x146   :  { %8419 = vst [vmem:[#allocation26_spill] sm:$0xff] %v5622_v43  ;;  %v458_v45 = vpop.f32.mrf.mxu0  ;;  %v5627_v46 = vpop.f32.mrf.mxu1 }
 0x147   :  { %8420 = vst [vmem:[#allocation27_spill] sm:$0xff] %v5625_v44  ;;  %v5630_v47 = vadd.f32 %v458_v45, %v5608_v35 }
 0x149   :  { %8421 = vst [vmem:[#allocation28_spill] sm:$0xff] %v5630_v47  ;;  %v8449_v47 = vmov 27  }
 0x14b   :  { %v406_v51 = vpop.f32.mrf.mxu2  ;;  %v432_v52 = vpop.f32.mrf.mxu3 }
 0x14c   :  { %v5639_v54 = vadd.f32 %v406_v51, %v5616_v39  ;;  %v5642_v55 = vadd.f32 %v432_v52, %v5619_v40 }
 0x14e   :  { %8422 = vst [vmem:[#allocation29_spill] sm:$0xff] %v5639_v54  ;;  %v582_v56 = vpop.f32.mrf.mxu1 }
 0x14f   :  { %8423 = vst [vmem:[#allocation30_spill] sm:$0xff] %v5642_v55  ;;  %v5648_v58 = vadd.f32 %v582_v56, %v5636_v53 }
 0x151   :  { %8424 = vst [vmem:[#allocation31_spill] sm:$0xff] %v5648_v58  ;;  %v8442_v58 = vmov 20  }
 0x153   :  { %v5651_v59 = vpop.f32.mrf.mxu2 }
 0x15b   :  { %v5653_v60 = vpop.f32.mrf.mxu2 }
 0x163   :  { %v510_v62 = vpop.f32.mrf.mxu2 }
 0x164   :  { %v5659_v63 = vadd.f32 %v510_v62, %v5656_v61 }
 0x166   :  { %8425 = vst [vmem:[#allocation32_spill] sm:$0xff] %v5659_v63 }
 0x16b   :  { %v5661_v0 = vpop.f32.mrf.mxu2 }
 0x16c   :  { %728 = vperm.xlu2 %4683, %v5661_v0   ;;  %698 = vperm.xlu0 %4682, %v5661_v0  }
 0x16d   :  { %668 = vperm.xlu1 %4681, %v5661_v0  }
 0x173   :  { %v5697_v17 = vpop.f32.mrf.mxu2 }
 0x174   :  { %4685 = vset.pattern.permute.xlu2 %v8221_v1  ;;  %4687 = vset.pattern.permute.xlu0 %v8243_v2  ;;  %8426 = vst [vmem:[#allocation33_spill] sm:$0xff] %v5697_v17 }
 0x175   :  { %4684 = vset.pattern.permute.xlu1 %v8259_v3  ;;  %806 = vperm.xlu2 %4685, %v5661_v0  }
 0x176   :  { %884 = vperm.xlu0 %4687, %v5661_v0   ;;  %776 = vperm.xlu1 %4684, %v5661_v0  }
 0x17b   :  { %v5770_v57 = vpop.f32.mrf.mxu2 }
 0x17d   :  { %4690 = vset.pattern.permute.xlu2 %v8271_v4 }
 0x17e   :  { %4689 = vset.pattern.permute.xlu0 %v8253_v5  ;;  %4686 = vset.pattern.permute.xlu1 %v8265_v6 }
 0x17f   :  { %992 = vperm.xlu2 %4690, %v5661_v0   ;;  %944 = vperm.xlu0 %4689, %v5661_v0  }
 0x180   :  { %836 = vperm.xlu1 %4686, %v5661_v0  }
 0x187   :  { %4691 = vset.pattern.permute.xlu2 %v8239_v7  ;;  %4697 = vset.pattern.permute.xlu0 %v8263_v8 }
 0x188   :  { %4688 = vset.pattern.permute.xlu1 %v8247_v9  ;;  %1022 = vperm.xlu2 %4691, %v5661_v0  }
 0x189   :  { %1238 = vperm.xlu0 %4697, %v5661_v0   ;;  %914 = vperm.xlu1 %4688, %v5661_v0  }
 0x190   :  { %4692 = vset.pattern.permute.xlu2 %v8225_v10 }
 0x191   :  { %4698 = vset.pattern.permute.xlu0 %v8241_v11  ;;  %4693 = vset.pattern.permute.xlu1 %v8227_v12 }
 0x192   :  { %1052 = vperm.xlu2 %4692, %v5661_v0   ;;  %1268 = vperm.xlu0 %4698, %v5661_v0  }
 0x193   :  { %1100 = vperm.xlu1 %4693, %v5661_v0  }
 0x19a   :  { %4695 = vset.pattern.permute.xlu2 %v8231_v13  ;;  %4707 = vset.pattern.permute.xlu0 %v8251_v14 }
 0x19b   :  { %4694 = vset.pattern.permute.xlu1 %v8255_v15  ;;  %1160 = vperm.xlu2 %4695, %v5661_v0  }
 0x19c   :  { %974 = vperm.xlu0 %4707, %v5661_v0   ;;  %1130 = vperm.xlu1 %4694, %v5661_v0  }
 0x1a3   :  { %4700 = vset.pattern.permute.xlu2 %v8223_v16 }
 0x1a4   :  { %4708 = vset.pattern.permute.xlu0 %v8217_v50  ;;  %4696 = vset.pattern.permute.xlu1 %v8235_v18 }
 0x1a5   :  { %1316 = vperm.xlu2 %4700, %v5661_v0   ;;  %1208 = vperm.xlu1 %4696, %v5661_v0  }
 0x1a6   :  { %672 = vperm.xlu0 %4708, %v5697_v17  }
 0x1ad   :  { %4704 = vset.pattern.permute.xlu2 %v8249_v19  ;;  %4699 = vset.pattern.permute.xlu1 %v8269_v20 }
 0x1ae   :  { %4713 = vset.pattern.permute.xlu0 %v8265_v6  ;;  %1424 = vperm.xlu2 %4704, %v5661_v0  }
 0x1af   :  { %758 = vperm.xlu1 %4699, %v5661_v0   ;;  %840 = vperm.xlu0 %4713, %v5697_v17  }
 0x1b6   :  { %4709 = vset.pattern.permute.xlu2 %v8257_v49 }
 0x1b7   :  { %4701 = vset.pattern.permute.xlu1 %v8219_v23  ;;  %4718 = vset.pattern.permute.xlu0 %v8239_v7  ;;  %v8261_v7 = vmov 16  }
 0x1b8   :  { %1346 = vperm.xlu1 %4701, %v5661_v0   ;;  %702 = vperm.xlu2 %4709, %v5697_v17  }
 0x1b9   :  { %1026 = vperm.xlu0 %4718, %v5697_v17  }
 0x1c0   :  { %4702 = vset.pattern.permute.xlu1 %v8229_v24  ;;  %4711 = vset.pattern.permute.xlu2 %v8259_v3 }
 0x1c1   :  { %4728 = vset.pattern.permute.xlu0 %v8223_v16  ;;  %1376 = vperm.xlu1 %4702, %v5661_v0  }
 0x1c2   :  { %780 = vperm.xlu2 %4711, %v5697_v17   ;;  %1320 = vperm.xlu0 %4728, %v5697_v17  }
 0x1c6   :  { %v5722_v25 = vpop.permute.xlu2 %728 }
 0x1c9   :  { %4703 = vset.pattern.permute.xlu1 %v8245_v26 }
 0x1ca   :  { %4712 = vset.pattern.permute.xlu2 %v8221_v1  ;;  %4729 = vset.pattern.permute.xlu0 %v8219_v23 }
 0x1cb   :  { %866 = vperm.xlu1 %4703, %v5661_v0   ;;  %810 = vperm.xlu2 %4712, %v5697_v17  }
 0x1cc   :  { %1350 = vperm.xlu0 %4729, %v5697_v17  }
 0x1cf   :  { %v5730_v27 = vpop.permute.xlu2 %806 }
 0x1d3   :  { %4705 = vset.pattern.permute.xlu1 %v8215_v28  ;;  %4716 = vset.pattern.permute.xlu2 %v8253_v5 }
 0x1d4   :  { %4731 = vset.pattern.permute.xlu0 %v8245_v26  ;;  %1454 = vperm.xlu1 %4705, %v5661_v0  }
 0x1d5   :  { %948 = vperm.xlu2 %4716, %v5697_v17   ;;  %870 = vperm.xlu0 %4731, %v5697_v17  }
 0x1d9   :  { %v5738_v29 = vpop.permute.xlu2 %992 }
 0x1dc   :  { %4706 = vset.pattern.permute.xlu1 %v8233_v36 }
 0x1dd   :  { %4717 = vset.pattern.permute.xlu2 %v8271_v4  ;;  %4732 = vset.pattern.permute.xlu0 %v8249_v19 }
 0x1de   :  { %1484 = vperm.xlu1 %4706, %v5661_v0   ;;  %996 = vperm.xlu2 %4717, %v5697_v17   ;;  %v5854_v19 = vpop.permute.xlu0 %698 }
 0x1df   :  { %1428 = vperm.xlu0 %4732, %v5697_v17   ;;  %v5746_v41 = vpop.permute.xlu1 %668 }
 0x1e2   :  { %v5748_v42 = vpop.permute.xlu2 %1022 }
 0x1e6   :  { %4710 = vset.pattern.permute.xlu1 %v8237_v48  ;;  %4721 = vset.pattern.permute.xlu2 %v8255_v15 }
 0x1e7   :  { %4733 = vset.pattern.permute.xlu0 %v8215_v28  ;;  %732 = vperm.xlu1 %4710, %v5697_v17  }
 0x1e8   :  { %1134 = vperm.xlu2 %4721, %v5697_v17   ;;  %1458 = vperm.xlu0 %4733, %v5697_v17   ;;  %v5756_v45 = vpop.permute.xlu1 %776 }
 0x1ec   :  { %v5758_v51 = vpop.permute.xlu2 %1052 }
 0x1ef   :  { %4714 = vset.pattern.permute.xlu1 %v8243_v2 }
 0x1f0   :  { %4722 = vset.pattern.permute.xlu2 %v8231_v13  ;;  %4735 = vset.pattern.permute.xlu0 %v8251_v14 }
 0x1f1   :  { %888 = vperm.xlu1 %4714, %v5697_v17   ;;  %1164 = vperm.xlu2 %4722, %v5697_v17  }
 0x1f2   :  { %978 = vperm.xlu0 %4735, %v5697_v17   ;;  %v5766_v52 = vpop.permute.xlu1 %836 }
 0x1f5   :  { %v5768_v56 = vpop.permute.xlu2 %1160 }
 0x1f9   :  { %4715 = vset.pattern.permute.xlu1 %v8247_v9  ;;  %4725 = vset.pattern.permute.xlu2 %v8263_v8 }
 0x1fa   :  { %4737 = vset.pattern.permute.xlu0 %v8217_v50  ;;  %918 = vperm.xlu1 %4715, %v5697_v17  }
 0x1fb   :  { %1242 = vperm.xlu2 %4725, %v5697_v17   ;;  %676 = vperm.xlu0 %4737, %v5770_v57   ;;  %v5778_v62 = vpop.permute.xlu1 %914 }
 0x1ff   :  { %v5780_v28 = vpop.permute.xlu2 %1316 }
 0x202   :  { %4719 = vset.pattern.permute.xlu1 %v8225_v10  ;;  %v8267_v10 = vmov 0  }
 0x203   :  { %4727 = vset.pattern.permute.xlu2 %v8269_v20  ;;  %4741 = vset.pattern.permute.xlu0 %v8221_v1 }
 0x204   :  { %1056 = vperm.xlu1 %4719, %v5697_v17   ;;  %762 = vperm.xlu2 %4727, %v5697_v17  }
 0x205   :  { %814 = vperm.xlu0 %4741, %v5770_v57   ;;  %v5788_v50 = vpop.permute.xlu1 %1100 }
 0x208   :  { %v5790_v23 = vpop.permute.xlu2 %1424 }
 0x209   :  { %8427 = vst [vmem:[#allocation34_spill] sm:$0xff] %v5790_v23 }
 0x20c   :  { %4720 = vset.pattern.permute.xlu1 %v8227_v12  ;;  %4730 = vset.pattern.permute.xlu2 %v8229_v24 }
 0x20d   :  { %4749 = vset.pattern.permute.xlu0 %v8227_v12  ;;  %1104 = vperm.xlu1 %4720, %v5697_v17  }
 0x20e   :  { %1380 = vperm.xlu2 %4730, %v5697_v17   ;;  %1108 = vperm.xlu0 %4749, %v5770_v57   ;;  %v5798_v1 = vpop.permute.xlu1 %1130 }
 0x212   :  { %v5800_v16 = vpop.permute.xlu2 %702 }
 0x215   :  { %4723 = vset.pattern.permute.xlu1 %v8267_v10 }
 0x216   :  { %4734 = vset.pattern.permute.xlu2 %v8233_v36  ;;  %4751 = vset.pattern.permute.xlu0 %v8231_v13 }
 0x217   :  { %653 = vperm.xlu1 %4723, %v5697_v17   ;;  %1488 = vperm.xlu2 %4734, %v5697_v17   ;;  %v5807_v12 = vpop.permute.xlu1 %1208 }
 0x218   :  { %1168 = vperm.xlu0 %4751, %v5770_v57  }
 0x21c   :  { %v5810_v24 = vpop.permute.xlu2 %780 }
 0x21f   :  { %4724 = vset.pattern.permute.xlu1 %v8235_v18  ;;  %4739 = vset.pattern.permute.xlu2 %v8237_v48 }
 0x220   :  { %4753 = vset.pattern.permute.xlu0 %v8235_v18  ;;  %1212 = vperm.xlu1 %4724, %v5697_v17  }
 0x221   :  { %736 = vperm.xlu2 %4739, %v5770_v57   ;;  %1216 = vperm.xlu0 %4753, %v5770_v57   ;;  %v5818_v13 = vpop.permute.xlu1 %758 }
 0x222   :  { %8428 = vst [vmem:[#allocation35_spill] sm:$0xff] %v5818_v13 }
 0x225   :  { %v5820_v36 = vpop.permute.xlu2 %810 }
 0x228   :  { %4726 = vset.pattern.permute.xlu1 %v8241_v11 }
 0x229   :  { %4743 = vset.pattern.permute.xlu2 %v8243_v2  ;;  %4755 = vset.pattern.permute.xlu0 %v8241_v11 }
 0x22a   :  { %1272 = vperm.xlu1 %4726, %v5697_v17   ;;  %892 = vperm.xlu2 %4743, %v5770_v57   ;;  %v5827_v18 = vpop.permute.xlu1 %1346 }
 0x22b   :  { %1276 = vperm.xlu0 %4755, %v5770_v57  }
 0x22f   :  { %v5830_v48 = vpop.permute.xlu2 %948 }
 0x232   :  { %4736 = vset.pattern.permute.xlu1 %v8261_v7  ;;  %4744 = vset.pattern.permute.xlu2 %v8247_v9 }
 0x233   :  { %4760 = vset.pattern.permute.xlu0 %v8245_v26  ;;  %1086 = vperm.xlu1 %4736, %v5697_v17   ;;  %v5836_v11 = vpop.permute.xlu1 %1376 }
 0x234   :  { %922 = vperm.xlu2 %4744, %v5770_v57   ;;  %874 = vperm.xlu0 %4760, %v5770_v57  }
 0x238   :  { %v5840_v2 = vpop.permute.xlu2 %996 }
 0x23b   :  { %4738 = vset.pattern.permute.xlu1 %v8257_v49 }
 0x23c   :  { %4745 = vset.pattern.permute.xlu2 %v8253_v5  ;;  %4764 = vset.pattern.permute.xlu0 %v8251_v14 }
 0x23d   :  { %952 = vperm.xlu2 %4745, %v5770_v57   ;;  %706 = vperm.xlu1 %4738, %v5770_v57   ;;  %v5847_v26 = vpop.permute.xlu1 %866 }
 0x23e   :  { %8429 = vst [vmem:[#allocation36_spill] sm:$0xff] %v5847_v26  ;;  %982 = vperm.xlu0 %4764, %v5770_v57  }
 0x242   :  { %v5850_v9 = vpop.permute.xlu2 %1134 }
 0x245   :  { %4750 = vset.pattern.permute.xlu2 %v8255_v15  ;;  %4740 = vset.pattern.permute.xlu1 %v8259_v3  ;;  %v5867_v15 = vpop.permute.xlu0 %884  ;;  %v5876_v3 = vadd.f32 %v5605_v34, %v5619_v40  ;;  %v5893_v34 = vadd.f32 %v5651_v59, %v5656_v61 }
 0x246   :  { %4765 = vset.pattern.permute.xlu0 %v8261_v7  ;;  %1138 = vperm.xlu2 %4750, %v5770_v57   ;;  %v5858_v14 = vpop.permute.xlu1 %1454 }
 0x247   :  { %8430 = vst [vmem:[#allocation37_spill] sm:$0xff] %v5858_v14  ;;  %784 = vperm.xlu1 %4740, %v5770_v57   ;;  %1082 = vperm.xlu0 %4765, %v5661_v0   ;;  %v1171_v59 = vmul.f32 %v5768_v56, %v5893_v34  ;;  %v8278_v14 = vmov 24  }
 0x248   :  { %8432 = vst [vmem:[#allocation39_spill] sm:$0xff] %v5893_v34 }
 0x24b   :  { %v5862_v5 = vpop.permute.xlu2 %1164 }
 0x24e   :  { %4754 = vset.pattern.permute.xlu2 %v8263_v8  ;;  %v847_v8 = vmul.f32 %v5766_v52, %v5876_v3  ;;  %v1141_v52 = vmul.f32 %v5798_v1, %v5893_v34  ;;  %v5911_v1 = vperm.slane %v5601_v32, 5 }
 0x24f   :  { %4742 = vset.pattern.permute.xlu1 %v8265_v6  ;;  %4766 = vset.pattern.permute.xlu0 %v8267_v10  ;;  %v5888_v10 = vpop.permute.xlu0 %944 }
 0x250   :  { %1246 = vperm.xlu2 %4754, %v5770_v57   ;;  %844 = vperm.xlu1 %4742, %v5770_v57   ;;  %v5871_v49 = vpop.permute.xlu1 %1484  ;;  %8437 = vst [vmem:[#allocation42_spill] sm:$0xff] %v5911_v1 }
 0x251   :  { %8431 = vst [vmem:[#allocation38_spill] sm:$0xff] %v5871_v49  ;;  %648 = vperm.xlu0 %4766, %v5661_v0  }
 0x255   :  { %v5878_v7 = vpop.permute.xlu2 %1242 }
 0x257   :  { %v1239_v26 = vpop.permute.xlu0 %1238 }
 0x258   :  { %4756 = vset.pattern.permute.xlu2 %v8269_v20  ;;  %4746 = vset.pattern.permute.xlu1 %v8271_v4  ;;  %v8435_v20 = vmov 14  }
 0x259   :  { %853 = vrot.lane.b32.xlu0 %v847_v8, %s5353_s27  ;;  %766 = vperm.xlu2 %4756, %v5770_v57   ;;  %v5886_v6 = vpop.permute.xlu1 %732  ;;  %v8434_v8 = vmov 29  }
 0x25a   :  { %1000 = vperm.xlu1 %4746, %v5770_v57  }
 0x25e   :  { %v5895_v40 = vpop.permute.xlu2 %762 }
 0x25f   :  { %8433 = vst [vmem:[#allocation40_spill] sm:$0xff] %v5895_v40  ;;  %v1269_v40 = vpop.permute.xlu0 %1268 }
 0x261   :  { %1147 = vrot.lane.b32.xlu0 %v1141_v52, %s5320_s5  ;;  %4761 = vset.pattern.permute.xlu2 %v8434_v8  ;;  %v530_v52 = vpop.f32.mrf.mxu3  ;;  %v8275_v8 = vmov 20  }
 0x262   :  { %4747 = vset.pattern.permute.xlu1 %v8435_v20  ;;  %1432 = vperm.xlu2 %4761, %v5770_v57   ;;  %v8438_v20 = vmov 15   ;;  %v5921_v56 = vadd.f32 %v530_v52, %v5911_v1 }
 0x263   :  { %1030 = vperm.xlu1 %4747, %v5770_v57   ;;  %v5904_v4 = vpop.permute.xlu1 %888 }
 0x264   :  { %8439 = vst [vmem:[#allocation43_spill] sm:$0xff] %v5921_v56  ;;  %v1249_v49 = vmul.f32 %v1239_v26, %v5921_v56  ;;  %v1279_v52 = vmul.f32 %v1269_v40, %v5921_v56 }
 0x267   :  { %v5932_v23 = vpop.permute.xlu0 %974 }
 0x268   :  { %v5908_v13 = vpop.permute.xlu2 %1380  ;;  %8441 = vst [vmem:[#allocation44_spill] sm:$0xff] %v5932_v23 }
 0x269   :  { %8436 = vst [vmem:[#allocation41_spill] sm:$0xff] %v5908_v13  ;;  %1177 = vrot.lane.b32.xlu0 %v1171_v59, %s5353_s27 }
 0x26a   :  { %4767 = vset.pattern.permute.xlu2 %v8275_v8  ;;  %v8440_v8 = vmov 0  }
 0x26b   :  { %4748 = vset.pattern.permute.xlu1 %v8438_v20  ;;  %1194 = vperm.xlu2 %4767, %v5697_v17  }
 0x26c   :  { %1060 = vperm.xlu1 %4748, %v5770_v57   ;;  %v5918_v22 = vpop.permute.xlu1 %918 }
 0x26f   :  { %v5952_v23 = vpop.permute.xlu0 %672 }
 0x271   :  { %1255 = vrot.lane.b32.xlu0 %v1249_v49, %s5320_s5  ;;  %v5925_v59 = vpop.permute.xlu2 %1488  ;;  %v5936_v49 = vperm.slane %v5601_v32, 3 }
 0x273   :  { %4769 = vset.pattern.permute.xlu2 %v8278_v14  ;;  %v5943_v14 = vadd.f32 %v5610_v37, %v5936_v49  ;;  %v5958_v37 = vadd.f32 %v5653_v60, %v5656_v61 }
 0x274   :  { %4752 = vset.pattern.permute.xlu1 %v8440_v8  ;;  %1302 = vperm.xlu2 %4769, %v5697_v17   ;;  %v8443_v8 = vmov 25   ;;  %v8445_v17 = vmov 24  }
 0x275   :  { %658 = vperm.xlu1 %4752, %v5770_v57  }
 0x276   :  { %v1057_v20 = vpop.permute.xlu1 %1056 }
 0x277   :  { %v1064_v40 = vmul.f32 %v1057_v20, %v5943_v14  ;;  %v1142_v20 = vmul.f32 %v5850_v9, %v5958_v37  ;;  %v5973_v60 = vpop.permute.xlu0 %840 }
 0x279   :  { %1285 = vrot.lane.b32.xlu0 %v1279_v52, %s5353_s27 }
 0x27b   :  { %v5938_v26 = vpop.permute.xlu2 %736 }
 0x27c   :  { %4772 = vset.pattern.permute.xlu2 %v8442_v58 }
 0x27d   :  { %4757 = vset.pattern.permute.xlu1 %v8443_v8  ;;  %1198 = vperm.xlu2 %4772, %v5770_v57   ;;  %v8446_v8 = vmov 26  }
 0x27e   :  { %1324 = vperm.xlu1 %4757, %v5770_v57  }
 0x27f   :  { %v5949_v52 = vpop.permute.xlu1 %1104 }
 0x281   :  { %1071 = vrot.lane.b32.xlu0 %v1064_v40, %s5353_s27 }
 0x284   :  { %v5954_v13 = vpop.permute.xlu2 %892 }
 0x285   :  { %8444 = vst [vmem:[#allocation45_spill] sm:$0xff] %v5954_v13  ;;  %4773 = vset.pattern.permute.xlu2 %v8445_v17  ;;  %v5971_v13 = vadd.f32 %v5603_v33, %v5616_v39  ;;  %v556_v39 = vpop.f32.mrf.mxu0 }
 0x286   :  { %4758 = vset.pattern.permute.xlu1 %v8446_v8  ;;  %1306 = vperm.xlu2 %4773, %v5770_v57   ;;  %v533_v8 = vpop.f32.mrf.mxu3 }
 0x287   :  { %1354 = vperm.xlu1 %4758, %v5770_v57   ;;  %8448 = vst [vmem:[#allocation47_spill] sm:$0xff] %v5971_v13  ;;  %v709_v61 = vmul.f32 %v5854_v19, %v5971_v13  ;;  %v5983_v9 = vadd.f32 %v533_v8, %v5911_v1  ;;  %v5989_v19 = vpop.permute.xlu0 %1026 }
 0x289   :  { %1149 = vrot.lane.b32.xlu0 %v1142_v20, %s5320_s5  ;;  %v5967_v40 = vpop.permute.xlu1 %653  ;;  %8450 = vst [vmem:[#allocation48_spill] sm:$0xff] %v5983_v9  ;;  %v1250_v8 = vmul.f32 %v5878_v7, %v5983_v9  ;;  %v8454_v7 = vmov 31  }
 0x28a   :  { %8447 = vst [vmem:[#allocation46_spill] sm:$0xff] %v5967_v40  ;;  %v739_v40 = vmul.f32 %v5722_v25, %v5971_v13 }
 0x28e   :  { %715 = vrot.lane.b32.xlu2 %v709_v61, %s5320_s5  ;;  %v5978_v63 = vpop.permute.xlu2 %922 }
 0x28f   :  { %4759 = vset.pattern.permute.xlu1 %v8449_v47  ;;  %v8452_v47 = vmov 30   ;;  %v1321_v1 = vpop.permute.xlu0 %1320 }
 0x290   :  { %1384 = vperm.xlu1 %4759, %v5770_v57  }
 0x292   :  { %v1213_v20 = vpop.permute.xlu1 %1212 }
 0x293   :  { %v1220_v33 = vmul.f32 %v1213_v20, %v5983_v9  ;;  %v787_v20 = vmul.f32 %v5756_v45, %v5876_v3  ;;  %v6015_v45 = vadd.f32 %v5597_v30, %v5608_v35 }
 0x295   :  { %1227 = vrot.lane.b32.xlu0 %v1220_v33, %s5356_s10  ;;  %v559_v33 = vpop.f32.mrf.mxu0  ;;  %v955_v30 = vmul.f32 %v5888_v10, %v6015_v45 }
 0x296   :  { %745 = vrot.lane.b32.xlu2 %v739_v40, %s5353_s27  ;;  %v6005_v40 = vperm.slane %v5601_v32, 6  ;;  %v895_v32 = vmul.f32 %v5867_v15, %v6015_v45  ;;  %v6036_v15 = vadd.f32 %v5599_v31, %v5936_v49 }
 0x297   :  { %v5992_v61 = vpop.permute.xlu2 %952 }
 0x298   :  { %8451 = vst [vmem:[#allocation49_spill] sm:$0xff] %v5992_v61  ;;  %4762 = vset.pattern.permute.xlu1 %v8452_v47  ;;  %v6010_v61 = vadd.f32 %v559_v33, %v6005_v40 }
 0x299   :  { %1462 = vperm.xlu1 %4762, %v5770_v57  }
 0x29a   :  { %8453 = vst [vmem:[#allocation50_spill] sm:$0xff] %v6010_v61 }
 0x29c   :  { %v6000_v25 = vpop.permute.xlu1 %1272 }
 0x29d   :  { %1257 = vrot.lane.b32.xlu0 %v1250_v8, %s5320_s5  ;;  %v1328_v8 = vmul.f32 %v1321_v1, %v6010_v61 }
 0x29e   :  { %793 = vrot.lane.b32.xlu2 %v787_v20, %s5356_s10 }
 0x2a0   :  { %v6007_v47 = vpop.permute.xlu2 %1138 }
 0x2a1   :  { %4763 = vset.pattern.permute.xlu1 %v8454_v7 }
 0x2a2   :  { %1492 = vperm.xlu1 %4763, %v5770_v57  }
 0x2a5   :  { %v6021_v20 = vpop.permute.xlu1 %1086  ;;  %1335 = vrot.lane.b32.xlu0 %v1328_v8, %s5356_s10  ;;  %v1033_v8 = vmul.f32 %v5748_v42, %v6036_v15  ;;  %v679_v42 = vmul.f32 %v5746_v41, %v5971_v13 }
 0x2a6   :  { %8455 = vst [vmem:[#allocation51_spill] sm:$0xff] %v6021_v20  ;;  %901 = vrot.lane.b32.xlu2 %v895_v32, %s5356_s10  ;;  %v1063_v32 = vmul.f32 %v5758_v51, %v6036_v15 }
 0x2aa   :  { %4768 = vset.pattern.permute.xlu1 %v8442_v58  ;;  %v6026_v33 = vpop.permute.xlu2 %1246  ;;  %v1351_v58 = vpop.permute.xlu0 %1350 }
 0x2ab   :  { %1190 = vperm.xlu1 %4768, %v5661_v0  }
 0x2ae   :  { %961 = vrot.lane.b32.xlu2 %v955_v30, %s5353_s27  ;;  %v8456_v30 = vmov 16  }
 0x2af   :  { %v6032_v35 = vpop.permute.xlu1 %706 }
 0x2b2   :  { %v6064_v7 = vpop.permute.xlu0 %870 }
 0x2b3   :  { %4770 = vset.pattern.permute.xlu1 %v8445_v17  ;;  %v6039_v1 = vpop.permute.xlu2 %766 }
 0x2b4   :  { %1298 = vperm.xlu1 %4770, %v5661_v0  }
 0x2b6   :  { %1039 = vrot.lane.b32.xlu2 %v1033_v8, %s5320_s5  ;;  %v1111_v8 = vmul.f32 %v5788_v50, %v5893_v34 }
 0x2b9   :  { %v6045_v10 = vpop.permute.xlu1 %784 }
 0x2ba   :  { %v1429_v41 = vpop.permute.xlu0 %1428 }
 0x2bc   :  { %4771 = vset.pattern.permute.xlu1 %v8456_v30  ;;  %v6050_v31 = vpop.permute.xlu2 %1432  ;;  %v817_v30 = vmul.f32 %v5730_v27, %v5876_v3  ;;  %v6083_v27 = vadd.f32 %v5627_v46, %v5936_v49  ;;  %v710_v46 = vmul.f32 %v5800_v16, %v5622_v43 }
 0x2bd   :  { %1090 = vperm.xlu1 %4771, %v5770_v57  }
 0x2be   :  { %1069 = vrot.lane.b32.xlu2 %v1063_v32, %s5353_s27  ;;  %v1219_v32 = vmul.f32 %v5807_v12, %v5921_v56  ;;  %8460 = vst [vmem:[#allocation55_spill] sm:$0xff] %v6083_v27 }
 0x2c2   :  { %v6054_v17 = vpop.permute.xlu1 %844 }
 0x2c5   :  { %685 = vrot.lane.b32.xlu1 %v679_v42, %s5356_s10  ;;  %v6061_v51 = vpop.permute.xlu2 %1194  ;;  %v6077_v42 = vadd.f32 %v556_v39, %v6005_v40  ;;  %v1459_v39 = vpop.permute.xlu0 %1458 }
 0x2c6   :  { %8457 = vst [vmem:[#allocation52_spill] sm:$0xff] %v6061_v51  ;;  %1117 = vrot.lane.b32.xlu2 %v1111_v8, %s5356_s10  ;;  %v925_v8 = vmul.f32 %v5778_v62, %v6015_v45  ;;  %v1003_v62 = vmul.f32 %v5738_v29, %v6036_v15  ;;  %v788_v29 = vmul.f32 %v5810_v24, %v5625_v44 }
 0x2c7   :  { %8459 = vst [vmem:[#allocation54_spill] sm:$0xff] %v6077_v42  ;;  %v1327_v12 = vmul.f32 %v5780_v28, %v6077_v42  ;;  %v848_v24 = vmul.f32 %v5973_v60, %v5625_v44  ;;  %v896_v60 = vmul.f32 %v5904_v4, %v5613_v38  ;;  %v956_v4 = vmul.f32 %v5830_v48, %v5613_v38 }
 0x2c8   :  { %v1004_v48 = vmul.f32 %v5840_v2, %v5943_v14 }
 0x2cc   :  { %v6070_v20 = vpop.permute.xlu1 %1000 }
 0x2cd   :  { %823 = vrot.lane.b32.xlu1 %v817_v30, %s5320_s5 }
 0x2ce   :  { %1225 = vrot.lane.b32.xlu2 %v1219_v32, %s5356_s10  ;;  %v6074_v50 = vpop.permute.xlu2 %1302 }
 0x2cf   :  { %8458 = vst [vmem:[#allocation53_spill] sm:$0xff] %v6074_v50 }
 0x2d5   :  { %931 = vrot.lane.b32.xlu1 %v925_v8, %s5320_s5  ;;  %v1031_v30 = vpop.permute.xlu1 %1030 }
 0x2d6   :  { %1333 = vrot.lane.b32.xlu2 %v1327_v12, %s5356_s10  ;;  %v1035_v32 = vmul.f32 %v1031_v30, %v6083_v27  ;;  %v680_v12 = vmul.f32 %v5952_v23, %v5622_v43  ;;  %v6107_v30 = vpop.permute.xlu0 %978  ;;  %v740_v23 = vmul.f32 %v5886_v6, %v5622_v43  ;;  %v818_v6 = vmul.f32 %v5820_v36, %v5625_v44 }
 0x2d7   :  { %v6090_v50 = vpop.permute.xlu2 %1198  ;;  %v926_v36 = vmul.f32 %v5918_v22, %v5613_v38  ;;  %v1172_v22 = vmul.f32 %v5862_v5, %v5958_v37  ;;  %v1034_v5 = vmul.f32 %v5989_v19, %v5943_v14 }
 0x2d8   :  { %8461 = vst [vmem:[#allocation56_spill] sm:$0xff] %v6090_v50  ;;  %1043 = vrot.lane.b32.xlu0 %v1035_v32, %s5320_s5  ;;  %v1358_v32 = vmul.f32 %v1351_v58, %v6010_v61 }
 0x2dd   :  { %1009 = vrot.lane.b32.xlu1 %v1003_v62, %s5356_s10 }
 0x2de   :  { %v1061_v28 = vpop.permute.xlu1 %1060  ;;  %717 = vrot.lane.b32.xlu2 %v710_v46, %s5320_s5  ;;  %v677_v46 = vpop.permute.xlu0 %676 }
 0x2df   :  { %v1065_v49 = vmul.f32 %v1061_v28, %v6083_v27  ;;  %v1357_v28 = vmul.f32 %v5827_v18, %v6077_v42 }
 0x2e0   :  { %v6100_v8 = vpop.permute.xlu2 %1306 }
 0x2e1   :  { %8462 = vst [vmem:[#allocation57_spill] sm:$0xff] %v6100_v8  ;;  %1073 = vrot.lane.b32.xlu0 %v1065_v49, %s5353_s27  ;;  %v8475_v8 = vld [vmem:[#allocation42_spill] sm:$0xff] }
 0x2e5   :  { %687 = vrot.lane.b32.xlu1 %v680_v12, %s5356_s10  ;;  %v1387_v12 = vmul.f32 %v5836_v11, %v6077_v42 }
 0x2e6   :  { %795 = vrot.lane.b32.xlu2 %v788_v29, %s5356_s10  ;;  %v815_v29 = vpop.permute.xlu0 %814 }
 0x2e7   :  { %v6111_v16 = vpop.permute.xlu1 %658 }
 0x2e8   :  { %v6114_v62 = vpop.permute.xlu2 %715 }
 0x2e9   :  { %1365 = vrot.lane.b32.xlu0 %v1358_v32, %s5320_s5 }
 0x2ed   :  { %747 = vrot.lane.b32.xlu1 %v740_v23, %s5353_s27  ;;  %v585_v23 = vpop.f32.mrf.mxu1 }
 0x2ee   :  { %855 = vrot.lane.b32.xlu2 %v848_v24, %s5353_s27  ;;  %v6148_v24 = vadd.f32 %v585_v23, %v5636_v53  ;;  %v1280_v23 = vmul.f32 %v6000_v25, %v5983_v9  ;;  %v741_v25 = vmul.f32 %v5938_v26, %v5639_v54  ;;  %v681_v26 = vmul.f32 %v677_v46, %v5639_v54 }
 0x2ef   :  { %v711_v46 = vmul.f32 %v6032_v35, %v5639_v54 }
 0x2f0   :  { %v6125_v49 = vpop.permute.xlu1 %1324  ;;  %v6127_v58 = vpop.permute.xlu2 %745  ;;  %8463 = vst [vmem:[#allocation58_spill] sm:$0xff] %v6148_v24  ;;  %v1436_v11 = vmul.f32 %v1429_v41, %v6148_v24  ;;  %v1496_v2 = vmul.f32 %v5925_v59, %v6148_v24  ;;  %v201_v59 = vld [vmem:[%s8464_s15 + $0x8] sm:$0xf] }
 0x2f1   :  { %1363 = vrot.lane.b32.xlu0 %v1357_v28, %s5320_s5 }
 0x2f5   :  { %825 = vrot.lane.b32.xlu1 %v818_v6, %s5320_s5 }
 0x2f6   :  { %903 = vrot.lane.b32.xlu2 %v896_v60, %s5356_s10  ;;  %v1109_v60 = vpop.permute.xlu0 %1108 }
 0x2f8   :  { %v6138_v18 = vpop.permute.xlu2 %793 }
 0x2f9   :  { %v6140_v32 = vpop.permute.xlu1 %1354  ;;  %1393 = vrot.lane.b32.xlu0 %v1387_v12, %s5353_s27  ;;  %v1466_v12 = vmul.f32 %v1459_v39, %v6148_v24 }
 0x2fd   :  { %933 = vrot.lane.b32.xlu1 %v926_v36, %s5320_s5 }
 0x2fe   :  { %963 = vrot.lane.b32.xlu2 %v956_v4, %s5353_s27  ;;  %v1169_v4 = vpop.permute.xlu0 %1168 }
 0x300   :  { %v6153_v28 = vpop.permute.xlu2 %901 }
 0x301   :  { %1443 = vrot.lane.b32.xlu0 %v1436_v11, %s5356_s10  ;;  %v1112_v11 = vmul.f32 %v5949_v52, %v5958_v37 }
 0x302   :  { %v6156_v6 = vpop.permute.xlu1 %1384 }
 0x305   :  { %1179 = vrot.lane.b32.xlu1 %v1172_v22, %s5353_s27 }
 0x306   :  { %1011 = vrot.lane.b32.xlu2 %v1004_v48, %s5356_s10  ;;  %v1217_v19 = vpop.permute.xlu0 %1216 }
 0x308   :  { %v6165_v41 = vpop.permute.xlu2 %961 }
 0x309   :  { %1473 = vrot.lane.b32.xlu0 %v1466_v12, %s5320_s5  ;;  %v819_v12 = vmul.f32 %v815_v29, %v5642_v55 }
 0x30b   :  { %v6170_v36 = vpop.permute.xlu1 %1462 }
 0x30d   :  { %1287 = vrot.lane.b32.xlu1 %v1280_v23, %s5353_s27 }
 0x30e   :  { %1041 = vrot.lane.b32.xlu2 %v1034_v5, %s5320_s5  ;;  %v1277_v5 = vpop.permute.xlu0 %1276 }
 0x310   :  { %v6178_v39 = vpop.permute.xlu2 %1039 }
 0x311   :  { %1503 = vrot.lane.b32.xlu0 %v1496_v2, %s5353_s27  ;;  %v8467_v2 = vmov 6  }
 0x314   :  { %v6185_v22 = vpop.permute.xlu1 %1492 }
 0x315   :  { %749 = vrot.lane.b32.xlu1 %v741_v25, %s5353_s27  ;;  %v8468_v25 = vld [vmem:[#allocation28_spill] sm:$0xff] }
 0x316   :  { %1119 = vrot.lane.b32.xlu2 %v1112_v11, %s5356_s10  ;;  %v927_v11 = vmul.f32 %v5978_v63, %v8468_v25 }
 0x318   :  { %v6192_v48 = vpop.permute.xlu2 %1069 }
 0x319   :  { %1550 = vperm.xlu0 %4766, %v201_v59  }
 0x31d   :  { %v6196_v23 = vpop.permute.xlu1 %1190  ;;  %827 = vrot.lane.b32.xlu1 %v819_v12, %s5320_s5  ;;  %v6215_v12 = vpop.permute.xlu0 %874 }
 0x31e   :  { %8465 = vst [vmem:[#allocation59_spill] sm:$0xff] %v6196_v23  ;;  %689 = vrot.lane.b32.xlu2 %v681_v26, %s5356_s10  ;;  %v1005_v26 = vmul.f32 %v6070_v20, %v6083_v27 }
 0x320   :  { %v6200_v52 = vpop.permute.xlu2 %1117 }
 0x321   :  { %8466 = vst [vmem:[#allocation60_spill] sm:$0xff] %v6200_v52  ;;  %1725 = vrot.lane.b32.xlu0 %v5548_v21, %s5353_s27  ;;  %v849_v21 = vmul.f32 %v6054_v17, %v5642_v55  ;;  %v8291_v17 = vmov 28  }
 0x322   :  { %4781 = vset.pattern.permute.xlu0 %v8467_v2  ;;  %v789_v2 = vmul.f32 %v6045_v10, %v5642_v55  ;;  %4775 = vset.pattern.permute.xlu1 %v8291_v17 }
 0x323   :  { %4774 = vset.pattern.permute.xlu2 %v8291_v17 }
 0x325   :  { %935 = vrot.lane.b32.xlu1 %v927_v11, %s5320_s5  ;;  %v8472_v11 = vld [vmem:[#allocation32_spill] sm:$0xff]  ;;  %v6230_v24 = vpop.permute.xlu0 %982 }
 0x326   :  { %v6210_v29 = vpop.permute.xlu1 %1298  ;;  %719 = vrot.lane.b32.xlu2 %v711_v46, %s5320_s5  ;;  %v1113_v46 = vmul.f32 %v1109_v60, %v8472_v11 }
 0x327   :  { %8469 = vst [vmem:[#allocation61_spill] sm:$0xff] %v6210_v29  ;;  %v8474_v29 = vld [vmem:[#allocation49_spill] sm:$0xff] }
 0x328   :  { %v6213_v59 = vpop.permute.xlu2 %1225 }
 0x329   :  { %8470 = vst [vmem:[#allocation62_spill] sm:$0xff] %v6213_v59 }
 0x32d   :  { %1013 = vrot.lane.b32.xlu1 %v1005_v26, %s5356_s10  ;;  %v8473_v26 = vld [vmem:[#allocation45_spill] sm:$0xff]  ;;  %v6245_v60 = vpop.permute.xlu0 %1082 }
 0x32e   :  { %797 = vrot.lane.b32.xlu2 %v789_v2, %s5356_s10  ;;  %v1143_v2 = vmul.f32 %v6007_v47, %v8472_v11  ;;  %v1173_v47 = vmul.f32 %v1169_v4, %v8472_v11 }
 0x32f   :  { %v6223_v63 = vpop.permute.xlu1 %1090 }
 0x330   :  { %v6225_v35 = vpop.permute.xlu2 %1333 }
 0x331   :  { %8471 = vst [vmem:[#allocation63_spill] sm:$0xff] %v6225_v35  ;;  %v897_v35 = vmul.f32 %v8473_v26, %v8468_v25  ;;  %v957_v26 = vmul.f32 %v8474_v29, %v8468_v25  ;;  %v562_v29 = vpop.f32.mrf.mxu0 }
 0x332   :  { %v6274_v56 = vadd.f32 %v562_v29, %v6005_v40  ;;  %v588_v29 = vpop.f32.mrf.mxu1 }
 0x334   :  { %8477 = vst [vmem:[#allocation49_spill] sm:$0xff] %v6274_v56 }
 0x335   :  { %1121 = vrot.lane.b32.xlu1 %v1113_v46, %s5356_s10  ;;  %v649_v17 = vpop.permute.xlu0 %648 }
 0x336   :  { %857 = vrot.lane.b32.xlu2 %v849_v21, %s5353_s27 }
 0x337   :  { %v6234_v20 = vpop.permute.xlu1 %685 }
 0x338   :  { %v6236_v10 = vpop.permute.xlu2 %717 }
 0x33d   :  { %1151 = vrot.lane.b32.xlu1 %v1143_v2, %s5320_s5  ;;  %v536_v2 = vpop.f32.mrf.mxu3 }
 0x33e   :  { %905 = vrot.lane.b32.xlu2 %v897_v35, %s5356_s10  ;;  %v6262_v59 = vadd.f32 %v536_v2, %v8475_v8  ;;  %v6277_v2 = vpop.permute.xlu0 %853 }
 0x33f   :  { %v6247_v21 = vpop.permute.xlu1 %823 }
 0x340   :  { %v6250_v46 = vpop.permute.xlu2 %795  ;;  %8476 = vst [vmem:[#allocation45_spill] sm:$0xff] %v6262_v59  ;;  %v1251_v23 = vmul.f32 %v6026_v33, %v6262_v59  ;;  %v1221_v4 = vmul.f32 %v1217_v19, %v6262_v59  ;;  %v1281_v8 = vmul.f32 %v1277_v5, %v6262_v59  ;;  %v1329_v33 = vmul.f32 %v6125_v49, %v6274_v56 }
 0x341   :  { %v1389_v49 = vmul.f32 %v6156_v6, %v6274_v56  ;;  %v6300_v59 = vadd.f32 %v588_v29, %v5636_v53  ;;  %v8485_v53 = vld [vmem:[#allocation31_spill] sm:$0xff]  ;;  %v8486_v29 = vld [vmem:[#allocation34_spill] sm:$0xff] }
 0x343   :  { %8481 = vst [vmem:[#allocation64_spill] sm:$0xff] %v6300_v59 }
 0x345   :  { %1181 = vrot.lane.b32.xlu1 %v1173_v47, %s5353_s27 }
 0x346   :  { %965 = vrot.lane.b32.xlu2 %v957_v26, %s5353_s27  ;;  %v6287_v50 = vpop.permute.xlu0 %1147 }
 0x347   :  { %v6257_v35 = vpop.permute.xlu1 %931  ;;  %8478 = vst [vmem:[#allocation42_spill] sm:$0xff] %v6287_v50  ;;  %v1437_v50 = vmul.f32 %v6050_v31, %v6300_v59 }
 0x348   :  { %v6259_v42 = vpop.permute.xlu2 %855 }
 0x34d   :  { %1259 = vrot.lane.b32.xlu1 %v1251_v23, %s5320_s5 }
 0x34e   :  { %1229 = vrot.lane.b32.xlu2 %v1221_v4, %s5356_s10  ;;  %v1359_v4 = vmul.f32 %v6140_v32, %v6274_v56 }
 0x34f   :  { %v6269_v47 = vpop.permute.xlu1 %1009 }
 0x350   :  { %v6271_v26 = vpop.permute.xlu2 %903 }
 0x355   :  { %1289 = vrot.lane.b32.xlu1 %v1281_v8, %s5353_s27  ;;  %v8479_v8 = vld [vmem:[#allocation33_spill] sm:$0xff] }
 0x356   :  { %1337 = vrot.lane.b32.xlu2 %v1329_v33, %s5356_s10  ;;  %v6297_v33 = vpop.permute.xlu0 %1177 }
 0x357   :  { %v688_v19 = vpop.permute.xlu1 %687  ;;  %8480 = vst [vmem:[#allocation33_spill] sm:$0xff] %v6297_v33  ;;  %v1435_v33 = vmul.f32 %v8486_v29, %v8485_v53  ;;  %v8490_v29 = vmov 1  }
 0x358   :  { %v6283_v23 = vpop.permute.xlu2 %963 }
 0x35d   :  { %1367 = vrot.lane.b32.xlu1 %v1359_v4, %s5320_s5  ;;  %v8482_v4 = vld [vmem:[#allocation41_spill] sm:$0xff] }
 0x35e   :  { %1414 = vperm.xlu2 %4774, %v5770_v57   ;;  %v1388_v57 = vmul.f32 %v8482_v4, %v6010_v61  ;;  %v6313_v56 = vpop.permute.xlu0 %1255 }
 0x35f   :  { %v748_v40 = vpop.permute.xlu1 %747  ;;  %8484 = vst [vmem:[#allocation41_spill] sm:$0xff] %v6313_v56  ;;  %v1497_v56 = vmul.f32 %v6185_v22, %v6300_v59 }
 0x360   :  { %v6293_v5 = vpop.permute.xlu2 %1011 }
 0x365   :  { %1397 = vrot.lane.b32.xlu1 %v1389_v49, %s5353_s27 }
 0x366   :  { %1410 = vperm.xlu2 %4774, %v8479_v8   ;;  %v8483_v8 = vmov 0  }
 0x367   :  { %v826_v32 = vpop.permute.xlu1 %825 }
 0x368   :  { %v6306_v6 = vpop.permute.xlu2 %1041 }
 0x36d   :  { %1395 = vrot.lane.b32.xlu1 %v1388_v57, %s5353_s27  ;;  %v6323_v57 = vpop.permute.xlu0 %1285 }
 0x36e   :  { %1445 = vrot.lane.b32.xlu2 %v1437_v50, %s5356_s10  ;;  %8488 = vst [vmem:[#allocation65_spill] sm:$0xff] %v6323_v57  ;;  %v1467_v50 = vmul.f32 %v6170_v36, %v6300_v59  ;;  %v8492_v36 = vld [vmem:[#allocation46_spill] sm:$0xff] }
 0x36f   :  { %v6310_v49 = vpop.permute.xlu1 %933  ;;  %4776 = vset.pattern.permute.xlu2 %v8483_v8  ;;  %v8489_v8 = vld [vmem:[#allocation37_spill] sm:$0xff]  ;;  %v662_v57 = vmul.f32 %v8492_v36, %v5622_v43  ;;  %v8494_v36 = vld [vmem:[#allocation40_spill] sm:$0xff] }
 0x370   :  { %v6319_v31 = vpop.permute.xlu2 %1119  ;;  %v1465_v61 = vmul.f32 %v8489_v8, %v8485_v53  ;;  %v770_v43 = vmul.f32 %v8494_v36, %v5625_v44 }
 0x371   :  { %v695_v9 = vadd.f32 %v688_v19, %v662_v57 }
 0x373   :  { %v725_v52 = vadd.f32 %v6236_v10, %v695_v9  ;;  %v8496_v9 = vld [vmem:[#allocation35_spill] sm:$0xff] }
 0x375   :  { %1406 = vperm.xlu1 %4775, %v5661_v0   ;;  %v6336_v51 = vpop.permute.xlu0 %1071  ;;  %v755_v22 = vadd.f32 %v748_v40, %v725_v52  ;;  %v663_v52 = vmul.f32 %v6111_v16, %v5639_v54  ;;  %v771_v16 = vmul.f32 %v6039_v1, %v5642_v55 }
 0x376   :  { %1441 = vrot.lane.b32.xlu2 %v1435_v33, %s5356_s10 }
 0x377   :  { %v6321_v4 = vpop.permute.xlu1 %1179 }
 0x378   :  { %8487 = vst [vmem:[#allocation34_spill] sm:$0xff] %v6321_v4  ;;  %v690_v33 = vpop.permute.xlu2 %689 }
 0x37d   :  { %1475 = vrot.lane.b32.xlu1 %v1467_v50, %s5320_s5  ;;  %v661_v50 = vmul.f32 %v649_v17, %v5971_v13  ;;  %v6347_v59 = vpop.permute.xlu0 %1149  ;;  %v773_v17 = vadd.f32 %v770_v43, %v755_v22  ;;  %v8495_v13 = vld [vmem:[#allocation24_spill] sm:$0xff]  ;;  %v696_v43 = vadd.f32 %v690_v33, %v663_v52 }
 0x37e   :  { %1471 = vrot.lane.b32.xlu2 %v1465_v61, %s5320_s5  ;;  %4777 = vset.pattern.permute.xlu1 %v8490_v29  ;;  %v8493_v61 = vld [vmem:[#allocation38_spill] sm:$0xff]  ;;  %v8497_v33 = vld [vmem:[#allocation36_spill] sm:$0xff] }
 0x37f   :  { %v6332_v0 = vpop.permute.xlu1 %1287  ;;  %v1495_v29 = vmul.f32 %v8493_v61, %v8485_v53  ;;  %v803_v10 = vadd.f32 %v6250_v46, %v773_v17 }
 0x380   :  { %8491 = vst [vmem:[#allocation37_spill] sm:$0xff] %v6332_v0  ;;  %v720_v4 = vpop.permute.xlu2 %719  ;;  %v694_v0 = vadd.f32 %v6234_v20, %v661_v50  ;;  %v769_v20 = vmul.f32 %v8496_v9, %v5876_v3 }
 0x382   :  { %v724_v19 = vadd.f32 %v6114_v62, %v694_v0  ;;  %v833_v62 = vadd.f32 %v826_v32, %v803_v10  ;;  %v726_v0 = vadd.f32 %v720_v4, %v696_v43 }
 0x384   :  { %v754_v57 = vadd.f32 %v6127_v58, %v724_v19  ;;  %v863_v22 = vadd.f32 %v6259_v42, %v833_v62  ;;  %v878_v19 = vmul.f32 %v6064_v7, %v5613_v38  ;;  %v879_v62 = vmul.f32 %v6215_v12, %v8468_v25 }
 0x385   :  { %1505 = vrot.lane.b32.xlu1 %v1497_v56, %s5353_s27  ;;  %v6360_v40 = vpop.permute.xlu0 %1227 }
 0x386   :  { %v772_v50 = vadd.f32 %v769_v20, %v754_v57  ;;  %v881_v54 = vadd.f32 %v878_v19, %v863_v22 }
 0x387   :  { %v750_v8 = vpop.permute.xlu1 %749 }
 0x388   :  { %v798_v61 = vpop.permute.xlu2 %797  ;;  %v802_v58 = vadd.f32 %v6138_v18, %v772_v50  ;;  %v756_v36 = vadd.f32 %v750_v8, %v726_v0  ;;  %v911_v18 = vadd.f32 %v6271_v26, %v881_v54  ;;  %v877_v8 = vmul.f32 %v8497_v33, %v6015_v45 }
 0x389   :  { %v986_v26 = vmul.f32 %v6107_v30, %v5943_v14  ;;  %v987_v30 = vmul.f32 %v6230_v24, %v6083_v27 }
 0x38a   :  { %v832_v17 = vadd.f32 %v6247_v21, %v802_v58  ;;  %v774_v57 = vadd.f32 %v771_v16, %v756_v36  ;;  %v941_v1 = vadd.f32 %v6310_v49, %v911_v18 }
 0x38c   :  { %v862_v4 = vadd.f32 %v6277_v2, %v832_v17  ;;  %v804_v42 = vadd.f32 %v798_v61, %v774_v57  ;;  %v971_v54 = vadd.f32 %v6283_v23, %v941_v1 }
 0x38d   :  { %1501 = vrot.lane.b32.xlu1 %v1495_v29, %s5353_s27  ;;  %v6369_v32 = vpop.permute.xlu0 %1257 }
 0x38e   :  { %v880_v52 = vadd.f32 %v877_v8, %v862_v4  ;;  %v989_v0 = vadd.f32 %v986_v26, %v971_v54  ;;  %v8500_v26 = vld [vmem:[#allocation60_spill] sm:$0xff] }
 0x38f   :  { %v828_v56 = vpop.permute.xlu1 %827 }
 0x390   :  { %v858_v9 = vpop.permute.xlu2 %857  ;;  %v834_v7 = vadd.f32 %v828_v56, %v804_v42  ;;  %v910_v2 = vadd.f32 %v6153_v28, %v880_v52  ;;  %v1019_v19 = vadd.f32 %v6293_v5, %v989_v0  ;;  %v8498_v28 = vld [vmem:[#allocation44_spill] sm:$0xff]  ;;  %v8499_v5 = vld [vmem:[#allocation51_spill] sm:$0xff] }
 0x391   :  { %v985_v16 = vmul.f32 %v8498_v28, %v6036_v15  ;;  %v8502_v0 = vld [vmem:[#allocation48_spill] sm:$0xff] }
 0x392   :  { %v864_v50 = vadd.f32 %v858_v9, %v834_v7  ;;  %v940_v43 = vadd.f32 %v6257_v35, %v910_v2  ;;  %v1049_v35 = vadd.f32 %v6306_v6, %v1019_v19 }
 0x394   :  { %v882_v61 = vadd.f32 %v879_v62, %v864_v50  ;;  %v970_v36 = vadd.f32 %v6165_v41, %v940_v43  ;;  %v1079_v18 = vadd.f32 %v6336_v51, %v1049_v35  ;;  %v1095_v62 = vmul.f32 %v6223_v63, %v8472_v11  ;;  %v8501_v43 = vld [vmem:[#allocation34_spill] sm:$0xff]  ;;  %v8505_v63 = vld [vmem:[#allocation33_spill] sm:$0xff]  ;;  %v8507_v35 = vld [vmem:[#allocation56_spill] sm:$0xff] }
 0x395   :  { %1727 = vrot.lane.b32.xlu1 %v8495_v13, %s5353_s27  ;;  %v6376_v21 = vpop.permute.xlu0 %1335 }
 0x396   :  { %v988_v17 = vadd.f32 %v985_v16, %v970_v36 }
 0x397   :  { %v936_v29 = vpop.permute.xlu1 %935 }
 0x398   :  { %v906_v10 = vpop.permute.xlu2 %905  ;;  %v1018_v4 = vadd.f32 %v6269_v47, %v988_v17  ;;  %v1093_v47 = vmul.f32 %v6245_v60, %v5893_v34  ;;  %v8506_v17 = vld [vmem:[#allocation45_spill] sm:$0xff] }
 0x399   :  { %v912_v49 = vadd.f32 %v906_v10, %v882_v61 }
 0x39a   :  { %v1048_v8 = vadd.f32 %v6178_v39, %v1018_v4  ;;  %v8508_v4 = vld [vmem:[#allocation43_spill] sm:$0xff] }
 0x39b   :  { %v942_v12 = vadd.f32 %v936_v29, %v912_v49  ;;  %v1094_v29 = vmul.f32 %v8499_v5, %v5958_v37 }
 0x39c   :  { %v1078_v24 = vadd.f32 %v6192_v48, %v1048_v8 }
 0x39d   :  { %v1044_v58 = vpop.permute.xlu0 %1043  ;;  %v1097_v7 = vadd.f32 %v1094_v29, %v1079_v18  ;;  %v8509_v18 = vld [vmem:[#allocation59_spill] sm:$0xff] }
 0x39f   :  { %v1014_v46 = vpop.permute.xlu1 %1013  ;;  %v1127_v6 = vadd.f32 %v6319_v31, %v1097_v7  ;;  %v8503_v31 = vld [vmem:[#allocation52_spill] sm:$0xff]  ;;  %v8510_v7 = vld [vmem:[#allocation62_spill] sm:$0xff] }
 0x3a0   :  { %v966_v22 = vpop.permute.xlu2 %965  ;;  %v1202_v49 = vmul.f32 %v8503_v31, %v8502_v0  ;;  %v8517_v31 = vld [vmem:[#allocation65_spill] sm:$0xff] }
 0x3a1   :  { %v972_v23 = vadd.f32 %v966_v22, %v942_v12  ;;  %v1157_v2 = vadd.f32 %v6347_v59, %v1127_v6  ;;  %v8504_v22 = vld [vmem:[#allocation42_spill] sm:$0xff] }
 0x3a3   :  { %v990_v57 = vadd.f32 %v987_v30, %v972_v23  ;;  %v1187_v48 = vadd.f32 %v8501_v43, %v1157_v2  ;;  %v8514_v2 = vld [vmem:[#allocation41_spill] sm:$0xff] }
 0x3a4   :  { %v8515_v43 = vld [vmem:[#allocation49_spill] sm:$0xff] }
 0x3a5   :  { %v1074_v41 = vpop.permute.xlu0 %1073  ;;  %v1020_v42 = vadd.f32 %v1014_v46, %v990_v57  ;;  %v1096_v46 = vadd.f32 %v1093_v47, %v1078_v24  ;;  %v1205_v19 = vadd.f32 %v1202_v49, %v1187_v48  ;;  %v1203_v57 = vmul.f32 %v8507_v35, %v8506_v17  ;;  %v8516_v48 = vld [vmem:[#allocation57_spill] sm:$0xff] }
 0x3a7   :  { %v1122_v20 = vpop.permute.xlu1 %1121  ;;  %v1050_v1 = vadd.f32 %v1044_v58, %v1020_v42  ;;  %v1126_v61 = vadd.f32 %v8500_v26, %v1096_v46  ;;  %v1235_v59 = vadd.f32 %v6360_v40, %v1205_v19  ;;  %v8512_v40 = vld [vmem:[#allocation50_spill] sm:$0xff]  ;;  %v8519_v19 = vld [vmem:[#allocation61_spill] sm:$0xff] }
 0x3a8   :  { %v1230_v52 = vpop.permute.xlu2 %1229 }
 0x3a9   :  { %v1080_v10 = vadd.f32 %v1074_v41, %v1050_v1  ;;  %v1156_v36 = vadd.f32 %v8504_v22, %v1126_v61  ;;  %v1201_v41 = vmul.f32 %v8509_v18, %v8508_v4  ;;  %v1265_v29 = vadd.f32 %v6369_v32, %v1235_v59  ;;  %v8511_v1 = vld [vmem:[#allocation37_spill] sm:$0xff] }
 0x3aa   :  { %v1311_v32 = vmul.f32 %v8516_v48, %v8515_v43 }
 0x3ab   :  { %v1098_v39 = vadd.f32 %v1095_v62, %v1080_v10  ;;  %v1186_v16 = vadd.f32 %v8505_v63, %v1156_v36  ;;  %v1295_v24 = vadd.f32 %v8511_v1, %v1265_v29 }
 0x3ad   :  { %v1366_v51 = vpop.permute.xlu0 %1365  ;;  %v1128_v58 = vadd.f32 %v1122_v20, %v1098_v39  ;;  %v1204_v20 = vadd.f32 %v1201_v41, %v1186_v16  ;;  %v8521_v41 = vld [vmem:[#allocation58_spill] sm:$0xff] }
 0x3af   :  { %v1152_v56 = vpop.permute.xlu1 %1151 }
 0x3b0   :  { %v1338_v54 = vpop.permute.xlu2 %1337  ;;  %v1158_v28 = vadd.f32 %v1152_v56, %v1128_v58  ;;  %v1234_v56 = vadd.f32 %v8510_v7, %v1204_v20 }
 0x3b2   :  { %v1264_v39 = vadd.f32 %v8514_v2, %v1234_v56 }
 0x3b4   :  { %v1294_v49 = vadd.f32 %v8517_v31, %v1264_v39  ;;  %v198_v31 = vld [vmem:[%s8523_s19] sm:$0xff] }
 0x3b5   :  { %v1364_v12 = vpop.permute.xlu0 %1363 }
 0x3b7   :  { %v1182_v9 = vpop.permute.xlu1 %1181 }
 0x3b8   :  { %v1188_v23 = vadd.f32 %v1182_v9, %v1158_v28  ;;  %v1415_v30 = vpop.permute.xlu2 %1414  ;;  %v8513_v9 = vld [vmem:[#allocation53_spill] sm:$0xff] }
 0x3b9   :  { %v1310_v47 = vmul.f32 %v8513_v9, %v8512_v40 }
 0x3ba   :  { %v1206_v42 = vadd.f32 %v1203_v57, %v1188_v23 }
 0x3bb   :  { %v1313_v26 = vadd.f32 %v1310_v47, %v1295_v24 }
 0x3bc   :  { %v1236_v6 = vadd.f32 %v1230_v52, %v1206_v42  ;;  %v8518_v52 = vld [vmem:[#allocation54_spill] sm:$0xff]  ;;  %v8522_v42 = vld [vmem:[#allocation64_spill] sm:$0xff] }
 0x3bd   :  { %v1394_v8 = vpop.permute.xlu0 %1393  ;;  %v1343_v22 = vadd.f32 %v6376_v21, %v1313_v26  ;;  %v1309_v28 = vmul.f32 %v8519_v19, %v8518_v52  ;;  %v1419_v7 = vmul.f32 %v1415_v30, %v8522_v42  ;;  %v600_v19 = vld [vmem:[#allocation11] sm:$0xff] }
 0x3bf   :  { %v1260_v33 = vpop.permute.xlu1 %1259  ;;  %v1373_v59 = vadd.f32 %v1366_v51, %v1343_v22  ;;  %v8524_v22 = vmov 5  }
 0x3c0   :  { %v1266_v10 = vadd.f32 %v1260_v33, %v1236_v6  ;;  %v1411_v62 = vpop.permute.xlu2 %1410  ;;  %v1312_v33 = vadd.f32 %v1309_v28, %v1294_v49  ;;  %v603_v49 = vld [vmem:[#allocation11 + $0x18] sm:$0xff]  ;;  %v199_v28 = vld [vmem:[%s8523_s19 + $0x8] sm:$0xf] }
 0x3c1   :  { %v1418_v20 = vmul.f32 %v1411_v62, %v8521_v41 }
 0x3c5   :  { %v1444_v36 = vpop.permute.xlu0 %1443 }
 0x3c7   :  { %v1290_v50 = vpop.permute.xlu1 %1289 }
 0x3c8   :  { %v1296_v61 = vadd.f32 %v1290_v50, %v1266_v10  ;;  %v1446_v23 = vpop.permute.xlu2 %1445  ;;  %v8520_v50 = vld [vmem:[#allocation63_spill] sm:$0xff] }
 0x3c9   :  { %v1342_v18 = vadd.f32 %v8520_v50, %v1312_v33  ;;  %v599_v33 = vld [vmem:[%s8199_s14 + $0x18] sm:$0xff]  ;;  %v5055_v50 = vld [vmem:[%s8197_s12] sm:$0xff] }
 0x3ca   :  { %v1314_v58 = vadd.f32 %v1311_v32, %v1296_v61  ;;  %1614 = vmatpush.msrb.mxu1 %v599_v33 }
 0x3cb   :  { %v1372_v24 = vadd.f32 %v1364_v12, %v1342_v18  ;;  %v200_v12 = vld [vmem:[%s8464_s15] sm:$0xff]  ;;  %s5359_s15 = smov [#allocation16]  }
 0x3cc   :  { %v1344_v16 = vadd.f32 %v1338_v54, %v1314_v58  ;;  %1545 = vperm.xlu2 %4776, %v200_v12   ;;  %v602_v58 = vld [vmem:[#allocation11 + $0x10] sm:$0xff] }
 0x3cd   :  { %v1474_v21 = vpop.permute.xlu0 %1473  ;;  %v1402_v51 = vadd.f32 %v1394_v8, %v1372_v24 }
 0x3cf   :  { %v1368_v60 = vpop.permute.xlu1 %1367 }
 0x3d0   :  { %v1374_v35 = vadd.f32 %v1368_v60, %v1344_v16  ;;  %v1442_v54 = vpop.permute.xlu2 %1441  ;;  %v598_v16 = vld [vmem:[%s8199_s14 + $0x10] sm:$0xff] }
 0x3d1   :  { %1615 = vmatpush.msrb.mxu1 %v598_v16 }
 0x3d4   :  { %4780 = vset.pattern.permute.xlu2 %v8524_v22 }
 0x3d5   :  { %v1504_v62 = vpop.permute.xlu0 %1503 }
 0x3d7   :  { %v1398_v5 = vpop.permute.xlu1 %1397 }
 0x3d8   :  { %v1404_v29 = vadd.f32 %v1398_v5, %v1374_v35  ;;  %v1472_v61 = vpop.permute.xlu2 %1471  ;;  %v5053_v35 = vld [vmem:[%s8197_s12 + $0x10] sm:$0xff] }
 0x3da   :  { %v1422_v6 = vadd.f32 %v1419_v7, %v1404_v29 }
 0x3dc   :  { %v1452_v10 = vadd.f32 %v1446_v23, %v1422_v6  ;;  %v5052_v23 = vld [vmem:[%s8197_s12 + $0x18] sm:$0xff] }
 0x3dd   :  { %v6474_v6 = vpop.permute.xlu0 %1550 }
 0x3de   :  { %8527 = vst [vmem:[#allocation38_spill] sm:$0xff] %v6474_v6 }
 0x3df   :  { %v1396_v46 = vpop.permute.xlu1 %1395 }
 0x3e0   :  { %v1403_v57 = vadd.f32 %v1396_v46, %v1373_v59  ;;  %v597_v59 = vld [vmem:[%s8199_s14 + $0x8] sm:$0xff] }
 0x3e1   :  { %1616 = vmatpush.msrb.mxu1 %v597_v59 }
 0x3e2   :  { %v1421_v56 = vadd.f32 %v1418_v20, %v1403_v57  ;;  %v5054_v57 = vld [vmem:[%s8197_s12 + $0x8] sm:$0xff]  ;;  %v1578_v20 = vpop.f32.mrf.mxu0 }
 0x3e4   :  { %v1451_v9 = vadd.f32 %v1444_v36, %v1421_v56  ;;  %v601_v36 = vld [vmem:[#allocation11 + $0x8] sm:$0xff]  ;;  %v4970_v56 = vld [vmem:[#allocation10] ss:$0 sm:$0xff] }
 0x3e6   :  { %v1481_v2 = vadd.f32 %v1474_v21, %v1451_v9 }
 0x3e7   :  { %v1407_v63 = vpop.permute.xlu1 %1406 }
 0x3e8   :  { %v1417_v47 = vmul.f32 %v1407_v63, %v8485_v53  ;;  %v1511_v5 = vadd.f32 %v1504_v62, %v1481_v2  ;;  %v8525_v63 = vld [vmem:[#allocation23_spill] sm:$0xff] }
 0x3ea   :  { %v1420_v60 = vadd.f32 %v1417_v47, %v1402_v51 }
 0x3ec   :  { %v1450_v30 = vadd.f32 %v1442_v54, %v1420_v60  ;;  %v1581_v54 = vpop.f32.mrf.mxu0 }
 0x3ee   :  { %v1480_v48 = vadd.f32 %v1472_v61, %v1450_v30 }
 0x3ef   :  { %v1476_v1 = vpop.permute.xlu1 %1475 }
 0x3f0   :  { %v1482_v46 = vadd.f32 %v1476_v1, %v1452_v10  ;;  %v4971_v10 = vld [vmem:[%s8202_s17] ss:$0 sm:$0xff] }
 0x3f7   :  { %v1506_v39 = vpop.permute.xlu1 %1505 }
 0x3f8   :  { %v1512_v26 = vadd.f32 %v1506_v39, %v1482_v46 }
 0x3fa   :  { %1533 = vmatpush.msra.mxu3 %v1512_v26 }
 0x3fc   :  { %1534 = vmatpush.msra.mxu3 %v1511_v5  ;;  %v4972_v5 = vld [vmem:[%s8201_s16] ss:$0 sm:$0xff] }
 0x3ff   :  { %v1502_v32 = vpop.permute.xlu1 %1501 }
 0x400   :  { %v1510_v8 = vadd.f32 %v1502_v32, %v1480_v48 }
 0x402   :  { %1535 = vmatpush.msra.mxu3 %v1510_v8 }
 0x403   :  { %4571 = vmatmul.msk.f32.vlgmr.msra.gmra.mxu3 %vm1513_vm7, %v198_v31 }
 0x404   :  { %1640 = vmatpush.msrb.mxu3 %v603_v49 }
 0x406   :  { %1641 = vmatpush.msrb.mxu3 %v602_v58 }
 0x408   :  { %1642 = vmatpush.msrb.mxu3 %v601_v36 }
 0x40a   :  { %1643 = vmatpush.msrb.mxu3 %v600_v19 }
 0x40b   :  { %4572 = vmatmul.msk.f32.gmra.mxu3 %vm1513_vm7, %v199_v28 }
 0x40c   :  { %2713 = vmatpush.msra.mxu3 %v599_v33 }
 0x40e   :  { %2714 = vmatpush.msra.mxu3 %v598_v16 }
 0x410   :  { %2715 = vmatpush.msra.mxu3 %v597_v59 }
 0x413   :  { %4577 = vmatmul.msk.f32.vlgmr.msrb.gmra.mxu3 %vm1555_vm6, %v8525_v63 }
 0x41b   :  { %4578 = vmatmul.msk.f32.gmra.mxu3 %vm1555_vm6, %v8495_v13  ;;  %v596_v13 = vld [vmem:[%s8199_s14] sm:$0xff] }
 0x41c   :  { %1617 = vmatpush.msrb.mxu1 %v596_v13  ;;  %2716 = vmatpush.msra.mxu3 %v596_v13 }
 0x41e   :  { %2678 = vmatpush.msra.mxu1 %v5052_v23  ;;  %3768 = vmatpush.msrb.mxu3 %v5052_v23 }
 0x420   :  { %2679 = vmatpush.msra.mxu1 %v5053_v35  ;;  %3769 = vmatpush.msrb.mxu3 %v5053_v35 }
 0x422   :  { %2680 = vmatpush.msra.mxu1 %v5054_v57  ;;  %3770 = vmatpush.msrb.mxu3 %v5054_v57 }
 0x424   :  { %2681 = vmatpush.msra.mxu1 %v5055_v50  ;;  %3771 = vmatpush.msrb.mxu3 %v5055_v50 }
 0x426   :  { %v6471_v18 = vpop.permute.xlu2 %1545 }
 0x427   :  { %8526 = vst [vmem:[#allocation46_spill] sm:$0xff] %v6471_v18 }
 0x486   :  { %v1537_v29 = vpop.f32.mrf.mxu3 }
 0x487   :  { %v1553_v7 = vmul.f32 %v6471_v18, %v1537_v29 }
 0x489   :  { %v1584_v21 = vadd.f32 %v1578_v20, %v1553_v7  ;;  %v1728_v7 = vpop.permute.xlu1 %1727 }
 0x48b   :  { %v1589_v1 = vadd.f32 %v4970_v56, %v1584_v21 }
 0x48d   :  { %v1591_v24 = vmax.f32 %v1589_v1, 0.0 }
 0x48e   :  { %v1540_v9 = vpop.f32.mrf.mxu3 }
 0x48f   :  { %v1554_v47 = vmul.f32 %v6474_v6, %v1540_v9  ;;  %4575 = vmatmul.msk.f32.vlgmr.msrb.gmra.mxu1 %vm1555_vm6, %v1591_v24  ;;  %v8563_v6 = vmov 6  }
 0x491   :  { %v1585_v51 = vadd.f32 %v1581_v54, %v1554_v47 }
 0x493   :  { %v1590_v60 = vadd.f32 %v4970_v56, %v1585_v51 }
 0x495   :  { %v1592_v46 = vmax.f32 %v1590_v60, 0.0 }
 0x496   :  { %v1645_v2 = vpop.f32.mrf.mxu3 }
 0x497   :  { %v1646_v39 = vadd.f32 %v4971_v10, %v1645_v2  ;;  %4576 = vmatmul.msk.f32.gmra.mxu1 %vm1555_vm6, %v1592_v46 }
 0x499   :  { %1693 = vrot.lane.b32.xlu2 %v1646_v39, %s5320_s5 }
 0x49e   :  { %v1648_v26 = vpop.f32.mrf.mxu3 }
 0x49f   :  { %v1649_v62 = vadd.f32 %v4971_v10, %v1648_v26 }
 0x4a1   :  { %1695 = vrot.lane.b32.xlu1 %v1649_v62, %s5320_s5 }
 0x4f3   :  { %v1694_v56 = vpop.permute.xlu2 %1693 }
 0x50c   :  { %v1619_v30 = vpop.f32.mrf.mxu1 }
 0x50d   :  { %v1620_v12 = vadd.f32 %v4972_v5, %v1619_v30 }
 0x50f   :  { %v1651_v61 = vadd.f32 %v1646_v39, %v1620_v12 }
 0x511   :  { %v4579_v48 = vmul.f32 -1.442695, %v1651_v61 }
 0x513   :  { %4980 = vpow2.f32 %v4579_v48  ;;  %v1696_v46 = vpop.permute.xlu1 %1695 }
 0x514   :  { %v1622_v32 = vpop.f32.mrf.mxu1 }
 0x515   :  { %v1623_v8 = vadd.f32 %v4972_v5, %v1622_v32 }
 0x517   :  { %v1652_v31 = vadd.f32 %v1649_v62, %v1623_v8 }
 0x519   :  { %v4981_v49 = vpop.eup %4980  ;;  %v4580_v58 = vmul.f32 -1.442695, %v1652_v31  ;;  %v1726_v31 = vpop.permute.xlu0 %1725 }
 0x51a   :  { %v1659_v36 = vadd.f32 1.0, %v4981_v49 }
 0x51b   :  { %4982 = vpow2.f32 %v4580_v58 }
 0x51c   :  { %4984 = vrcp.f32 %v1659_v36  ;;  %v1672_v59 = vand.u32 2147483648, %v1659_v36  ;;  %v1670_v23 = vand.u32 2147483647, %v1659_v36  ;;  %vm1666_vm9 = vweird.f32 %v1659_v36 }
 0x51e   :  { %v1673_v50 = vor.u32 1.1754944e-38, %v1672_v59  ;;  %vm1671_vm11 = vcmp.eq.f32.partialorder %v1670_v23, 8.507059e+37  ;;  %v5057_v23 = vld [vmem:[%s8417_s9 + $0x8] sm:$0xff] }
 0x521   :  { %v4983_v19 = vpop.eup %4982 }
 0x522   :  { %v4985_v28 = vpop.eup %4984  ;;  %v1660_v63 = vadd.f32 1.0, %v4983_v19 }
 0x523   :  { %v1662_v33 = vmul.f32 %v4985_v28, %v1659_v36  ;;  %vm1667_vm8 = vweird.f32 %v4985_v28 }
 0x524   :  { %4986 = vrcp.f32 %v1660_v63  ;;  %vm1668_vm10 = vmor %vm1666_vm9, %vm1667_vm8  ;;  %v1687_v9 = vand.u32 2147483648, %v1660_v63  ;;  %v1685_v54 = vand.u32 2147483647, %v1660_v63  ;;  %vm1681_vm13 = vweird.f32 %v1660_v63 }
 0x525   :  { %v1663_v16 = vsub.f32 1.0, %v1662_v33 }
 0x526   :  { %v1688_v10 = vor.u32 1.1754944e-38, %v1687_v9  ;;  %vm1686_vm15 = vcmp.eq.f32.partialorder %v1685_v54, 8.507059e+37  ;;  %v8541_v9 = vmov 9   ;;  %v8543_v54 = vmov 18  }
 0x527   :  { %v1664_v13 = vmul.f32 %v4985_v28, %v1663_v16 }
 0x529   :  { %v1665_v35 = vadd.f32 %v4985_v28, %v1664_v13  ;;  %v5056_v13 = vld [vmem:[%s8417_s9] sm:$0xff] }
 0x52a   :  { %v4987_v57 = vpop.eup %4986 }
 0x52b   :  { %v1669_v20 = vsel %vm1668_vm10, %v4985_v28, %v1665_v35  ;;  %v1677_v29 = vmul.f32 %v4987_v57, %v1660_v63  ;;  %vm1682_vm12 = vweird.f32 %v4987_v57  ;;  %v5058_v35 = vld [vmem:[%s8417_s9 + $0x10] sm:$0xff] }
 0x52c   :  { %v1674_v21 = vsel %vm1671_vm11, %v1673_v50, %v1669_v20  ;;  %vm1683_vm14 = vmor %vm1681_vm13, %vm1682_vm12  ;;  %v8533_v50 = vmov 13   ;;  %v8534_v20 = vmov 7  }
 0x52d   :  { %v1699_v1 = vmul.f32 %v1694_v56, %v1674_v21  ;;  %v1678_v24 = vsub.f32 1.0, %v1677_v29  ;;  %v1713_v32 = vsub.f32 1.0, %v1674_v21  ;;  %v1731_v36 = vmul.f32 %v1726_v31, %v1674_v21 }
 0x52e   :  { %v8535_v29 = vmov 2   ;;  %v8537_v56 = vmov 10   ;;  %v8538_v21 = vmov 3  }
 0x52f   :  { %1703 = vrot.lane.b32.xlu2 %v1699_v1, %s5320_s5  ;;  %v1679_v47 = vmul.f32 %v4987_v57, %v1678_v24  ;;  %v8539_v1 = vmov 19   ;;  %v8540_v24 = vmov 17  }
 0x531   :  { %v1680_v51 = vadd.f32 %v4987_v57, %v1679_v47  ;;  %v8542_v47 = vmov 22  }
 0x533   :  { %v1684_v60 = vsel %vm1683_vm14, %v4987_v57, %v1680_v51  ;;  %v8544_v51 = vmov 11  }
 0x534   :  { %v1689_v2 = vsel %vm1686_vm15, %v1688_v10, %v1684_v60  ;;  %v8545_v10 = vmov 26   ;;  %v8546_v60 = vmov 21  }
 0x535   :  { %v1700_v39 = vmul.f32 %v1696_v46, %v1689_v2  ;;  %v1732_v63 = vmul.f32 %v1728_v7, %v1689_v2  ;;  %v8536_v7 = vmov 15   ;;  %v8547_v46 = vmov 14  }
 0x537   :  { %1705 = vrot.lane.b32.xlu1 %v1700_v39, %s5320_s5  ;;  %v8549_v39 = vmov 23  }
 0x589   :  { %v1704_v26 = vpop.permute.xlu2 %1703 }
 0x58a   :  { %v1709_v62 = vadd.f32 %v1704_v26, %v1620_v12  ;;  %v1714_v12 = vsub.f32 1.0, %v1689_v2  ;;  %v8548_v2 = vmov 27   ;;  %v8550_v26 = vmov 0  }
 0x58c   :  { %4988 = vtanh.f32 %v1709_v62  ;;  %v8551_v62 = vmov 12  }
 0x592   :  { %v4989_v5 = vpop.eup %4988 }
 0x593   :  { %1717 = vrot.lane.b32.xlu2 %v4989_v5, %s5356_s10  ;;  %v8552_v5 = vmov 4  }
 0x5a9   :  { %v1706_v30 = vpop.permute.xlu1 %1705 }
 0x5aa   :  { %v1710_v61 = vadd.f32 %v1706_v30, %v1623_v8  ;;  %v8553_v30 = vmov 25  }
 0x5ac   :  { %4990 = vtanh.f32 %v1710_v61  ;;  %v8554_v61 = vmov 16  }
 0x5b2   :  { %v4991_v48 = vpop.eup %4990 }
 0x5b3   :  { %1719 = vrot.lane.b32.xlu0 %v4991_v48, %s5356_s10  ;;  %v8555_v48 = vmov 29  }
 0x5ed   :  { %v1718_v49 = vpop.permute.xlu2 %1717 }
 0x5ee   :  { %v1723_v58 = vmul.f32 %v1718_v49, %v1713_v32  ;;  %v8556_v32 = vmov 8   ;;  %v8558_v49 = vmov 30  }
 0x5f0   :  { %v6491_v19 = vadd.f32 %v1731_v36, %v1723_v58  ;;  %v8559_v36 = vmov 31  }
 0x5f2   :  { %8528 = vst [vmem:[#allocation40_spill] sm:$0xff] %v6491_v19  ;;  %1737 = vrot.lane.b32.xlu2 %v6491_v19, %s5356_s10 }
 0x625   :  { %v1720_v28 = vpop.permute.xlu0 %1719 }
 0x626   :  { %v1724_v33 = vmul.f32 %v1720_v28, %v1714_v12  ;;  %v8560_v28 = vmov 20  }
 0x628   :  { %v6495_v16 = vadd.f32 %v1732_v63, %v1724_v33  ;;  %v8561_v33 = vmov 24  }
 0x62a   :  { %8529 = vst [vmem:[#allocation24_spill] sm:$0xff] %v6495_v16  ;;  %1739 = vrot.lane.b32.xlu1 %v6495_v16, %s5356_s10 }
 0x64c   :  { %v6499_v8 = vpop.permute.xlu2 %1737 }
 0x64d   :  { %8530 = vst [vmem:[#allocation35_spill] sm:$0xff] %v6499_v8  ;;  %4587 = vmatmul.msk.f32.vlgmr.msra.gmra.mxu1 %vm1555_vm6, %v6499_v8 }
 0x69c   :  { %v6503_v59 = vpop.permute.xlu1 %1739 }
 0x69d   :  { %8531 = vst [vmem:[#allocation36_spill] sm:$0xff] %v6503_v59  ;;  %4581 = vmatpush.msk.msra.mxu0 %vm616_vm4, %v6503_v59  ;;  %4588 = vmatmul.msk.f32.gmra.mxu1 %vm1555_vm6, %v6503_v59 }
 0x69f   :  { %1759 = vmatpush.msra.mxu0 %v6499_v8 }
 0x6a0   :  { %4582 = vmatmul.msk.f32.vlgmr.msra.gmra.mxu0 %vm606_vm5, %v5056_v13 }
 0x6a8   :  { %4583 = vmatmul.msk.f32.gmra.mxu0 %vm606_vm5, %v5057_v23 }
 0x6b0   :  { %4584 = vmatmul.msk.f32.gmra.mxu0 %vm606_vm5, %v5058_v35  ;;  %v8562_v35 = vmov 1  }
 0x71d   :  { %v6522_v57 = vpop.f32.mrf.mxu0 }
 0x71e   :  { %8532 = vst [vmem:[#allocation44_spill] sm:$0xff] %v6522_v57  ;;  %1930 = vperm.xlu0 %4781, %v6522_v57   ;;  %1900 = vperm.xlu2 %4780, %v6522_v57  }
 0x71f   :  { %1792 = vperm.xlu1 %4777, %v6522_v57  }
 0x725   :  { %v6575_v31 = vpop.f32.mrf.mxu0 }
 0x726   :  { %4786 = vset.pattern.permute.xlu0 %v8533_v50  ;;  %4782 = vset.pattern.permute.xlu2 %v8534_v20  ;;  %8557 = vst [vmem:[#allocation51_spill] sm:$0xff] %v6575_v31 }
 0x727   :  { %4778 = vset.pattern.permute.xlu1 %v8535_v29  ;;  %2116 = vperm.xlu0 %4786, %v6522_v57  }
 0x728   :  { %1960 = vperm.xlu2 %4782, %v6522_v57   ;;  %1822 = vperm.xlu1 %4778, %v6522_v57  }
 0x72d   :  { %v6642_v43 = vpop.f32.mrf.mxu0 }
 0x72f   :  { %4788 = vset.pattern.permute.xlu0 %v8536_v7 }
 0x730   :  { %4784 = vset.pattern.permute.xlu2 %v8537_v56  ;;  %4779 = vset.pattern.permute.xlu1 %v8538_v21 }
 0x731   :  { %2176 = vperm.xlu0 %4788, %v6522_v57   ;;  %2038 = vperm.xlu2 %4784, %v6522_v57  }
 0x732   :  { %1852 = vperm.xlu1 %4779, %v6522_v57  }
 0x739   :  { %4791 = vset.pattern.permute.xlu0 %v8539_v1  ;;  %4789 = vset.pattern.permute.xlu2 %v8540_v24 }
 0x73a   :  { %4783 = vset.pattern.permute.xlu1 %v8541_v9  ;;  %2284 = vperm.xlu0 %4791, %v6522_v57  }
 0x73b   :  { %2224 = vperm.xlu2 %4789, %v6522_v57   ;;  %2008 = vperm.xlu1 %4783, %v6522_v57  }
 0x742   :  { %4794 = vset.pattern.permute.xlu0 %v8542_v47 }
 0x743   :  { %4790 = vset.pattern.permute.xlu2 %v8543_v54  ;;  %4785 = vset.pattern.permute.xlu1 %v8544_v51 }
 0x744   :  { %2362 = vperm.xlu0 %4794, %v6522_v57   ;;  %2254 = vperm.xlu2 %4790, %v6522_v57  }
 0x745   :  { %2068 = vperm.xlu1 %4785, %v6522_v57  }
 0x74c   :  { %4798 = vset.pattern.permute.xlu0 %v8545_v10  ;;  %4793 = vset.pattern.permute.xlu2 %v8546_v60 }
 0x74d   :  { %4787 = vset.pattern.permute.xlu1 %v8547_v46  ;;  %2470 = vperm.xlu0 %4798, %v6522_v57  }
 0x74e   :  { %2332 = vperm.xlu2 %4793, %v6522_v57   ;;  %2146 = vperm.xlu1 %4787, %v6522_v57  }
 0x755   :  { %4799 = vset.pattern.permute.xlu0 %v8548_v2 }
 0x756   :  { %4795 = vset.pattern.permute.xlu2 %v8549_v39  ;;  %4792 = vset.pattern.permute.xlu1 %v8550_v26 }
 0x757   :  { %2500 = vperm.xlu0 %4799, %v6522_v57   ;;  %2392 = vperm.xlu2 %4795, %v6522_v57  }
 0x758   :  { %1772 = vperm.xlu1 %4792, %v6522_v57  }
 0x75f   :  { %4804 = vset.pattern.permute.xlu0 %v8551_v62  ;;  %4796 = vset.pattern.permute.xlu2 %v8552_v5 }
 0x760   :  { %4797 = vset.pattern.permute.xlu1 %v8553_v30  ;;  %2098 = vperm.xlu0 %4804, %v6522_v57  }
 0x761   :  { %1882 = vperm.xlu2 %4796, %v6522_v57   ;;  %2440 = vperm.xlu1 %4797, %v6522_v57  }
 0x768   :  { %4805 = vset.pattern.permute.xlu0 %v8554_v61 }
 0x769   :  { %4801 = vset.pattern.permute.xlu2 %v8555_v48  ;;  %4800 = vset.pattern.permute.xlu1 %v8556_v32 }
 0x76a   :  { %2206 = vperm.xlu0 %4805, %v6522_v57   ;;  %2548 = vperm.xlu2 %4801, %v6522_v57  }
 0x76b   :  { %1990 = vperm.xlu1 %4800, %v6522_v57  }
 0x772   :  { %4811 = vset.pattern.permute.xlu0 %v8524_v22  ;;  %4809 = vset.pattern.permute.xlu2 %v8535_v29 }
 0x773   :  { %4802 = vset.pattern.permute.xlu1 %v8558_v49  ;;  %1904 = vperm.xlu0 %4811, %v6575_v31  }
 0x774   :  { %2578 = vperm.xlu1 %4802, %v6522_v57   ;;  %1826 = vperm.xlu2 %4809, %v6575_v31  }
 0x778   :  { %v6583_v58 = vpop.permute.xlu2 %1900 }
 0x77b   :  { %4816 = vset.pattern.permute.xlu0 %v8544_v51 }
 0x77c   :  { %4803 = vset.pattern.permute.xlu1 %v8559_v36  ;;  %4810 = vset.pattern.permute.xlu2 %v8538_v21 }
 0x77d   :  { %2608 = vperm.xlu1 %4803, %v6522_v57   ;;  %2072 = vperm.xlu0 %4816, %v6575_v31  }
 0x77e   :  { %1856 = vperm.xlu2 %4810, %v6575_v31  }
 0x782   :  { %v6591_v12 = vpop.permute.xlu2 %1960 }
 0x785   :  { %4806 = vset.pattern.permute.xlu1 %v8560_v28  ;;  %4821 = vset.pattern.permute.xlu0 %v8543_v54 }
 0x786   :  { %4814 = vset.pattern.permute.xlu2 %v8541_v9  ;;  %2314 = vperm.xlu1 %4806, %v6522_v57  }
 0x787   :  { %2258 = vperm.xlu0 %4821, %v6575_v31   ;;  %2012 = vperm.xlu2 %4814, %v6575_v31  }
 0x78b   :  { %v6599_v63 = vpop.permute.xlu2 %2038 }
 0x78e   :  { %4807 = vset.pattern.permute.xlu1 %v8561_v33 }
 0x78f   :  { %4825 = vset.pattern.permute.xlu0 %v8542_v47  ;;  %4815 = vset.pattern.permute.xlu2 %v8537_v56 }
 0x790   :  { %2422 = vperm.xlu1 %4807, %v6522_v57   ;;  %2366 = vperm.xlu0 %4825, %v6575_v31   ;;  %v6663_v57 = vpop.permute.xlu0 %1930 }
 0x791   :  { %2042 = vperm.xlu2 %4815, %v6575_v31   ;;  %v6607_v13 = vpop.permute.xlu1 %1792 }
 0x795   :  { %v6609_v23 = vpop.permute.xlu2 %2224 }
 0x798   :  { %4808 = vset.pattern.permute.xlu1 %v8562_v35  ;;  %4832 = vset.pattern.permute.xlu0 %v8555_v48 }
 0x799   :  { %4819 = vset.pattern.permute.xlu2 %v8536_v7  ;;  %2552 = vperm.xlu0 %4832, %v6575_v31   ;;  %v6675_v25 = vpop.permute.xlu0 %2116 }
 0x79a   :  { %2180 = vperm.xlu2 %4819, %v6575_v31   ;;  %1796 = vperm.xlu1 %4808, %v6575_v31   ;;  %v6617_v16 = vpop.permute.xlu1 %1822 }
 0x79e   :  { %v6619_v19 = vpop.permute.xlu2 %2254 }
 0x7a1   :  { %4833 = vset.pattern.permute.xlu0 %v8558_v49 }
 0x7a2   :  { %4820 = vset.pattern.permute.xlu2 %v8540_v24  ;;  %4812 = vset.pattern.permute.xlu1 %v8563_v6 }
 0x7a3   :  { %2582 = vperm.xlu0 %4833, %v6575_v31   ;;  %2228 = vperm.xlu2 %4820, %v6575_v31  }
 0x7a4   :  { %1934 = vperm.xlu1 %4812, %v6575_v31   ;;  %v6627_v18 = vpop.permute.xlu1 %1852 }
 0x7a8   :  { %v6629_v59 = vpop.permute.xlu2 %2332 }
 0x7a9   :  { %8564 = vst [vmem:[#allocation60_spill] sm:$0xff] %v6629_v59 }
 0x7ab   :  { %4835 = vset.pattern.permute.xlu0 %v8551_v62  ;;  %4823 = vset.pattern.permute.xlu2 %v8550_v26 }
 0x7ac   :  { %4813 = vset.pattern.permute.xlu1 %v8534_v20  ;;  %2102 = vperm.xlu0 %4835, %v6575_v31  }
 0x7ad   :  { %1777 = vperm.xlu2 %4823, %v6575_v31   ;;  %1964 = vperm.xlu1 %4813, %v6575_v31   ;;  %v6637_v8 = vpop.permute.xlu1 %2008 }
 0x7b1   :  { %v6639_v42 = vpop.permute.xlu2 %2392 }
 0x7b4   :  { %4839 = vset.pattern.permute.xlu0 %v8562_v35 }
 0x7b5   :  { %4824 = vset.pattern.permute.xlu2 %v8546_v60  ;;  %4817 = vset.pattern.permute.xlu1 %v8533_v50 }
 0x7b6   :  { %2336 = vperm.xlu2 %4824, %v6575_v31   ;;  %2120 = vperm.xlu1 %4817, %v6575_v31  }
 0x7b7   :  { %1800 = vperm.xlu0 %4839, %v6642_v43   ;;  %v6649_v53 = vpop.permute.xlu1 %2068 }
 0x7bb   :  { %v6651_v17 = vpop.permute.xlu2 %1882 }
 0x7bc   :  { %8565 = vst [vmem:[#allocation34_spill] sm:$0xff] %v6651_v17 }
 0x7be   :  { %4828 = vset.pattern.permute.xlu2 %v8553_v30  ;;  %4818 = vset.pattern.permute.xlu1 %v8547_v46 }
 0x7bf   :  { %4841 = vset.pattern.permute.xlu0 %v8538_v21  ;;  %2444 = vperm.xlu2 %4828, %v6575_v31  }
 0x7c0   :  { %2150 = vperm.xlu1 %4818, %v6575_v31   ;;  %1860 = vperm.xlu0 %4841, %v6642_v43   ;;  %v6659_v35 = vpop.permute.xlu1 %2146 }
 0x7c4   :  { %v6661_v11 = vpop.permute.xlu2 %2548 }
 0x7c5   :  { %8566 = vst [vmem:[#allocation52_spill] sm:$0xff] %v6661_v11 }
 0x7c7   :  { %4829 = vset.pattern.permute.xlu2 %v8545_v10 }
 0x7c8   :  { %4822 = vset.pattern.permute.xlu1 %v8539_v1  ;;  %4846 = vset.pattern.permute.xlu0 %v8537_v56 }
 0x7c9   :  { %2474 = vperm.xlu2 %4829, %v6575_v31   ;;  %2288 = vperm.xlu1 %4822, %v6575_v31  }
 0x7ca   :  { %2046 = vperm.xlu0 %4846, %v6642_v43   ;;  %v6671_v21 = vpop.permute.xlu1 %1772 }
 0x7cb   :  { %8567 = vst [vmem:[#allocation42_spill] sm:$0xff] %v6671_v21  ;;  %v6687_v21 = vpop.permute.xlu0 %2176 }
 0x7ce   :  { %v6673_v17 = vpop.permute.xlu2 %1826 }
 0x7d1   :  { %4831 = vset.pattern.permute.xlu2 %v8556_v32  ;;  %4826 = vset.pattern.permute.xlu1 %v8549_v39 }
 0x7d2   :  { %4856 = vset.pattern.permute.xlu0 %v8542_v47  ;;  %1994 = vperm.xlu2 %4831, %v6575_v31  }
 0x7d3   :  { %2396 = vperm.xlu1 %4826, %v6575_v31   ;;  %2370 = vperm.xlu0 %4856, %v6642_v43   ;;  %v6683_v56 = vpop.permute.xlu1 %2440 }
 0x7d4   :  { %8568 = vst [vmem:[#allocation33_spill] sm:$0xff] %v6683_v56  ;;  %v2285_v56 = vpop.permute.xlu0 %2284 }
 0x7d8   :  { %v6685_v11 = vpop.permute.xlu2 %1856 }
 0x7da   :  { %4834 = vset.pattern.permute.xlu2 %v8559_v36 }
 0x7db   :  { %4827 = vset.pattern.permute.xlu1 %v8552_v5  ;;  %4859 = vset.pattern.permute.xlu0 %v8553_v30 }
 0x7dc   :  { %2612 = vperm.xlu2 %4834, %v6575_v31   ;;  %1886 = vperm.xlu1 %4827, %v6575_v31  }
 0x7dd   :  { %2448 = vperm.xlu0 %4859, %v6642_v43   ;;  %v6695_v47 = vpop.permute.xlu1 %1990 }
 0x7de   :  { %8569 = vst [vmem:[#allocation56_spill] sm:$0xff] %v6695_v47  ;;  %v2363_v47 = vpop.permute.xlu0 %2362 }
 0x7e1   :  { %v6697_v55 = vpop.permute.xlu2 %2012 }
 0x7e2   :  { %8570 = vst [vmem:[#allocation59_spill] sm:$0xff] %v6697_v55 }
 0x7e4   :  { %4837 = vset.pattern.permute.xlu2 %v8560_v28  ;;  %4830 = vset.pattern.permute.xlu1 %v8548_v2 }
 0x7e5   :  { %4860 = vset.pattern.permute.xlu0 %v8545_v10  ;;  %2318 = vperm.xlu2 %4837, %v6575_v31  }
 0x7e6   :  { %2504 = vperm.xlu1 %4830, %v6575_v31   ;;  %2478 = vperm.xlu0 %4860, %v6642_v43   ;;  %v6705_v30 = vpop.permute.xlu1 %2578 }
 0x7e7   :  { %8571 = vst [vmem:[#allocation62_spill] sm:$0xff] %v6705_v30  ;;  %v6719_v30 = vpop.permute.xlu0 %2470 }
 0x7eb   :  { %v6707_v59 = vpop.permute.xlu2 %2042 }
 0x7ed   :  { %4838 = vset.pattern.permute.xlu2 %v8561_v33 }
 0x7ee   :  { %4836 = vset.pattern.permute.xlu1 %v8554_v61  ;;  %4861 = vset.pattern.permute.xlu0 %v8548_v2 }
 0x7ef   :  { %2426 = vperm.xlu2 %4838, %v6575_v31   ;;  %2210 = vperm.xlu1 %4836, %v6575_v31   ;;  %v6714_v10 = vpop.permute.xlu1 %2608  ;;  %v2265_v31 = vmul.f32 %v6619_v19, %v5893_v34 }
 0x7f0   :  { %8572 = vst [vmem:[#allocation37_spill] sm:$0xff] %v6714_v10  ;;  %2508 = vperm.xlu0 %4861, %v6642_v43  }
 0x7f4   :  { %v2181_v55 = vpop.permute.xlu2 %2180 }
 0x7f7   :  { %4840 = vset.pattern.permute.xlu2 %v8535_v29  ;;  %4843 = vset.pattern.permute.xlu1 %v8563_v6 }
 0x7f8   :  { %4866 = vset.pattern.permute.xlu0 %v8551_v62  ;;  %1938 = vperm.xlu1 %4843, %v6642_v43   ;;  %v6723_v2 = vpop.permute.xlu1 %2314  ;;  %v6734_v62 = vpop.permute.xlu0 %2500 }
 0x7f9   :  { %8573 = vst [vmem:[#allocation53_spill] sm:$0xff] %v6723_v2  ;;  %1830 = vperm.xlu2 %4840, %v6642_v43   ;;  %2106 = vperm.xlu0 %4866, %v6642_v43   ;;  %v2295_v2 = vmul.f32 %v2285_v56, %v5893_v34 }
 0x7fd   :  { %v6727_v10 = vpop.permute.xlu2 %2228 }
 0x800   :  { %4845 = vset.pattern.permute.xlu1 %v8541_v9  ;;  %v6749_v19 = vpop.permute.xlu0 %2098 }
 0x801   :  { %4842 = vset.pattern.permute.xlu2 %v8524_v22  ;;  %2271 = vrot.lane.b32.xlu0 %v2265_v31, %s5320_s5 }
 0x802   :  { %2016 = vperm.xlu1 %4845, %v6642_v43   ;;  %1908 = vperm.xlu2 %4842, %v6642_v43   ;;  %v6738_v6 = vpop.permute.xlu1 %2422 }
 0x803   :  { %8574 = vst [vmem:[#allocation41_spill] sm:$0xff] %v6738_v6  ;;  %4875 = vset.pattern.permute.xlu0 %v8524_v22  ;;  %v2373_v22 = vmul.f32 %v2363_v47, %v8508_v4 }
 0x807   :  { %v6742_v29 = vpop.permute.xlu2 %1777 }
 0x808   :  { %v6759_v56 = vpop.permute.xlu0 %2206 }
 0x809   :  { %2301 = vrot.lane.b32.xlu0 %v2295_v2, %s5353_s27  ;;  %8575 = vst [vmem:[#allocation57_spill] sm:$0xff] %v6759_v56 }
 0x80a   :  { %4847 = vset.pattern.permute.xlu1 %v8544_v51  ;;  %4844 = vset.pattern.permute.xlu2 %v8534_v20  ;;  %v2403_v51 = vmul.f32 %v6639_v42, %v8508_v4 }
 0x80b   :  { %2076 = vperm.xlu1 %4847, %v6642_v43   ;;  %1968 = vperm.xlu2 %4844, %v6642_v43  }
 0x80c   :  { %v6751_v31 = vpop.permute.xlu1 %1796 }
 0x810   :  { %v2337_v9 = vpop.permute.xlu2 %2336  ;;  %v6774_v20 = vpop.permute.xlu0 %1904 }
 0x811   :  { %2379 = vrot.lane.b32.xlu0 %v2373_v22, %s5320_s5  ;;  %v8576_v22 = vld [vmem:[#allocation26_spill] sm:$0xff] }
 0x813   :  { %4851 = vset.pattern.permute.xlu1 %v8540_v24  ;;  %4848 = vset.pattern.permute.xlu2 %v8533_v50  ;;  %v1834_v24 = vmul.f32 %v6673_v17, %v8576_v22 }
 0x814   :  { %2232 = vperm.xlu1 %4851, %v6642_v43   ;;  %2124 = vperm.xlu2 %4848, %v6642_v43  }
 0x816   :  { %v6761_v2 = vpop.permute.xlu1 %1934 }
 0x818   :  { %v6786_v17 = vpop.permute.xlu0 %2072 }
 0x819   :  { %2409 = vrot.lane.b32.xlu0 %v2403_v51, %s5353_s27  ;;  %v2445_v47 = vpop.permute.xlu2 %2444  ;;  %v1864_v51 = vmul.f32 %v6685_v11, %v8576_v22 }
 0x81c   :  { %4852 = vset.pattern.permute.xlu1 %v8543_v54  ;;  %4849 = vset.pattern.permute.xlu2 %v8547_v46 }
 0x81d   :  { %2262 = vperm.xlu1 %4852, %v6642_v43   ;;  %2154 = vperm.xlu2 %4849, %v6642_v43  }
 0x81f   :  { %v6772_v50 = vpop.permute.xlu1 %1964 }
 0x821   :  { %1841 = vrot.lane.b32.xlu0 %v1834_v24, %s5320_s5  ;;  %v2188_v24 = vmul.f32 %v2181_v55, %v5943_v14 }
 0x823   :  { %v2475_v42 = vpop.permute.xlu2 %2474 }
 0x825   :  { %4853 = vset.pattern.permute.xlu1 %v8539_v1  ;;  %4850 = vset.pattern.permute.xlu2 %v8536_v7  ;;  %v2259_v1 = vpop.permute.xlu0 %2258 }
 0x826   :  { %2292 = vperm.xlu1 %4853, %v6642_v43   ;;  %2184 = vperm.xlu2 %4850, %v6642_v43   ;;  %v2266_v7 = vmul.f32 %v2259_v1, %v5958_v37 }
 0x828   :  { %v6783_v46 = vpop.permute.xlu1 %2120 }
 0x829   :  { %1871 = vrot.lane.b32.xlu0 %v1864_v51, %s5353_s27 }
 0x82c   :  { %v6788_v54 = vpop.permute.xlu2 %1994 }
 0x82d   :  { %v2367_v1 = vpop.permute.xlu0 %2366 }
 0x82e   :  { %4855 = vset.pattern.permute.xlu1 %v8546_v60  ;;  %4854 = vset.pattern.permute.xlu2 %v8550_v26  ;;  %v2344_v60 = vmul.f32 %v2337_v9, %v8502_v0 }
 0x82f   :  { %2340 = vperm.xlu1 %4855, %v6642_v43   ;;  %1782 = vperm.xlu2 %4854, %v6642_v43  }
 0x831   :  { %2195 = vrot.lane.b32.xlu0 %v2188_v24, %s5353_s27 }
 0x832   :  { %v6796_v11 = vpop.permute.xlu1 %2150 }
 0x833   :  { %v2158_v6 = vmul.f32 %v6796_v11, %v5943_v14 }
 0x836   :  { %v6798_v51 = vpop.permute.xlu2 %2612 }
 0x837   :  { %4857 = vset.pattern.permute.xlu1 %v8549_v39  ;;  %4858 = vset.pattern.permute.xlu2 %v8552_v5  ;;  %v1911_v39 = vmul.f32 %v6583_v58, %v5876_v3 }
 0x838   :  { %2400 = vperm.xlu1 %4857, %v6642_v43   ;;  %1890 = vperm.xlu2 %4858, %v6642_v43  }
 0x839   :  { %2273 = vrot.lane.b32.xlu0 %v2266_v7, %s5320_s5  ;;  %v2374_v7 = vmul.f32 %v2367_v1, %v8502_v0 }
 0x83b   :  { %v6806_v55 = vpop.permute.xlu1 %2288 }
 0x83f   :  { %v6808_v24 = vpop.permute.xlu2 %2318 }
 0x840   :  { %8577 = vst [vmem:[#allocation65_spill] sm:$0xff] %v6808_v24  ;;  %4863 = vset.pattern.permute.xlu1 %v8555_v48  ;;  %4862 = vset.pattern.permute.xlu2 %v8556_v32 }
 0x841   :  { %2556 = vperm.xlu1 %4863, %v6642_v43   ;;  %1998 = vperm.xlu2 %4862, %v6642_v43  }
 0x842   :  { %2351 = vrot.lane.b32.xlu0 %v2344_v60, %s5356_s10  ;;  %v2452_v60 = vmul.f32 %v2445_v47, %v8512_v40  ;;  %v8579_v47 = vmov 28  }
 0x845   :  { %v6816_v5 = vpop.permute.xlu1 %2396 }
 0x849   :  { %4864 = vset.pattern.permute.xlu1 %v8558_v49  ;;  %4868 = vset.pattern.permute.xlu2 %v8560_v28  ;;  %v6821_v9 = vpop.permute.xlu2 %2426 }
 0x84a   :  { %8578 = vst [vmem:[#allocation61_spill] sm:$0xff] %v6821_v9  ;;  %2381 = vrot.lane.b32.xlu0 %v2374_v7, %s5320_s5  ;;  %2586 = vperm.xlu1 %4864, %v6642_v43   ;;  %v2482_v7 = vmul.f32 %v2475_v42, %v8512_v40 }
 0x84b   :  { %2322 = vperm.xlu2 %4868, %v6642_v43  }
 0x84e   :  { %v6826_v32 = vpop.permute.xlu1 %1886 }
 0x852   :  { %2459 = vrot.lane.b32.xlu0 %v2452_v60, %s5356_s10  ;;  %4865 = vset.pattern.permute.xlu1 %v8559_v36  ;;  %v8580_v36 = vld [vmem:[#allocation47_spill] sm:$0xff] }
 0x853   :  { %4869 = vset.pattern.permute.xlu2 %v8561_v33  ;;  %2616 = vperm.xlu1 %4865, %v6642_v43   ;;  %v6833_v1 = vpop.permute.xlu2 %1830  ;;  %v1863_v49 = vmul.f32 %v6627_v18, %v8580_v36  ;;  %v1803_v42 = vmul.f32 %v6607_v13, %v8580_v36  ;;  %v1833_v48 = vmul.f32 %v6617_v16, %v8580_v36 }
 0x854   :  { %2430 = vperm.xlu2 %4869, %v6642_v43   ;;  %v1941_v13 = vmul.f32 %v6663_v57, %v5876_v3 }
 0x858   :  { %v6837_v28 = vpop.permute.xlu1 %2504 }
 0x85a   :  { %2489 = vrot.lane.b32.xlu0 %v2482_v7, %s5320_s5 }
 0x85b   :  { %4867 = vset.pattern.permute.xlu1 %v8554_v61 }
 0x85c   :  { %4870 = vset.pattern.permute.xlu2 %v8579_v47  ;;  %2214 = vperm.xlu1 %4867, %v6642_v43   ;;  %v6843_v60 = vpop.permute.xlu2 %1908 }
 0x85d   :  { %2538 = vperm.xlu2 %4870, %v6642_v43  }
 0x861   :  { %v6846_v33 = vpop.permute.xlu1 %2210 }
 0x864   :  { %1869 = vrot.lane.b32.xlu1 %v1863_v49, %s5353_s27  ;;  %v2049_v49 = vmul.f32 %v6599_v63, %v6015_v45 }
 0x865   :  { %1809 = vrot.lane.b32.xlu2 %v1803_v42, %s5356_s10  ;;  %v6854_v7 = vpop.permute.xlu2 %1968  ;;  %4871 = vset.pattern.permute.xlu1 %v8579_v47 }
 0x86a   :  { %v6859_v43 = vpop.permute.xlu1 %1938 }
 0x86c   :  { %1917 = vrot.lane.b32.xlu1 %v1911_v39, %s5356_s10  ;;  %v2127_v39 = vmul.f32 %v6675_v25, %v6036_v15  ;;  %v2019_v25 = vmul.f32 %v6637_v8, %v6015_v45  ;;  %v2079_v8 = vmul.f32 %v6649_v53, %v6015_v45  ;;  %v2157_v53 = vmul.f32 %v6659_v35, %v6036_v15 }
 0x86d   :  { %1839 = vrot.lane.b32.xlu2 %v1833_v48, %s5320_s5  ;;  %v1971_v48 = vmul.f32 %v6591_v12, %v5876_v3 }
 0x86e   :  { %v6865_v18 = vpop.permute.xlu2 %2124 }
 0x874   :  { %2055 = vrot.lane.b32.xlu1 %v2049_v49, %s5320_s5  ;;  %v6872_v58 = vpop.permute.xlu1 %2016 }
 0x875   :  { %1947 = vrot.lane.b32.xlu2 %v1941_v13, %s5320_s5  ;;  %v1912_v13 = vmul.f32 %v6774_v20, %v5625_v44  ;;  %v1972_v20 = vmul.f32 %v6772_v50, %v5625_v44 }
 0x877   :  { %v2155_v42 = vpop.permute.xlu2 %2154 }
 0x878   :  { %v2159_v16 = vmul.f32 %v2155_v42, %v6083_v27  ;;  %v2553_v42 = vpop.permute.xlu0 %2552 }
 0x87a   :  { %2167 = vrot.lane.b32.xlu0 %v2159_v16, %s5320_s5  ;;  %v2481_v16 = vmul.f32 %v6719_v30, %v8518_v52 }
 0x87c   :  { %2133 = vrot.lane.b32.xlu1 %v2127_v39, %s5356_s10 }
 0x87d   :  { %1977 = vrot.lane.b32.xlu2 %v1971_v48, %s5353_s27  ;;  %v6883_v57 = vpop.permute.xlu1 %2076 }
 0x880   :  { %v2185_v63 = vpop.permute.xlu2 %2184  ;;  %v2583_v30 = vpop.permute.xlu0 %2582 }
 0x881   :  { %v2189_v49 = vmul.f32 %v2185_v63, %v6083_v27  ;;  %v2511_v63 = vmul.f32 %v6734_v62, %v8518_v52  ;;  %v2296_v62 = vmul.f32 %v6806_v55, %v5958_v37  ;;  %v2590_v35 = vmul.f32 %v2583_v30, %v8521_v41 }
 0x882   :  { %v2404_v55 = vmul.f32 %v6816_v5, %v8502_v0  ;;  %v2620_v30 = vmul.f32 %v6798_v51, %v8521_v41  ;;  %v8583_v5 = vld [vmem:[#allocation60_spill] sm:$0xff]  ;;  %v8585_v51 = vld [vmem:[#allocation33_spill] sm:$0xff] }
 0x883   :  { %2197 = vrot.lane.b32.xlu0 %v2189_v49, %s5353_s27  ;;  %v2050_v49 = vmul.f32 %v6707_v59, %v5613_v38  ;;  %v2187_v59 = vmul.f32 %v6687_v21, %v6036_v15  ;;  %v2235_v21 = vmul.f32 %v6609_v23, %v5893_v34 }
 0x884   :  { %1919 = vrot.lane.b32.xlu1 %v1912_v13, %s5356_s10 }
 0x885   :  { %2025 = vrot.lane.b32.xlu2 %v2019_v25, %s5356_s10  ;;  %v2560_v25 = vmul.f32 %v2553_v42, %v8521_v41  ;;  %v2128_v41 = vmul.f32 %v6783_v46, %v5943_v14 }
 0x886   :  { %v6893_v12 = vpop.permute.xlu1 %2232 }
 0x889   :  { %v6897_v39 = vpop.permute.xlu2 %1782 }
 0x88b   :  { %2487 = vrot.lane.b32.xlu0 %v2481_v16, %s5320_s5  ;;  %v6926_v16 = vpop.permute.xlu0 %2102 }
 0x88c   :  { %1979 = vrot.lane.b32.xlu1 %v1972_v20, %s5353_s27 }
 0x88d   :  { %2085 = vrot.lane.b32.xlu2 %v2079_v8, %s5353_s27 }
 0x88f   :  { %v6906_v48 = vpop.permute.xlu1 %2262 }
 0x892   :  { %v6912_v13 = vpop.permute.xlu2 %1890 }
 0x893   :  { %2517 = vrot.lane.b32.xlu0 %v2511_v63, %s5353_s27  ;;  %v1801_v42 = vpop.permute.xlu0 %1800 }
 0x894   :  { %2057 = vrot.lane.b32.xlu1 %v2050_v49, %s5320_s5  ;;  %v8582_v49 = vld [vmem:[#allocation29_spill] sm:$0xff] }
 0x895   :  { %2163 = vrot.lane.b32.xlu2 %v2157_v53, %s5320_s5  ;;  %v1805_v53 = vmul.f32 %v1801_v42, %v8582_v49 }
 0x898   :  { %v6919_v50 = vpop.permute.xlu1 %2292 }
 0x89b   :  { %v6928_v20 = vpop.permute.xlu2 %1998  ;;  %2567 = vrot.lane.b32.xlu0 %v2560_v25, %s5356_s10 }
 0x89c   :  { %2303 = vrot.lane.b32.xlu1 %v2296_v62, %s5353_s27  ;;  %v2343_v62 = vmul.f32 %v8583_v5, %v8508_v4  ;;  %v1804_v5 = vmul.f32 %v6751_v31, %v8576_v22 }
 0x89d   :  { %2193 = vrot.lane.b32.xlu2 %v2187_v59, %s5353_s27  ;;  %v1861_v59 = vpop.permute.xlu0 %1860 }
 0x8a1   :  { %v6934_v8 = vpop.permute.xlu1 %2340 }
 0x8a3   :  { %2597 = vrot.lane.b32.xlu0 %v2590_v35, %s5320_s5  ;;  %v1835_v35 = vmul.f32 %v6833_v1, %v8582_v49 }
 0x8a4   :  { %2411 = vrot.lane.b32.xlu1 %v2404_v55, %s5353_s27  ;;  %v2451_v55 = vmul.f32 %v8585_v51, %v8518_v52  ;;  %v8587_v51 = vld [vmem:[#allocation30_spill] sm:$0xff]  ;;  %v8591_v52 = vld [vmem:[#allocation44_spill] sm:$0xff] }
 0x8a5   :  { %2241 = vrot.lane.b32.xlu2 %v2235_v21, %s5356_s10  ;;  %v6943_v63 = vpop.permute.xlu2 %2322 }
 0x8a6   :  { %8581 = vst [vmem:[#allocation63_spill] sm:$0xff] %v6943_v63  ;;  %v8601_v63 = vld [vmem:[#allocation51_spill] sm:$0xff] }
 0x8aa   :  { %v6948_v25 = vpop.permute.xlu1 %2400 }
 0x8ab   :  { %2627 = vrot.lane.b32.xlu0 %v2620_v30, %s5353_s27  ;;  %v2047_v30 = vpop.permute.xlu0 %2046 }
 0x8ac   :  { %1813 = vrot.lane.b32.xlu1 %v1805_v53, %s5356_s10  ;;  %v1865_v53 = vmul.f32 %v1861_v59, %v8582_v49 }
 0x8ad   :  { %2349 = vrot.lane.b32.xlu2 %v2343_v62, %s5356_s10 }
 0x8ae   :  { %v6955_v23 = vpop.permute.xlu2 %2430 }
 0x8af   :  { %8584 = vst [vmem:[#allocation23_spill] sm:$0xff] %v6955_v23  ;;  %v1943_v23 = vmul.f32 %v6859_v43, %v8587_v51 }
 0x8b3   :  { %v6961_v21 = vpop.permute.xlu1 %2556  ;;  %v2371_v47 = vpop.permute.xlu0 %2370 }
 0x8b4   :  { %1843 = vrot.lane.b32.xlu1 %v1835_v35, %s5320_s5  ;;  %v1913_v35 = vmul.f32 %v6843_v60, %v8587_v51 }
 0x8b5   :  { %2457 = vrot.lane.b32.xlu2 %v2451_v55, %s5356_s10  ;;  %v1942_v55 = vmul.f32 %v6761_v2, %v5625_v44 }
 0x8b7   :  { %v6965_v42 = vpop.permute.xlu2 %2538 }
 0x8b8   :  { %8586 = vst [vmem:[#allocation60_spill] sm:$0xff] %v6965_v42  ;;  %v2080_v42 = vmul.f32 %v6786_v17, %v5613_v38 }
 0x8bb   :  { %v6991_v60 = vpop.permute.xlu0 %2448 }
 0x8bc   :  { %v6970_v62 = vpop.permute.xlu1 %2586  ;;  %1873 = vrot.lane.b32.xlu1 %v1865_v53, %s5353_s27  ;;  %v1973_v53 = vmul.f32 %v6854_v7, %v8587_v51 }
 0x8bd   :  { %1811 = vrot.lane.b32.xlu2 %v1804_v5, %s5356_s10  ;;  %v8588_v5 = vld [vmem:[#allocation59_spill] sm:$0xff] }
 0x8be   :  { %v2020_v26 = vmul.f32 %v8588_v5, %v5613_v38 }
 0x8bf   :  { %v6974_v1 = vpop.permute.xlu2 %1809 }
 0x8c4   :  { %1921 = vrot.lane.b32.xlu1 %v1913_v35, %s5356_s10 }
 0x8c5   :  { %1949 = vrot.lane.b32.xlu2 %v1942_v55, %s5320_s5  ;;  %v6982_v31 = vpop.permute.xlu1 %2616  ;;  %v8590_v55 = vld [vmem:[#allocation28_spill] sm:$0xff] }
 0x8c6   :  { %v2051_v61 = vmul.f32 %v2047_v30, %v8590_v55  ;;  %v2512_v30 = vmul.f32 %v6837_v28, %v8512_v40  ;;  %v2081_v4 = vmul.f32 %v6883_v57, %v8590_v55 }
 0x8c7   :  { %v6984_v59 = vpop.permute.xlu2 %1839 }
 0x8cc   :  { %1981 = vrot.lane.b32.xlu1 %v1973_v53, %s5353_s27  ;;  %v2479_v53 = vpop.permute.xlu0 %2478 }
 0x8cd   :  { %2027 = vrot.lane.b32.xlu2 %v2020_v26, %s5356_s10  ;;  %v2129_v26 = vmul.f32 %v6865_v18, %v6083_v27 }
 0x8ce   :  { %v6994_v2 = vpop.permute.xlu1 %2214 }
 0x8cf   :  { %8589 = vst [vmem:[#allocation33_spill] sm:$0xff] %v6994_v2  ;;  %v6996_v35 = vpop.permute.xlu2 %1947 }
 0x8d4   :  { %2059 = vrot.lane.b32.xlu1 %v2051_v61, %s5320_s5 }
 0x8d5   :  { %2087 = vrot.lane.b32.xlu2 %v2080_v42, %s5353_s27  ;;  %v2509_v42 = vpop.permute.xlu0 %2508 }
 0x8d6   :  { %v7003_v7 = vpop.permute.xlu1 %1869 }
 0x8d7   :  { %v7005_v5 = vpop.permute.xlu2 %1977 }
 0x8dc   :  { %2137 = vrot.lane.b32.xlu1 %v2129_v26, %s5356_s10 }
 0x8dd   :  { %2135 = vrot.lane.b32.xlu2 %v2128_v41, %s5356_s10  ;;  %v2236_v41 = vmul.f32 %v6727_v10, %v5958_v37  ;;  %v7029_v26 = vpop.permute.xlu0 %2106  ;;  %v8594_v10 = vmov 1  }
 0x8de   :  { %v7013_v17 = vpop.permute.xlu1 %1917 }
 0x8df   :  { %v7015_v61 = vpop.permute.xlu2 %2025 }
 0x8e4   :  { %2519 = vrot.lane.b32.xlu1 %v2512_v30, %s5353_s27  ;;  %v8592_v30 = vld [vmem:[#allocation32_spill] sm:$0xff] }
 0x8e5   :  { %2165 = vrot.lane.b32.xlu2 %v2158_v6, %s5320_s5  ;;  %v2237_v6 = vmul.f32 %v6893_v12, %v8592_v30  ;;  %v7042_v9 = vpop.permute.xlu0 %2271  ;;  %v2267_v40 = vmul.f32 %v6906_v48, %v8592_v30  ;;  %v2021_v12 = vmul.f32 %v6872_v58, %v8590_v55 }
 0x8e6   :  { %v7023_v46 = vpop.permute.xlu1 %2055  ;;  %8593 = vst [vmem:[#allocation59_spill] sm:$0xff] %v7042_v9 }
 0x8e7   :  { %v7025_v18 = vpop.permute.xlu2 %2085 }
 0x8ec   :  { %2530 = vperm.xlu1 %4871, %v8591_v52  }
 0x8ed   :  { %2243 = vrot.lane.b32.xlu2 %v2236_v41, %s5356_s10 }
 0x8ee   :  { %v7033_v28 = vpop.permute.xlu1 %2133 }
 0x8ef   :  { %v7035_v11 = vpop.permute.xlu2 %2163 }
 0x8f4   :  { %2245 = vrot.lane.b32.xlu1 %v2237_v6, %s5356_s10  ;;  %v7058_v6 = vpop.permute.xlu0 %2301 }
 0x8f5   :  { %1951 = vrot.lane.b32.xlu2 %v1943_v23, %s5320_s5  ;;  %4872 = vset.pattern.permute.xlu1 %v8594_v10  ;;  %8596 = vst [vmem:[#allocation66_spill] sm:$0xff] %v7058_v6  ;;  %v2297_v10 = vmul.f32 %v6919_v50, %v8592_v30 }
 0x8f6   :  { %v7046_v52 = vpop.permute.xlu1 %1919 }
 0x8f7   :  { %v7048_v41 = vpop.permute.xlu2 %2193 }
 0x8f8   :  { %8595 = vst [vmem:[#allocation44_spill] sm:$0xff] %v7048_v41 }
 0x8fc   :  { %2275 = vrot.lane.b32.xlu1 %v2267_v40, %s5320_s5  ;;  %v7072_v48 = vpop.permute.xlu0 %2379 }
 0x8fd   :  { %2029 = vrot.lane.b32.xlu2 %v2021_v12, %s5356_s10  ;;  %8599 = vst [vmem:[#allocation69_spill] sm:$0xff] %v7072_v48  ;;  %v8600_v12 = vld [vmem:[#allocation45_spill] sm:$0xff] }
 0x8fe   :  { %v7056_v43 = vpop.permute.xlu1 %1979  ;;  %v2375_v6 = vmul.f32 %v2371_v47, %v8600_v12  ;;  %v2405_v57 = vmul.f32 %v6948_v25, %v8600_v12  ;;  %v8609_v48 = vld [vmem:[#allocation49_spill] sm:$0xff] }
 0x8ff   :  { %v7060_v23 = vpop.permute.xlu2 %2241 }
 0x900   :  { %8597 = vst [vmem:[#allocation67_spill] sm:$0xff] %v7060_v23 }
 0x904   :  { %2305 = vrot.lane.b32.xlu1 %v2297_v10, %s5353_s27  ;;  %v8605_v10 = vld [vmem:[#allocation52_spill] sm:$0xff]  ;;  %v7085_v24 = vpop.permute.xlu0 %2409 }
 0x905   :  { %2089 = vrot.lane.b32.xlu2 %v2081_v4, %s5353_s27  ;;  %v8604_v4 = vld [vmem:[#allocation31_spill] sm:$0xff]  ;;  %8606 = vst [vmem:[#allocation52_spill] sm:$0xff] %v7085_v24 }
 0x906   :  { %v7068_v58 = vpop.permute.xlu1 %2057  ;;  %v2559_v23 = vmul.f32 %v8605_v10, %v8604_v4 }
 0x907   :  { %v7070_v40 = vpop.permute.xlu2 %2349 }
 0x908   :  { %8598 = vst [vmem:[#allocation68_spill] sm:$0xff] %v7070_v40  ;;  %v2483_v40 = vmul.f32 %v2479_v53, %v8609_v48 }
 0x90c   :  { %2383 = vrot.lane.b32.xlu1 %v2375_v6, %s5320_s5  ;;  %v8608_v6 = vmov 2   ;;  %v1842_v25 = vpop.permute.xlu0 %1841 }
 0x90d   :  { %2534 = vperm.xlu2 %4870, %v8601_v63  }
 0x90e   :  { %v7077_v50 = vpop.permute.xlu1 %2303 }
 0x90f   :  { %8602 = vst [vmem:[#allocation51_spill] sm:$0xff] %v7077_v50  ;;  %v7079_v9 = vpop.permute.xlu2 %2457 }
 0x910   :  { %8603 = vst [vmem:[#allocation70_spill] sm:$0xff] %v7079_v9  ;;  %v2345_v9 = vmul.f32 %v6934_v8, %v8600_v12  ;;  %v8610_v8 = vld [vmem:[#allocation64_spill] sm:$0xff] }
 0x914   :  { %2413 = vrot.lane.b32.xlu1 %v2405_v57, %s5353_s27  ;;  %v2513_v57 = vmul.f32 %v2509_v42, %v8609_v48 }
 0x915   :  { %2565 = vrot.lane.b32.xlu2 %v2559_v23, %s5356_s10  ;;  %v2453_v23 = vmul.f32 %v6991_v60, %v8609_v48 }
 0x916   :  { %v7089_v47 = vpop.permute.xlu1 %2411  ;;  %4873 = vset.pattern.permute.xlu2 %v8608_v6  ;;  %v1872_v6 = vpop.permute.xlu0 %1871 }
 0x917   :  { %8607 = vst [vmem:[#allocation71_spill] sm:$0xff] %v7089_v47  ;;  %v1812_v63 = vpop.permute.xlu2 %1811 }
 0x91c   :  { %2491 = vrot.lane.b32.xlu1 %v2483_v40, %s5320_s5  ;;  %v2591_v40 = vmul.f32 %v6970_v62, %v8610_v8 }
 0x91d   :  { %2353 = vrot.lane.b32.xlu2 %v2345_v9, %s5356_s10  ;;  %v2561_v9 = vmul.f32 %v6961_v21, %v8610_v8 }
 0x91e   :  { %v1814_v10 = vpop.permute.xlu1 %1813  ;;  %v7108_v60 = vpop.permute.xlu0 %2195 }
 0x91f   :  { %v1950_v24 = vpop.permute.xlu2 %1949 }
 0x924   :  { %2521 = vrot.lane.b32.xlu1 %v2513_v57, %s5353_s27  ;;  %v2621_v57 = vmul.f32 %v6982_v31, %v8610_v8 }
 0x925   :  { %2461 = vrot.lane.b32.xlu2 %v2453_v23, %s5356_s10  ;;  %v8611_v23 = vld [vmem:[#allocation62_spill] sm:$0xff] }
 0x926   :  { %v1844_v53 = vpop.permute.xlu1 %1843  ;;  %v2589_v48 = vmul.f32 %v8611_v23, %v8604_v4  ;;  %v7120_v50 = vpop.permute.xlu0 %2273 }
 0x927   :  { %v2028_v47 = vpop.permute.xlu2 %2027 }
 0x92c   :  { %2599 = vrot.lane.b32.xlu1 %v2591_v40, %s5320_s5  ;;  %v1786_v40 = vmul.f32 %v6742_v29, %v8576_v22  ;;  %v8613_v29 = vld [vmem:[#allocation42_spill] sm:$0xff] }
 0x92d   :  { %2569 = vrot.lane.b32.xlu2 %v2561_v9, %s5356_s10  ;;  %v8612_v9 = vld [vmem:[#allocation37_spill] sm:$0xff]  ;;  %v1785_v22 = vmul.f32 %v8613_v29, %v8580_v36 }
 0x92e   :  { %v1874_v42 = vpop.permute.xlu1 %1873  ;;  %v2619_v0 = vmul.f32 %v8612_v9, %v8604_v4  ;;  %v1819_v56 = vadd.f32 %v1812_v63, %v1786_v40  ;;  %v1787_v63 = vmul.f32 %v6897_v39, %v8582_v49 }
 0x92f   :  { %v2088_v12 = vpop.permute.xlu2 %2087 }
 0x930   :  { %v1849_v8 = vadd.f32 %v1842_v25, %v1819_v56  ;;  %v1820_v25 = vadd.f32 %v1814_v10, %v1787_v63 }
 0x932   :  { %v1879_v34 = vadd.f32 %v1872_v6, %v1849_v8  ;;  %v1850_v8 = vadd.f32 %v1844_v53, %v1820_v25 }
 0x934   :  { %2629 = vrot.lane.b32.xlu1 %v2621_v57, %s5353_s27  ;;  %v7125_v57 = vpop.permute.xlu0 %2351 }
 0x935   :  { %2595 = vrot.lane.b32.xlu2 %v2589_v48, %s5320_s5  ;;  %v1894_v48 = vmul.f32 %v6826_v32, %v5625_v44  ;;  %v8614_v44 = vld [vmem:[#allocation34_spill] sm:$0xff] }
 0x936   :  { %v1922_v62 = vpop.permute.xlu1 %1921  ;;  %v1893_v4 = vmul.f32 %v8614_v44, %v5876_v3 }
 0x937   :  { %v2136_v21 = vpop.permute.xlu2 %2135  ;;  %v1897_v2 = vadd.f32 %v1894_v48, %v1879_v34  ;;  %v1880_v48 = vadd.f32 %v1874_v42, %v1850_v8 }
 0x939   :  { %v1927_v6 = vadd.f32 %v7046_v52, %v1897_v2 }
 0x93b   :  { %v1957_v34 = vadd.f32 %v1950_v24, %v1927_v6 }
 0x93c   :  { %2625 = vrot.lane.b32.xlu1 %v2619_v0, %s5353_s27  ;;  %v1818_v0 = vadd.f32 %v6974_v1, %v1785_v22  ;;  %v7137_v29 = vpop.permute.xlu0 %2381  ;;  %v1895_v22 = vmul.f32 %v6912_v13, %v8587_v51 }
 0x93e   :  { %v1982_v31 = vpop.permute.xlu1 %1981  ;;  %v1848_v56 = vadd.f32 %v6984_v59, %v1818_v0  ;;  %v1987_v59 = vadd.f32 %v7056_v43, %v1957_v34  ;;  %v1898_v2 = vadd.f32 %v1895_v22, %v1880_v48  ;;  %v8615_v43 = vld [vmem:[#allocation56_spill] sm:$0xff] }
 0x93f   :  { %v2166_v23 = vpop.permute.xlu2 %2165  ;;  %v2001_v0 = vmul.f32 %v8615_v43, %v6015_v45  ;;  %v8618_v43 = vld [vmem:[#allocation39_spill] sm:$0xff] }
 0x940   :  { %v1878_v32 = vadd.f32 %v7003_v7, %v1848_v56  ;;  %v2002_v7 = vmul.f32 %v6788_v54, %v5613_v38  ;;  %v1928_v52 = vadd.f32 %v1922_v62, %v1898_v2  ;;  %v2003_v54 = vmul.f32 %v6928_v20, %v8590_v55 }
 0x941   :  { %v2109_v2 = vmul.f32 %v6749_v19, %v6036_v15 }
 0x942   :  { %v1896_v39 = vadd.f32 %v1893_v4, %v1878_v32  ;;  %v2005_v24 = vadd.f32 %v2002_v7, %v1987_v59  ;;  %v2110_v32 = vmul.f32 %v6926_v16, %v5943_v14 }
 0x944   :  { %v1926_v1 = vadd.f32 %v7013_v17, %v1896_v39  ;;  %v7148_v42 = vpop.permute.xlu0 %2459  ;;  %v2035_v4 = vadd.f32 %v2028_v47, %v2005_v24 }
 0x946   :  { %v2060_v41 = vpop.permute.xlu1 %2059  ;;  %v1956_v44 = vadd.f32 %v6996_v35, %v1926_v1  ;;  %v2065_v35 = vadd.f32 %v7068_v58, %v2035_v4  ;;  %v2111_v58 = vmul.f32 %v7029_v26, %v6083_v27 }
 0x947   :  { %v2244_v9 = vpop.permute.xlu2 %2243 }
 0x948   :  { %v1986_v13 = vadd.f32 %v7005_v5, %v1956_v44 }
 0x94a   :  { %v2004_v56 = vadd.f32 %v2001_v0, %v1986_v13 }
 0x94c   :  { %v7160_v5 = vpop.permute.xlu0 %2489  ;;  %v2034_v47 = vadd.f32 %v7015_v61, %v2004_v56  ;;  %v8621_v56 = vld [vmem:[#allocation48_spill] sm:$0xff] }
 0x94e   :  { %v2138_v40 = vpop.permute.xlu1 %2137  ;;  %v2064_v20 = vadd.f32 %v7023_v46, %v2034_v47 }
 0x94f   :  { %v1952_v36 = vpop.permute.xlu2 %1951 }
 0x950   :  { %v1958_v53 = vadd.f32 %v1952_v36, %v1928_v52  ;;  %v2095_v36 = vadd.f32 %v2088_v12, %v2065_v35  ;;  %v2094_v1 = vadd.f32 %v7025_v18, %v2064_v20  ;;  %v8622_v35 = vld [vmem:[#allocation65_spill] sm:$0xff]  ;;  %v8624_v20 = vld [vmem:[#allocation59_spill] sm:$0xff] }
 0x952   :  { %v1988_v17 = vadd.f32 %v1982_v31, %v1958_v53  ;;  %v2113_v8 = vadd.f32 %v2110_v32, %v2095_v36  ;;  %v2112_v46 = vadd.f32 %v2109_v2, %v2094_v1  ;;  %v8626_v1 = vld [vmem:[#allocation63_spill] sm:$0xff]  ;;  %v8627_v2 = vld [vmem:[#allocation66_spill] sm:$0xff] }
 0x954   :  { %v2006_v6 = vadd.f32 %v2003_v54, %v1988_v17  ;;  %v2143_v22 = vadd.f32 %v2136_v21, %v2113_v8  ;;  %v2168_v59 = vpop.permute.xlu0 %2167  ;;  %v2142_v44 = vadd.f32 %v7033_v28, %v2112_v46  ;;  %v8617_v17 = vld [vmem:[#allocation44_spill] sm:$0xff]  ;;  %v8620_v54 = vld [vmem:[#allocation51_spill] sm:$0xff] }
 0x956   :  { %v7145_v10 = vpop.permute.xlu1 %2519  ;;  %v2173_v12 = vadd.f32 %v2166_v23, %v2143_v22 }
 0x957   :  { %v2030_v63 = vpop.permute.xlu2 %2029 }
 0x958   :  { %v2036_v25 = vadd.f32 %v2030_v63, %v2006_v6  ;;  %v2203_v61 = vadd.f32 %v7108_v60, %v2173_v12  ;;  %v2172_v63 = vadd.f32 %v7035_v11, %v2142_v44  ;;  %v8616_v60 = vld [vmem:[#allocation33_spill] sm:$0xff]  ;;  %v2326_v6 = vmul.f32 %v8622_v35, %v8621_v56  ;;  %v8623_v11 = vld [vmem:[#allocation67_spill] sm:$0xff] }
 0x959   :  { %v2219_v4 = vmul.f32 %v8616_v60, %v8592_v30  ;;  %v8625_v12 = vld [vmem:[#allocation45_spill] sm:$0xff] }
 0x95a   :  { %v2066_v34 = vadd.f32 %v2060_v41, %v2036_v25  ;;  %v2218_v41 = vmul.f32 %v6846_v33, %v5958_v37  ;;  %v2202_v33 = vadd.f32 %v8617_v17, %v2172_v63 }
 0x95c   :  { %v2221_v52 = vadd.f32 %v2218_v41, %v2203_v61  ;;  %v2198_v24 = vpop.permute.xlu0 %2197 }
 0x95e   :  { %v7155_v62 = vpop.permute.xlu1 %2530  ;;  %v2251_v26 = vadd.f32 %v2244_v9, %v2221_v52  ;;  %v8629_v52 = vld [vmem:[#allocation53_spill] sm:$0xff] }
 0x95f   :  { %v2090_v31 = vpop.permute.xlu2 %2089 }
 0x960   :  { %v2096_v39 = vadd.f32 %v2090_v31, %v2066_v34  ;;  %v2281_v19 = vadd.f32 %v7120_v50, %v2251_v26 }
 0x962   :  { %v2114_v16 = vadd.f32 %v2111_v58, %v2096_v39  ;;  %v2311_v28 = vadd.f32 %v8620_v54, %v2281_v19 }
 0x964   :  { %v2144_v21 = vadd.f32 %v2138_v40, %v2114_v16  ;;  %v8619_v40 = vld [vmem:[#allocation57_spill] sm:$0xff]  ;;  %v2329_v50 = vadd.f32 %v2326_v6, %v2311_v28  ;;  %v2488_v31 = vpop.permute.xlu0 %2487 }
 0x965   :  { %v2217_v0 = vmul.f32 %v8619_v40, %v8618_v43  ;;  %v8636_v28 = vld [vmem:[#allocation69_spill] sm:$0xff] }
 0x966   :  { %v2246_v48 = vpop.permute.xlu1 %2245  ;;  %v2174_v23 = vadd.f32 %v2168_v59, %v2144_v21  ;;  %v2359_v39 = vadd.f32 %v7125_v57, %v2329_v50  ;;  %v2327_v59 = vmul.f32 %v8626_v1, %v8625_v12  ;;  %v8628_v21 = vld [vmem:[#allocation43_spill] sm:$0xff]  ;;  %v8631_v57 = vld [vmem:[#allocation50_spill] sm:$0xff]  ;;  %v8637_v50 = vld [vmem:[#allocation52_spill] sm:$0xff]  ;;  %v8689_v12 = vmov 5  }
 0x967   :  { %v2535_v18 = vpop.permute.xlu2 %2534  ;;  %v2220_v36 = vadd.f32 %v2217_v0, %v2202_v33  ;;  %v8635_v0 = vld [vmem:[#allocation23_spill] sm:$0xff] }
 0x968   :  { %v2204_v13 = vadd.f32 %v2198_v24, %v2174_v23  ;;  %v2389_v41 = vadd.f32 %v7137_v29, %v2359_v39  ;;  %v8630_v23 = vld [vmem:[#allocation71_spill] sm:$0xff]  ;;  %v8634_v29 = vld [vmem:[#allocation49_spill] sm:$0xff] }
 0x969   :  { %v2250_v32 = vadd.f32 %v8623_v11, %v2220_v36  ;;  %v2435_v54 = vmul.f32 %v8635_v0, %v8634_v29 }
 0x96a   :  { %v2222_v9 = vadd.f32 %v2219_v4, %v2204_v13  ;;  %v2419_v24 = vadd.f32 %v8630_v23, %v2389_v41  ;;  %v8633_v4 = vld [vmem:[#allocation68_spill] sm:$0xff] }
 0x96b   :  { %v2280_v22 = vadd.f32 %v8624_v20, %v2250_v32  ;;  %v8638_v20 = vld [vmem:[#allocation54_spill] sm:$0xff]  ;;  %v8642_v41 = vld [vmem:[#allocation60_spill] sm:$0xff] }
 0x96c   :  { %v2252_v47 = vadd.f32 %v2246_v48, %v2222_v9  ;;  %v2325_v48 = vmul.f32 %v8629_v52, %v8628_v21  ;;  %v2518_v44 = vpop.permute.xlu0 %2517 }
 0x96d   :  { %v2310_v61 = vadd.f32 %v8627_v2, %v2280_v22  ;;  %v8639_v22 = vld [vmem:[#allocation41_spill] sm:$0xff] }
 0x96e   :  { %v2276_v7 = vpop.permute.xlu1 %2275  ;;  %v2433_v39 = vmul.f32 %v8639_v22, %v8638_v20  ;;  %v8645_v22 = vld [vmem:[#allocation35_spill] sm:$0xff] }
 0x96f   :  { %v2566_v8 = vpop.permute.xlu2 %2565  ;;  %v2282_v34 = vadd.f32 %v2276_v7, %v2252_v47  ;;  %v2328_v7 = vadd.f32 %v2325_v48, %v2310_v61 }
 0x971   :  { %v2358_v17 = vadd.f32 %v8633_v4, %v2328_v7  ;;  %v8643_v7 = vld [vmem:[#allocation70_spill] sm:$0xff] }
 0x973   :  { %v2388_v9 = vadd.f32 %v8636_v28, %v2358_v17 }
 0x974   :  { %v2568_v36 = vpop.permute.xlu0 %2567 }
 0x975   :  { %v2418_v47 = vadd.f32 %v8637_v50, %v2388_v9  ;;  %v5065_v50 = vld [vmem:[%s8199_s14 + $0x18] sm:$0xff] }
 0x976   :  { %v2306_v53 = vpop.permute.xlu1 %2305 }
 0x977   :  { %v2312_v58 = vadd.f32 %v2306_v53, %v2282_v34  ;;  %v2354_v26 = vpop.permute.xlu2 %2353  ;;  %v8632_v53 = vld [vmem:[#allocation61_spill] sm:$0xff] }
 0x978   :  { %v2434_v19 = vmul.f32 %v8632_v53, %v8631_v57 }
 0x979   :  { %v2330_v46 = vadd.f32 %v2327_v59, %v2312_v58  ;;  %v8640_v58 = vld [vmem:[#allocation58_spill] sm:$0xff] }
 0x97a   :  { %v2437_v33 = vadd.f32 %v2434_v19, %v2419_v24  ;;  %v2542_v1 = vmul.f32 %v2535_v18, %v8640_v58 }
 0x97b   :  { %v2360_v63 = vadd.f32 %v2354_v26, %v2330_v46 }
 0x97c   :  { %v2467_v35 = vadd.f32 %v7148_v42, %v2437_v33  ;;  %v8641_v42 = vld [vmem:[#allocation64_spill] sm:$0xff]  ;;  %v2598_v48 = vpop.permute.xlu0 %2597 }
 0x97d   :  { %v2543_v46 = vmul.f32 %v8642_v41, %v8641_v42  ;;  %v5069_v41 = vld [vmem:[#allocation10] ss:$0 sm:$0xff] }
 0x97e   :  { %v2384_v25 = vpop.permute.xlu1 %2383 }
 0x97f   :  { %v2390_v13 = vadd.f32 %v2384_v25, %v2360_v63  ;;  %v2462_v11 = vpop.permute.xlu2 %2461  ;;  %v2497_v25 = vadd.f32 %v7160_v5, %v2467_v35 }
 0x981   :  { %v2527_v2 = vadd.f32 %v7145_v10, %v2497_v25  ;;  %v5067_v25 = vld [vmem:[%s8199_s14 + $0x8] sm:$0xff] }
 0x983   :  { %v2545_v52 = vadd.f32 %v2542_v1, %v2527_v2  ;;  %v2683_v2 = vpop.f32.mrf.mxu1 }
 0x985   :  { %v2575_v63 = vadd.f32 %v2568_v36, %v2545_v52 }
 0x986   :  { %v2414_v16 = vpop.permute.xlu1 %2413 }
 0x987   :  { %v2420_v40 = vadd.f32 %v2414_v16, %v2390_v13  ;;  %v2436_v16 = vadd.f32 %v2433_v39, %v2418_v47  ;;  %v2570_v24 = vpop.permute.xlu2 %2569  ;;  %v8644_v13 = vld [vmem:[#allocation31_spill] sm:$0xff]  ;;  %v2605_v4 = vadd.f32 %v2598_v48, %v2575_v63  ;;  %v5066_v47 = vld [vmem:[%s8199_s14 + $0x10] sm:$0xff]  ;;  %v8646_v39 = vld [vmem:[#allocation36_spill] sm:$0xff] }
 0x988   :  { %v2541_v18 = vmul.f32 %v7155_v62, %v8644_v13  ;;  %v5059_v62 = vld [vmem:[%s8523_s19] sm:$0xff] }
 0x989   :  { %v2438_v6 = vadd.f32 %v2435_v54, %v2420_v40  ;;  %v2466_v23 = vadd.f32 %v8643_v7, %v2436_v16  ;;  %v2628_v40 = vpop.permute.xlu0 %2627 }
 0x98a   :  { %v2635_v54 = vadd.f32 %v2628_v40, %v2605_v4 }
 0x98b   :  { %v2468_v34 = vadd.f32 %v2462_v11, %v2438_v6  ;;  %v2496_v53 = vadd.f32 %v2488_v31, %v2466_v23  ;;  %v5060_v31 = vld [vmem:[#allocation11 + $0x18] sm:$0xff]  ;;  %v5062_v11 = vld [vmem:[#allocation11 + $0x8] sm:$0xff]  ;;  %v2686_v23 = vpop.f32.mrf.mxu1 }
 0x98d   :  { %v2526_v17 = vadd.f32 %v2518_v44, %v2496_v53  ;;  %v5061_v44 = vld [vmem:[#allocation11 + $0x10] sm:$0xff] }
 0x98e   :  { %v2492_v60 = vpop.permute.xlu1 %2491 }
 0x98f   :  { %v2498_v59 = vadd.f32 %v2492_v60, %v2468_v34  ;;  %v2544_v0 = vadd.f32 %v2541_v18, %v2526_v17  ;;  %v2596_v28 = vpop.permute.xlu2 %2595  ;;  %v5068_v34 = vld [vmem:[%s8199_s14] sm:$0xff] }
 0x990   :  { %v5071_v17 = vld [vmem:[%s8201_s16] ss:$0 sm:$0xff] }
 0x991   :  { %v2574_v9 = vadd.f32 %v2566_v8, %v2544_v0  ;;  %v5064_v8 = vld [vmem:[%s8523_s19 + $0x8] sm:$0xf] }
 0x993   :  { %v2604_v35 = vadd.f32 %v2596_v28, %v2574_v9 }
 0x996   :  { %v2522_v32 = vpop.permute.xlu1 %2521 }
 0x997   :  { %v2528_v61 = vadd.f32 %v2522_v32, %v2498_v59  ;;  %v5063_v32 = vld [vmem:[#allocation11] sm:$0xff] }
 0x998   :  { %v8647_v59 = vld [vmem:[#allocation46_spill] sm:$0xff] }
 0x999   :  { %v2546_v5 = vadd.f32 %v2543_v46, %v2528_v61 }
 0x99b   :  { %v2576_v19 = vadd.f32 %v2570_v24, %v2546_v5 }
 0x99e   :  { %v2600_v26 = vpop.permute.xlu1 %2599 }
 0x99f   :  { %v2606_v60 = vadd.f32 %v2600_v26, %v2576_v19  ;;  %v8648_v26 = vld [vmem:[#allocation38_spill] sm:$0xff]  ;;  %v5070_v19 = vld [vmem:[%s8202_s17] ss:$0 sm:$0xff] }
 0x9a6   :  { %v2630_v10 = vpop.permute.xlu1 %2629 }
 0x9a7   :  { %v2636_v33 = vadd.f32 %v2630_v10, %v2606_v60 }
 0x9a9   :  { %2650 = vmatpush.msra.mxu2 %v2636_v33 }
 0x9ab   :  { %2651 = vmatpush.msra.mxu2 %v2635_v54 }
 0x9ae   :  { %v2626_v6 = vpop.permute.xlu1 %2625 }
 0x9af   :  { %v2634_v36 = vadd.f32 %v2626_v6, %v2604_v35 }
 0x9b1   :  { %2652 = vmatpush.msra.mxu2 %v2634_v36 }
 0x9b2   :  { %4585 = vmatmul.msk.f32.vlgmr.msra.gmra.mxu2 %vm1513_vm7, %v5059_v62 }
 0x9b3   :  { %2736 = vmatpush.msrb.mxu2 %v5060_v31 }
 0x9b5   :  { %2737 = vmatpush.msrb.mxu2 %v5061_v44 }
 0x9b7   :  { %2738 = vmatpush.msrb.mxu2 %v5062_v11 }
 0x9b9   :  { %2739 = vmatpush.msrb.mxu2 %v5063_v32 }
 0x9ba   :  { %4586 = vmatmul.msk.f32.gmra.mxu2 %vm1513_vm7, %v5064_v8 }
 0x9bb   :  { %3803 = vmatpush.msra.mxu2 %v5065_v50 }
 0x9bd   :  { %3804 = vmatpush.msra.mxu2 %v5066_v47 }
 0x9bf   :  { %3805 = vmatpush.msra.mxu2 %v5067_v25 }
 0x9c1   :  { %3806 = vmatpush.msra.mxu2 %v5068_v34 }
 0x9c2   :  { %4591 = vmatmul.msk.f32.vlgmr.msrb.gmra.mxu2 %vm1555_vm6, %v8645_v22 }
 0x9ca   :  { %4592 = vmatmul.msk.f32.gmra.mxu2 %vm1555_vm6, %v8646_v39 }
 0xa35   :  { %v2654_v1 = vpop.f32.mrf.mxu2 }
 0xa36   :  { %v2660_v16 = vmul.f32 %v2654_v1, %v8647_v59 }
 0xa38   :  { %v2689_v61 = vadd.f32 %v2683_v2, %v2660_v16 }
 0xa3a   :  { %v2691_v46 = vadd.f32 %v5069_v41, %v2689_v61 }
 0xa3c   :  { %v2693_v52 = vmax.f32 %v2691_v46, 0.0 }
 0xa3d   :  { %v2657_v48 = vpop.f32.mrf.mxu2 }
 0xa3e   :  { %v2661_v7 = vmul.f32 %v2657_v48, %v8648_v26  ;;  %4589 = vmatmul.msk.f32.vlgmr.msra.gmra.mxu3 %vm1555_vm6, %v2693_v52  ;;  %v8686_v26 = vmov 20  }
 0xa40   :  { %v2690_v5 = vadd.f32 %v2686_v23, %v2661_v7 }
 0xa42   :  { %v2692_v24 = vadd.f32 %v5069_v41, %v2690_v5 }
 0xa44   :  { %v2694_v63 = vmax.f32 %v2692_v24, 0.0 }
 0xa45   :  { %v2741_v53 = vpop.f32.mrf.mxu2 }
 0xa46   :  { %v2742_v18 = vadd.f32 %v5070_v19, %v2741_v53  ;;  %4590 = vmatmul.msk.f32.gmra.mxu3 %vm1555_vm6, %v2694_v63 }
 0xa48   :  { %2789 = vrot.lane.b32.xlu0 %v2742_v18, %s5320_s5 }
 0xa4d   :  { %v2744_v60 = vpop.f32.mrf.mxu2 }
 0xa4e   :  { %v2745_v4 = vadd.f32 %v5070_v19, %v2744_v60 }
 0xa50   :  { %2791 = vrot.lane.b32.xlu2 %v2745_v4, %s5320_s5 }
 0xaaa   :  { %v2792_v24 = vpop.permute.xlu2 %2791 }
 0xaba   :  { %v2790_v16 = vpop.permute.xlu0 %2789 }
 0xac1   :  { %v2718_v10 = vpop.f32.mrf.mxu3 }
 0xac2   :  { %v2719_v33 = vadd.f32 %v5071_v17, %v2718_v10 }
 0xac4   :  { %v2747_v40 = vadd.f32 %v2742_v18, %v2719_v33 }
 0xac6   :  { %v4593_v0 = vmul.f32 -1.442695, %v2747_v40 }
 0xac8   :  { %4992 = vpow2.f32 %v4593_v0 }
 0xac9   :  { %v2721_v54 = vpop.f32.mrf.mxu3 }
 0xaca   :  { %v2722_v28 = vadd.f32 %v5071_v17, %v2721_v54  ;;  %v8649_v54 = vld [vmem:[#allocation40_spill] sm:$0xff] }
 0xacc   :  { %v2748_v9 = vadd.f32 %v2745_v4, %v2722_v28 }
 0xace   :  { %v4993_v35 = vpop.eup %4992  ;;  %v4594_v6 = vmul.f32 -1.442695, %v2748_v9 }
 0xacf   :  { %v2755_v36 = vadd.f32 1.0, %v4993_v35 }
 0xad0   :  { %4994 = vpow2.f32 %v4594_v6 }
 0xad1   :  { %4996 = vrcp.f32 %v2755_v36  ;;  %v2768_v8 = vand.u32 2147483648, %v2755_v36  ;;  %v2766_v47 = vand.u32 2147483647, %v2755_v36  ;;  %vm2762_vm1 = vweird.f32 %v2755_v36 }
 0xad3   :  { %v2769_v22 = vor.u32 1.1754944e-38, %v2768_v8  ;;  %vm2767_vm8 = vcmp.eq.f32.partialorder %v2766_v47, 8.507059e+37  ;;  %v5072_v8 = vld [vmem:[%s8417_s9] sm:$0xff]  ;;  %v5074_v47 = vld [vmem:[%s8417_s9 + $0x10] sm:$0xff] }
 0xad6   :  { %v4995_v62 = vpop.eup %4994 }
 0xad7   :  { %v4997_v31 = vpop.eup %4996  ;;  %v2756_v44 = vadd.f32 1.0, %v4995_v62  ;;  %v8651_v62 = vld [vmem:[#allocation24_spill] sm:$0xff] }
 0xad8   :  { %v2758_v11 = vmul.f32 %v4997_v31, %v2755_v36  ;;  %vm2763_vm0 = vweird.f32 %v4997_v31 }
 0xad9   :  { %4998 = vrcp.f32 %v2756_v44  ;;  %vm2764_vm2 = vmor %vm2762_vm1, %vm2763_vm0  ;;  %v2783_v46 = vand.u32 2147483648, %v2756_v44  ;;  %v2781_v48 = vand.u32 2147483647, %v2756_v44  ;;  %vm2777_vm10 = vweird.f32 %v2756_v44 }
 0xada   :  { %v2759_v32 = vsub.f32 1.0, %v2758_v11 }
 0xadb   :  { %v2784_v23 = vor.u32 1.1754944e-38, %v2783_v46  ;;  %vm2782_vm12 = vcmp.eq.f32.partialorder %v2781_v48, 8.507059e+37  ;;  %v8664_v46 = vmov 13   ;;  %v8666_v48 = vmov 17  }
 0xadc   :  { %v2760_v50 = vmul.f32 %v4997_v31, %v2759_v32 }
 0xade   :  { %v2761_v25 = vadd.f32 %v4997_v31, %v2760_v50  ;;  %v5073_v50 = vld [vmem:[%s8417_s9 + $0x8] sm:$0xff]  ;;  %s4521_s9 = sshll.u32 %s5359_s15, 4  ;;  %s4522_s9 = int_to_ptr.vmem [resolvable:$true] %s4521_s9 }
 0xadf   :  { %v4999_v34 = vpop.eup %4998 }
 0xae0   :  { %v2765_v39 = vsel %vm2764_vm2, %v4997_v31, %v2761_v25  ;;  %v2773_v1 = vmul.f32 %v4999_v34, %v2756_v44  ;;  %vm2778_vm9 = vweird.f32 %v4999_v34 }
 0xae1   :  { %v2770_v2 = vsel %vm2767_vm8, %v2769_v22, %v2765_v39  ;;  %vm2779_vm11 = vmor %vm2777_vm10, %vm2778_vm9  ;;  %v8657_v22 = vmov 9   ;;  %v8658_v39 = vmov 3  }
 0xae2   :  { %v2795_v61 = vmul.f32 %v2790_v16, %v2770_v2  ;;  %v2774_v41 = vsub.f32 1.0, %v2773_v1  ;;  %v2809_v40 = vsub.f32 1.0, %v2770_v2  ;;  %v2821_v9 = vmul.f32 %v2770_v2, %v8649_v54 }
 0xae3   :  { %v8659_v1 = vmov 18   ;;  %v8660_v16 = vmov 10   ;;  %v8661_v2 = vmov 6   ;;  %v8680_v54 = vmov 2  }
 0xae4   :  { %2799 = vrot.lane.b32.xlu2 %v2795_v61, %s5320_s5  ;;  %v2775_v52 = vmul.f32 %v4999_v34, %v2774_v41  ;;  %v8662_v61 = vmov 12   ;;  %v8663_v41 = vmov 11  }
 0xae6   :  { %v2776_v7 = vadd.f32 %v4999_v34, %v2775_v52  ;;  %v8665_v52 = vmov 16  }
 0xae8   :  { %v2780_v5 = vsel %vm2779_vm11, %v4999_v34, %v2776_v7  ;;  %v8656_v34 = vmov 7   ;;  %v8667_v7 = vmov 14  }
 0xae9   :  { %v2785_v63 = vsel %vm2782_vm12, %v2784_v23, %v2780_v5  ;;  %v8669_v5 = vmov 0  }
 0xaea   :  { %v2796_v53 = vmul.f32 %v2792_v24, %v2785_v63  ;;  %v2822_v31 = vmul.f32 %v2785_v63, %v8651_v62  ;;  %v8670_v24 = vmov 15  }
 0xaec   :  { %2801 = vrot.lane.b32.xlu1 %v2796_v53, %s5320_s5  ;;  %v8672_v53 = vmov 19  }
 0xb3e   :  { %v2800_v19 = vpop.permute.xlu2 %2799 }
 0xb3f   :  { %v2805_v18 = vadd.f32 %v2800_v19, %v2719_v33  ;;  %v2810_v33 = vsub.f32 1.0, %v2785_v63  ;;  %v8671_v63 = vmov 21   ;;  %v8673_v19 = vmov 25  }
 0xb41   :  { %5000 = vtanh.f32 %v2805_v18  ;;  %v8674_v18 = vmov 22  }
 0xb47   :  { %v5001_v60 = vpop.eup %5000 }
 0xb48   :  { %2813 = vrot.lane.b32.xlu1 %v5001_v60, %s5356_s10  ;;  %v8675_v60 = vmov 29  }
 0xb5e   :  { %v2802_v4 = vpop.permute.xlu1 %2801 }
 0xb5f   :  { %v2806_v10 = vadd.f32 %v2802_v4, %v2722_v28  ;;  %v8676_v4 = vmov 23  }
 0xb61   :  { %5002 = vtanh.f32 %v2806_v10  ;;  %v8677_v10 = vmov 1  }
 0xb67   :  { %v5003_v17 = vpop.eup %5002 }
 0xb68   :  { %2815 = vrot.lane.b32.xlu0 %v5003_v17, %s5356_s10  ;;  %v8678_v17 = vmov 4  }
 0xbba   :  { %v2814_v0 = vpop.permute.xlu1 %2813 }
 0xbbb   :  { %v2819_v35 = vmul.f32 %v2814_v0, %v2809_v40  ;;  %v8679_v0 = vmov 26  }
 0xbbd   :  { %v7252_v6 = vadd.f32 %v2821_v9, %v2819_v35  ;;  %v8681_v35 = vmov 27  }
 0xbbf   :  { %8650 = vst [vmem:[#allocation62_spill] sm:$0xff] %v7252_v6  ;;  %2827 = vrot.lane.b32.xlu0 %v7252_v6, %s5356_s10 }
 0xbda   :  { %v2816_v36 = vpop.permute.xlu0 %2815 }
 0xbdb   :  { %v2820_v44 = vmul.f32 %v2816_v36, %v2810_v33  ;;  %v8682_v36 = vmov 8  }
 0xbdd   :  { %v7257_v28 = vadd.f32 %v2822_v31, %v2820_v44  ;;  %v8683_v44 = vmov 30  }
 0xbdf   :  { %8652 = vst [vmem:[#allocation37_spill] sm:$0xff] %v7257_v28  ;;  %2829 = vrot.lane.b32.xlu2 %v7257_v28, %s5356_s10 }
 0xc31   :  { %v7261_v11 = vpop.permute.xlu0 %2827 }
 0xc32   :  { %8653 = vst [vmem:[#allocation42_spill] sm:$0xff] %v7261_v11  ;;  %4601 = vmatmul.msk.f32.vlgmr.msrb.gmra.mxu3 %vm1555_vm6, %v7261_v11 }
 0xc39   :  { %v7265_v32 = vpop.permute.xlu2 %2829 }
 0xc3a   :  { %8654 = vst [vmem:[#allocation34_spill] sm:$0xff] %v7265_v32  ;;  %4595 = vmatpush.msk.msrb.mxu0 %vm616_vm4, %v7265_v32  ;;  %4602 = vmatmul.msk.f32.gmra.mxu3 %vm1555_vm6, %v7265_v32 }
 0xc3c   :  { %2849 = vmatpush.msrb.mxu0 %v7261_v11  ;;  %v8687_v11 = vmov 24  }
 0xc3d   :  { %4596 = vmatmul.msk.f32.vlgmr.msrb.gmra.mxu0 %vm606_vm5, %v5072_v8 }
 0xc45   :  { %4597 = vmatmul.msk.f32.gmra.mxu0 %vm606_vm5, %v5073_v50 }
 0xc4d   :  { %4598 = vmatmul.msk.f32.gmra.mxu0 %vm606_vm5, %v5074_v47  ;;  %v8684_v47 = vmov 31  }
 0xcba   :  { %v7284_v25 = vpop.f32.mrf.mxu0 }
 0xcbb   :  { %8655 = vst [vmem:[#allocation56_spill] sm:$0xff] %v7284_v25  ;;  %2990 = vperm.xlu0 %4875, %v7284_v25   ;;  %2912 = vperm.xlu2 %4873, %v7284_v25  }
 0xcbc   :  { %2882 = vperm.xlu1 %4872, %v7284_v25  }
 0xcc2   :  { %v7313_v23 = vpop.f32.mrf.mxu0 }
 0xcc3   :  { %4877 = vset.pattern.permute.xlu0 %v8656_v34  ;;  %4878 = vset.pattern.permute.xlu2 %v8657_v22  ;;  %8668 = vst [vmem:[#allocation33_spill] sm:$0xff] %v7313_v23 }
 0xcc4   :  { %4874 = vset.pattern.permute.xlu1 %v8658_v39  ;;  %3050 = vperm.xlu0 %4877, %v7284_v25  }
 0xcc5   :  { %3098 = vperm.xlu2 %4878, %v7284_v25   ;;  %2942 = vperm.xlu1 %4874, %v7284_v25  }
 0xcca   :  { %v7413_v13 = vpop.f32.mrf.mxu0 }
 0xccc   :  { %4885 = vset.pattern.permute.xlu0 %v8659_v1 }
 0xccd   :  { %4879 = vset.pattern.permute.xlu2 %v8660_v16  ;;  %4876 = vset.pattern.permute.xlu1 %v8661_v2 }
 0xcce   :  { %3344 = vperm.xlu0 %4885, %v7284_v25   ;;  %3128 = vperm.xlu2 %4879, %v7284_v25  }
 0xccf   :  { %3020 = vperm.xlu1 %4876, %v7284_v25  }
 0xcd6   :  { %4899 = vset.pattern.permute.xlu0 %v8662_v61  ;;  %4880 = vset.pattern.permute.xlu2 %v8663_v41 }
 0xcd7   :  { %4881 = vset.pattern.permute.xlu1 %v8664_v46  ;;  %3188 = vperm.xlu0 %4899, %v7284_v25  }
 0xcd8   :  { %3158 = vperm.xlu2 %4880, %v7284_v25   ;;  %3206 = vperm.xlu1 %4881, %v7284_v25  }
 0xcdf   :  { %4900 = vset.pattern.permute.xlu0 %v8665_v52 }
 0xce0   :  { %4884 = vset.pattern.permute.xlu2 %v8666_v48  ;;  %4882 = vset.pattern.permute.xlu1 %v8667_v7 }
 0xce1   :  { %3296 = vperm.xlu0 %4900, %v7284_v25   ;;  %3314 = vperm.xlu2 %4884, %v7284_v25  }
 0xce2   :  { %3236 = vperm.xlu1 %4882, %v7284_v25  }
 0xce9   :  { %4905 = vset.pattern.permute.xlu0 %v8658_v39  ;;  %4887 = vset.pattern.permute.xlu2 %v8669_v5 }
 0xcea   :  { %4883 = vset.pattern.permute.xlu1 %v8670_v24  ;;  %2862 = vperm.xlu2 %4887, %v7284_v25  }
 0xceb   :  { %3266 = vperm.xlu1 %4883, %v7284_v25   ;;  %2946 = vperm.xlu0 %4905, %v7313_v23  }
 0xcf2   :  { %4888 = vset.pattern.permute.xlu2 %v8671_v63 }
 0xcf3   :  { %4886 = vset.pattern.permute.xlu1 %v8672_v53  ;;  %4910 = vset.pattern.permute.xlu0 %v8660_v16 }
 0xcf4   :  { %3422 = vperm.xlu2 %4888, %v7284_v25   ;;  %3374 = vperm.xlu1 %4886, %v7284_v25  }
 0xcf5   :  { %3132 = vperm.xlu0 %4910, %v7313_v23  }
 0xcfc   :  { %4892 = vset.pattern.permute.xlu2 %v8673_v19  ;;  %4889 = vset.pattern.permute.xlu1 %v8674_v18 }
 0xcfd   :  { %4915 = vset.pattern.permute.xlu0 %v8666_v48  ;;  %3530 = vperm.xlu2 %4892, %v7284_v25  }
 0xcfe   :  { %3452 = vperm.xlu1 %4889, %v7284_v25   ;;  %3318 = vperm.xlu0 %4915, %v7313_v23  }
 0xd05   :  { %4896 = vset.pattern.permute.xlu2 %v8675_v60 }
 0xd06   :  { %4890 = vset.pattern.permute.xlu1 %v8676_v4  ;;  %4918 = vset.pattern.permute.xlu0 %v8669_v5 }
 0xd07   :  { %3638 = vperm.xlu2 %4896, %v7284_v25   ;;  %3482 = vperm.xlu1 %4890, %v7284_v25  }
 0xd08   :  { %2867 = vperm.xlu0 %4918, %v7313_v23  }
 0xd0f   :  { %4903 = vset.pattern.permute.xlu2 %v8677_v10  ;;  %4891 = vset.pattern.permute.xlu1 %v8678_v17 }
 0xd10   :  { %4920 = vset.pattern.permute.xlu0 %v8674_v18  ;;  %2972 = vperm.xlu1 %4891, %v7284_v25  }
 0xd11   :  { %3456 = vperm.xlu0 %4920, %v7313_v23   ;;  %2886 = vperm.xlu2 %4903, %v7313_v23  }
 0xd15   :  { %v7345_v40 = vpop.permute.xlu2 %2912 }
 0xd18   :  { %4893 = vset.pattern.permute.xlu1 %v8679_v0 }
 0xd19   :  { %4922 = vset.pattern.permute.xlu0 %v8678_v17  ;;  %4904 = vset.pattern.permute.xlu2 %v8680_v54 }
 0xd1a   :  { %3560 = vperm.xlu1 %4893, %v7284_v25   ;;  %2976 = vperm.xlu0 %4922, %v7313_v23  }
 0xd1b   :  { %2916 = vperm.xlu2 %4904, %v7313_v23  }
 0xd1f   :  { %v7353_v9 = vpop.permute.xlu2 %3098 }
 0xd22   :  { %4894 = vset.pattern.permute.xlu1 %v8681_v35  ;;  %4923 = vset.pattern.permute.xlu0 %v8673_v19 }
 0xd23   :  { %4908 = vset.pattern.permute.xlu2 %v8656_v34  ;;  %3590 = vperm.xlu1 %4894, %v7284_v25  }
 0xd24   :  { %3534 = vperm.xlu0 %4923, %v7313_v23   ;;  %3054 = vperm.xlu2 %4908, %v7313_v23  }
 0xd28   :  { %v7361_v33 = vpop.permute.xlu2 %3128 }
 0xd2b   :  { %4895 = vset.pattern.permute.xlu1 %v8682_v36 }
 0xd2c   :  { %4924 = vset.pattern.permute.xlu0 %v8679_v0  ;;  %4909 = vset.pattern.permute.xlu2 %v8657_v22 }
 0xd2d   :  { %3080 = vperm.xlu1 %4895, %v7284_v25   ;;  %3564 = vperm.xlu0 %4924, %v7313_v23  }
 0xd2e   :  { %3102 = vperm.xlu2 %4909, %v7313_v23   ;;  %v7369_v62 = vpop.permute.xlu1 %2882 }
 0xd32   :  { %v7371_v31 = vpop.permute.xlu2 %3158 }
 0xd35   :  { %4897 = vset.pattern.permute.xlu1 %v8683_v44  ;;  %4926 = vset.pattern.permute.xlu0 %v8682_v36 }
 0xd36   :  { %4913 = vset.pattern.permute.xlu2 %v8667_v7  ;;  %3668 = vperm.xlu1 %4897, %v7284_v25  }
 0xd37   :  { %3084 = vperm.xlu0 %4926, %v7313_v23   ;;  %3240 = vperm.xlu2 %4913, %v7313_v23   ;;  %v7379_v8 = vpop.permute.xlu1 %2942 }
 0xd3b   :  { %v7381_v50 = vpop.permute.xlu2 %3314 }
 0xd3e   :  { %4898 = vset.pattern.permute.xlu1 %v8684_v47 }
 0xd3f   :  { %4927 = vset.pattern.permute.xlu0 %v8675_v60  ;;  %4914 = vset.pattern.permute.xlu2 %v8670_v24 }
 0xd40   :  { %3698 = vperm.xlu1 %4898, %v7284_v25   ;;  %3642 = vperm.xlu0 %4927, %v7313_v23  }
 0xd41   :  { %3270 = vperm.xlu2 %4914, %v7313_v23   ;;  %v7389_v6 = vpop.permute.xlu1 %3020 }
 0xd44   :  { %v7391_v28 = vpop.permute.xlu2 %2862 }
 0xd45   :  { %8685 = vst [vmem:[#allocation44_spill] sm:$0xff] %v7391_v28  ;;  %v7425_v28 = vpop.permute.xlu0 %2990 }
 0xd48   :  { %4901 = vset.pattern.permute.xlu1 %v8686_v26  ;;  %4928 = vset.pattern.permute.xlu0 %v8683_v44 }
 0xd49   :  { %4919 = vset.pattern.permute.xlu2 %v8671_v63  ;;  %3404 = vperm.xlu1 %4901, %v7284_v25  }
 0xd4a   :  { %3672 = vperm.xlu0 %4928, %v7313_v23   ;;  %3426 = vperm.xlu2 %4919, %v7313_v23   ;;  %v7399_v59 = vpop.permute.xlu1 %3206 }
 0xd4d   :  { %v3051_v51 = vpop.permute.xlu0 %3050 }
 0xd4e   :  { %v7401_v32 = vpop.permute.xlu2 %3422 }
 0xd51   :  { %4902 = vset.pattern.permute.xlu1 %v8687_v11 }
 0xd52   :  { %4930 = vset.pattern.permute.xlu0 %v8662_v61  ;;  %4921 = vset.pattern.permute.xlu2 %v8676_v4 }
 0xd53   :  { %3512 = vperm.xlu1 %4902, %v7284_v25   ;;  %3192 = vperm.xlu0 %4930, %v7313_v23  }
 0xd54   :  { %3486 = vperm.xlu2 %4921, %v7313_v23   ;;  %v7409_v42 = vpop.permute.xlu1 %3236 }
 0xd55   :  { %v3345_v38 = vpop.permute.xlu0 %3344 }
 0xd57   :  { %v7411_v29 = vpop.permute.xlu2 %3530 }
 0xd58   :  { %8688 = vst [vmem:[#allocation39_spill] sm:$0xff] %v7411_v29 }
 0xd5b   :  { %4906 = vset.pattern.permute.xlu1 %v8689_v12  ;;  %4935 = vset.pattern.permute.xlu0 %v8680_v54 }
 0xd5c   :  { %4925 = vset.pattern.permute.xlu2 %v8681_v35  ;;  %2994 = vperm.xlu1 %4906, %v7313_v23  }
 0xd5d   :  { %3594 = vperm.xlu2 %4925, %v7313_v23   ;;  %2920 = vperm.xlu0 %4935, %v7413_v13   ;;  %v7421_v30 = vpop.permute.xlu1 %3266 }
 0xd61   :  { %v7423_v25 = vpop.permute.xlu2 %3638 }
 0xd62   :  { %8690 = vst [vmem:[#allocation57_spill] sm:$0xff] %v7423_v25 }
 0xd64   :  { %4907 = vset.pattern.permute.xlu1 %v8661_v2 }
 0xd65   :  { %4929 = vset.pattern.permute.xlu2 %v8684_v47  ;;  %4943 = vset.pattern.permute.xlu0 %v8664_v46 }
 0xd66   :  { %3024 = vperm.xlu1 %4907, %v7313_v23   ;;  %3702 = vperm.xlu2 %4929, %v7313_v23   ;;  %v7432_v54 = vpop.permute.xlu1 %3374 }
 0xd67   :  { %3214 = vperm.xlu0 %4943, %v7413_v13  }
 0xd6b   :  { %v7435_v55 = vpop.permute.xlu2 %2886 }
 0xd6e   :  { %4911 = vset.pattern.permute.xlu1 %v8663_v41  ;;  %4932 = vset.pattern.permute.xlu2 %v8686_v26 }
 0xd6f   :  { %4945 = vset.pattern.permute.xlu0 %v8670_v24  ;;  %3162 = vperm.xlu1 %4911, %v7313_v23  }
 0xd70   :  { %3408 = vperm.xlu2 %4932, %v7313_v23   ;;  %3274 = vperm.xlu0 %4945, %v7413_v13   ;;  %v7443_v25 = vpop.permute.xlu1 %3452 }
 0xd75   :  { %v7445_v49 = vpop.permute.xlu2 %2916 }
 0xd77   :  { %4912 = vset.pattern.permute.xlu1 %v8664_v46  ;;  %v7459_v46 = vpop.permute.xlu0 %3188 }
 0xd78   :  { %4933 = vset.pattern.permute.xlu2 %v8687_v11  ;;  %4953 = vset.pattern.permute.xlu0 %v8678_v17  ;;  %8691 = vst [vmem:[#allocation51_spill] sm:$0xff] %v7459_v46 }
 0xd79   :  { %3210 = vperm.xlu1 %4912, %v7313_v23   ;;  %3516 = vperm.xlu2 %4933, %v7313_v23   ;;  %v7452_v24 = vpop.permute.xlu1 %3482 }
 0xd7a   :  { %2980 = vperm.xlu0 %4953, %v7413_v13  }
 0xd7e   :  { %v7455_v58 = vpop.permute.xlu2 %3054 }
 0xd81   :  { %4916 = vset.pattern.permute.xlu1 %v8659_v1  ;;  %4937 = vset.pattern.permute.xlu2 %v8689_v12  ;;  %v7472_v12 = vpop.permute.xlu0 %3296 }
 0xd82   :  { %4957 = vset.pattern.permute.xlu0 %v8682_v36  ;;  %3348 = vperm.xlu1 %4916, %v7313_v23   ;;  %v7463_v17 = vpop.permute.xlu1 %2972  ;;  %8694 = vst [vmem:[#allocation59_spill] sm:$0xff] %v7472_v12  ;;  %v3061_v12 = vmul.f32 %v3051_v51, %v5876_v3 }
 0xd83   :  { %8692 = vst [vmem:[#allocation65_spill] sm:$0xff] %v7463_v17  ;;  %2998 = vperm.xlu2 %4937, %v7413_v13   ;;  %3088 = vperm.xlu0 %4957, %v7413_v13   ;;  %v8696_v17 = vld [vmem:[#allocation47_spill] sm:$0xff] }
 0xd88   :  { %v7467_v29 = vpop.permute.xlu2 %3102 }
 0xd89   :  { %8693 = vst [vmem:[#allocation67_spill] sm:$0xff] %v7467_v29  ;;  %v2953_v29 = vmul.f32 %v7379_v8, %v8696_v17  ;;  %v3355_v8 = vmul.f32 %v3345_v38, %v8618_v43 }
 0xd8a   :  { %4917 = vset.pattern.permute.xlu1 %v8672_v53 }
 0xd8b   :  { %4938 = vset.pattern.permute.xlu2 %v8661_v2  ;;  %4961 = vset.pattern.permute.xlu0 %v8662_v61  ;;  %v7489_v61 = vpop.permute.xlu0 %2946 }
 0xd8c   :  { %3378 = vperm.xlu1 %4917, %v7313_v23   ;;  %3028 = vperm.xlu2 %4938, %v7413_v13   ;;  %v7476_v36 = vpop.permute.xlu1 %3560 }
 0xd8d   :  { %3196 = vperm.xlu0 %4961, %v7413_v13  }
 0xd91   :  { %v7479_v46 = vpop.permute.xlu2 %3240 }
 0xd92   :  { %8695 = vst [vmem:[#allocation63_spill] sm:$0xff] %v7479_v46 }
 0xd94   :  { %4931 = vset.pattern.permute.xlu1 %v8665_v52  ;;  %4939 = vset.pattern.permute.xlu2 %v8656_v34  ;;  %v7501_v34 = vpop.permute.xlu0 %3132 }
 0xd95   :  { %2959 = vrot.lane.b32.xlu0 %v2953_v29, %s5353_s27  ;;  %3300 = vperm.xlu1 %4931, %v7313_v23   ;;  %v7487_v2 = vpop.permute.xlu1 %3590 }
 0xd96   :  { %3058 = vperm.xlu2 %4939, %v7413_v13   ;;  %4967 = vset.pattern.permute.xlu0 %v8684_v47 }
 0xd9b   :  { %v3271_v46 = vpop.permute.xlu2 %3270 }
 0xd9d   :  { %3067 = vrot.lane.b32.xlu0 %v3061_v12, %s5353_s27  ;;  %4934 = vset.pattern.permute.xlu1 %v8677_v10  ;;  %v3385_v10 = vmul.f32 %v7432_v54, %v8618_v43 }
 0xd9e   :  { %4944 = vset.pattern.permute.xlu2 %v8667_v7  ;;  %2890 = vperm.xlu1 %4934, %v7413_v13   ;;  %v7513_v7 = vpop.permute.xlu0 %3318 }
 0xd9f   :  { %3244 = vperm.xlu2 %4944, %v7413_v13   ;;  %v7499_v29 = vpop.permute.xlu1 %3080 }
 0xda4   :  { %v7504_v23 = vpop.permute.xlu2 %3426 }
 0xda5   :  { %3361 = vrot.lane.b32.xlu0 %v3355_v8, %s5320_s5 }
 0xda6   :  { %4936 = vset.pattern.permute.xlu1 %v8658_v39  ;;  %v7528_v12 = vpop.permute.xlu0 %2867 }
 0xda7   :  { %4946 = vset.pattern.permute.xlu2 %v8666_v48  ;;  %2950 = vperm.xlu1 %4936, %v7413_v13   ;;  %v3463_v48 = vmul.f32 %v7443_v25, %v8628_v21 }
 0xda8   :  { %3322 = vperm.xlu2 %4946, %v7413_v13   ;;  %v7511_v51 = vpop.permute.xlu1 %3668 }
 0xda9   :  { %8697 = vst [vmem:[#allocation66_spill] sm:$0xff] %v7511_v51  ;;  %v3434_v51 = vmul.f32 %v7504_v23, %v8621_v56 }
 0xdad   :  { %3391 = vrot.lane.b32.xlu0 %v3385_v10, %s5353_s27 }
 0xdae   :  { %v7518_v38 = vpop.permute.xlu2 %3486  ;;  %v7542_v25 = vpop.permute.xlu0 %3456 }
 0xdaf   :  { %4940 = vset.pattern.permute.xlu1 %v8657_v22  ;;  %v3493_v22 = vmul.f32 %v7452_v24, %v8628_v21  ;;  %v3464_v23 = vmul.f32 %v7542_v25, %v8621_v56  ;;  %v3169_v25 = vmul.f32 %v7371_v31, %v6015_v45  ;;  %v3247_v31 = vmul.f32 %v7409_v42, %v6036_v15 }
 0xdb0   :  { %4948 = vset.pattern.permute.xlu2 %v8672_v53  ;;  %3106 = vperm.xlu1 %4940, %v7413_v13   ;;  %v3277_v42 = vmul.f32 %v7421_v30, %v6036_v15  ;;  %v7683_v30 = vld [vmem:[%s8203_s18 + $0x30] sm:$0xff] }
 0xdb1   :  { %3382 = vperm.xlu2 %4948, %v7413_v13   ;;  %8705 = vst [vmem:[#allocation23_spill] sm:$0xff] %v7683_v30 }
 0xdb2   :  { %v7524_v39 = vpop.permute.xlu1 %3698 }
 0xdb3   :  { %8698 = vst [vmem:[#allocation43_spill] sm:$0xff] %v7524_v39  ;;  %v2893_v39 = vmul.f32 %v7369_v62, %v8696_v17 }
 0xdb5   :  { %3469 = vrot.lane.b32.xlu0 %v3463_v48, %s5320_s5 }
 0xdb6   :  { %v7555_v10 = vpop.permute.xlu0 %2976 }
 0xdb7   :  { %v7531_v54 = vpop.permute.xlu2 %3594 }
 0xdb8   :  { %4941 = vset.pattern.permute.xlu1 %v8660_v16  ;;  %v8699_v16 = vld [vmem:[#allocation26_spill] sm:$0xff] }
 0xdb9   :  { %4949 = vset.pattern.permute.xlu2 %v8669_v5  ;;  %3136 = vperm.xlu1 %4941, %v7413_v13   ;;  %v2894_v5 = vmul.f32 %v7435_v55, %v8699_v16 }
 0xdba   :  { %2872 = vperm.xlu2 %4949, %v7413_v13  }
 0xdbb   :  { %v7539_v53 = vpop.permute.xlu1 %3404 }
 0xdbd   :  { %3499 = vrot.lane.b32.xlu0 %v3493_v22, %s5353_s27 }
 0xdc0   :  { %v7544_v8 = vpop.permute.xlu2 %3702 }
 0xdc1   :  { %4942 = vset.pattern.permute.xlu1 %v8663_v41  ;;  %v3278_v41 = vmul.f32 %v3271_v46, %v5943_v14 }
 0xdc2   :  { %4950 = vset.pattern.permute.xlu2 %v8671_v63  ;;  %3166 = vperm.xlu1 %4942, %v7413_v13   ;;  %v3535_v63 = vpop.permute.xlu0 %3534 }
 0xdc3   :  { %3430 = vperm.xlu2 %4950, %v7413_v13  }
 0xdc5   :  { %2901 = vrot.lane.b32.xlu0 %v2894_v5, %s5356_s10  ;;  %v7553_v24 = vpop.permute.xlu1 %3512 }
 0xdc6   :  { %8700 = vst [vmem:[#allocation53_spill] sm:$0xff] %v7553_v24 }
 0xdca   :  { %4947 = vset.pattern.permute.xlu1 %v8659_v1  ;;  %v7558_v48 = vpop.permute.xlu2 %3408 }
 0xdcb   :  { %8701 = vst [vmem:[#allocation71_spill] sm:$0xff] %v7558_v48  ;;  %4954 = vset.pattern.permute.xlu2 %v8673_v19  ;;  %3352 = vperm.xlu1 %4947, %v7413_v13   ;;  %v3565_v19 = vpop.permute.xlu0 %3564 }
 0xdcc   :  { %3538 = vperm.xlu2 %4954, %v7413_v13  }
 0xdcd   :  { %3285 = vrot.lane.b32.xlu0 %v3278_v41, %s5353_s27 }
 0xdce   :  { %v7565_v55 = vpop.permute.xlu1 %2994 }
 0xdd3   :  { %4951 = vset.pattern.permute.xlu1 %v8674_v18  ;;  %v7568_v22 = vpop.permute.xlu2 %3516 }
 0xdd4   :  { %8702 = vst [vmem:[#allocation61_spill] sm:$0xff] %v7568_v22  ;;  %4958 = vset.pattern.permute.xlu2 %v8675_v60  ;;  %3460 = vperm.xlu1 %4951, %v7413_v13   ;;  %v7584_v60 = vpop.permute.xlu0 %3084 }
 0xdd5   :  { %3646 = vperm.xlu2 %4958, %v7413_v13  }
 0xdd8   :  { %v7573_v1 = vpop.permute.xlu1 %3024 }
 0xddc   :  { %4952 = vset.pattern.permute.xlu1 %v8676_v4  ;;  %v8703_v4 = vmov 28   ;;  %v7596_v41 = vpop.permute.xlu0 %3642 }
 0xddd   :  { %4963 = vset.pattern.permute.xlu2 %v8686_v26  ;;  %v7577_v46 = vpop.permute.xlu2 %2998  ;;  %3490 = vperm.xlu1 %4952, %v7413_v13  }
 0xdde   :  { %3412 = vperm.xlu2 %4963, %v7413_v13  }
 0xde1   :  { %v7581_v18 = vpop.permute.xlu1 %3162 }
 0xde4   :  { %v7608_v48 = vpop.permute.xlu0 %3672 }
 0xde5   :  { %4955 = vset.pattern.permute.xlu1 %v8679_v0 }
 0xde6   :  { %4964 = vset.pattern.permute.xlu2 %v8687_v11  ;;  %v7587_v5 = vpop.permute.xlu2 %3028  ;;  %3568 = vperm.xlu1 %4955, %v7413_v13  }
 0xde7   :  { %3520 = vperm.xlu2 %4964, %v7413_v13  }
 0xdeb   :  { %v7591_v26 = vpop.permute.xlu1 %3210 }
 0xdee   :  { %4956 = vset.pattern.permute.xlu1 %v8681_v35 }
 0xdef   :  { %4965 = vset.pattern.permute.xlu2 %v8703_v4  ;;  %3598 = vperm.xlu1 %4956, %v7413_v13  }
 0xdf0   :  { %3628 = vperm.xlu2 %4965, %v7413_v13   ;;  %v7599_v0 = vpop.permute.xlu2 %3058 }
 0xdf4   :  { %v3349_v11 = vpop.permute.xlu1 %3348 }
 0xdf5   :  { %v3356_v22 = vmul.f32 %v3349_v11, %v5958_v37  ;;  %v3001_v11 = vmul.f32 %v7425_v28, %v5876_v3  ;;  %v3109_v28 = vmul.f32 %v7353_v9, %v6015_v45  ;;  %v2923_v9 = vmul.f32 %v7345_v40, %v8696_v17 }
 0xdf6   :  { %v3031_v40 = vmul.f32 %v7389_v6, %v5876_v3  ;;  %v3139_v6 = vmul.f32 %v7361_v33, %v6015_v45  ;;  %v7689_v33 = vld [vmem:[%s8203_s18 + $0x28] sm:$0xff] }
 0xdf7   :  { %4959 = vset.pattern.permute.xlu1 %v8683_v44  ;;  %3363 = vrot.lane.b32.xlu0 %v3356_v22, %s5320_s5  ;;  %v7622_v44 = vpop.permute.xlu0 %3192  ;;  %8706 = vst [vmem:[#allocation69_spill] sm:$0xff] %v7689_v33 }
 0xdf8   :  { %2899 = vrot.lane.b32.xlu2 %v2893_v39, %s5356_s10  ;;  %3676 = vperm.xlu1 %4959, %v7413_v13  }
 0xdf9   :  { %v3245_v35 = vpop.permute.xlu2 %3244 }
 0xdfe   :  { %v7614_v24 = vpop.permute.xlu1 %3378 }
 0xdff   :  { %3441 = vrot.lane.b32.xlu0 %v3434_v51, %s5356_s10  ;;  %v3542_v51 = vmul.f32 %v3535_v63, %v8631_v57  ;;  %v7639_v22 = vpop.permute.xlu0 %2920 }
 0xe00   :  { %3007 = vrot.lane.b32.xlu2 %v3001_v11, %s5356_s10  ;;  %4960 = vset.pattern.permute.xlu1 %v8684_v47 }
 0xe01   :  { %3706 = vperm.xlu1 %4960, %v7413_v13  }
 0xe02   :  { %v7620_v62 = vpop.permute.xlu2 %3322 }
 0xe07   :  { %v7628_v39 = vpop.permute.xlu1 %3300  ;;  %3471 = vrot.lane.b32.xlu0 %v3464_v23, %s5320_s5  ;;  %v7657_v63 = vpop.permute.xlu0 %3214 }
 0xe08   :  { %3115 = vrot.lane.b32.xlu2 %v3109_v28, %s5356_s10 }
 0xe09   :  { %4962 = vset.pattern.permute.xlu1 %v8665_v52  ;;  %v3572_v52 = vmul.f32 %v3565_v19, %v8631_v57 }
 0xe0a   :  { %3304 = vperm.xlu1 %4962, %v7413_v13  }
 0xe0b   :  { %v7634_v47 = vpop.permute.xlu2 %3382 }
 0xe0f   :  { %3549 = vrot.lane.b32.xlu0 %v3542_v51, %s5356_s10  ;;  %v3275_v19 = vpop.permute.xlu0 %3274 }
 0xe10   :  { %3175 = vrot.lane.b32.xlu2 %v3169_v25, %s5353_s27  ;;  %v7645_v11 = vpop.permute.xlu1 %2890  ;;  %v3279_v25 = vmul.f32 %v3275_v19, %v6083_v27  ;;  %v3433_v19 = vmul.f32 %v7401_v32, %v8628_v21  ;;  %v5358_v32 = vmov 0.0  }
 0xe12   :  { %2929 = vrot.lane.b32.xlu1 %v2923_v9, %s5320_s5  ;;  %v3325_v9 = vmul.f32 %v7381_v50, %v8618_v43  ;;  %v7712_v50 = vld [vmem:[%s8203_s18 + $0x18] sm:$0xff] }
 0xe13   :  { %4966 = vset.pattern.permute.xlu1 %v8703_v4  ;;  %v3249_v4 = vmul.f32 %v3245_v35, %v6083_v27  ;;  %v7678_v35 = vld [vmem:[%s8203_s18 + $0x38] sm:$0xff]  ;;  %8708 = vst [vmem:[#allocation54_spill] sm:$0xff] %v7712_v50 }
 0xe14   :  { %v7649_v13 = vpop.permute.xlu2 %2872  ;;  %8704 = vst [vmem:[#allocation68_spill] sm:$0xff] %v7678_v35  ;;  %3938 = vmatpush.msra.mxu3 %v7678_v35  ;;  %v8728_v35 = vld [vmem:[#allocation30_spill] sm:$0xff] }
 0xe16   :  { %3939 = vmatpush.msra.mxu3 %v7683_v30 }
 0xe17   :  { %3579 = vrot.lane.b32.xlu0 %v3572_v52, %s5320_s5 }
 0xe18   :  { %3253 = vrot.lane.b32.xlu2 %v3247_v31, %s5320_s5  ;;  %3940 = vmatpush.msra.mxu3 %v7689_v33  ;;  %v3217_v31 = vmul.f32 %v7399_v59, %v6036_v15  ;;  %v7720_v59 = vld [vmem:[%s8203_s18 + $0x10] sm:$0xff] }
 0xe19   :  { %v7660_v23 = vpop.permute.xlu1 %2950  ;;  %8709 = vst [vmem:[#allocation41_spill] sm:$0xff] %v7720_v59  ;;  %v7767_v33 = vld [vmem:[#allocation13] sm:$0xff] }
 0xe1a   :  { %3037 = vrot.lane.b32.xlu1 %v3031_v40, %s5320_s5  ;;  %v7705_v40 = vld [vmem:[%s8203_s18 + $0x20] sm:$0xff]  ;;  %8718 = vst [vmem:[#allocation47_spill] sm:$0xff] %v7767_v33 }
 0xe1b   :  { %8707 = vst [vmem:[#allocation52_spill] sm:$0xff] %v7705_v40  ;;  %3941 = vmatpush.msra.mxu3 %v7705_v40 }
 0xe1d   :  { %v7664_v28 = vpop.permute.xlu2 %3430  ;;  %3942 = vmatpush.msra.mxu3 %v7712_v50 }
 0xe1f   :  { %3257 = vrot.lane.b32.xlu0 %v3249_v4, %s5320_s5  ;;  %3943 = vmatpush.msra.mxu3 %v7720_v59  ;;  %v8716_v59 = vld [vmem:[#allocation27_spill] sm:$0xff] }
 0xe20   :  { %3283 = vrot.lane.b32.xlu2 %v3277_v42, %s5353_s27  ;;  %v7725_v42 = vld [vmem:[%s8203_s18 + $0x8] sm:$0xff]  ;;  %v3032_v50 = vmul.f32 %v7573_v1, %v8716_v59  ;;  %v2954_v1 = vmul.f32 %v7489_v61, %v8699_v16 }
 0xe21   :  { %8710 = vst [vmem:[#allocation60_spill] sm:$0xff] %v7725_v42  ;;  %3944 = vmatpush.msra.mxu3 %v7725_v42  ;;  %v3601_v42 = vmul.f32 %v7487_v2, %v8638_v20  ;;  %v8719_v2 = vld [vmem:[#allocation58_spill] sm:$0xff] }
 0xe22   :  { %3145 = vrot.lane.b32.xlu1 %v3139_v6, %s5320_s5  ;;  %v7673_v51 = vpop.permute.xlu1 %3106  ;;  %v3571_v6 = vmul.f32 %v7476_v36, %v8638_v20  ;;  %v7742_v36 = vld [vmem:[%s8203_s18] sm:$0xff]  ;;  %v3680_v61 = vmul.f32 %v7608_v48, %v8719_v2  ;;  %v3710_v48 = vmul.f32 %v7544_v8, %v8719_v2 }
 0xe23   :  { %8711 = vst [vmem:[#allocation70_spill] sm:$0xff] %v7742_v36  ;;  %3945 = vmatpush.msra.mxu3 %v7742_v36  ;;  %v8715_v36 = vld [vmem:[#allocation39_spill] sm:$0xff] }
 0xe24   :  { %3946 = vmatmul.f32.vlgmr.msra.gmra.mxu3 %v5358_v32 }
 0xe26   :  { %v7695_v52 = vpop.permute.xlu2 %3538 }
 0xe27   :  { %3287 = vrot.lane.b32.xlu0 %v3279_v25, %s5353_s27 }
 0xe28   :  { %3331 = vrot.lane.b32.xlu2 %v3325_v9, %s5356_s10  ;;  %v2924_v9 = vmul.f32 %v7445_v49, %v8699_v16 }
 0xe2a   :  { %3223 = vrot.lane.b32.xlu1 %v3217_v31, %s5356_s10  ;;  %v7746_v31 = vld [vmem:[#allocation13 + $0x18] sm:$0xff] }
 0xe2b   :  { %v7714_v4 = vpop.permute.xlu1 %3136  ;;  %8712 = vst [vmem:[#allocation35_spill] sm:$0xff] %v7746_v31  ;;  %3968 = vmatpush.msra.mxu0 %v7746_v31 }
 0xe2f   :  { %v7732_v25 = vpop.permute.xlu2 %3646  ;;  %3577 = vrot.lane.b32.xlu0 %v3571_v6, %s5320_s5  ;;  %v7749_v6 = vld [vmem:[#allocation13 + $0x10] sm:$0xff] }
 0xe30   :  { %3439 = vrot.lane.b32.xlu2 %v3433_v19, %s5356_s10  ;;  %8713 = vst [vmem:[#allocation36_spill] sm:$0xff] %v7749_v6  ;;  %v7753_v19 = vld [vmem:[#allocation13 + $0x8] sm:$0xff]  ;;  %3969 = vmatpush.msra.mxu0 %v7749_v6 }
 0xe31   :  { %8714 = vst [vmem:[#allocation40_spill] sm:$0xff] %v7753_v19 }
 0xe32   :  { %2931 = vrot.lane.b32.xlu1 %v2924_v9, %s5320_s5  ;;  %v3541_v9 = vmul.f32 %v8715_v36, %v8638_v20  ;;  %3970 = vmatpush.msra.mxu0 %v7753_v19 }
 0xe34   :  { %v7751_v49 = vpop.permute.xlu1 %3166  ;;  %3971 = vmatpush.msra.mxu0 %v7767_v33 }
 0xe35   :  { %3972 = vmatmul.f32.vlgmr.msra.gmra.mxu0 %v5358_v32 }
 0xe36   :  { %4165 = vmatpush.msrb.mxu0 %v7746_v31 }
 0xe37   :  { %3607 = vrot.lane.b32.xlu0 %v3601_v42, %s5353_s27  ;;  %v3650_v42 = vmul.f32 %v7596_v41, %v8719_v2  ;;  %v3002_v41 = vmul.f32 %v7565_v55, %v8716_v59  ;;  %v3062_v55 = vmul.f32 %v7455_v58, %v8716_v59 }
 0xe38   :  { %3547 = vrot.lane.b32.xlu2 %v3541_v9, %s5356_s10  ;;  %v7765_v40 = vpop.permute.xlu2 %3412  ;;  %4166 = vmatpush.msrb.mxu0 %v7749_v6  ;;  %v7779_v9 = vpop.permute.xlu0 %2980 }
 0xe39   :  { %8717 = vst [vmem:[#allocation24_spill] sm:$0xff] %v7765_v40  ;;  %v3602_v40 = vmul.f32 %v7531_v54, %v8631_v57 }
 0xe3a   :  { %3039 = vrot.lane.b32.xlu1 %v3032_v50, %s5320_s5  ;;  %8720 = vst [vmem:[#allocation26_spill] sm:$0xff] %v7779_v9  ;;  %4167 = vmatpush.msrb.mxu0 %v7753_v19  ;;  %v8721_v50 = vld [vmem:[#allocation25_spill] sm:$0xff] }
 0xe3b   :  { %v3140_v32 = vmul.f32 %v7501_v34, %v8721_v50  ;;  %v3386_v34 = vmul.f32 %v7614_v24, %v5958_v37  ;;  %v3494_v24 = vmul.f32 %v7518_v38, %v8621_v56  ;;  %v8727_v19 = vld [vmem:[#allocation29_spill] sm:$0xff]  ;;  %v8735_v56 = vld [vmem:[#allocation32_spill] sm:$0xff] }
 0xe3c   :  { %4168 = vmatpush.msrb.mxu0 %v7767_v33  ;;  %v2895_v58 = vmul.f32 %v7645_v11, %v8727_v19  ;;  %v3218_v11 = vmul.f32 %v7591_v26, %v5943_v14 }
 0xe3d   :  { %v7774_v36 = vpop.permute.xlu1 %3352 }
 0xe3f   :  { %3657 = vrot.lane.b32.xlu0 %v3650_v42, %s5356_s10 }
 0xe40   :  { %2961 = vrot.lane.b32.xlu2 %v2954_v1, %s5353_s27  ;;  %v7800_v1 = vpop.permute.xlu0 %3088 }
 0xe41   :  { %v7786_v31 = vpop.permute.xlu2 %3520  ;;  %8723 = vst [vmem:[#allocation27_spill] sm:$0xff] %v7800_v1 }
 0xe42   :  { %8722 = vst [vmem:[#allocation39_spill] sm:$0xff] %v7786_v31  ;;  %3147 = vrot.lane.b32.xlu1 %v3140_v32, %s5320_s5 }
 0xe46   :  { %v7794_v42 = vpop.permute.xlu1 %3460 }
 0xe47   :  { %3687 = vrot.lane.b32.xlu0 %v3680_v61, %s5320_s5 }
 0xe48   :  { %3009 = vrot.lane.b32.xlu2 %v3002_v41, %s5356_s10  ;;  %v7816_v41 = vpop.permute.xlu0 %3196 }
 0xe49   :  { %8725 = vst [vmem:[#allocation72_spill] sm:$0xff] %v7816_v41 }
 0xe4a   :  { %v7802_v33 = vpop.permute.xlu2 %3628  ;;  %3393 = vrot.lane.b32.xlu1 %v3386_v34, %s5353_s27  ;;  %v8726_v34 = vld [vmem:[#allocation67_spill] sm:$0xff] }
 0xe4b   :  { %8724 = vst [vmem:[#allocation25_spill] sm:$0xff] %v7802_v33  ;;  %v3110_v8 = vmul.f32 %v8726_v34, %v8721_v50  ;;  %v8730_v33 = vld [vmem:[#allocation28_spill] sm:$0xff] }
 0xe4f   :  { %v7809_v32 = vpop.permute.xlu1 %3490  ;;  %3717 = vrot.lane.b32.xlu0 %v3710_v48, %s5353_s27 }
 0xe50   :  { %3069 = vrot.lane.b32.xlu2 %v3062_v55, %s5353_s27  ;;  %v2960_v38 = vpop.permute.xlu0 %2959  ;;  %v3170_v55 = vmul.f32 %v7581_v18, %v8721_v50 }
 0xe52   :  { %v2900_v61 = vpop.permute.xlu2 %2899  ;;  %3501 = vrot.lane.b32.xlu1 %v3494_v24, %s5353_s27  ;;  %v2925_v24 = vmul.f32 %v7639_v22, %v8727_v19 }
 0xe58   :  { %3117 = vrot.lane.b32.xlu2 %v3110_v8, %s5356_s10  ;;  %v7823_v6 = vpop.permute.xlu1 %3568  ;;  %v3068_v8 = vpop.permute.xlu0 %3067 }
 0xe5a   :  { %v3008_v48 = vpop.permute.xlu2 %3007  ;;  %2903 = vrot.lane.b32.xlu1 %v2895_v58, %s5356_s10  ;;  %v3033_v58 = vmul.f32 %v7587_v5, %v8728_v35 }
 0xe60   :  { %3177 = vrot.lane.b32.xlu2 %v3170_v55, %s5353_s27  ;;  %v8729_v55 = vld [vmem:[#allocation63_spill] sm:$0xff]  ;;  %v7847_v26 = vpop.permute.xlu0 %3361 }
 0xe61   :  { %v7831_v34 = vpop.permute.xlu1 %3598  ;;  %v3248_v2 = vmul.f32 %v8729_v55, %v5943_v14 }
 0xe62   :  { %v3116_v30 = vpop.permute.xlu2 %3115  ;;  %2933 = vrot.lane.b32.xlu1 %v2925_v24, %s5320_s5  ;;  %v3141_v24 = vmul.f32 %v7714_v4, %v8730_v33 }
 0xe68   :  { %3225 = vrot.lane.b32.xlu2 %v3218_v11, %s5356_s10  ;;  %v3326_v11 = vmul.f32 %v7513_v7, %v5958_v37  ;;  %v7858_v4 = vpop.permute.xlu0 %3391  ;;  %v8732_v7 = vld [vmem:[#allocation44_spill] sm:$0xff] }
 0xe6a   :  { %v3176_v18 = vpop.permute.xlu2 %3175  ;;  %3041 = vrot.lane.b32.xlu1 %v3033_v58, %s5320_s5  ;;  %v7840_v22 = vpop.permute.xlu1 %3676  ;;  %v3219_v58 = vmul.f32 %v7657_v63, %v6083_v27  ;;  %v2875_v63 = vmul.f32 %v8732_v7, %v8696_v17  ;;  %v8734_v17 = vld [vmem:[#allocation56_spill] sm:$0xff] }
 0xe70   :  { %3255 = vrot.lane.b32.xlu2 %v3248_v2, %s5320_s5  ;;  %v7870_v27 = vpop.permute.xlu0 %3469 }
 0xe72   :  { %v3254_v31 = vpop.permute.xlu2 %3253  ;;  %3149 = vrot.lane.b32.xlu1 %v3141_v24, %s5320_s5  ;;  %v2955_v24 = vmul.f32 %v7660_v23, %v8727_v19  ;;  %v8733_v23 = vld [vmem:[#allocation65_spill] sm:$0xff] }
 0xe73   :  { %v7850_v5 = vpop.permute.xlu1 %3706  ;;  %v2983_v9 = vmul.f32 %v8733_v23, %v5876_v3  ;;  %v3327_v3 = vmul.f32 %v7620_v62, %v8735_v56  ;;  %v8736_v23 = vld [vmem:[#allocation51_spill] sm:$0xff] }
 0xe78   :  { %3333 = vrot.lane.b32.xlu2 %v3326_v11, %s5356_s10  ;;  %v2908_v11 = vadd.f32 %v2900_v61, %v2875_v63  ;;  %v3063_v63 = vmul.f32 %v7599_v0, %v8728_v35  ;;  %v3111_v0 = vmul.f32 %v7673_v51, %v8730_v33 }
 0xe7a   :  { %v3284_v55 = vpop.permute.xlu2 %3283  ;;  %3227 = vrot.lane.b32.xlu1 %v3219_v58, %s5356_s10 }
 0xe7c   :  { %v7860_v2 = vpop.permute.xlu1 %3304 }
 0xe7d   :  { %8731 = vst [vmem:[#allocation67_spill] sm:$0xff] %v7860_v2  ;;  %v3003_v2 = vmul.f32 %v7577_v46, %v8728_v35  ;;  %v3500_v46 = vpop.permute.xlu0 %3499 }
 0xe80   :  { %2963 = vrot.lane.b32.xlu2 %v2955_v24, %s5353_s27 }
 0xe82   :  { %v3332_v41 = vpop.permute.xlu2 %3331  ;;  %3609 = vrot.lane.b32.xlu1 %v3602_v40, %s5353_s27 }
 0xe84   :  { %v2930_v58 = vpop.permute.xlu1 %2929 }
 0xe85   :  { %v2938_v1 = vadd.f32 %v2930_v58, %v2908_v11  ;;  %v3091_v11 = vmul.f32 %v7499_v29, %v6015_v45  ;;  %v3199_v45 = vmul.f32 %v8736_v23, %v6036_v15  ;;  %v2902_v62 = vpop.permute.xlu0 %2901  ;;  %v3387_v15 = vmul.f32 %v7634_v47, %v8735_v56 }
 0xe86   :  { %v2984_v47 = vmul.f32 %v7555_v10, %v8716_v59 }
 0xe87   :  { %v2968_v54 = vadd.f32 %v2960_v38, %v2938_v1 }
 0xe88   :  { %3011 = vrot.lane.b32.xlu2 %v3003_v2, %s5356_s10 }
 0xe89   :  { %v2986_v24 = vadd.f32 %v2983_v9, %v2968_v54 }
 0xe8a   :  { %v3440_v57 = vpop.permute.xlu2 %3439  ;;  %3620 = vperm.xlu1 %4966, %v8734_v17  }
 0xe8b   :  { %v3016_v7 = vadd.f32 %v3008_v48, %v2986_v24 }
 0xe8c   :  { %v3038_v40 = vpop.permute.xlu1 %3037 }
 0xe8d   :  { %v3046_v61 = vadd.f32 %v3038_v40, %v3016_v7  ;;  %v3171_v7 = vmul.f32 %v7751_v49, %v8730_v33  ;;  %v2876_v40 = vmul.f32 %v7528_v12, %v8699_v16  ;;  %v8739_v16 = vld [vmem:[#allocation33_spill] sm:$0xff] }
 0xe8f   :  { %v3076_v58 = vadd.f32 %v3068_v8, %v3046_v61  ;;  %v3357_v8 = vmul.f32 %v7774_v36, %v8735_v56  ;;  %v8737_v36 = vld [vmem:[#allocation59_spill] sm:$0xff] }
 0xe90   :  { %3071 = vrot.lane.b32.xlu2 %v3063_v63, %s5353_s27 }
 0xe91   :  { %v3094_v9 = vadd.f32 %v3091_v11, %v3076_v58  ;;  %v2909_v11 = vadd.f32 %v2902_v62, %v2876_v40  ;;  %v7904_v58 = vpop.permute.xlu0 %3285  ;;  %v8743_v40 = vld [vmem:[#allocation49_spill] sm:$0xff] }
 0xe92   :  { %v3548_v1 = vpop.permute.xlu2 %3547  ;;  %3335 = vrot.lane.b32.xlu1 %v3327_v3, %s5356_s10 }
 0xe93   :  { %v3124_v48 = vadd.f32 %v3116_v30, %v3094_v9 }
 0xe94   :  { %v3146_v38 = vpop.permute.xlu1 %3145 }
 0xe95   :  { %v3154_v2 = vadd.f32 %v3146_v38, %v3124_v48  ;;  %v8738_v38 = vld [vmem:[#allocation45_spill] sm:$0xff] }
 0xe96   :  { %v3465_v12 = vmul.f32 %v7794_v42, %v8738_v38  ;;  %v8741_v42 = vld [vmem:[#allocation57_spill] sm:$0xff] }
 0xe97   :  { %v3184_v29 = vadd.f32 %v3176_v18, %v3154_v2  ;;  %v3307_v18 = vmul.f32 %v8737_v36, %v8618_v43 }
 0xe98   :  { %3119 = vrot.lane.b32.xlu2 %v3111_v0, %s5356_s10 }
 0xe99   :  { %v3202_v54 = vadd.f32 %v3199_v45, %v3184_v29 }
 0xe9a   :  { %v2962_v24 = vpop.permute.xlu2 %2961  ;;  %3365 = vrot.lane.b32.xlu1 %v3357_v8, %s5320_s5  ;;  %v8740_v8 = vld [vmem:[#allocation31_spill] sm:$0xff] }
 0xe9b   :  { %v3649_v62 = vmul.f32 %v8741_v42, %v8740_v8 }
 0xe9c   :  { %v3224_v30 = vpop.permute.xlu1 %3223 }
 0xe9d   :  { %v3232_v17 = vadd.f32 %v3224_v30, %v3202_v54  ;;  %v3092_v54 = vmul.f32 %v7584_v60, %v8721_v50 }
 0xe9f   :  { %v3262_v51 = vadd.f32 %v3254_v31, %v3232_v17 }
 0xea0   :  { %3179 = vrot.lane.b32.xlu2 %v3171_v7, %s5353_s27 }
 0xea1   :  { %v3292_v61 = vadd.f32 %v3284_v55, %v3262_v51  ;;  %v3415_v55 = vmul.f32 %v7539_v53, %v8628_v21 }
 0xea2   :  { %v3010_v63 = vpop.permute.xlu2 %3009  ;;  %3395 = vrot.lane.b32.xlu1 %v3387_v15, %s5353_s27 }
 0xea3   :  { %v3310_v49 = vadd.f32 %v3307_v18, %v3292_v61  ;;  %v7933_v18 = vpop.f32.mrf.mxu3  ;;  %v3200_v61 = vmul.f32 %v7622_v44, %v5943_v14  ;;  %v8744_v14 = vld [vmem:[#allocation64_spill] sm:$0xff] }
 0xea4   :  { %v2932_v31 = vpop.permute.xlu1 %2931  ;;  %v3651_v44 = vmul.f32 %v7732_v25, %v8744_v14  ;;  %v8745_v25 = vld [vmem:[#allocation66_spill] sm:$0xff] }
 0xea5   :  { %v3340_v3 = vadd.f32 %v3332_v41, %v3310_v49  ;;  %v2939_v9 = vadd.f32 %v2932_v31, %v2909_v11  ;;  %v7916_v41 = vpop.permute.xlu0 %3363  ;;  %v3543_v49 = vmul.f32 %v7695_v52, %v8743_v40  ;;  %v3603_v31 = vmul.f32 %v7831_v34, %v8743_v40  ;;  %v4973_v34 = vld [vmem:[%s8205_s20] ss:$0 sm:$0xff] }
 0xea7   :  { %v3370_v48 = vadd.f32 %v7847_v26, %v3340_v3  ;;  %v2969_v43 = vadd.f32 %v2962_v24, %v2939_v9  ;;  %v8742_v24 = vld [vmem:[#allocation53_spill] sm:$0xff] }
 0xea8   :  { %3624 = vperm.xlu2 %4965, %v8739_v16   ;;  %v3523_v30 = vmul.f32 %v8742_v24, %v8638_v20  ;;  %v3573_v20 = vmul.f32 %v7823_v6, %v8743_v40 }
 0xea9   :  { %v3400_v2 = vadd.f32 %v7858_v4, %v3370_v48  ;;  %v2987_v0 = vadd.f32 %v2984_v47, %v2969_v43  ;;  %v3495_v4 = vmul.f32 %v7809_v32, %v8738_v38  ;;  %v3435_v32 = vmul.f32 %v7664_v28, %v8738_v38 }
 0xeaa   :  { %v3070_v23 = vpop.permute.xlu2 %3069  ;;  %3473 = vrot.lane.b32.xlu1 %v3465_v12, %s5320_s5  ;;  %v3681_v48 = vmul.f32 %v7840_v22, %v8744_v14 }
 0xeab   :  { %v3418_v10 = vadd.f32 %v3415_v55, %v3400_v2  ;;  %v3017_v59 = vadd.f32 %v3010_v63, %v2987_v0  ;;  %v7946_v6 = vpop.f32.mrf.mxu3 }
 0xeac   :  { %v3040_v26 = vpop.permute.xlu1 %3039 }
 0xead   :  { %v3448_v45 = vadd.f32 %v3440_v57, %v3418_v10  ;;  %v3047_v29 = vadd.f32 %v3040_v26, %v3017_v59  ;;  %v3442_v60 = vpop.permute.xlu0 %3441  ;;  %v3308_v10 = vmul.f32 %v7628_v39, %v5958_v37  ;;  %v3711_v59 = vmul.f32 %v7850_v5, %v8744_v14 }
 0xeae   :  { %v2877_v37 = vmul.f32 %v7649_v13, %v8727_v19  ;;  %v8749_v13 = vld [vmem:[#allocation26_spill] sm:$0xff] }
 0xeaf   :  { %v3478_v21 = vadd.f32 %v7870_v27, %v3448_v45  ;;  %v3077_v53 = vadd.f32 %v3070_v23, %v3047_v29  ;;  %v3679_v23 = vmul.f32 %v8745_v25, %v8740_v8  ;;  %v4974_v29 = vld [vmem:[%s8206_s21] ss:$0 sm:$0xff]  ;;  %v2985_v19 = vmul.f32 %v8749_v13, %v8728_v35  ;;  %v8752_v35 = vld [vmem:[#allocation27_spill] sm:$0xff] }
 0xeb0   :  { %3655 = vrot.lane.b32.xlu2 %v3649_v62, %s5356_s10 }
 0xeb1   :  { %v3508_v17 = vadd.f32 %v3500_v46, %v3478_v21  ;;  %v3095_v57 = vadd.f32 %v3092_v54, %v3077_v53  ;;  %v8746_v21 = vld [vmem:[#allocation48_spill] sm:$0xff]  ;;  %v8747_v53 = vld [vmem:[#allocation71_spill] sm:$0xff] }
 0xeb2   :  { %v3118_v7 = vpop.permute.xlu2 %3117  ;;  %3503 = vrot.lane.b32.xlu1 %v3495_v4, %s5353_s27  ;;  %v3973_v22 = vpop.f32.mrf.mxu0  ;;  %v3416_v4 = vmul.f32 %v8747_v53, %v8746_v21 }
 0xeb3   :  { %v3526_v51 = vadd.f32 %v3523_v30, %v3508_v17  ;;  %v3125_v15 = vadd.f32 %v3118_v7, %v3095_v57  ;;  %v3947_v12 = vpop.f32.mrf.mxu3  ;;  %v8748_v17 = vld [vmem:[#allocation43_spill] sm:$0xff] }
 0xeb4   :  { %v3148_v36 = vpop.permute.xlu1 %3147  ;;  %v3948_v0 = vadd.f32 %v4973_v34, %v3947_v12  ;;  %v3709_v57 = vmul.f32 %v8748_v17, %v8740_v8 }
 0xeb5   :  { %v7929_v50 = vadd.f32 %v3548_v1, %v3526_v51  ;;  %v3155_v27 = vadd.f32 %v3148_v36, %v3125_v15  ;;  %v3472_v28 = vpop.permute.xlu0 %3471 }
 0xeb6   :  { %v3976_v45 = vadd.f32 %v3973_v22, %v3948_v0 }
 0xeb8   :  { %3443 = vrot.lane.b32.xlu2 %v3435_v32, %s5356_s10  ;;  %v7973_v5 = vadd.f32 %v4974_v29, %v3976_v45  ;;  %v8753_v45 = vld [vmem:[#allocation55_spill] sm:$0xff]  ;;  %v8754_v29 = vld [vmem:[#allocation72_spill] sm:$0xff] }
 0xeba   :  { %v3178_v46 = vpop.permute.xlu2 %3177  ;;  %3581 = vrot.lane.b32.xlu1 %v3573_v20, %s5320_s5  ;;  %5004 = vtanh.f32 %v7973_v5 }
 0xebb   :  { %v3185_v63 = vadd.f32 %v3178_v46, %v3155_v27 }
 0xebc   :  { %v3394_v1 = vpop.permute.xlu1 %3393 }
 0xebd   :  { %v3203_v11 = vadd.f32 %v3200_v61, %v3185_v63  ;;  %v3550_v52 = vpop.permute.xlu0 %3549 }
 0xec0   :  { %3551 = vrot.lane.b32.xlu2 %v3543_v49, %s5356_s10  ;;  %v5005_v61 = vpop.eup %5004 }
 0xec2   :  { %v3226_v3 = vpop.permute.xlu2 %3225  ;;  %3611 = vrot.lane.b32.xlu1 %v3603_v31, %s5353_s27 }
 0xec3   :  { %v3233_v9 = vadd.f32 %v3226_v3, %v3203_v11  ;;  %v8750_v3 = vld [vmem:[#allocation50_spill] sm:$0xff] }
 0xec4   :  { %v3502_v47 = vpop.permute.xlu1 %3501 }
 0xec5   :  { %v3580_v62 = vpop.permute.xlu0 %3579 }
 0xec8   :  { %3659 = vrot.lane.b32.xlu2 %v3651_v44, %s5356_s10 }
 0xeca   :  { %v3256_v43 = vpop.permute.xlu2 %3255  ;;  %3689 = vrot.lane.b32.xlu1 %v3681_v48, %s5320_s5 }
 0xecb   :  { %v3263_v16 = vadd.f32 %v3256_v43, %v3233_v9  ;;  %v8751_v9 = vld [vmem:[#allocation61_spill] sm:$0xff] }
 0xecc   :  { %v2904_v55 = vpop.permute.xlu1 %2903  ;;  %v3524_v44 = vmul.f32 %v8751_v9, %v8750_v3 }
 0xecd   :  { %v3293_v2 = vadd.f32 %v7904_v58, %v3263_v16  ;;  %v2910_v24 = vadd.f32 %v2904_v55, %v2877_v37  ;;  %v3258_v46 = vpop.permute.xlu0 %3257 }
 0xecf   :  { %v3311_v26 = vadd.f32 %v3308_v10, %v3293_v2 }
 0xed0   :  { %3685 = vrot.lane.b32.xlu2 %v3679_v23, %s5320_s5 }
 0xed2   :  { %v3334_v58 = vpop.permute.xlu2 %3333  ;;  %3719 = vrot.lane.b32.xlu1 %v3711_v59, %s5353_s27 }
 0xed3   :  { %v3341_v42 = vadd.f32 %v3334_v58, %v3311_v26  ;;  %v3201_v58 = vmul.f32 %v8754_v29, %v8753_v45 }
 0xed4   :  { %v2934_v54 = vpop.permute.xlu1 %2933 }
 0xed5   :  { %v3371_v39 = vadd.f32 %v7916_v41, %v3341_v42  ;;  %v2940_v51 = vadd.f32 %v2934_v54, %v2910_v24  ;;  %v3288_v31 = vpop.permute.xlu0 %3287 }
 0xed7   :  { %v3401_v30 = vadd.f32 %v3394_v1, %v3371_v39 }
 0xed9   :  { %v3419_v7 = vadd.f32 %v3416_v4, %v3401_v30  ;;  %v8755_v4 = vld [vmem:[#allocation67_spill] sm:$0xff] }
 0xeda   :  { %v2964_v15 = vpop.permute.xlu2 %2963  ;;  %3715 = vrot.lane.b32.xlu1 %v3709_v57, %s5353_s27  ;;  %v3309_v24 = vmul.f32 %v8755_v4, %v8735_v56  ;;  %v8757_v56 = vld [vmem:[#allocation39_spill] sm:$0xff] }
 0xedb   :  { %v3449_v41 = vadd.f32 %v3442_v60, %v3419_v7  ;;  %v2970_v36 = vadd.f32 %v2964_v15, %v2940_v51  ;;  %v3093_v60 = vmul.f32 %v8752_v35, %v8730_v33 }
 0xedc   :  { %v3042_v27 = vpop.permute.xlu1 %3041 }
 0xedd   :  { %v2988_v32 = vadd.f32 %v2985_v19, %v2970_v36  ;;  %v3479_v20 = vadd.f32 %v3472_v28, %v3449_v41  ;;  %v8756_v19 = vld [vmem:[#allocation24_spill] sm:$0xff] }
 0xede   :  { %v3417_v41 = vmul.f32 %v8756_v19, %v8738_v38  ;;  %v5079_v19 = vld [vmem:[#allocation11] sm:$0xff] }
 0xedf   :  { %v3509_v63 = vadd.f32 %v3502_v47, %v3479_v20  ;;  %v3578_v47 = vpop.permute.xlu0 %3577 }
 0xee0   :  { %v3586_v10 = vadd.f32 %v3578_v47, %v7929_v50 }
 0xee1   :  { %v3527_v12 = vadd.f32 %v3524_v44, %v3509_v63 }
 0xee2   :  { %v3012_v1 = vpop.permute.xlu2 %3011  ;;  %4004 = vrot.lane.b32.xlu1 %v5005_v61, %s5320_s5 }
 0xee3   :  { %v3018_v49 = vadd.f32 %v3012_v1, %v2988_v32  ;;  %v3557_v55 = vadd.f32 %v3550_v52, %v3527_v12  ;;  %v3525_v1 = vmul.f32 %v8757_v56, %v8743_v40  ;;  %v8768_v56 = vld [vmem:[#allocation70_spill] sm:$0xff] }
 0xee4   :  { %v3150_v11 = vpop.permute.xlu1 %3149 }
 0xee5   :  { %v3048_v48 = vadd.f32 %v3042_v27, %v3018_v49  ;;  %v3587_v0 = vadd.f32 %v3580_v62, %v3557_v55 }
 0xee7   :  { %v3608_v33 = vpop.permute.xlu0 %3607 }
 0xee8   :  { %v3616_v37 = vadd.f32 %v3608_v33, %v3586_v10 }
 0xeea   :  { %v3072_v34 = vpop.permute.xlu2 %3071 }
 0xeeb   :  { %v3078_v43 = vadd.f32 %v3072_v34, %v3048_v48 }
 0xeec   :  { %v3228_v28 = vpop.permute.xlu1 %3227 }
 0xeed   :  { %v3096_v16 = vadd.f32 %v3093_v60, %v3078_v43  ;;  %v8758_v43 = vld [vmem:[#allocation25_spill] sm:$0xff] }
 0xeee   :  { %v3633_v12 = vmul.f32 %v8758_v43, %v8744_v14 }
 0xeef   :  { %v3658_v48 = vpop.permute.xlu0 %3657 }
 0xef2   :  { %v3120_v2 = vpop.permute.xlu2 %3119 }
 0xef3   :  { %v3126_v23 = vadd.f32 %v3120_v2, %v3096_v16  ;;  %v8759_v16 = vld [vmem:[#allocation58_spill] sm:$0xff] }
 0xef4   :  { %v3610_v25 = vpop.permute.xlu1 %3609 }
 0xef5   :  { %v3617_v22 = vadd.f32 %v3610_v25, %v3587_v0  ;;  %v3156_v59 = vadd.f32 %v3150_v11, %v3126_v23  ;;  %v4609_v11 = vmul.f32 -1.442695, %v7973_v5 }
 0xef7   :  { %5006 = vpow2.f32 %v4609_v11  ;;  %v3688_v2 = vpop.permute.xlu0 %3687  ;;  %v8770_v11 = vld [vmem:[#allocation35_spill] sm:$0xff] }
 0xefa   :  { %v3180_v26 = vpop.permute.xlu2 %3179 }
 0xefb   :  { %v3186_v42 = vadd.f32 %v3180_v26, %v3156_v59 }
 0xefc   :  { %v3621_v54 = vpop.permute.xlu1 %3620 }
 0xefd   :  { %v3204_v39 = vadd.f32 %v3201_v58, %v3186_v42  ;;  %v3631_v52 = vmul.f32 %v3621_v54, %v8740_v8  ;;  %v5007_v9 = vpop.eup %5006 }
 0xefe   :  { %v3985_v34 = vadd.f32 1.0, %v5007_v9 }
 0xeff   :  { %v3234_v21 = vadd.f32 %v3228_v28, %v3204_v39  ;;  %v3634_v53 = vadd.f32 %v3631_v52, %v3616_v37  ;;  %v3718_v33 = vpop.permute.xlu0 %3717 }
 0xf00   :  { %5008 = vrcp.f32 %v3985_v34  ;;  %vm3991_vm13 = vweird.f32 %v3985_v34 }
 0xf01   :  { %v3264_v62 = vadd.f32 %v3258_v46, %v3234_v21 }
 0xf02   :  { %v3625_v57 = vpop.permute.xlu2 %3624 }
 0xf03   :  { %v3294_v30 = vadd.f32 %v3288_v31, %v3264_v62  ;;  %v3632_v40 = vmul.f32 %v3625_v57, %v8759_v16  ;;  %v3995_v62 = vand.u32 2147483647, %v3985_v34 }
 0xf04   :  { %v3336_v50 = vpop.permute.xlu1 %3335 }
 0xf05   :  { %v3312_v17 = vadd.f32 %v3309_v24, %v3294_v30  ;;  %v3635_v5 = vadd.f32 %v3632_v40, %v3617_v22  ;;  %v3997_v22 = vand.u32 2147483648, %v3985_v34  ;;  %vm3996_vm0 = vcmp.eq.f32.partialorder %v3995_v62, 8.507059e+37 }
 0xf06   :  { %v5009_v47 = vpop.eup %5008 }
 0xf07   :  { %v3342_v51 = vadd.f32 %v3336_v50, %v3312_v17  ;;  %v3665_v23 = vadd.f32 %v3658_v48, %v3635_v5  ;;  %v3987_v10 = vmul.f32 %v5009_v47, %v3985_v34  ;;  %vm3992_vm14 = vweird.f32 %v5009_v47  ;;  %v5075_v17 = vld [vmem:[%s8523_s19] sm:$0xff]  ;;  %v8774_v34 = vld [vmem:[#allocation46_spill] sm:$0xff] }
 0xf08   :  { %vm3993_vm15 = vmor %vm3991_vm13, %vm3992_vm14  ;;  %v3998_v30 = vor.u32 1.1754944e-38, %v3997_v22  ;;  %vm4056_vm14 = vcmask 91136  }
 0xf09   :  { %v3695_v45 = vadd.f32 %v3688_v2, %v3665_v23  ;;  %v3988_v29 = vsub.f32 1.0, %v3987_v10 }
 0xf0a   :  { %v3656_v27 = vpop.permute.xlu2 %3655 }
 0xf0b   :  { %v3725_v14 = vadd.f32 %v3718_v33, %v3695_v45  ;;  %v3989_v54 = vmul.f32 %v5009_v47, %v3988_v29  ;;  %v3664_v39 = vadd.f32 %v3656_v27, %v3634_v53  ;;  %v5076_v53 = vld [vmem:[#allocation11 + $0x18] sm:$0xff]  ;;  %v8761_v27 = vld [vmem:[#allocation23_spill] sm:$0xff]  ;;  %v5083_v29 = vld [vmem:[%s8201_s16] ss:$0 sm:$0xff] }
 0xf0c   :  { %v3366_v7 = vpop.permute.xlu1 %3365 }
 0xf0d   :  { %v3372_v15 = vadd.f32 %v3366_v7, %v3342_v51  ;;  %v3990_v21 = vadd.f32 %v5009_v47, %v3989_v54  ;;  %v5077_v7 = vld [vmem:[#allocation11 + $0x10] sm:$0xff] }
 0xf0f   :  { %v3994_v50 = vsel %vm3993_vm15, %v5009_v47, %v3990_v21 }
 0xf10   :  { %v3999_v57 = vsel %vm3996_vm0, %v3998_v30, %v3994_v50 }
 0xf11   :  { %v4002_v9 = vmul.f32 0.0, %v3999_v57 }
 0xf12   :  { %v3444_v20 = vpop.permute.xlu2 %3443 }
 0xf14   :  { %v3396_v13 = vpop.permute.xlu1 %3395 }
 0xf15   :  { %v3402_v36 = vadd.f32 %v3396_v13, %v3372_v15  ;;  %v5078_v13 = vld [vmem:[#allocation11 + $0x8] sm:$0xff] }
 0xf17   :  { %v3420_v8 = vadd.f32 %v3417_v41, %v3402_v36  ;;  %v5080_v41 = vld [vmem:[%s8523_s19 + $0x8] sm:$0xf]  ;;  %v8760_v36 = vld [vmem:[#allocation68_spill] sm:$0xff] }
 0xf19   :  { %v3450_v46 = vadd.f32 %v3444_v20, %v3420_v8  ;;  %v8762_v8 = vld [vmem:[#allocation69_spill] sm:$0xff]  ;;  %v8764_v20 = vld [vmem:[#allocation42_spill] sm:$0xff] }
 0xf1a   :  { %v3552_v44 = vpop.permute.xlu2 %3551 }
 0xf1c   :  { %v3474_v32 = vpop.permute.xlu1 %3473 }
 0xf1d   :  { %v3480_v61 = vadd.f32 %v3474_v32, %v3450_v46  ;;  %v8763_v32 = vld [vmem:[#allocation52_spill] sm:$0xff]  ;;  %v8765_v46 = vld [vmem:[#allocation54_spill] sm:$0xff] }
 0xf22   :  { %v3660_v25 = vpop.permute.xlu2 %3659 }
 0xf24   :  { %v3504_v63 = vpop.permute.xlu1 %3503 }
 0xf25   :  { %v3510_v49 = vadd.f32 %v3504_v63, %v3480_v61  ;;  %v8766_v61 = vld [vmem:[#allocation41_spill] sm:$0xff]  ;;  %v8767_v63 = vld [vmem:[#allocation60_spill] sm:$0xff] }
 0xf27   :  { %v3528_v31 = vadd.f32 %v3525_v1, %v3510_v49  ;;  %v8769_v1 = vld [vmem:[#allocation34_spill] sm:$0xff]  ;;  %v8771_v49 = vld [vmem:[#allocation36_spill] sm:$0xff] }
 0xf29   :  { %v3558_v38 = vadd.f32 %v3552_v44, %v3528_v31  ;;  %v8772_v31 = vld [vmem:[#allocation40_spill] sm:$0xff] }
 0xf2a   :  { %v3686_v37 = vpop.permute.xlu2 %3685 }
 0xf2b   :  { %v3694_v52 = vadd.f32 %v3686_v37, %v3664_v39 }
 0xf2c   :  { %v3582_v3 = vpop.permute.xlu1 %3581 }
 0xf2d   :  { %v3588_v35 = vadd.f32 %v3582_v3, %v3558_v38  ;;  %v8773_v3 = vld [vmem:[#allocation47_spill] sm:$0xff] }
 0xf34   :  { %v3612_v60 = vpop.permute.xlu1 %3611 }
 0xf35   :  { %v3618_v28 = vadd.f32 %v3612_v60, %v3588_v35 }
 0xf37   :  { %v3636_v55 = vadd.f32 %v3633_v12, %v3618_v28  ;;  %v5081_v12 = vld [vmem:[#allocation10] ss:$0 sm:$0xff] }
 0xf39   :  { %v3666_v59 = vadd.f32 %v3660_v25, %v3636_v55  ;;  %v8775_v55 = vld [vmem:[#allocation38_spill] sm:$0xff] }
 0xf3c   :  { %v3690_v0 = vpop.permute.xlu1 %3689 }
 0xf3d   :  { %v3696_v26 = vadd.f32 %v3690_v0, %v3666_v59 }
 0xf44   :  { %v3720_v58 = vpop.permute.xlu1 %3719 }
 0xf45   :  { %v3726_v42 = vadd.f32 %v3720_v58, %v3696_v26 }
 0xf47   :  { %3740 = vmatpush.msrb.mxu1 %v3726_v42 }
 0xf49   :  { %3741 = vmatpush.msrb.mxu1 %v3725_v14 }
 0xf4c   :  { %v3716_v4 = vpop.permute.xlu1 %3715 }
 0xf4d   :  { %v3724_v24 = vadd.f32 %v3716_v4, %v3694_v52 }
 0xf4f   :  { %3742 = vmatpush.msrb.mxu1 %v3724_v24 }
 0xf50   :  { %4599 = vmatmul.msk.f32.vlgmr.msrb.gmra.mxu1 %vm1513_vm7, %v5075_v17 }
 0xf51   :  { %3826 = vmatpush.msra.mxu1 %v5076_v53 }
 0xf53   :  { %3827 = vmatpush.msra.mxu1 %v5077_v7 }
 0xf54   :  { %v4005_v51 = vpop.permute.xlu1 %4004 }
 0xf55   :  { %v4007_v15 = vmul.f32 %v4005_v51, %v3999_v57  ;;  %3828 = vmatpush.msra.mxu1 %v5078_v13 }
 0xf57   :  { %4009 = vrot.lane.b32.xlu1 %v4007_v15, %s5353_s27  ;;  %3829 = vmatpush.msra.mxu1 %v5079_v19 }
 0xf58   :  { %4600 = vmatmul.msk.f32.gmra.mxu1 %vm1513_vm7, %v5080_v41 }
 0xf59   :  { %4137 = vmatpush.msrb.mxu1 %v8760_v36 }
 0xf5b   :  { %4138 = vmatpush.msrb.mxu1 %v8761_v27 }
 0xf5d   :  { %4139 = vmatpush.msrb.mxu1 %v8762_v8 }
 0xf5f   :  { %4140 = vmatpush.msrb.mxu1 %v8763_v32 }
 0xf60   :  { %4605 = vmatmul.msk.f32.vlgmr.msra.gmra.mxu1 %vm1555_vm6, %v8764_v20 }
 0xf61   :  { %4141 = vmatpush.msrb.mxu1 %v8765_v46 }
 0xf63   :  { %4142 = vmatpush.msrb.mxu1 %v8766_v61 }
 0xf65   :  { %4143 = vmatpush.msrb.mxu1 %v8767_v63 }
 0xf67   :  { %4144 = vmatpush.msrb.mxu1 %v8768_v56 }
 0xf68   :  { %4606 = vmatmul.msk.f32.gmra.mxu1 %vm1555_vm6, %v8769_v1 }
 0xf69   :  { %4347 = vmatpush.msra.mxu1 %v8770_v11 }
 0xf6b   :  { %4348 = vmatpush.msra.mxu1 %v8771_v49 }
 0xf6d   :  { %4349 = vmatpush.msra.mxu1 %v8772_v31 }
 0xf6f   :  { %4350 = vmatpush.msra.mxu1 %v8773_v3 }
 0xfc9   :  { %v4010_v44 = vpop.permute.xlu1 %4009 }
 0xfca   :  { %v8027_v38 = vadd.f32 %v4010_v44, %v4002_v9 }
 0xfcc   :  { %5010 = vtanh.f32 %v8027_v38 }
 0xfcd   :  { %v3744_v48 = vpop.f32.mrf.mxu1 }
 0xfce   :  { %v3750_v35 = vmul.f32 %v3744_v48, %v8774_v34 }
 0xfd0   :  { %v3779_v60 = vadd.f32 %v7933_v18, %v3750_v35  ;;  %v5082_v18 = vld [vmem:[%s8202_s17] ss:$0 sm:$0xff] }
 0xfd2   :  { %v5011_v43 = vpop.eup %5010  ;;  %v3781_v28 = vadd.f32 %v5081_v12, %v3779_v60 }
 0xfd3   :  { %4015 = vrot.lane.b32.xlu1 %v5011_v43, %s5320_s5  ;;  %v8776_v43 = vld [vmem:[#allocation37_spill] sm:$0xff] }
 0xfd4   :  { %v3783_v16 = vmax.f32 %v3781_v28, 0.0 }
 0xfd5   :  { %v3747_v40 = vpop.f32.mrf.mxu1 }
 0xfd6   :  { %v3751_v5 = vmul.f32 %v3747_v40, %v8775_v55  ;;  %4603 = vmatmul.msk.f32.vlgmr.msra.gmra.mxu2 %vm1555_vm6, %v3783_v16 }
 0xfd8   :  { %v3780_v47 = vadd.f32 %v7946_v6, %v3751_v5  ;;  %v8777_v5 = vld [vmem:[#allocation62_spill] sm:$0xff] }
 0xfda   :  { %v3782_v2 = vadd.f32 %v5081_v12, %v3780_v47 }
 0xfdc   :  { %v3784_v0 = vmax.f32 %v3782_v2, 0.0 }
 0xfdd   :  { %v3831_v25 = vpop.f32.mrf.mxu1 }
 0xfde   :  { %v3832_v23 = vadd.f32 %v5082_v18, %v3831_v25  ;;  %4604 = vmatmul.msk.f32.gmra.mxu2 %vm1555_vm6, %v3784_v0 }
 0xfe0   :  { %3879 = vrot.lane.b32.xlu0 %v3832_v23, %s5320_s5 }
 0xfe5   :  { %v3834_v10 = vpop.f32.mrf.mxu1 }
 0xfe6   :  { %v3835_v59 = vadd.f32 %v5082_v18, %v3834_v10 }
 0xfe8   :  { %3881 = vrot.lane.b32.xlu2 %v3835_v59, %s5320_s5 }
0x1042   :  { %v3882_v56 = vpop.permute.xlu2 %3881 }
0x1045   :  { %v4016_v26 = vpop.permute.xlu1 %4015 }
0x1046   :  { %v4018_v45 = vmul.f32 %v4016_v26, %v3999_v57 }
0x1048   :  { %4020 = vrot.lane.b32.xlu1 %v4018_v45, %s5353_s27 }
0x1052   :  { %v3880_v19 = vpop.permute.xlu0 %3879 }
0x1059   :  { %v3808_v6 = vpop.f32.mrf.mxu2 }
0x105a   :  { %v3809_v58 = vadd.f32 %v5083_v29, %v3808_v6 }
0x105c   :  { %v3837_v42 = vadd.f32 %v3832_v23, %v3809_v58 }
0x105e   :  { %v4607_v33 = vmul.f32 -1.442695, %v3837_v42 }
0x1060   :  { %5012 = vpow2.f32 %v4607_v33 }
0x1061   :  { %v3811_v14 = vpop.f32.mrf.mxu2 }
0x1062   :  { %v3812_v54 = vadd.f32 %v5083_v29, %v3811_v14 }
0x1064   :  { %v3838_v37 = vadd.f32 %v3835_v59, %v3812_v54 }
0x1066   :  { %v5013_v39 = vpop.eup %5012  ;;  %v4608_v22 = vmul.f32 -1.442695, %v3838_v37 }
0x1067   :  { %v3845_v52 = vadd.f32 1.0, %v5013_v39 }
0x1068   :  { %5014 = vpow2.f32 %v4608_v22 }
0x1069   :  { %5016 = vrcp.f32 %v3845_v52  ;;  %v3858_v50 = vand.u32 2147483648, %v3845_v52  ;;  %v3856_v53 = vand.u32 2147483647, %v3845_v52  ;;  %vm3852_vm1 = vweird.f32 %v3845_v52 }
0x106b   :  { %v3859_v51 = vor.u32 1.1754944e-38, %v3858_v50  ;;  %vm3857_vm8 = vcmp.eq.f32.partialorder %v3856_v53, 8.507059e+37 }
0x106e   :  { %v5015_v21 = vpop.eup %5014 }
0x106f   :  { %v5017_v62 = vpop.eup %5016  ;;  %v3846_v4 = vadd.f32 1.0, %v5015_v21 }
0x1070   :  { %v3848_v24 = vmul.f32 %v5017_v62, %v3845_v52  ;;  %vm3853_vm7 = vweird.f32 %v5017_v62 }
0x1071   :  { %5018 = vrcp.f32 %v3846_v4  ;;  %vm3854_vm2 = vmor %vm3852_vm1, %vm3853_vm7  ;;  %v3873_v8 = vand.u32 2147483648, %v3846_v4  ;;  %v3871_v20 = vand.u32 2147483647, %v3846_v4  ;;  %vm3867_vm10 = vweird.f32 %v3846_v4 }
0x1072   :  { %v3849_v30 = vsub.f32 1.0, %v3848_v24 }
0x1073   :  { %v3874_v61 = vor.u32 1.1754944e-38, %v3873_v8  ;;  %vm3872_vm12 = vcmp.eq.f32.partialorder %v3871_v20, 8.507059e+37 }
0x1074   :  { %v3850_v17 = vmul.f32 %v5017_v62, %v3849_v30 }
0x1076   :  { %v3851_v57 = vadd.f32 %v5017_v62, %v3850_v17 }
0x1077   :  { %v5019_v7 = vpop.eup %5018 }
0x1078   :  { %v3855_v15 = vsel %vm3854_vm2, %v5017_v62, %v3851_v57  ;;  %v3863_v13 = vmul.f32 %v5019_v7, %v3846_v4  ;;  %vm3868_vm9 = vweird.f32 %v5019_v7 }
0x1079   :  { %v3860_v41 = vsel %vm3857_vm8, %v3859_v51, %v3855_v15  ;;  %vm3869_vm11 = vmor %vm3867_vm10, %vm3868_vm9 }
0x107a   :  { %v3885_v36 = vmul.f32 %v3880_v19, %v3860_v41  ;;  %v3864_v27 = vsub.f32 1.0, %v3863_v13  ;;  %v3899_v40 = vsub.f32 1.0, %v3860_v41  ;;  %v3911_v47 = vmul.f32 %v3860_v41, %v8777_v5  ;;  %v4976_v13 = vld [vmem:[%s8206_s21] ss:$0 sm:$0xff] }
0x107c   :  { %3889 = vrot.lane.b32.xlu0 %v3885_v36, %s5320_s5  ;;  %v3865_v32 = vmul.f32 %v5019_v7, %v3864_v27 }
0x107e   :  { %v3866_v46 = vadd.f32 %v5019_v7, %v3865_v32 }
0x1080   :  { %v3870_v63 = vsel %vm3869_vm11, %v5019_v7, %v3866_v46  ;;  %v4975_v7 = vld [vmem:[%s8205_s20] ss:$0 sm:$0xff] }
0x1081   :  { %v3875_v1 = vsel %vm3872_vm12, %v3874_v61, %v3870_v63 }
0x1082   :  { %v3886_v11 = vmul.f32 %v3882_v56, %v3875_v1  ;;  %v3900_v35 = vsub.f32 1.0, %v3875_v1  ;;  %v3912_v12 = vmul.f32 %v3875_v1, %v8776_v43 }
0x1084   :  { %3891 = vrot.lane.b32.xlu2 %v3886_v11, %s5320_s5 }
0x10ba   :  { %v8048_v49 = vpop.permute.xlu1 %4020 }
0x10bb   :  { %4616 = vmatmul.msk.f32.vlgmr.msrb.gmra.mxu0 %vm1555_vm6, %v8048_v49 }
0x10de   :  { %v3892_v31 = vpop.permute.xlu2 %3891 }
0x10df   :  { %v3896_v3 = vadd.f32 %v3892_v31, %v3812_v54 }
0x10e1   :  { %5020 = vtanh.f32 %v3896_v3 }
0x10e7   :  { %v5021_v9 = vpop.eup %5020 }
0x10e8   :  { %3905 = vrot.lane.b32.xlu2 %v5021_v9, %s5356_s10 }
0x10ee   :  { %v3890_v44 = vpop.permute.xlu0 %3889 }
0x10ef   :  { %v3895_v48 = vadd.f32 %v3890_v44, %v3809_v58 }
0x10f1   :  { %5022 = vtanh.f32 %v3895_v48 }
0x10f7   :  { %v5023_v34 = vpop.eup %5022 }
0x10f8   :  { %3903 = vrot.lane.b32.xlu0 %v5023_v34, %s5356_s10 }
0x1138   :  { %v4170_v19 = vpop.f32.mrf.mxu0 }
0x1142   :  { %v3906_v60 = vpop.permute.xlu2 %3905 }
0x1143   :  { %v3910_v28 = vmul.f32 %v3906_v60, %v3900_v35 }
0x1145   :  { %v3914_v16 = vadd.f32 %v3912_v12, %v3910_v28 }
0x1147   :  { %4026 = vrot.lane.b32.xlu2 %v3914_v16, %s5356_s10 }
0x116a   :  { %v3904_v55 = vpop.permute.xlu0 %3903 }
0x116b   :  { %v3909_v2 = vmul.f32 %v3904_v55, %v3899_v40 }
0x116d   :  { %v3913_v0 = vadd.f32 %v3911_v47, %v3909_v2 }
0x116f   :  { %4024 = vrot.lane.b32.xlu0 %v3913_v0, %s5356_s10  ;;  %s8778_s10 = sld [smem:[#allocation78_spill]] }
0x1175   :  { %v8071_v23 = vld [vmem:[%s8778_s10] sm:$0x3] }
0x1176   :  { %vm4054_vm13 = vcmp.gt.f32.partialorder %v8071_v23, 0.0 }
0x11a1   :  { %v4027_v25 = vpop.permute.xlu2 %4026 }
0x11a2   :  { %4610 = vmatpush.xpose.msk.msrb.mxu2 %vm1555_vm6, %v4027_v25  ;;  %4613 = vmatpush.msk.msrb.mxu3 %vm616_vm4, %v4027_v25 }
0x11e1   :  { %v4025_v18 = vpop.permute.xlu0 %4024 }
0x11e2   :  { %4611 = vmatpush.xpose.msk.msrb.mxu2 %vm1555_vm6, %v4025_v18  ;;  %4103 = vmatpush.msrb.mxu3 %v4025_v18 }
0x11e4   :  { %4621 = vmatpush.msk.msra.mxu3 %vm616_vm4, %v4027_v25 }
0x11e5   :  { %4612 = vmatmul.msk.f32.vlgmr.msrb.gmra.mxu2 %vm1555_vm6, %v8048_v49 }
0x11e6   :  { %4618 = vmatpush.xpose.msk.msra.mxu2 %vm1555_vm6, %v4027_v25  ;;  %4285 = vmatpush.msra.mxu3 %v4025_v18 }
0x11ea   :  { %4619 = vmatpush.xpose.msk.msra.mxu2 %vm1555_vm6, %v4025_v18 }
0x11ee   :  { %4626 = vmatpush.xpose.msk.msrb.mxu2 %vm1555_vm6, %v4027_v25 }
0x11f2   :  { %4627 = vmatpush.xpose.msk.msrb.mxu2 %vm1555_vm6, %v4025_v18 }
0x1268   :  { %v4051_v10 = vpop.f32.mrf.mxu2 }
0x1269   :  { %v4055_v59 = vsel %vm4054_vm13, %v4051_v10, -1e+30 }
0x126a   :  { %v4057_v26 = vsel %vm4056_vm14, %v4055_v59, -inf }
0x126b   :  { %4058 = vmax.xlane.f32.xlu2 %v4057_v26 }
0x12de   :  { %v4059_v45 = vpop.xlane.xlu2 %4058 }
0x12df   :  { %v4060_v6 = vsub.f32 %v4055_v59, %v4059_v45 }
0x12e1   :  { %v4061_v29 = vmul.f32 1.442695, %v4060_v6 }
0x12e3   :  { %5024 = vpow2.f32 %v4061_v29 }
0x12e9   :  { %v5025_v58 = vpop.eup %5024 }
0x12ea   :  { %v4063_v42 = vsel %vm4054_vm13, %v5025_v58, 0.0 }
0x12eb   :  { %v4064_v33 = vsel %vm4056_vm14, %v4063_v42, 0.0 }
0x12ec   :  { %4065 = vadd.xlane.f32.xlu0 %v4064_v33 }
0x135f   :  { %v4066_v14 = vpop.xlane.xlu0 %4065 }
0x1360   :  { %5026 = vrcp.f32 %v4066_v14  ;;  %v4078_v22 = vand.u32 2147483648, %v4066_v14  ;;  %v4076_v21 = vand.u32 2147483647, %v4066_v14  ;;  %vm4072_vm0 = vweird.f32 %v4066_v14 }
0x1362   :  { %v4079_v4 = vor.u32 1.1754944e-38, %v4078_v22  ;;  %vm4077_vm1 = vcmp.eq.f32.partialorder %v4076_v21, 8.507059e+37  ;;  %v4302_v22 = vld [vmem:[%s8203_s18 + $0x30] sm:$0xff]  ;;  %v4300_v21 = vld [vmem:[%s8203_s18 + $0x20] sm:$0xff] }
0x1366   :  { %v5027_v54 = vpop.eup %5026 }
0x1367   :  { %v4068_v37 = vmul.f32 %v5027_v54, %v4066_v14  ;;  %vm4073_vm15 = vweird.f32 %v5027_v54 }
0x1368   :  { %vm4074_vm7 = vmor %vm4072_vm0, %vm4073_vm15 }
0x1369   :  { %v4069_v39 = vsub.f32 1.0, %v4068_v37 }
0x136b   :  { %v4070_v52 = vmul.f32 %v5027_v54, %v4069_v39  ;;  %v4303_v39 = vld [vmem:[%s8203_s18 + $0x38] sm:$0xff] }
0x136c   :  { %4319 = vmatpush.msra.mxu0 %v4303_v39  ;;  %v4483_v39 = vld [vmem:[%s8207_s22 + $0x28] sm:$0xff] }
0x136d   :  { %v4071_v62 = vadd.f32 %v5027_v54, %v4070_v52  ;;  %v4301_v52 = vld [vmem:[%s8203_s18 + $0x28] sm:$0xff] }
0x136e   :  { %4320 = vmatpush.msra.mxu0 %v4302_v22  ;;  %v4482_v22 = vld [vmem:[%s8207_s22 + $0x20] sm:$0xff] }
0x136f   :  { %v4075_v24 = vsel %vm4074_vm7, %v5027_v54, %v4071_v62  ;;  %v4299_v62 = vld [vmem:[%s8203_s18 + $0x18] sm:$0xff] }
0x1370   :  { %v4080_v30 = vsel %vm4077_vm1, %v4079_v4, %v4075_v24  ;;  %4321 = vmatpush.msra.mxu0 %v4301_v52  ;;  %v4298_v4 = vld [vmem:[%s8203_s18 + $0x10] sm:$0xff]  ;;  %v4297_v24 = vld [vmem:[%s8203_s18 + $0x8] sm:$0xff]  ;;  %v4481_v52 = vld [vmem:[%s8207_s22 + $0x18] sm:$0xff] }
0x1371   :  { %v4081_v50 = vmul.f32 %v4080_v30, %v4063_v42 }
0x1372   :  { %4322 = vmatpush.msra.mxu0 %v4300_v21  ;;  %v4480_v21 = vld [vmem:[%s8207_s22 + $0x10] sm:$0xff] }
0x1373   :  { %4614 = vmatmul.msk.f32.vlgmr.msrb.gmra.mxu3 %vm606_vm5, %v4081_v50  ;;  %v4296_v50 = vld [vmem:[%s8203_s18] sm:$0xff] }
0x1374   :  { %4629 = vmatpush.msk.msrb.mxu3 %vm616_vm4, %v4027_v25  ;;  %4323 = vmatpush.msra.mxu0 %v4299_v62  ;;  %v4479_v62 = vld [vmem:[%s8207_s22 + $0x8] sm:$0xff] }
0x1376   :  { %4467 = vmatpush.msrb.mxu3 %v4025_v18  ;;  %4324 = vmatpush.msra.mxu0 %v4298_v4 }
0x1378   :  { %4325 = vmatpush.msra.mxu0 %v4297_v24  ;;  %v4478_v24 = vld [vmem:[%s8207_s22] sm:$0xff] }
0x137a   :  { %4326 = vmatpush.msra.mxu0 %v4296_v50 }
0x13f6   :  { %v4105_v17 = vpop.f32.mrf.mxu3 }
0x13f7   :  { %4110 = vrot.lane.b32.xlu1 %v4105_v17, %s5353_s27 }
0x1469   :  { %v4111_v53 = vpop.permute.xlu1 %4110 }
0x146a   :  { %v4113_v57 = vsel %vm1555_vm6, %v8048_v49, %v4111_v53 }
0x146b   :  { %4615 = vmatmul.msk.f32.vlgmr.msrb.gmra.mxu1 %vm373_vm3, %v4113_v57  ;;  %v4977_v57 = vld [vmem:[%s8205_s20] ss:$0 sm:$0xff] }
0x14e8   :  { %v4146_v51 = vpop.f32.mrf.mxu1 }
0x14e9   :  { %v4147_v15 = vadd.f32 %v4975_v7, %v4146_v51 }
0x14eb   :  { %v4173_v41 = vadd.f32 %v4170_v19, %v4147_v15  ;;  %v4978_v15 = vld [vmem:[%s8206_s21] ss:$0 sm:$0xff] }
0x14ed   :  { %v4178_v36 = vadd.f32 %v4976_v13, %v4173_v41 }
0x14ef   :  { %5028 = vtanh.f32 %v4178_v36  ;;  %v4617_v8 = vmul.f32 -1.442695, %v4178_v36 }
0x14f1   :  { %5030 = vpow2.f32 %v4617_v8 }
0x14f5   :  { %v5029_v27 = vpop.eup %5028 }
0x14f6   :  { %4201 = vrot.lane.b32.xlu1 %v5029_v27, %s5320_s5 }
0x14f7   :  { %v5031_v32 = vpop.eup %5030 }
0x14f8   :  { %v4182_v20 = vadd.f32 1.0, %v5031_v32 }
0x14fa   :  { %5032 = vrcp.f32 %v4182_v20  ;;  %v4194_v11 = vand.u32 2147483648, %v4182_v20  ;;  %vm4188_vm2 = vweird.f32 %v4182_v20  ;;  %v4192_v49 = vand.u32 2147483647, %v4182_v20 }
0x14fc   :  { %v4195_v3 = vor.u32 1.1754944e-38, %v4194_v11  ;;  %vm4193_vm9 = vcmp.eq.f32.partialorder %v4192_v49, 8.507059e+37 }
0x1500   :  { %v5033_v46 = vpop.eup %5032 }
0x1501   :  { %v4184_v61 = vmul.f32 %v5033_v46, %v4182_v20  ;;  %vm4189_vm4 = vweird.f32 %v5033_v46 }
0x1502   :  { %vm4190_vm8 = vmor %vm4188_vm2, %vm4189_vm4 }
0x1503   :  { %v4185_v63 = vsub.f32 1.0, %v4184_v61 }
0x1505   :  { %v4186_v56 = vmul.f32 %v5033_v46, %v4185_v63 }
0x1507   :  { %v4187_v1 = vadd.f32 %v5033_v46, %v4186_v56 }
0x1509   :  { %v4191_v31 = vsel %vm4190_vm8, %v5033_v46, %v4187_v1 }
0x150a   :  { %v4196_v44 = vsel %vm4193_vm9, %v4195_v3, %v4191_v31 }
0x150b   :  { %v4199_v34 = vmul.f32 %v4196_v44, %v8027_v38 }
0x1568   :  { %v4202_v9 = vpop.permute.xlu1 %4201 }
0x1569   :  { %v4204_v48 = vmul.f32 %v4202_v9, %v4196_v44 }
0x156b   :  { %4206 = vrot.lane.b32.xlu1 %v4204_v48, %s5353_s27 }
0x15dd   :  { %v4207_v35 = vpop.permute.xlu1 %4206 }
0x15de   :  { %v8095_v60 = vadd.f32 %v4207_v35, %v4199_v34 }
0x15e0   :  { %5034 = vtanh.f32 %v8095_v60 }
0x15e6   :  { %v5035_v43 = vpop.eup %5034 }
0x15e7   :  { %4212 = vrot.lane.b32.xlu1 %v5035_v43, %s5320_s5 }
0x1659   :  { %v4213_v12 = vpop.permute.xlu1 %4212 }
0x165a   :  { %v4215_v28 = vmul.f32 %v4213_v12, %v4196_v44 }
0x165c   :  { %4217 = vrot.lane.b32.xlu1 %v4215_v28, %s5353_s27 }
0x16ce   :  { %v4218_v16 = vpop.permute.xlu1 %4217 }
0x16cf   :  { %4620 = vmatmul.msk.f32.vlgmr.msra.gmra.mxu2 %vm1555_vm6, %v4218_v16  ;;  %4624 = vmatmul.msk.f32.vlgmr.msra.gmra.mxu1 %vm1555_vm6, %v4218_v16 }
0x174c   :  { %v4352_v13 = vpop.f32.mrf.mxu1 }
0x1752   :  { %v4238_v40 = vpop.f32.mrf.mxu2 }
0x1753   :  { %v4241_v38 = vsel %vm4054_vm13, %v4238_v40, -1e+30 }
0x1754   :  { %v4242_v55 = vsel %vm4056_vm14, %v4241_v38, -inf }
0x1755   :  { %4243 = vmax.xlane.f32.xlu2 %v4242_v55 }
0x17c8   :  { %v4244_v5 = vpop.xlane.xlu2 %4243 }
0x17c9   :  { %v4245_v47 = vsub.f32 %v4241_v38, %v4244_v5 }
0x17cb   :  { %v4246_v2 = vmul.f32 1.442695, %v4245_v47 }
0x17cd   :  { %5036 = vpow2.f32 %v4246_v2 }
0x17d3   :  { %v5037_v0 = vpop.eup %5036 }
0x17d4   :  { %v4248_v25 = vsel %vm4054_vm13, %v5037_v0, 0.0 }
0x17d5   :  { %v4249_v18 = vsel %vm4056_vm14, %v4248_v25, 0.0 }
0x17d6   :  { %4250 = vadd.xlane.f32.xlu1 %v4249_v18 }
0x1849   :  { %v4251_v10 = vpop.xlane.xlu1 %4250 }
0x184a   :  { %5038 = vrcp.f32 %v4251_v10  ;;  %v4263_v6 = vand.u32 2147483648, %v4251_v10  ;;  %v4261_v58 = vand.u32 2147483647, %v4251_v10  ;;  %vm4257_vm11 = vweird.f32 %v4251_v10 }
0x184c   :  { %v4264_v33 = vor.u32 1.1754944e-38, %v4263_v6  ;;  %vm4262_vm15 = vcmp.eq.f32.partialorder %v4261_v58, 8.507059e+37 }
0x1850   :  { %v5039_v59 = vpop.eup %5038 }
0x1851   :  { %v4253_v26 = vmul.f32 %v5039_v59, %v4251_v10  ;;  %vm4258_vm10 = vweird.f32 %v5039_v59 }
0x1852   :  { %vm4259_vm12 = vmor %vm4257_vm11, %vm4258_vm10 }
0x1853   :  { %v4254_v45 = vsub.f32 1.0, %v4253_v26 }
0x1855   :  { %v4255_v29 = vmul.f32 %v5039_v59, %v4254_v45 }
0x1857   :  { %v4256_v42 = vadd.f32 %v5039_v59, %v4255_v29 }
0x1859   :  { %v4260_v14 = vsel %vm4259_vm12, %v5039_v59, %v4256_v42 }
0x185a   :  { %v4265_v54 = vsel %vm4262_vm15, %v4264_v33, %v4260_v14 }
0x185b   :  { %v4266_v37 = vmul.f32 %v4265_v54, %v4248_v25  ;;  %v4485_v54 = vld [vmem:[%s8207_s22 + $0x38] sm:$0xff] }
0x185c   :  { %4501 = vmatpush.msrb.mxu1 %v4485_v54 }
0x185d   :  { %4622 = vmatmul.msk.f32.vlgmr.msra.gmra.mxu3 %vm606_vm5, %v4266_v37  ;;  %v4484_v37 = vld [vmem:[%s8207_s22 + $0x30] sm:$0xff] }
0x185e   :  { %4502 = vmatpush.msrb.mxu1 %v4484_v37 }
0x1860   :  { %4503 = vmatpush.msrb.mxu1 %v4483_v39 }
0x1862   :  { %4504 = vmatpush.msrb.mxu1 %v4482_v22 }
0x1864   :  { %4505 = vmatpush.msrb.mxu1 %v4481_v52 }
0x1866   :  { %4506 = vmatpush.msrb.mxu1 %v4480_v21 }
0x1868   :  { %4507 = vmatpush.msrb.mxu1 %v4479_v62 }
0x186a   :  { %4508 = vmatpush.msrb.mxu1 %v4478_v24 }
0x18e0   :  { %v4287_v30 = vpop.f32.mrf.mxu3 }
0x18e1   :  { %4292 = vrot.lane.b32.xlu2 %v4287_v30, %s5353_s27 }
0x193b   :  { %v4293_v17 = vpop.permute.xlu2 %4292 }
0x193c   :  { %v4295_v53 = vsel %vm1555_vm6, %v4218_v16, %v4293_v17  ;;  %v4979_v17 = vld [vmem:[#allocation14] ss:$0 sm:$0xff] }
0x193d   :  { %4623 = vmatmul.msk.f32.vlgmr.msra.gmra.mxu0 %vm373_vm3, %v4295_v53 }
0x19ba   :  { %v4328_v7 = vpop.f32.mrf.mxu0 }
0x19bb   :  { %v4329_v51 = vadd.f32 %v4977_v57, %v4328_v7 }
0x19bd   :  { %v4355_v19 = vadd.f32 %v4352_v13, %v4329_v51 }
0x19bf   :  { %v4360_v41 = vadd.f32 %v4978_v15, %v4355_v19 }
0x19c1   :  { %5040 = vtanh.f32 %v4360_v41  ;;  %v4625_v27 = vmul.f32 -1.442695, %v4360_v41 }
0x19c3   :  { %5042 = vpow2.f32 %v4625_v27 }
0x19c7   :  { %v5041_v36 = vpop.eup %5040 }
0x19c8   :  { %4383 = vrot.lane.b32.xlu0 %v5041_v36, %s5320_s5 }
0x19c9   :  { %v5043_v8 = vpop.eup %5042 }
0x19ca   :  { %v4364_v32 = vadd.f32 1.0, %v5043_v8 }
0x19cc   :  { %5044 = vrcp.f32 %v4364_v32  ;;  %v4376_v1 = vand.u32 2147483648, %v4364_v32  ;;  %vm4370_vm7 = vweird.f32 %v4364_v32  ;;  %v4374_v11 = vand.u32 2147483647, %v4364_v32 }
0x19ce   :  { %v4377_v31 = vor.u32 1.1754944e-38, %v4376_v1  ;;  %vm4375_vm4 = vcmp.eq.f32.partialorder %v4374_v11, 8.507059e+37 }
0x19d2   :  { %v5045_v20 = vpop.eup %5044 }
0x19d3   :  { %v4366_v46 = vmul.f32 %v5045_v20, %v4364_v32  ;;  %vm4371_vm0 = vweird.f32 %v5045_v20 }
0x19d4   :  { %vm4372_vm1 = vmor %vm4370_vm7, %vm4371_vm0 }
0x19d5   :  { %v4367_v61 = vsub.f32 1.0, %v4366_v46 }
0x19d7   :  { %v4368_v63 = vmul.f32 %v5045_v20, %v4367_v61 }
0x19d9   :  { %v4369_v56 = vadd.f32 %v5045_v20, %v4368_v63 }
0x19db   :  { %v4373_v49 = vsel %vm4372_vm1, %v5045_v20, %v4369_v56 }
0x19dc   :  { %v4378_v9 = vsel %vm4375_vm4, %v4377_v31, %v4373_v49 }
0x19dd   :  { %v4381_v48 = vmul.f32 %v4378_v9, %v8095_v60 }
0x1a3a   :  { %v4384_v3 = vpop.permute.xlu0 %4383 }
0x1a3b   :  { %v4386_v44 = vmul.f32 %v4384_v3, %v4378_v9 }
0x1a3d   :  { %4388 = vrot.lane.b32.xlu0 %v4386_v44, %s5353_s27 }
0x1aaf   :  { %v4389_v34 = vpop.permute.xlu0 %4388 }
0x1ab0   :  { %v4391_v35 = vadd.f32 %v4389_v34, %v4381_v48 }
0x1ab2   :  { %5046 = vtanh.f32 %v4391_v35 }
0x1ab8   :  { %v5047_v43 = vpop.eup %5046 }
0x1ab9   :  { %4394 = vrot.lane.b32.xlu2 %v5047_v43, %s5320_s5 }
0x1b13   :  { %v4395_v12 = vpop.permute.xlu2 %4394 }
0x1b14   :  { %v4397_v28 = vmul.f32 %v4395_v12, %v4378_v9 }
0x1b16   :  { %4399 = vrot.lane.b32.xlu0 %v4397_v28, %s5353_s27 }
0x1b88   :  { %v4400_v16 = vpop.permute.xlu0 %4399 }
0x1b89   :  { %4628 = vmatmul.msk.f32.vlgmr.msrb.gmra.mxu2 %vm1555_vm6, %v4400_v16 }
0x1c0c   :  { %v4420_v40 = vpop.f32.mrf.mxu2 }
0x1c0d   :  { %v4423_v38 = vsel %vm4054_vm13, %v4420_v40, -1e+30 }
0x1c0e   :  { %v4424_v55 = vsel %vm4056_vm14, %v4423_v38, -inf }
0x1c0f   :  { %4425 = vmax.xlane.f32.xlu2 %v4424_v55 }
0x1c82   :  { %v4426_v60 = vpop.xlane.xlu2 %4425 }
0x1c83   :  { %v4427_v5 = vsub.f32 %v4423_v38, %v4426_v60 }
0x1c85   :  { %v4428_v47 = vmul.f32 1.442695, %v4427_v5 }
0x1c87   :  { %5048 = vpow2.f32 %v4428_v47 }
0x1c8d   :  { %v5049_v2 = vpop.eup %5048 }
0x1c8e   :  { %v4430_v0 = vsel %vm4054_vm13, %v5049_v2, 0.0 }
0x1c8f   :  { %v4431_v25 = vsel %vm4056_vm14, %v4430_v0, 0.0 }
0x1c90   :  { %4432 = vadd.xlane.f32.xlu0 %v4431_v25 }
0x1d03   :  { %v4433_v18 = vpop.xlane.xlu0 %4432 }
0x1d04   :  { %5050 = vrcp.f32 %v4433_v18  ;;  %v4445_v45 = vand.u32 2147483648, %v4433_v18  ;;  %v4443_v29 = vand.u32 2147483647, %v4433_v18  ;;  %vm4439_vm8 = vweird.f32 %v4433_v18 }
0x1d06   :  { %v4446_v42 = vor.u32 1.1754944e-38, %v4445_v45  ;;  %vm4444_vm10 = vcmp.eq.f32.partialorder %v4443_v29, 8.507059e+37 }
0x1d0a   :  { %v5051_v10 = vpop.eup %5050 }
0x1d0b   :  { %v4435_v59 = vmul.f32 %v5051_v10, %v4433_v18  ;;  %vm4440_vm2 = vweird.f32 %v5051_v10 }
0x1d0c   :  { %vm4441_vm9 = vmor %vm4439_vm8, %vm4440_vm2 }
0x1d0d   :  { %v4436_v26 = vsub.f32 1.0, %v4435_v59 }
0x1d0f   :  { %v4437_v6 = vmul.f32 %v5051_v10, %v4436_v26 }
0x1d11   :  { %v4438_v58 = vadd.f32 %v5051_v10, %v4437_v6 }
0x1d13   :  { %v4442_v33 = vsel %vm4441_vm9, %v5051_v10, %v4438_v58 }
0x1d14   :  { %v4447_v23 = vsel %vm4444_vm10, %v4446_v42, %v4442_v33 }
0x1d15   :  { %v4448_v14 = vmul.f32 %v4447_v23, %v4430_v0 }
0x1d17   :  { %4630 = vmatmul.msk.f32.vlgmr.msrb.gmra.mxu3 %vm606_vm5, %v4448_v14  ;;  %vm4514_vm5 = vcmask 123904  }
0x1d9a   :  { %v4469_v4 = vpop.f32.mrf.mxu3 }
0x1d9b   :  { %4474 = vrot.lane.b32.xlu1 %v4469_v4, %s5353_s27 }
0x1e0d   :  { %v4475_v30 = vpop.permute.xlu1 %4474 }
0x1e0e   :  { %v4477_v50 = vsel %vm1555_vm6, %v4400_v16, %v4475_v30 }
0x1e0f   :  { %4631 = vmatmul.msk.f32.vlgmr.msrb.gmra.mxu1 %vm373_vm3, %v4477_v50 }
0x1e8c   :  { %v4510_v53 = vpop.f32.mrf.mxu1 }
0x1e8d   :  { %v4511_v57 = vadd.f32 %v4979_v17, %v4510_v53 }
0x1e8f   :  { %v4513_v7 = vmax.f32 %v4511_v57, 0.0 }
0x1e91   :  { %4515 = vst.msk [vmem:[#allocation16] sm:$0x3] %vm4514_vm5, %v4513_v7 }
0x1e92   :  { %4526 = dma.vmem_to_hbm [thread:$0]  %s4522_s9, 32, %s4524_s0, [#allocation4]  }
0x1e93   :  { %5310 = dma.done.wait [#allocation4], 32  }
0x1e94   :  { %5311 = vsyncadd [#allocation4], 4294967264 }
0x1e95   :  { %4531 = vsyncpa [#allocation3], 1 }
0x1e96   :  { %4532 = vsyncpa [#allocation6], 1 }
0x1e97   :  { %4533 = vsyncpa [#allocation9], 1 }
0x1e98   :  { %4534 = vsyncpa [#allocation12], 1 }
0x1e99   :  { %4535 = vsyncpa [#allocation15], 1 }
0x1e9a   :  { %4536 = vsyncpa [#allocation4], 1 }

</bundles_post_ra>
